<compile_context>
chip_gen: v7x
topology: tpu7x:2x2x1
jax: 0.10.0
libtpu: 0.0.40
codegen_flags: <defaults>
</compile_context>

<pallas_src>
import functools

import jax
import jax.numpy as jnp
from jax.experimental import pallas as pl
from jax.experimental.pallas import tpu as pltpu

# ----------------------------- configuration ------------------------------
IMG = 16
PATCH = 4
IN_CHANS = 1
EMBED_DIM = 32
NUM_HEADS = 4
HEAD_DIM = EMBED_DIM // NUM_HEADS
DEPTH = 4
LOCAL_UP_TO = 2            # first LOCAL_UP_TO blocks use GPSA, the rest MHSA
MLP_RATIO = 4
NUM_CLASSES = 3
HEAD_HIDDEN = 1024
NUM_PATCHES = (IMG // PATCH) ** 2
PATCH_DIM = IN_CHANS * PATCH * PATCH
LN_EPS = 1e-6
BN_EPS = 1e-5
GELU_C = 0.7978845608028654  # sqrt(2/pi)
SCALE = HEAD_DIM ** -0.5


# --------------------------- in-kernel helpers -----------------------------
def _gelu(x):
    # TODO(synk): PyTorch/timm GELU is erf-exact; tanh approximation used for
    # guaranteed Mosaic lowering (max abs deviation ~1e-3).
    return 0.5 * x * (1.0 + jnp.tanh(GELU_C * (x + 0.044715 * x * x * x)))


def _softmax(x):
    m = jnp.max(x, axis=-1, keepdims=True)
    e = jnp.exp(x - m)
    return e * pl.reciprocal(jnp.sum(e, axis=-1, keepdims=True), approx=True)


def _ln(x, g_ref, b_ref):
    mu = jnp.mean(x, axis=-1, keepdims=True)
    xc = x - mu
    var = jnp.mean(xc * xc, axis=-1, keepdims=True)
    return xc * jax.lax.rsqrt(var + LN_EPS) * g_ref[...] + b_ref[...]


def _gpsa(x, blk):
    """Gated positional self-attention on the (NUM_PATCHES, D) patch tokens."""
    # q-columns of qk_w already carry the attention scale (folded at prep time).
    qk = jnp.dot(x, blk["qk_w"][...], preferred_element_type=jnp.float32)     # (N, 2D)
    v = jnp.dot(x, blk["v_w"][...], preferred_element_type=jnp.float32)       # (N, D)
    gate = blk["gate"][...]                                                    # (1, H) = sigmoid(gating)
    pos = blk["pos_attn"][...]                                                 # (H*N, N), already softmaxed
    proj_w = blk["proj_w"][...]                                                # (D, D)
    out = blk["proj_b"][...]                                                   # (1, D) accumulation seed
    for h in range(NUM_HEADS):
        lo, hi = h * HEAD_DIM, (h + 1) * HEAD_DIM
        q_h = qk[:, lo:hi]                                                     # (N, Dh), pre-scaled
        k_h = qk[:, EMBED_DIM + lo:EMBED_DIM + hi]                             # (N, Dh)
        v_h = v[:, lo:hi]                                                      # (N, Dh)
        s = jax.lax.dot_general(q_h, k_h, (((1,), (1,)), ((), ())),
                                preferred_element_type=jnp.float32)            # (N, N)
        patch_attn = _softmax(s)
        pos_h = pos[h * NUM_PATCHES:(h + 1) * NUM_PATCHES, :]                  # (N, N)
        g_h = gate[:, h:h + 1]                                                 # (1, 1)
        attn = (1.0 - g_h) * patch_attn + g_h * pos_h
        attn = attn * pl.reciprocal(jnp.sum(attn, axis=-1, keepdims=True), approx=True)
        o_h = jnp.dot(attn, v_h, preferred_element_type=jnp.float32)           # (N, Dh)
        # head-merge fused into the output projection:
        #   concat_h(o_h) @ W == sum_h o_h @ W[h*Dh:(h+1)*Dh, :]
        out = out + jnp.dot(o_h, proj_w[lo:hi, :], preferred_element_type=jnp.float32)
    return out


def _mhsa(x, blk):
    """Standard multi-head self-attention on (N, D) tokens."""
    qkv = jnp.dot(x, blk["qkv_w"][...], preferred_element_type=jnp.float32)    # (N, 3D)
    proj_w = blk["proj_w"][...]
    out = blk["proj_b"][...]
    for h in range(NUM_HEADS):
        lo, hi = h * HEAD_DIM, (h + 1) * HEAD_DIM
        q_h = qkv[:, lo:hi]                                                    # pre-scaled
        k_h = qkv[:, EMBED_DIM + lo:EMBED_DIM + hi]
        v_h = qkv[:, 2 * EMBED_DIM + lo:2 * EMBED_DIM + hi]
        s = jax.lax.dot_general(q_h, k_h, (((1,), (1,)), ((), ())),
                                preferred_element_type=jnp.float32)            # (N, N)
        attn = _softmax(s)
        o_h = jnp.dot(attn, v_h, preferred_element_type=jnp.float32)           # (N, Dh)
        out = out + jnp.dot(o_h, proj_w[lo:hi, :], preferred_element_type=jnp.float32)
    return out


def _mlp(x, blk):
    h = jnp.dot(x, blk["fc1_w"][...], preferred_element_type=jnp.float32) + blk["fc1_b"][...]
    h = _gelu(h)
    return jnp.dot(h, blk["fc2_w"][...], preferred_element_type=jnp.float32) + blk["fc2_b"][...]


def _block(x, blk, use_gpsa):
    h = _ln(x, blk["ln1_g"], blk["ln1_b"])
    x = x + (_gpsa(h, blk) if use_gpsa else _mhsa(h, blk))
    h = _ln(x, blk["ln2_g"], blk["ln2_b"])
    return x + _mlp(h, blk)


# ------------------------------ fused kernel -------------------------------
def _convit_kernel(*refs, treedef):
    """Entire ConViT forward for one batch element (one grid step)."""
    patches_ref = refs[0]
    out_ref = refs[-1]
    P = jax.tree_util.tree_unflatten(treedef, refs[1:-1])

    # patch embedding (conv bias is folded into pos_embed at prepare time)
    x = patches_ref[0]                                                          # (NP, PATCH_DIM)
    tok = jnp.dot(x, P["patch_w"][...], preferred_element_type=jnp.float32)
    tok = tok + P["pos_embed"][...]                                             # (NP, D)

    for u, blk in enumerate(P["blocks"]):
        if u == LOCAL_UP_TO:
            # timm prepends the cls token here.  The remaining (MHSA) blocks are
            # permutation-equivariant and pooling only reads the cls row, so we
            # append it instead -> the sublane concat stays tile-aligned (16 + 1)
            # and the result is mathematically identical.
            tok = jnp.concatenate([tok, P["cls_token"][...]], axis=0)           # (NP+1, D)
        tok = _block(tok, blk, use_gpsa=(u < LOCAL_UP_TO))

    # final LayerNorm (per-token, so applying it only to the cls row is exact)
    cls = tok[NUM_PATCHES:NUM_PATCHES + 1, :]                                   # (1, D)
    cls = _ln(cls, P["norm_g"], P["norm_b"])

    # custom head: Linear(32,1024) -> PReLU -> BatchNorm1d(eval, folded) -> Linear(1024,3)
    h = jnp.dot(cls, P["head_w1"][...], preferred_element_type=jnp.float32) + P["head_b1"][...]
    h = jnp.where(h >= 0.0, h, P["prelu_alpha"][...] * h)
    h = h * P["bn_s"][...] + P["bn_t"][...]
    out_ref[0] = (jnp.dot(h, P["head_w2"][...], preferred_element_type=jnp.float32)
                  + P["head_b2"][...])


# ------------------------------ host wrappers -------------------------------
def _const_index_map(nd):
    return lambda b, _nd=nd: (0,) * _nd


def _patchify(x):
    """NCHW -> (B, num_patches, C*ph*pw), per-patch flatten order (C, ph, pw) like Conv2d."""
    B = x.shape[0]
    g = IMG // PATCH
    xp = x.reshape(B, IN_CHANS, g, PATCH, g, PATCH)
    return xp.transpose(0, 2, 4, 1, 3, 5).reshape(B, g * g, PATCH_DIM)


def convit_forward(x, kernel_params):
    B = x.shape[0]
    patches = _patchify(x)
    flat, treedef = jax.tree_util.tree_flatten(kernel_params)

    in_specs = [pl.BlockSpec((1, NUM_PATCHES, PATCH_DIM), lambda b: (b, 0, 0))]
    in_specs += [pl.BlockSpec(a.shape, _const_index_map(a.ndim)) for a in flat]

    out = pl.pallas_call(
        functools.partial(_convit_kernel, treedef=treedef),
        grid=(B,),
        in_specs=in_specs,
        out_specs=pl.BlockSpec((1, 1, NUM_CLASSES), lambda b: (b, 0, 0)),
        out_shape=jax.ShapeDtypeStruct((B, 1, NUM_CLASSES), jnp.float32),
        compiler_params=pltpu.CompilerParams(
            dimension_semantics=("parallel",),      # batch elements -> both TCs on v7x
            vmem_limit_bytes=32 * 1024 * 1024,
        ),
    )(patches, *flat)
    return out.reshape(B, NUM_CLASSES)


# --------------------------- parameters (raw, torch-like) -------------------
def get_rel_indices(num_patches):
    img = int(num_patches ** 0.5)
    ind = jnp.arange(img)[None, :] - jnp.arange(img)[:, None]
    indx = jnp.tile(ind, (img, img))
    indy = jnp.repeat(jnp.repeat(ind, img, axis=0), img, axis=1)
    indd = indx ** 2 + indy ** 2
    return jnp.stack([indx, indy, indd], axis=-1).astype(jnp.float32)   # (N, N, 3)


def init_params(key):
    keys = iter(jax.random.split(key, 128))

    def nrm(shape, s=0.02):
        return s * jax.random.normal(next(keys), shape, jnp.float32)

    P = {
        "patch_w": nrm((PATCH_DIM, EMBED_DIM)),
        "patch_b": jnp.zeros((EMBED_DIM,), jnp.float32),
        "pos_embed": nrm((1, NUM_PATCHES, EMBED_DIM)),
        "cls_token": nrm((1, 1, EMBED_DIM)),
        "norm_g": jnp.ones((EMBED_DIM,), jnp.float32),
        "norm_b": jnp.zeros((EMBED_DIM,), jnp.float32),
        "head_w1": nrm((EMBED_DIM, HEAD_HIDDEN)),
        "head_b1": jnp.zeros((HEAD_HIDDEN,), jnp.float32),
        "prelu_alpha": jnp.full((1, 1), 0.25, jnp.float32),   # nn.PReLU() default: 1 parameter
        "bn_g": jnp.ones((HEAD_HIDDEN,), jnp.float32),
        "bn_b": jnp.zeros((HEAD_HIDDEN,), jnp.float32),
        "bn_mean": jnp.zeros((HEAD_HIDDEN,), jnp.float32),
        "bn_var": jnp.ones((HEAD_HIDDEN,), jnp.float32),
        "head_w2": nrm((HEAD_HIDDEN, NUM_CLASSES)),
        "head_b2": jnp.zeros((NUM_CLASSES,), jnp.float32),
    }
    blocks = []
    for u in range(DEPTH):
        blk = {
            "ln1_g": jnp.ones((EMBED_DIM,), jnp.float32),
            "ln1_b": jnp.zeros((EMBED_DIM,), jnp.float32),
            "ln2_g": jnp.ones((EMBED_DIM,), jnp.float32),
            "ln2_b": jnp.zeros((EMBED_DIM,), jnp.float32),
            "proj_w": nrm((EMBED_DIM, EMBED_DIM)),
            "proj_b": jnp.zeros((EMBED_DIM,), jnp.float32),
            "fc1_w": nrm((EMBED_DIM, EMBED_DIM * MLP_RATIO)),
            "fc1_b": jnp.zeros((EMBED_DIM * MLP_RATIO,), jnp.float32),
            "fc2_w": nrm((EMBED_DIM * MLP_RATIO, EMBED_DIM)),
            "fc2_b": jnp.zeros((EMBED_DIM,), jnp.float32),
        }
        if u < LOCAL_UP_TO:   # GPSA block (qkv_bias=False in timm convit)
            blk["qk_w"] = nrm((EMBED_DIM, 2 * EMBED_DIM))
            blk["v_w"] = nrm((EMBED_DIM, EMBED_DIM))
            blk["pos_proj_w"] = nrm((3, NUM_HEADS))
            blk["pos_proj_b"] = jnp.zeros((NUM_HEADS,), jnp.float32)
            blk["gating"] = jnp.ones((NUM_HEADS,), jnp.float32)
        else:                 # MHSA block
            blk["qkv_w"] = nrm((EMBED_DIM, 3 * EMBED_DIM))
        blocks.append(blk)
    P["blocks"] = blocks
    return P


def _fold_scale_into_q(w):
    """Fold the attention scale into the q columns (first EMBED_DIM) of a qk/qkv weight."""
    return jnp.concatenate([w[:, :EMBED_DIM] * SCALE, w[:, EMBED_DIM:]], axis=1)


def prepare_params(P):
    """Derive the eval-mode kernel parameter set (done once at parameter-load time)."""
    D, H = EMBED_DIM, NUM_HEADS
    rel = get_rel_indices(NUM_PATCHES).reshape(NUM_PATCHES * NUM_PATCHES, 3)

    # TODO(synk): BatchNorm1d is folded with running statistics (eval mode); training-mode
    # batch statistics are not representable in a stateless fused forward.
    bn_s = P["bn_g"] * jax.lax.rsqrt(P["bn_var"] + BN_EPS)
    bn_t = P["bn_b"] - P["bn_mean"] * bn_s

    kp = {
        "patch_w": P["patch_w"],
        # conv (patch-embed) bias folded into the positional embedding:
        "pos_embed": P["pos_embed"].reshape(NUM_PATCHES, D) + P["patch_b"].reshape(1, D),
        "cls_token": P["cls_token"].reshape(1, D),
        "norm_g": P["norm_g"].reshape(1, D),
        "norm_b": P["norm_b"].reshape(1, D),
        "head_w1": P["head_w1"],
        "head_b1": P["head_b1"].reshape(1, HEAD_HIDDEN),
        "prelu_alpha": P["prelu_alpha"].reshape(1, 1),
        "bn_s": bn_s.reshape(1, HEAD_HIDDEN),
        "bn_t": bn_t.reshape(1, HEAD_HIDDEN),
        "head_w2": P["head_w2"],
        "head_b2": P["head_b2"].reshape(1, NUM_CLASSES),
        "blocks": [],
    }
    for u, blk in enumerate(P["blocks"]):
        kb = {
            "ln1_g": blk["ln1_g"].reshape(1, D), "ln1_b": blk["ln1_b"].reshape(1, D),
            "ln2_g": blk["ln2_g"].reshape(1, D), "ln2_b": blk["ln2_b"].reshape(1, D),
            "proj_w": blk["proj_w"], "proj_b": blk["proj_b"].reshape(1, D),
            "fc1_w": blk["fc1_w"], "fc1_b": blk["fc1_b"].reshape(1, D * MLP_RATIO),
            "fc2_w": blk["fc2_w"], "fc2_b": blk["fc2_b"].reshape(1, D),
        }
        if u < LOCAL_UP_TO:
            kb["qk_w"] = _fold_scale_into_q(blk["qk_w"])     # scale folded into q columns
            kb["v_w"] = blk["v_w"]
            # input-independent positional attention: softmax(pos_proj(rel_indices))
            pos = rel @ blk["pos_proj_w"] + blk["pos_proj_b"]                    # (N*N, H)
            pos = pos.reshape(NUM_PATCHES, NUM_PATCHES, H).transpose(2, 0, 1)    # (H, N, N)
            pos = jax.nn.softmax(pos, axis=-1)
            kb["pos_attn"] = pos.reshape(H * NUM_PATCHES, NUM_PATCHES)
            kb["gate"] = jax.nn.sigmoid(blk["gating"]).reshape(1, H)
        else:
            kb["qkv_w"] = _fold_scale_into_q(blk["qkv_w"])   # scale folded into q columns
        kp["blocks"].append(kb)
    return jax.tree_util.tree_map(lambda a: a.astype(jnp.float32), kp)


# ----------------------------------- main -----------------------------------
if __name__ == "__main__":
    key = jax.random.PRNGKey(0)
    pkey, xkey = jax.random.split(key)
    raw_params = init_params(pkey)
    kernel_params = prepare_params(raw_params)          # one-time eval-mode prep

    x = jax.random.normal(xkey, (2, IN_CHANS, IMG, IMG), jnp.float32)  # NCHW like PyTorch

    fwd = jax.jit(convit_forward)
    out = jax.block_until_ready(fwd(x, kernel_params))

    assert out.shape == (2, NUM_CLASSES)
    assert bool(jnp.all(jnp.isfinite(out)))
    print("KERNEL_OK")
</pallas_src>

<mosaic_0001>
module attributes {stable_mosaic.version = 11 : i64} {
  func.func @_convit_kernel(%arg0: i32, %arg1: memref<1x16x16xf32, #tpu.memory_space<vmem>>, %arg2: memref<1x128xf32, #tpu.memory_space<vmem>>, %arg3: memref<32x128xf32, #tpu.memory_space<vmem>>, %arg4: memref<1x32xf32, #tpu.memory_space<vmem>>, %arg5: memref<128x32xf32, #tpu.memory_space<vmem>>, %arg6: memref<1x4xf32, #tpu.memory_space<vmem>>, %arg7: memref<1x32xf32, #tpu.memory_space<vmem>>, %arg8: memref<1x32xf32, #tpu.memory_space<vmem>>, %arg9: memref<1x32xf32, #tpu.memory_space<vmem>>, %arg10: memref<1x32xf32, #tpu.memory_space<vmem>>, %arg11: memref<64x16xf32, #tpu.memory_space<vmem>>, %arg12: memref<1x32xf32, #tpu.memory_space<vmem>>, %arg13: memref<32x32xf32, #tpu.memory_space<vmem>>, %arg14: memref<32x64xf32, #tpu.memory_space<vmem>>, %arg15: memref<32x32xf32, #tpu.memory_space<vmem>>, %arg16: memref<1x128xf32, #tpu.memory_space<vmem>>, %arg17: memref<32x128xf32, #tpu.memory_space<vmem>>, %arg18: memref<1x32xf32, #tpu.memory_space<vmem>>, %arg19: memref<128x32xf32, #tpu.memory_space<vmem>>, %arg20: memref<1x4xf32, #tpu.memory_space<vmem>>, %arg21: memref<1x32xf32, #tpu.memory_space<vmem>>, %arg22: memref<1x32xf32, #tpu.memory_space<vmem>>, %arg23: memref<1x32xf32, #tpu.memory_space<vmem>>, %arg24: memref<1x32xf32, #tpu.memory_space<vmem>>, %arg25: memref<64x16xf32, #tpu.memory_space<vmem>>, %arg26: memref<1x32xf32, #tpu.memory_space<vmem>>, %arg27: memref<32x32xf32, #tpu.memory_space<vmem>>, %arg28: memref<32x64xf32, #tpu.memory_space<vmem>>, %arg29: memref<32x32xf32, #tpu.memory_space<vmem>>, %arg30: memref<1x128xf32, #tpu.memory_space<vmem>>, %arg31: memref<32x128xf32, #tpu.memory_space<vmem>>, %arg32: memref<1x32xf32, #tpu.memory_space<vmem>>, %arg33: memref<128x32xf32, #tpu.memory_space<vmem>>, %arg34: memref<1x32xf32, #tpu.memory_space<vmem>>, %arg35: memref<1x32xf32, #tpu.memory_space<vmem>>, %arg36: memref<1x32xf32, #tpu.memory_space<vmem>>, %arg37: memref<1x32xf32, #tpu.memory_space<vmem>>, %arg38: memref<1x32xf32, #tpu.memory_space<vmem>>, %arg39: memref<32x32xf32, #tpu.memory_space<vmem>>, %arg40: memref<32x96xf32, #tpu.memory_space<vmem>>, %arg41: memref<1x128xf32, #tpu.memory_space<vmem>>, %arg42: memref<32x128xf32, #tpu.memory_space<vmem>>, %arg43: memref<1x32xf32, #tpu.memory_space<vmem>>, %arg44: memref<128x32xf32, #tpu.memory_space<vmem>>, %arg45: memref<1x32xf32, #tpu.memory_space<vmem>>, %arg46: memref<1x32xf32, #tpu.memory_space<vmem>>, %arg47: memref<1x32xf32, #tpu.memory_space<vmem>>, %arg48: memref<1x32xf32, #tpu.memory_space<vmem>>, %arg49: memref<1x32xf32, #tpu.memory_space<vmem>>, %arg50: memref<32x32xf32, #tpu.memory_space<vmem>>, %arg51: memref<32x96xf32, #tpu.memory_space<vmem>>, %arg52: memref<1x1024xf32, #tpu.memory_space<vmem>>, %arg53: memref<1x1024xf32, #tpu.memory_space<vmem>>, %arg54: memref<1x32xf32, #tpu.memory_space<vmem>>, %arg55: memref<1x1024xf32, #tpu.memory_space<vmem>>, %arg56: memref<1x3xf32, #tpu.memory_space<vmem>>, %arg57: memref<32x1024xf32, #tpu.memory_space<vmem>>, %arg58: memref<1024x3xf32, #tpu.memory_space<vmem>>, %arg59: memref<1x32xf32, #tpu.memory_space<vmem>>, %arg60: memref<1x32xf32, #tpu.memory_space<vmem>>, %arg61: memref<16x32xf32, #tpu.memory_space<vmem>>, %arg62: memref<16x32xf32, #tpu.memory_space<vmem>>, %arg63: memref<1x1xf32, #tpu.memory_space<vmem>>, %arg64: memref<1x1x3xf32, #tpu.memory_space<vmem>>) attributes {dimension_semantics = [#tpu.dimension_semantics<parallel>], iteration_bounds = array<i64: 2>, scalar_prefetch = 0 : i64, scratch_operands = 0 : i64, tpu.core_type = #tpu.core_type<tc>, window_params = [{transform_indices = @transform_0, window_bounds = array<i64: 1, 16, 16>}, {pipeline_mode = #tpu.pipeline_mode<synchronous>, transform_indices = @transform_1, window_bounds = array<i64: 1, 128>}, {pipeline_mode = #tpu.pipeline_mode<synchronous>, transform_indices = @transform_2, window_bounds = array<i64: 32, 128>}, {pipeline_mode = #tpu.pipeline_mode<synchronous>, transform_indices = @transform_3, window_bounds = array<i64: 1, 32>}, {pipeline_mode = #tpu.pipeline_mode<synchronous>, transform_indices = @transform_4, window_bounds = array<i64: 128, 32>}, {pipeline_mode = #tpu.pipeline_mode<synchronous>, transform_indices = @transform_5, window_bounds = array<i64: 1, 4>}, {pipeline_mode = #tpu.pipeline_mode<synchronous>, transform_indices = @transform_6, window_bounds = array<i64: 1, 32>}, {pipeline_mode = #tpu.pipeline_mode<synchronous>, transform_indices = @transform_7, window_bounds = array<i64: 1, 32>}, {pipeline_mode = #tpu.pipeline_mode<synchronous>, transform_indices = @transform_8, window_bounds = array<i64: 1, 32>}, {pipeline_mode = #tpu.pipeline_mode<synchronous>, transform_indices = @transform_9, window_bounds = array<i64: 1, 32>}, {pipeline_mode = #tpu.pipeline_mode<synchronous>, transform_indices = @transform_10, window_bounds = array<i64: 64, 16>}, {pipeline_mode = #tpu.pipeline_mode<synchronous>, transform_indices = @transform_11, window_bounds = array<i64: 1, 32>}, {pipeline_mode = #tpu.pipeline_mode<synchronous>, transform_indices = @transform_12, window_bounds = array<i64: 32, 32>}, {pipeline_mode = #tpu.pipeline_mode<synchronous>, transform_indices = @transform_13, window_bounds = array<i64: 32, 64>}, {pipeline_mode = #tpu.pipeline_mode<synchronous>, transform_indices = @transform_14, window_bounds = array<i64: 32, 32>}, {pipeline_mode = #tpu.pipeline_mode<synchronous>, transform_indices = @transform_15, window_bounds = array<i64: 1, 128>}, {pipeline_mode = #tpu.pipeline_mode<synchronous>, transform_indices = @transform_16, window_bounds = array<i64: 32, 128>}, {pipeline_mode = #tpu.pipeline_mode<synchronous>, transform_indices = @transform_17, window_bounds = array<i64: 1, 32>}, {pipeline_mode = #tpu.pipeline_mode<synchronous>, transform_indices = @transform_18, window_bounds = array<i64: 128, 32>}, {pipeline_mode = #tpu.pipeline_mode<synchronous>, transform_indices = @transform_19, window_bounds = array<i64: 1, 4>}, {pipeline_mode = #tpu.pipeline_mode<synchronous>, transform_indices = @transform_20, window_bounds = array<i64: 1, 32>}, {pipeline_mode = #tpu.pipeline_mode<synchronous>, transform_indices = @transform_21, window_bounds = array<i64: 1, 32>}, {pipeline_mode = #tpu.pipeline_mode<synchronous>, transform_indices = @transform_22, window_bounds = array<i64: 1, 32>}, {pipeline_mode = #tpu.pipeline_mode<synchronous>, transform_indices = @transform_23, window_bounds = array<i64: 1, 32>}, {pipeline_mode = #tpu.pipeline_mode<synchronous>, transform_indices = @transform_24, window_bounds = array<i64: 64, 16>}, {pipeline_mode = #tpu.pipeline_mode<synchronous>, transform_indices = @transform_25, window_bounds = array<i64: 1, 32>}, {pipeline_mode = #tpu.pipeline_mode<synchronous>, transform_indices = @transform_26, window_bounds = array<i64: 32, 32>}, {pipeline_mode = #tpu.pipeline_mode<synchronous>, transform_indices = @transform_27, window_bounds = array<i64: 32, 64>}, {pipeline_mode = #tpu.pipeline_mode<synchronous>, transform_indices = @transform_28, window_bounds = array<i64: 32, 32>}, {pipeline_mode = #tpu.pipeline_mode<synchronous>, transform_indices = @transform_29, window_bounds = array<i64: 1, 128>}, {pipeline_mode = #tpu.pipeline_mode<synchronous>, transform_indices = @transform_30, window_bounds = array<i64: 32, 128>}, {pipeline_mode = #tpu.pipeline_mode<synchronous>, transform_indices = @transform_31, window_bounds = array<i64: 1, 32>}, {pipeline_mode = #tpu.pipeline_mode<synchronous>, transform_indices = @transform_32, window_bounds = array<i64: 128, 32>}, {pipeline_mode = #tpu.pipeline_mode<synchronous>, transform_indices = @transform_33, window_bounds = array<i64: 1, 32>}, {pipeline_mode = #tpu.pipeline_mode<synchronous>, transform_indices = @transform_34, window_bounds = array<i64: 1, 32>}, {pipeline_mode = #tpu.pipeline_mode<synchronous>, transform_indices = @transform_35, window_bounds = array<i64: 1, 32>}, {pipeline_mode = #tpu.pipeline_mode<synchronous>, transform_indices = @transform_36, window_bounds = array<i64: 1, 32>}, {pipeline_mode = #tpu.pipeline_mode<synchronous>, transform_indices = @transform_37, window_bounds = array<i64: 1, 32>}, {pipeline_mode = #tpu.pipeline_mode<synchronous>, transform_indices = @transform_38, window_bounds = array<i64: 32, 32>}, {pipeline_mode = #tpu.pipeline_mode<synchronous>, transform_indices = @transform_39, window_bounds = array<i64: 32, 96>}, {pipeline_mode = #tpu.pipeline_mode<synchronous>, transform_indices = @transform_40, window_bounds = array<i64: 1, 128>}, {pipeline_mode = #tpu.pipeline_mode<synchronous>, transform_indices = @transform_41, window_bounds = array<i64: 32, 128>}, {pipeline_mode = #tpu.pipeline_mode<synchronous>, transform_indices = @transform_42, window_bounds = array<i64: 1, 32>}, {pipeline_mode = #tpu.pipeline_mode<synchronous>, transform_indices = @transform_43, window_bounds = array<i64: 128, 32>}, {pipeline_mode = #tpu.pipeline_mode<synchronous>, transform_indices = @transform_44, window_bounds = array<i64: 1, 32>}, {pipeline_mode = #tpu.pipeline_mode<synchronous>, transform_indices = @transform_45, window_bounds = array<i64: 1, 32>}, {pipeline_mode = #tpu.pipeline_mode<synchronous>, transform_indices = @transform_46, window_bounds = array<i64: 1, 32>}, {pipeline_mode = #tpu.pipeline_mode<synchronous>, transform_indices = @transform_47, window_bounds = array<i64: 1, 32>}, {pipeline_mode = #tpu.pipeline_mode<synchronous>, transform_indices = @transform_48, window_bounds = array<i64: 1, 32>}, {pipeline_mode = #tpu.pipeline_mode<synchronous>, transform_indices = @transform_49, window_bounds = array<i64: 32, 32>}, {pipeline_mode = #tpu.pipeline_mode<synchronous>, transform_indices = @transform_50, window_bounds = array<i64: 32, 96>}, {pipeline_mode = #tpu.pipeline_mode<synchronous>, transform_indices = @transform_51, window_bounds = array<i64: 1, 1024>}, {pipeline_mode = #tpu.pipeline_mode<synchronous>, transform_indices = @transform_52, window_bounds = array<i64: 1, 1024>}, {pipeline_mode = #tpu.pipeline_mode<synchronous>, transform_indices = @transform_53, window_bounds = array<i64: 1, 32>}, {pipeline_mode = #tpu.pipeline_mode<synchronous>, transform_indices = @transform_54, window_bounds = array<i64: 1, 1024>}, {pipeline_mode = #tpu.pipeline_mode<synchronous>, transform_indices = @transform_55, window_bounds = array<i64: 1, 3>}, {pipeline_mode = #tpu.pipeline_mode<synchronous>, transform_indices = @transform_56, window_bounds = array<i64: 32, 1024>}, {pipeline_mode = #tpu.pipeline_mode<synchronous>, transform_indices = @transform_57, window_bounds = array<i64: 1024, 3>}, {pipeline_mode = #tpu.pipeline_mode<synchronous>, transform_indices = @transform_58, window_bounds = array<i64: 1, 32>}, {pipeline_mode = #tpu.pipeline_mode<synchronous>, transform_indices = @transform_59, window_bounds = array<i64: 1, 32>}, {pipeline_mode = #tpu.pipeline_mode<synchronous>, transform_indices = @transform_60, window_bounds = array<i64: 16, 32>}, {pipeline_mode = #tpu.pipeline_mode<synchronous>, transform_indices = @transform_61, window_bounds = array<i64: 16, 32>}, {pipeline_mode = #tpu.pipeline_mode<synchronous>, transform_indices = @transform_62, window_bounds = array<i64: 1, 1>}, {transform_indices = @transform_63, window_bounds = array<i64: 1, 1, 3>}]} {
    %c0 = arith.constant 0 : index
    %c0_0 = arith.constant 0 : index
    %c0_1 = arith.constant 0 : index
    %0 = vector.load %arg1[%c0, %c0_0, %c0_1] : memref<1x16x16xf32, #tpu.memory_space<vmem>>, vector<1x16x16xf32>
    %1 = vector.shape_cast %0 : vector<1x16x16xf32> to vector<16x16xf32>
    %c0_2 = arith.constant 0 : index
    %c0_3 = arith.constant 0 : index
    %2 = vector.load %arg61[%c0_2, %c0_3] : memref<16x32xf32, #tpu.memory_space<vmem>>, vector<16x32xf32>
    %cst = arith.constant dense<0.000000e+00> : vector<16x32xf32>
    %3 = tpu.matmul %1, %2, %cst {dimension_numbers = #tpu.dot_dimension_numbers<[1], [0], [0], [1], [0, 0, 1, 1], [], []>} : vector<16x16xf32>, vector<16x32xf32>, vector<16x32xf32> -> vector<16x32xf32>
    %c0_4 = arith.constant 0 : index
    %c0_5 = arith.constant 0 : index
    %4 = vector.load %arg62[%c0_4, %c0_5] : memref<16x32xf32, #tpu.memory_space<vmem>>, vector<16x32xf32>
    %5 = arith.addf %3, %4 : vector<16x32xf32>
    %cst_6 = arith.constant dense<0.000000e+00> : vector<16xf32>
    %6 = vector.multi_reduction <add>, %5, %cst_6 [1] : vector<16x32xf32> to vector<16xf32>
    %7 = vector.shape_cast %6 : vector<16xf32> to vector<16x1xf32>
    %cst_7 = arith.constant 3.200000e+01 : f32
    %8 = vector.broadcast %cst_7 : f32 to vector<16x1xf32>
    %9 = arith.divf %7, %8 : vector<16x1xf32>
    %10 = vector.broadcast %9 : vector<16x1xf32> to vector<16x32xf32>
    %11 = arith.subf %5, %10 : vector<16x32xf32>
    %12 = arith.mulf %11, %11 : vector<16x32xf32>
    %cst_8 = arith.constant dense<0.000000e+00> : vector<16xf32>
    %13 = vector.multi_reduction <add>, %12, %cst_8 [1] : vector<16x32xf32> to vector<16xf32>
    %14 = vector.shape_cast %13 : vector<16xf32> to vector<16x1xf32>
    %cst_9 = arith.constant 3.200000e+01 : f32
    %15 = vector.broadcast %cst_9 : f32 to vector<16x1xf32>
    %16 = arith.divf %14, %15 : vector<16x1xf32>
    %cst_10 = arith.constant 9.99999997E-7 : f32
    %17 = vector.broadcast %cst_10 : f32 to vector<16x1xf32>
    %18 = arith.addf %16, %17 : vector<16x1xf32>
    %19 = math.rsqrt %18 : vector<16x1xf32>
    %20 = vector.broadcast %19 : vector<16x1xf32> to vector<16x32xf32>
    %21 = arith.mulf %11, %20 : vector<16x32xf32>
    %c0_11 = arith.constant 0 : index
    %c0_12 = arith.constant 0 : index
    %22 = vector.load %arg8[%c0_11, %c0_12] : memref<1x32xf32, #tpu.memory_space<vmem>>, vector<1x32xf32>
    %23 = vector.broadcast %22 : vector<1x32xf32> to vector<16x32xf32>
    %24 = arith.mulf %21, %23 : vector<16x32xf32>
    %c0_13 = arith.constant 0 : index
    %c0_14 = arith.constant 0 : index
    %25 = vector.load %arg7[%c0_13, %c0_14] : memref<1x32xf32, #tpu.memory_space<vmem>>, vector<1x32xf32>
    %26 = vector.broadcast %25 : vector<1x32xf32> to vector<16x32xf32>
    %27 = arith.addf %24, %26 : vector<16x32xf32>
    %c0_15 = arith.constant 0 : index
    %c0_16 = arith.constant 0 : index
    %28 = vector.load %arg14[%c0_15, %c0_16] : memref<32x64xf32, #tpu.memory_space<vmem>>, vector<32x64xf32>
    %cst_17 = arith.constant dense<0.000000e+00> : vector<16x64xf32>
    %29 = tpu.matmul %27, %28, %cst_17 {dimension_numbers = #tpu.dot_dimension_numbers<[1], [0], [0], [1], [0, 0, 1, 1], [], []>} : vector<16x32xf32>, vector<32x64xf32>, vector<16x64xf32> -> vector<16x64xf32>
    %c0_18 = arith.constant 0 : index
    %c0_19 = arith.constant 0 : index
    %30 = vector.load %arg15[%c0_18, %c0_19] : memref<32x32xf32, #tpu.memory_space<vmem>>, vector<32x32xf32>
    %cst_20 = arith.constant dense<0.000000e+00> : vector<16x32xf32>
    %31 = tpu.matmul %27, %30, %cst_20 {dimension_numbers = #tpu.dot_dimension_numbers<[1], [0], [0], [1], [0, 0, 1, 1], [], []>} : vector<16x32xf32>, vector<32x32xf32>, vector<16x32xf32> -> vector<16x32xf32>
    %c0_21 = arith.constant 0 : index
    %c0_22 = arith.constant 0 : index
    %32 = vector.load %arg6[%c0_21, %c0_22] : memref<1x4xf32, #tpu.memory_space<vmem>>, vector<1x4xf32>
    %c0_23 = arith.constant 0 : index
    %c0_24 = arith.constant 0 : index
    %33 = vector.load %arg11[%c0_23, %c0_24] : memref<64x16xf32, #tpu.memory_space<vmem>>, vector<64x16xf32>
    %c0_25 = arith.constant 0 : index
    %c0_26 = arith.constant 0 : index
    %34 = vector.load %arg13[%c0_25, %c0_26] : memref<32x32xf32, #tpu.memory_space<vmem>>, vector<32x32xf32>
    %c0_27 = arith.constant 0 : index
    %c0_28 = arith.constant 0 : index
    %35 = vector.load %arg12[%c0_27, %c0_28] : memref<1x32xf32, #tpu.memory_space<vmem>>, vector<1x32xf32>
    %36 = vector.extract_strided_slice %29 {offsets = [0, 0], sizes = [16, 8], strides = [1, 1]} : vector<16x64xf32> to vector<16x8xf32>
    %37 = vector.extract_strided_slice %29 {offsets = [0, 32], sizes = [16, 8], strides = [1, 1]} : vector<16x64xf32> to vector<16x8xf32>
    %38 = vector.extract_strided_slice %31 {offsets = [0, 0], sizes = [16, 8], strides = [1, 1]} : vector<16x32xf32> to vector<16x8xf32>
    %cst_29 = arith.constant dense<0.000000e+00> : vector<16x16xf32>
    %39 = tpu.matmul %36, %37, %cst_29 {dimension_numbers = #tpu.dot_dimension_numbers<[1], [1], [0], [0], [0, 0, 1, 0], [], []>} : vector<16x8xf32>, vector<16x8xf32>, vector<16x16xf32> -> vector<16x16xf32>
    %cst_30 = arith.constant dense<0xFF800000> : vector<16xf32>
    %40 = vector.multi_reduction <maximumf>, %39, %cst_30 [1] : vector<16x16xf32> to vector<16xf32>
    %41 = vector.shape_cast %40 : vector<16xf32> to vector<16x1xf32>
    %42 = vector.broadcast %41 : vector<16x1xf32> to vector<16x16xf32>
    %43 = arith.subf %39, %42 : vector<16x16xf32>
    %44 = math.exp %43 : vector<16x16xf32>
    %cst_31 = arith.constant dense<0.000000e+00> : vector<16xf32>
    %45 = vector.multi_reduction <add>, %44, %cst_31 [1] : vector<16x16xf32> to vector<16xf32>
    %46 = vector.shape_cast %45 : vector<16xf32> to vector<16x1xf32>
    %47 = tpu.reciprocal %46 {approx = true} : vector<16x1xf32> -> vector<16x1xf32>
    %48 = vector.broadcast %47 : vector<16x1xf32> to vector<16x16xf32>
    %49 = arith.mulf %44, %48 : vector<16x16xf32>
    %50 = vector.extract_strided_slice %33 {offsets = [0, 0], sizes = [16, 16], strides = [1, 1]} : vector<64x16xf32> to vector<16x16xf32>
    %51 = vector.extract_strided_slice %32 {offsets = [0, 0], sizes = [1, 1], strides = [1, 1]} : vector<1x4xf32> to vector<1x1xf32>
    %cst_32 = arith.constant 1.000000e+00 : f32
    %52 = vector.broadcast %cst_32 : f32 to vector<1x1xf32>
    %53 = arith.subf %52, %51 : vector<1x1xf32>
    %54 = vector.broadcast %53 : vector<1x1xf32> to vector<16x16xf32>
    %55 = arith.mulf %54, %49 : vector<16x16xf32>
    %56 = vector.broadcast %51 : vector<1x1xf32> to vector<16x16xf32>
    %57 = arith.mulf %56, %50 : vector<16x16xf32>
    %58 = arith.addf %55, %57 : vector<16x16xf32>
    %cst_33 = arith.constant dense<0.000000e+00> : vector<16xf32>
    %59 = vector.multi_reduction <add>, %58, %cst_33 [1] : vector<16x16xf32> to vector<16xf32>
    %60 = vector.shape_cast %59 : vector<16xf32> to vector<16x1xf32>
    %61 = tpu.reciprocal %60 {approx = true} : vector<16x1xf32> -> vector<16x1xf32>
    %62 = vector.broadcast %61 : vector<16x1xf32> to vector<16x16xf32>
    %63 = arith.mulf %58, %62 : vector<16x16xf32>
    %cst_34 = arith.constant dense<0.000000e+00> : vector<16x8xf32>
    %64 = tpu.matmul %63, %38, %cst_34 {dimension_numbers = #tpu.dot_dimension_numbers<[1], [0], [0], [1], [0, 0, 1, 1], [], []>} : vector<16x16xf32>, vector<16x8xf32>, vector<16x8xf32> -> vector<16x8xf32>
    %65 = vector.extract_strided_slice %34 {offsets = [0, 0], sizes = [8, 32], strides = [1, 1]} : vector<32x32xf32> to vector<8x32xf32>
    %cst_35 = arith.constant dense<0.000000e+00> : vector<16x32xf32>
    %66 = tpu.matmul %64, %65, %cst_35 {dimension_numbers = #tpu.dot_dimension_numbers<[1], [0], [0], [1], [0, 0, 1, 1], [], []>} : vector<16x8xf32>, vector<8x32xf32>, vector<16x32xf32> -> vector<16x32xf32>
    %67 = vector.broadcast %35 : vector<1x32xf32> to vector<16x32xf32>
    %68 = arith.addf %67, %66 : vector<16x32xf32>
    %69 = vector.extract_strided_slice %29 {offsets = [0, 8], sizes = [16, 8], strides = [1, 1]} : vector<16x64xf32> to vector<16x8xf32>
    %70 = vector.extract_strided_slice %29 {offsets = [0, 40], sizes = [16, 8], strides = [1, 1]} : vector<16x64xf32> to vector<16x8xf32>
    %71 = vector.extract_strided_slice %31 {offsets = [0, 8], sizes = [16, 8], strides = [1, 1]} : vector<16x32xf32> to vector<16x8xf32>
    %cst_36 = arith.constant dense<0.000000e+00> : vector<16x16xf32>
    %72 = tpu.matmul %69, %70, %cst_36 {dimension_numbers = #tpu.dot_dimension_numbers<[1], [1], [0], [0], [0, 0, 1, 0], [], []>} : vector<16x8xf32>, vector<16x8xf32>, vector<16x16xf32> -> vector<16x16xf32>
    %cst_37 = arith.constant dense<0xFF800000> : vector<16xf32>
    %73 = vector.multi_reduction <maximumf>, %72, %cst_37 [1] : vector<16x16xf32> to vector<16xf32>
    %74 = vector.shape_cast %73 : vector<16xf32> to vector<16x1xf32>
    %75 = vector.broadcast %74 : vector<16x1xf32> to vector<16x16xf32>
    %76 = arith.subf %72, %75 : vector<16x16xf32>
    %77 = math.exp %76 : vector<16x16xf32>
    %cst_38 = arith.constant dense<0.000000e+00> : vector<16xf32>
    %78 = vector.multi_reduction <add>, %77, %cst_38 [1] : vector<16x16xf32> to vector<16xf32>
    %79 = vector.shape_cast %78 : vector<16xf32> to vector<16x1xf32>
    %80 = tpu.reciprocal %79 {approx = true} : vector<16x1xf32> -> vector<16x1xf32>
    %81 = vector.broadcast %80 : vector<16x1xf32> to vector<16x16xf32>
    %82 = arith.mulf %77, %81 : vector<16x16xf32>
    %83 = vector.extract_strided_slice %33 {offsets = [16, 0], sizes = [16, 16], strides = [1, 1]} : vector<64x16xf32> to vector<16x16xf32>
    %84 = vector.extract_strided_slice %32 {offsets = [0, 1], sizes = [1, 1], strides = [1, 1]} : vector<1x4xf32> to vector<1x1xf32>
    %cst_39 = arith.constant 1.000000e+00 : f32
    %85 = vector.broadcast %cst_39 : f32 to vector<1x1xf32>
    %86 = arith.subf %85, %84 : vector<1x1xf32>
    %87 = vector.broadcast %86 : vector<1x1xf32> to vector<16x16xf32>
    %88 = arith.mulf %87, %82 : vector<16x16xf32>
    %89 = vector.broadcast %84 : vector<1x1xf32> to vector<16x16xf32>
    %90 = arith.mulf %89, %83 : vector<16x16xf32>
    %91 = arith.addf %88, %90 : vector<16x16xf32>
    %cst_40 = arith.constant dense<0.000000e+00> : vector<16xf32>
    %92 = vector.multi_reduction <add>, %91, %cst_40 [1] : vector<16x16xf32> to vector<16xf32>
    %93 = vector.shape_cast %92 : vector<16xf32> to vector<16x1xf32>
    %94 = tpu.reciprocal %93 {approx = true} : vector<16x1xf32> -> vector<16x1xf32>
    %95 = vector.broadcast %94 : vector<16x1xf32> to vector<16x16xf32>
    %96 = arith.mulf %91, %95 : vector<16x16xf32>
    %cst_41 = arith.constant dense<0.000000e+00> : vector<16x8xf32>
    %97 = tpu.matmul %96, %71, %cst_41 {dimension_numbers = #tpu.dot_dimension_numbers<[1], [0], [0], [1], [0, 0, 1, 1], [], []>} : vector<16x16xf32>, vector<16x8xf32>, vector<16x8xf32> -> vector<16x8xf32>
    %98 = vector.extract_strided_slice %34 {offsets = [8, 0], sizes = [8, 32], strides = [1, 1]} : vector<32x32xf32> to vector<8x32xf32>
    %cst_42 = arith.constant dense<0.000000e+00> : vector<16x32xf32>
    %99 = tpu.matmul %97, %98, %cst_42 {dimension_numbers = #tpu.dot_dimension_numbers<[1], [0], [0], [1], [0, 0, 1, 1], [], []>} : vector<16x8xf32>, vector<8x32xf32>, vector<16x32xf32> -> vector<16x32xf32>
    %100 = arith.addf %68, %99 : vector<16x32xf32>
    %101 = vector.extract_strided_slice %29 {offsets = [0, 16], sizes = [16, 8], strides = [1, 1]} : vector<16x64xf32> to vector<16x8xf32>
    %102 = vector.extract_strided_slice %29 {offsets = [0, 48], sizes = [16, 8], strides = [1, 1]} : vector<16x64xf32> to vector<16x8xf32>
    %103 = vector.extract_strided_slice %31 {offsets = [0, 16], sizes = [16, 8], strides = [1, 1]} : vector<16x32xf32> to vector<16x8xf32>
    %cst_43 = arith.constant dense<0.000000e+00> : vector<16x16xf32>
    %104 = tpu.matmul %101, %102, %cst_43 {dimension_numbers = #tpu.dot_dimension_numbers<[1], [1], [0], [0], [0, 0, 1, 0], [], []>} : vector<16x8xf32>, vector<16x8xf32>, vector<16x16xf32> -> vector<16x16xf32>
    %cst_44 = arith.constant dense<0xFF800000> : vector<16xf32>
    %105 = vector.multi_reduction <maximumf>, %104, %cst_44 [1] : vector<16x16xf32> to vector<16xf32>
    %106 = vector.shape_cast %105 : vector<16xf32> to vector<16x1xf32>
    %107 = vector.broadcast %106 : vector<16x1xf32> to vector<16x16xf32>
    %108 = arith.subf %104, %107 : vector<16x16xf32>
    %109 = math.exp %108 : vector<16x16xf32>
    %cst_45 = arith.constant dense<0.000000e+00> : vector<16xf32>
    %110 = vector.multi_reduction <add>, %109, %cst_45 [1] : vector<16x16xf32> to vector<16xf32>
    %111 = vector.shape_cast %110 : vector<16xf32> to vector<16x1xf32>
    %112 = tpu.reciprocal %111 {approx = true} : vector<16x1xf32> -> vector<16x1xf32>
    %113 = vector.broadcast %112 : vector<16x1xf32> to vector<16x16xf32>
    %114 = arith.mulf %109, %113 : vector<16x16xf32>
    %115 = vector.extract_strided_slice %33 {offsets = [32, 0], sizes = [16, 16], strides = [1, 1]} : vector<64x16xf32> to vector<16x16xf32>
    %116 = vector.extract_strided_slice %32 {offsets = [0, 2], sizes = [1, 1], strides = [1, 1]} : vector<1x4xf32> to vector<1x1xf32>
    %cst_46 = arith.constant 1.000000e+00 : f32
    %117 = vector.broadcast %cst_46 : f32 to vector<1x1xf32>
    %118 = arith.subf %117, %116 : vector<1x1xf32>
    %119 = vector.broadcast %118 : vector<1x1xf32> to vector<16x16xf32>
    %120 = arith.mulf %119, %114 : vector<16x16xf32>
    %121 = vector.broadcast %116 : vector<1x1xf32> to vector<16x16xf32>
    %122 = arith.mulf %121, %115 : vector<16x16xf32>
    %123 = arith.addf %120, %122 : vector<16x16xf32>
    %cst_47 = arith.constant dense<0.000000e+00> : vector<16xf32>
    %124 = vector.multi_reduction <add>, %123, %cst_47 [1] : vector<16x16xf32> to vector<16xf32>
    %125 = vector.shape_cast %124 : vector<16xf32> to vector<16x1xf32>
    %126 = tpu.reciprocal %125 {approx = true} : vector<16x1xf32> -> vector<16x1xf32>
    %127 = vector.broadcast %126 : vector<16x1xf32> to vector<16x16xf32>
    %128 = arith.mulf %123, %127 : vector<16x16xf32>
    %cst_48 = arith.constant dense<0.000000e+00> : vector<16x8xf32>
    %129 = tpu.matmul %128, %103, %cst_48 {dimension_numbers = #tpu.dot_dimension_numbers<[1], [0], [0], [1], [0, 0, 1, 1], [], []>} : vector<16x16xf32>, vector<16x8xf32>, vector<16x8xf32> -> vector<16x8xf32>
    %130 = vector.extract_strided_slice %34 {offsets = [16, 0], sizes = [8, 32], strides = [1, 1]} : vector<32x32xf32> to vector<8x32xf32>
    %cst_49 = arith.constant dense<0.000000e+00> : vector<16x32xf32>
    %131 = tpu.matmul %129, %130, %cst_49 {dimension_numbers = #tpu.dot_dimension_numbers<[1], [0], [0], [1], [0, 0, 1, 1], [], []>} : vector<16x8xf32>, vector<8x32xf32>, vector<16x32xf32> -> vector<16x32xf32>
    %132 = arith.addf %100, %131 : vector<16x32xf32>
    %133 = vector.extract_strided_slice %29 {offsets = [0, 24], sizes = [16, 8], strides = [1, 1]} : vector<16x64xf32> to vector<16x8xf32>
    %134 = vector.extract_strided_slice %29 {offsets = [0, 56], sizes = [16, 8], strides = [1, 1]} : vector<16x64xf32> to vector<16x8xf32>
    %135 = vector.extract_strided_slice %31 {offsets = [0, 24], sizes = [16, 8], strides = [1, 1]} : vector<16x32xf32> to vector<16x8xf32>
    %cst_50 = arith.constant dense<0.000000e+00> : vector<16x16xf32>
    %136 = tpu.matmul %133, %134, %cst_50 {dimension_numbers = #tpu.dot_dimension_numbers<[1], [1], [0], [0], [0, 0, 1, 0], [], []>} : vector<16x8xf32>, vector<16x8xf32>, vector<16x16xf32> -> vector<16x16xf32>
    %cst_51 = arith.constant dense<0xFF800000> : vector<16xf32>
    %137 = vector.multi_reduction <maximumf>, %136, %cst_51 [1] : vector<16x16xf32> to vector<16xf32>
    %138 = vector.shape_cast %137 : vector<16xf32> to vector<16x1xf32>
    %139 = vector.broadcast %138 : vector<16x1xf32> to vector<16x16xf32>
    %140 = arith.subf %136, %139 : vector<16x16xf32>
    %141 = math.exp %140 : vector<16x16xf32>
    %cst_52 = arith.constant dense<0.000000e+00> : vector<16xf32>
    %142 = vector.multi_reduction <add>, %141, %cst_52 [1] : vector<16x16xf32> to vector<16xf32>
    %143 = vector.shape_cast %142 : vector<16xf32> to vector<16x1xf32>
    %144 = tpu.reciprocal %143 {approx = true} : vector<16x1xf32> -> vector<16x1xf32>
    %145 = vector.broadcast %144 : vector<16x1xf32> to vector<16x16xf32>
    %146 = arith.mulf %141, %145 : vector<16x16xf32>
    %147 = vector.extract_strided_slice %33 {offsets = [48, 0], sizes = [16, 16], strides = [1, 1]} : vector<64x16xf32> to vector<16x16xf32>
    %148 = vector.extract_strided_slice %32 {offsets = [0, 3], sizes = [1, 1], strides = [1, 1]} : vector<1x4xf32> to vector<1x1xf32>
    %cst_53 = arith.constant 1.000000e+00 : f32
    %149 = vector.broadcast %cst_53 : f32 to vector<1x1xf32>
    %150 = arith.subf %149, %148 : vector<1x1xf32>
    %151 = vector.broadcast %150 : vector<1x1xf32> to vector<16x16xf32>
    %152 = arith.mulf %151, %146 : vector<16x16xf32>
    %153 = vector.broadcast %148 : vector<1x1xf32> to vector<16x16xf32>
    %154 = arith.mulf %153, %147 : vector<16x16xf32>
    %155 = arith.addf %152, %154 : vector<16x16xf32>
    %cst_54 = arith.constant dense<0.000000e+00> : vector<16xf32>
    %156 = vector.multi_reduction <add>, %155, %cst_54 [1] : vector<16x16xf32> to vector<16xf32>
    %157 = vector.shape_cast %156 : vector<16xf32> to vector<16x1xf32>
    %158 = tpu.reciprocal %157 {approx = true} : vector<16x1xf32> -> vector<16x1xf32>
    %159 = vector.broadcast %158 : vector<16x1xf32> to vector<16x16xf32>
    %160 = arith.mulf %155, %159 : vector<16x16xf32>
    %cst_55 = arith.constant dense<0.000000e+00> : vector<16x8xf32>
    %161 = tpu.matmul %160, %135, %cst_55 {dimension_numbers = #tpu.dot_dimension_numbers<[1], [0], [0], [1], [0, 0, 1, 1], [], []>} : vector<16x16xf32>, vector<16x8xf32>, vector<16x8xf32> -> vector<16x8xf32>
    %162 = vector.extract_strided_slice %34 {offsets = [24, 0], sizes = [8, 32], strides = [1, 1]} : vector<32x32xf32> to vector<8x32xf32>
    %cst_56 = arith.constant dense<0.000000e+00> : vector<16x32xf32>
    %163 = tpu.matmul %161, %162, %cst_56 {dimension_numbers = #tpu.dot_dimension_numbers<[1], [0], [0], [1], [0, 0, 1, 1], [], []>} : vector<16x8xf32>, vector<8x32xf32>, vector<16x32xf32> -> vector<16x32xf32>
    %164 = arith.addf %132, %163 : vector<16x32xf32>
    %165 = arith.addf %5, %164 : vector<16x32xf32>
    %cst_57 = arith.constant dense<0.000000e+00> : vector<16xf32>
    %166 = vector.multi_reduction <add>, %165, %cst_57 [1] : vector<16x32xf32> to vector<16xf32>
    %167 = vector.shape_cast %166 : vector<16xf32> to vector<16x1xf32>
    %cst_58 = arith.constant 3.200000e+01 : f32
    %168 = vector.broadcast %cst_58 : f32 to vector<16x1xf32>
    %169 = arith.divf %167, %168 : vector<16x1xf32>
    %170 = vector.broadcast %169 : vector<16x1xf32> to vector<16x32xf32>
    %171 = arith.subf %165, %170 : vector<16x32xf32>
    %172 = arith.mulf %171, %171 : vector<16x32xf32>
    %cst_59 = arith.constant dense<0.000000e+00> : vector<16xf32>
    %173 = vector.multi_reduction <add>, %172, %cst_59 [1] : vector<16x32xf32> to vector<16xf32>
    %174 = vector.shape_cast %173 : vector<16xf32> to vector<16x1xf32>
    %cst_60 = arith.constant 3.200000e+01 : f32
    %175 = vector.broadcast %cst_60 : f32 to vector<16x1xf32>
    %176 = arith.divf %174, %175 : vector<16x1xf32>
    %cst_61 = arith.constant 9.99999997E-7 : f32
    %177 = vector.broadcast %cst_61 : f32 to vector<16x1xf32>
    %178 = arith.addf %176, %177 : vector<16x1xf32>
    %179 = math.rsqrt %178 : vector<16x1xf32>
    %180 = vector.broadcast %179 : vector<16x1xf32> to vector<16x32xf32>
    %181 = arith.mulf %171, %180 : vector<16x32xf32>
    %c0_62 = arith.constant 0 : index
    %c0_63 = arith.constant 0 : index
    %182 = vector.load %arg10[%c0_62, %c0_63] : memref<1x32xf32, #tpu.memory_space<vmem>>, vector<1x32xf32>
    %183 = vector.broadcast %182 : vector<1x32xf32> to vector<16x32xf32>
    %184 = arith.mulf %181, %183 : vector<16x32xf32>
    %c0_64 = arith.constant 0 : index
    %c0_65 = arith.constant 0 : index
    %185 = vector.load %arg9[%c0_64, %c0_65] : memref<1x32xf32, #tpu.memory_space<vmem>>, vector<1x32xf32>
    %186 = vector.broadcast %185 : vector<1x32xf32> to vector<16x32xf32>
    %187 = arith.addf %184, %186 : vector<16x32xf32>
    %c0_66 = arith.constant 0 : index
    %c0_67 = arith.constant 0 : index
    %188 = vector.load %arg3[%c0_66, %c0_67] : memref<32x128xf32, #tpu.memory_space<vmem>>, vector<32x128xf32>
    %cst_68 = arith.constant dense<0.000000e+00> : vector<16x128xf32>
    %189 = tpu.matmul %187, %188, %cst_68 {dimension_numbers = #tpu.dot_dimension_numbers<[1], [0], [0], [1], [0, 0, 1, 1], [], []>} : vector<16x32xf32>, vector<32x128xf32>, vector<16x128xf32> -> vector<16x128xf32>
    %c0_69 = arith.constant 0 : index
    %c0_70 = arith.constant 0 : index
    %190 = vector.load %arg2[%c0_69, %c0_70] : memref<1x128xf32, #tpu.memory_space<vmem>>, vector<1x128xf32>
    %191 = vector.broadcast %190 : vector<1x128xf32> to vector<16x128xf32>
    %192 = arith.addf %189, %191 : vector<16x128xf32>
    %cst_71 = arith.constant 5.000000e-01 : f32
    %193 = vector.broadcast %cst_71 : f32 to vector<16x128xf32>
    %194 = arith.mulf %193, %192 : vector<16x128xf32>
    %cst_72 = arith.constant 4.471500e-02 : f32
    %195 = vector.broadcast %cst_72 : f32 to vector<16x128xf32>
    %196 = arith.mulf %195, %192 : vector<16x128xf32>
    %197 = arith.mulf %196, %192 : vector<16x128xf32>
    %198 = arith.mulf %197, %192 : vector<16x128xf32>
    %199 = arith.addf %192, %198 : vector<16x128xf32>
    %cst_73 = arith.constant 0.797884583 : f32
    %200 = vector.broadcast %cst_73 : f32 to vector<16x128xf32>
    %201 = arith.mulf %200, %199 : vector<16x128xf32>
    %202 = math.tanh %201 : vector<16x128xf32>
    %cst_74 = arith.constant 1.000000e+00 : f32
    %203 = vector.broadcast %cst_74 : f32 to vector<16x128xf32>
    %204 = arith.addf %203, %202 : vector<16x128xf32>
    %205 = arith.mulf %194, %204 : vector<16x128xf32>
    %c0_75 = arith.constant 0 : index
    %c0_76 = arith.constant 0 : index
    %206 = vector.load %arg5[%c0_75, %c0_76] : memref<128x32xf32, #tpu.memory_space<vmem>>, vector<128x32xf32>
    %cst_77 = arith.constant dense<0.000000e+00> : vector<16x32xf32>
    %207 = tpu.matmul %205, %206, %cst_77 {dimension_numbers = #tpu.dot_dimension_numbers<[1], [0], [0], [1], [0, 0, 1, 1], [], []>} : vector<16x128xf32>, vector<128x32xf32>, vector<16x32xf32> -> vector<16x32xf32>
    %c0_78 = arith.constant 0 : index
    %c0_79 = arith.constant 0 : index
    %208 = vector.load %arg4[%c0_78, %c0_79] : memref<1x32xf32, #tpu.memory_space<vmem>>, vector<1x32xf32>
    %209 = vector.broadcast %208 : vector<1x32xf32> to vector<16x32xf32>
    %210 = arith.addf %207, %209 : vector<16x32xf32>
    %211 = arith.addf %165, %210 : vector<16x32xf32>
    %cst_80 = arith.constant dense<0.000000e+00> : vector<16xf32>
    %212 = vector.multi_reduction <add>, %211, %cst_80 [1] : vector<16x32xf32> to vector<16xf32>
    %213 = vector.shape_cast %212 : vector<16xf32> to vector<16x1xf32>
    %cst_81 = arith.constant 3.200000e+01 : f32
    %214 = vector.broadcast %cst_81 : f32 to vector<16x1xf32>
    %215 = arith.divf %213, %214 : vector<16x1xf32>
    %216 = vector.broadcast %215 : vector<16x1xf32> to vector<16x32xf32>
    %217 = arith.subf %211, %216 : vector<16x32xf32>
    %218 = arith.mulf %217, %217 : vector<16x32xf32>
    %cst_82 = arith.constant dense<0.000000e+00> : vector<16xf32>
    %219 = vector.multi_reduction <add>, %218, %cst_82 [1] : vector<16x32xf32> to vector<16xf32>
    %220 = vector.shape_cast %219 : vector<16xf32> to vector<16x1xf32>
    %cst_83 = arith.constant 3.200000e+01 : f32
    %221 = vector.broadcast %cst_83 : f32 to vector<16x1xf32>
    %222 = arith.divf %220, %221 : vector<16x1xf32>
    %cst_84 = arith.constant 9.99999997E-7 : f32
    %223 = vector.broadcast %cst_84 : f32 to vector<16x1xf32>
    %224 = arith.addf %222, %223 : vector<16x1xf32>
    %225 = math.rsqrt %224 : vector<16x1xf32>
    %226 = vector.broadcast %225 : vector<16x1xf32> to vector<16x32xf32>
    %227 = arith.mulf %217, %226 : vector<16x32xf32>
    %c0_85 = arith.constant 0 : index
    %c0_86 = arith.constant 0 : index
    %228 = vector.load %arg22[%c0_85, %c0_86] : memref<1x32xf32, #tpu.memory_space<vmem>>, vector<1x32xf32>
    %229 = vector.broadcast %228 : vector<1x32xf32> to vector<16x32xf32>
    %230 = arith.mulf %227, %229 : vector<16x32xf32>
    %c0_87 = arith.constant 0 : index
    %c0_88 = arith.constant 0 : index
    %231 = vector.load %arg21[%c0_87, %c0_88] : memref<1x32xf32, #tpu.memory_space<vmem>>, vector<1x32xf32>
    %232 = vector.broadcast %231 : vector<1x32xf32> to vector<16x32xf32>
    %233 = arith.addf %230, %232 : vector<16x32xf32>
    %c0_89 = arith.constant 0 : index
    %c0_90 = arith.constant 0 : index
    %234 = vector.load %arg28[%c0_89, %c0_90] : memref<32x64xf32, #tpu.memory_space<vmem>>, vector<32x64xf32>
    %cst_91 = arith.constant dense<0.000000e+00> : vector<16x64xf32>
    %235 = tpu.matmul %233, %234, %cst_91 {dimension_numbers = #tpu.dot_dimension_numbers<[1], [0], [0], [1], [0, 0, 1, 1], [], []>} : vector<16x32xf32>, vector<32x64xf32>, vector<16x64xf32> -> vector<16x64xf32>
    %c0_92 = arith.constant 0 : index
    %c0_93 = arith.constant 0 : index
    %236 = vector.load %arg29[%c0_92, %c0_93] : memref<32x32xf32, #tpu.memory_space<vmem>>, vector<32x32xf32>
    %cst_94 = arith.constant dense<0.000000e+00> : vector<16x32xf32>
    %237 = tpu.matmul %233, %236, %cst_94 {dimension_numbers = #tpu.dot_dimension_numbers<[1], [0], [0], [1], [0, 0, 1, 1], [], []>} : vector<16x32xf32>, vector<32x32xf32>, vector<16x32xf32> -> vector<16x32xf32>
    %c0_95 = arith.constant 0 : index
    %c0_96 = arith.constant 0 : index
    %238 = vector.load %arg20[%c0_95, %c0_96] : memref<1x4xf32, #tpu.memory_space<vmem>>, vector<1x4xf32>
    %c0_97 = arith.constant 0 : index
    %c0_98 = arith.constant 0 : index
    %239 = vector.load %arg25[%c0_97, %c0_98] : memref<64x16xf32, #tpu.memory_space<vmem>>, vector<64x16xf32>
    %c0_99 = arith.constant 0 : index
    %c0_100 = arith.constant 0 : index
    %240 = vector.load %arg27[%c0_99, %c0_100] : memref<32x32xf32, #tpu.memory_space<vmem>>, vector<32x32xf32>
    %c0_101 = arith.constant 0 : index
    %c0_102 = arith.constant 0 : index
    %241 = vector.load %arg26[%c0_101, %c0_102] : memref<1x32xf32, #tpu.memory_space<vmem>>, vector<1x32xf32>
    %242 = vector.extract_strided_slice %235 {offsets = [0, 0], sizes = [16, 8], strides = [1, 1]} : vector<16x64xf32> to vector<16x8xf32>
    %243 = vector.extract_strided_slice %235 {offsets = [0, 32], sizes = [16, 8], strides = [1, 1]} : vector<16x64xf32> to vector<16x8xf32>
    %244 = vector.extract_strided_slice %237 {offsets = [0, 0], sizes = [16, 8], strides = [1, 1]} : vector<16x32xf32> to vector<16x8xf32>
    %cst_103 = arith.constant dense<0.000000e+00> : vector<16x16xf32>
    %245 = tpu.matmul %242, %243, %cst_103 {dimension_numbers = #tpu.dot_dimension_numbers<[1], [1], [0], [0], [0, 0, 1, 0], [], []>} : vector<16x8xf32>, vector<16x8xf32>, vector<16x16xf32> -> vector<16x16xf32>
    %cst_104 = arith.constant dense<0xFF800000> : vector<16xf32>
    %246 = vector.multi_reduction <maximumf>, %245, %cst_104 [1] : vector<16x16xf32> to vector<16xf32>
    %247 = vector.shape_cast %246 : vector<16xf32> to vector<16x1xf32>
    %248 = vector.broadcast %247 : vector<16x1xf32> to vector<16x16xf32>
    %249 = arith.subf %245, %248 : vector<16x16xf32>
    %250 = math.exp %249 : vector<16x16xf32>
    %cst_105 = arith.constant dense<0.000000e+00> : vector<16xf32>
    %251 = vector.multi_reduction <add>, %250, %cst_105 [1] : vector<16x16xf32> to vector<16xf32>
    %252 = vector.shape_cast %251 : vector<16xf32> to vector<16x1xf32>
    %253 = tpu.reciprocal %252 {approx = true} : vector<16x1xf32> -> vector<16x1xf32>
    %254 = vector.broadcast %253 : vector<16x1xf32> to vector<16x16xf32>
    %255 = arith.mulf %250, %254 : vector<16x16xf32>
    %256 = vector.extract_strided_slice %239 {offsets = [0, 0], sizes = [16, 16], strides = [1, 1]} : vector<64x16xf32> to vector<16x16xf32>
    %257 = vector.extract_strided_slice %238 {offsets = [0, 0], sizes = [1, 1], strides = [1, 1]} : vector<1x4xf32> to vector<1x1xf32>
    %cst_106 = arith.constant 1.000000e+00 : f32
    %258 = vector.broadcast %cst_106 : f32 to vector<1x1xf32>
    %259 = arith.subf %258, %257 : vector<1x1xf32>
    %260 = vector.broadcast %259 : vector<1x1xf32> to vector<16x16xf32>
    %261 = arith.mulf %260, %255 : vector<16x16xf32>
    %262 = vector.broadcast %257 : vector<1x1xf32> to vector<16x16xf32>
    %263 = arith.mulf %262, %256 : vector<16x16xf32>
    %264 = arith.addf %261, %263 : vector<16x16xf32>
    %cst_107 = arith.constant dense<0.000000e+00> : vector<16xf32>
    %265 = vector.multi_reduction <add>, %264, %cst_107 [1] : vector<16x16xf32> to vector<16xf32>
    %266 = vector.shape_cast %265 : vector<16xf32> to vector<16x1xf32>
    %267 = tpu.reciprocal %266 {approx = true} : vector<16x1xf32> -> vector<16x1xf32>
    %268 = vector.broadcast %267 : vector<16x1xf32> to vector<16x16xf32>
    %269 = arith.mulf %264, %268 : vector<16x16xf32>
    %cst_108 = arith.constant dense<0.000000e+00> : vector<16x8xf32>
    %270 = tpu.matmul %269, %244, %cst_108 {dimension_numbers = #tpu.dot_dimension_numbers<[1], [0], [0], [1], [0, 0, 1, 1], [], []>} : vector<16x16xf32>, vector<16x8xf32>, vector<16x8xf32> -> vector<16x8xf32>
    %271 = vector.extract_strided_slice %240 {offsets = [0, 0], sizes = [8, 32], strides = [1, 1]} : vector<32x32xf32> to vector<8x32xf32>
    %cst_109 = arith.constant dense<0.000000e+00> : vector<16x32xf32>
    %272 = tpu.matmul %270, %271, %cst_109 {dimension_numbers = #tpu.dot_dimension_numbers<[1], [0], [0], [1], [0, 0, 1, 1], [], []>} : vector<16x8xf32>, vector<8x32xf32>, vector<16x32xf32> -> vector<16x32xf32>
    %273 = vector.broadcast %241 : vector<1x32xf32> to vector<16x32xf32>
    %274 = arith.addf %273, %272 : vector<16x32xf32>
    %275 = vector.extract_strided_slice %235 {offsets = [0, 8], sizes = [16, 8], strides = [1, 1]} : vector<16x64xf32> to vector<16x8xf32>
    %276 = vector.extract_strided_slice %235 {offsets = [0, 40], sizes = [16, 8], strides = [1, 1]} : vector<16x64xf32> to vector<16x8xf32>
    %277 = vector.extract_strided_slice %237 {offsets = [0, 8], sizes = [16, 8], strides = [1, 1]} : vector<16x32xf32> to vector<16x8xf32>
    %cst_110 = arith.constant dense<0.000000e+00> : vector<16x16xf32>
    %278 = tpu.matmul %275, %276, %cst_110 {dimension_numbers = #tpu.dot_dimension_numbers<[1], [1], [0], [0], [0, 0, 1, 0], [], []>} : vector<16x8xf32>, vector<16x8xf32>, vector<16x16xf32> -> vector<16x16xf32>
    %cst_111 = arith.constant dense<0xFF800000> : vector<16xf32>
    %279 = vector.multi_reduction <maximumf>, %278, %cst_111 [1] : vector<16x16xf32> to vector<16xf32>
    %280 = vector.shape_cast %279 : vector<16xf32> to vector<16x1xf32>
    %281 = vector.broadcast %280 : vector<16x1xf32> to vector<16x16xf32>
    %282 = arith.subf %278, %281 : vector<16x16xf32>
    %283 = math.exp %282 : vector<16x16xf32>
    %cst_112 = arith.constant dense<0.000000e+00> : vector<16xf32>
    %284 = vector.multi_reduction <add>, %283, %cst_112 [1] : vector<16x16xf32> to vector<16xf32>
    %285 = vector.shape_cast %284 : vector<16xf32> to vector<16x1xf32>
    %286 = tpu.reciprocal %285 {approx = true} : vector<16x1xf32> -> vector<16x1xf32>
    %287 = vector.broadcast %286 : vector<16x1xf32> to vector<16x16xf32>
    %288 = arith.mulf %283, %287 : vector<16x16xf32>
    %289 = vector.extract_strided_slice %239 {offsets = [16, 0], sizes = [16, 16], strides = [1, 1]} : vector<64x16xf32> to vector<16x16xf32>
    %290 = vector.extract_strided_slice %238 {offsets = [0, 1], sizes = [1, 1], strides = [1, 1]} : vector<1x4xf32> to vector<1x1xf32>
    %cst_113 = arith.constant 1.000000e+00 : f32
    %291 = vector.broadcast %cst_113 : f32 to vector<1x1xf32>
    %292 = arith.subf %291, %290 : vector<1x1xf32>
    %293 = vector.broadcast %292 : vector<1x1xf32> to vector<16x16xf32>
    %294 = arith.mulf %293, %288 : vector<16x16xf32>
    %295 = vector.broadcast %290 : vector<1x1xf32> to vector<16x16xf32>
    %296 = arith.mulf %295, %289 : vector<16x16xf32>
    %297 = arith.addf %294, %296 : vector<16x16xf32>
    %cst_114 = arith.constant dense<0.000000e+00> : vector<16xf32>
    %298 = vector.multi_reduction <add>, %297, %cst_114 [1] : vector<16x16xf32> to vector<16xf32>
    %299 = vector.shape_cast %298 : vector<16xf32> to vector<16x1xf32>
    %300 = tpu.reciprocal %299 {approx = true} : vector<16x1xf32> -> vector<16x1xf32>
    %301 = vector.broadcast %300 : vector<16x1xf32> to vector<16x16xf32>
    %302 = arith.mulf %297, %301 : vector<16x16xf32>
    %cst_115 = arith.constant dense<0.000000e+00> : vector<16x8xf32>
    %303 = tpu.matmul %302, %277, %cst_115 {dimension_numbers = #tpu.dot_dimension_numbers<[1], [0], [0], [1], [0, 0, 1, 1], [], []>} : vector<16x16xf32>, vector<16x8xf32>, vector<16x8xf32> -> vector<16x8xf32>
    %304 = vector.extract_strided_slice %240 {offsets = [8, 0], sizes = [8, 32], strides = [1, 1]} : vector<32x32xf32> to vector<8x32xf32>
    %cst_116 = arith.constant dense<0.000000e+00> : vector<16x32xf32>
    %305 = tpu.matmul %303, %304, %cst_116 {dimension_numbers = #tpu.dot_dimension_numbers<[1], [0], [0], [1], [0, 0, 1, 1], [], []>} : vector<16x8xf32>, vector<8x32xf32>, vector<16x32xf32> -> vector<16x32xf32>
    %306 = arith.addf %274, %305 : vector<16x32xf32>
    %307 = vector.extract_strided_slice %235 {offsets = [0, 16], sizes = [16, 8], strides = [1, 1]} : vector<16x64xf32> to vector<16x8xf32>
    %308 = vector.extract_strided_slice %235 {offsets = [0, 48], sizes = [16, 8], strides = [1, 1]} : vector<16x64xf32> to vector<16x8xf32>
    %309 = vector.extract_strided_slice %237 {offsets = [0, 16], sizes = [16, 8], strides = [1, 1]} : vector<16x32xf32> to vector<16x8xf32>
    %cst_117 = arith.constant dense<0.000000e+00> : vector<16x16xf32>
    %310 = tpu.matmul %307, %308, %cst_117 {dimension_numbers = #tpu.dot_dimension_numbers<[1], [1], [0], [0], [0, 0, 1, 0], [], []>} : vector<16x8xf32>, vector<16x8xf32>, vector<16x16xf32> -> vector<16x16xf32>
    %cst_118 = arith.constant dense<0xFF800000> : vector<16xf32>
    %311 = vector.multi_reduction <maximumf>, %310, %cst_118 [1] : vector<16x16xf32> to vector<16xf32>
    %312 = vector.shape_cast %311 : vector<16xf32> to vector<16x1xf32>
    %313 = vector.broadcast %312 : vector<16x1xf32> to vector<16x16xf32>
    %314 = arith.subf %310, %313 : vector<16x16xf32>
    %315 = math.exp %314 : vector<16x16xf32>
    %cst_119 = arith.constant dense<0.000000e+00> : vector<16xf32>
    %316 = vector.multi_reduction <add>, %315, %cst_119 [1] : vector<16x16xf32> to vector<16xf32>
    %317 = vector.shape_cast %316 : vector<16xf32> to vector<16x1xf32>
    %318 = tpu.reciprocal %317 {approx = true} : vector<16x1xf32> -> vector<16x1xf32>
    %319 = vector.broadcast %318 : vector<16x1xf32> to vector<16x16xf32>
    %320 = arith.mulf %315, %319 : vector<16x16xf32>
    %321 = vector.extract_strided_slice %239 {offsets = [32, 0], sizes = [16, 16], strides = [1, 1]} : vector<64x16xf32> to vector<16x16xf32>
    %322 = vector.extract_strided_slice %238 {offsets = [0, 2], sizes = [1, 1], strides = [1, 1]} : vector<1x4xf32> to vector<1x1xf32>
    %cst_120 = arith.constant 1.000000e+00 : f32
    %323 = vector.broadcast %cst_120 : f32 to vector<1x1xf32>
    %324 = arith.subf %323, %322 : vector<1x1xf32>
    %325 = vector.broadcast %324 : vector<1x1xf32> to vector<16x16xf32>
    %326 = arith.mulf %325, %320 : vector<16x16xf32>
    %327 = vector.broadcast %322 : vector<1x1xf32> to vector<16x16xf32>
    %328 = arith.mulf %327, %321 : vector<16x16xf32>
    %329 = arith.addf %326, %328 : vector<16x16xf32>
    %cst_121 = arith.constant dense<0.000000e+00> : vector<16xf32>
    %330 = vector.multi_reduction <add>, %329, %cst_121 [1] : vector<16x16xf32> to vector<16xf32>
    %331 = vector.shape_cast %330 : vector<16xf32> to vector<16x1xf32>
    %332 = tpu.reciprocal %331 {approx = true} : vector<16x1xf32> -> vector<16x1xf32>
    %333 = vector.broadcast %332 : vector<16x1xf32> to vector<16x16xf32>
    %334 = arith.mulf %329, %333 : vector<16x16xf32>
    %cst_122 = arith.constant dense<0.000000e+00> : vector<16x8xf32>
    %335 = tpu.matmul %334, %309, %cst_122 {dimension_numbers = #tpu.dot_dimension_numbers<[1], [0], [0], [1], [0, 0, 1, 1], [], []>} : vector<16x16xf32>, vector<16x8xf32>, vector<16x8xf32> -> vector<16x8xf32>
    %336 = vector.extract_strided_slice %240 {offsets = [16, 0], sizes = [8, 32], strides = [1, 1]} : vector<32x32xf32> to vector<8x32xf32>
    %cst_123 = arith.constant dense<0.000000e+00> : vector<16x32xf32>
    %337 = tpu.matmul %335, %336, %cst_123 {dimension_numbers = #tpu.dot_dimension_numbers<[1], [0], [0], [1], [0, 0, 1, 1], [], []>} : vector<16x8xf32>, vector<8x32xf32>, vector<16x32xf32> -> vector<16x32xf32>
    %338 = arith.addf %306, %337 : vector<16x32xf32>
    %339 = vector.extract_strided_slice %235 {offsets = [0, 24], sizes = [16, 8], strides = [1, 1]} : vector<16x64xf32> to vector<16x8xf32>
    %340 = vector.extract_strided_slice %235 {offsets = [0, 56], sizes = [16, 8], strides = [1, 1]} : vector<16x64xf32> to vector<16x8xf32>
    %341 = vector.extract_strided_slice %237 {offsets = [0, 24], sizes = [16, 8], strides = [1, 1]} : vector<16x32xf32> to vector<16x8xf32>
    %cst_124 = arith.constant dense<0.000000e+00> : vector<16x16xf32>
    %342 = tpu.matmul %339, %340, %cst_124 {dimension_numbers = #tpu.dot_dimension_numbers<[1], [1], [0], [0], [0, 0, 1, 0], [], []>} : vector<16x8xf32>, vector<16x8xf32>, vector<16x16xf32> -> vector<16x16xf32>
    %cst_125 = arith.constant dense<0xFF800000> : vector<16xf32>
    %343 = vector.multi_reduction <maximumf>, %342, %cst_125 [1] : vector<16x16xf32> to vector<16xf32>
    %344 = vector.shape_cast %343 : vector<16xf32> to vector<16x1xf32>
    %345 = vector.broadcast %344 : vector<16x1xf32> to vector<16x16xf32>
    %346 = arith.subf %342, %345 : vector<16x16xf32>
    %347 = math.exp %346 : vector<16x16xf32>
    %cst_126 = arith.constant dense<0.000000e+00> : vector<16xf32>
    %348 = vector.multi_reduction <add>, %347, %cst_126 [1] : vector<16x16xf32> to vector<16xf32>
    %349 = vector.shape_cast %348 : vector<16xf32> to vector<16x1xf32>
    %350 = tpu.reciprocal %349 {approx = true} : vector<16x1xf32> -> vector<16x1xf32>
    %351 = vector.broadcast %350 : vector<16x1xf32> to vector<16x16xf32>
    %352 = arith.mulf %347, %351 : vector<16x16xf32>
    %353 = vector.extract_strided_slice %239 {offsets = [48, 0], sizes = [16, 16], strides = [1, 1]} : vector<64x16xf32> to vector<16x16xf32>
    %354 = vector.extract_strided_slice %238 {offsets = [0, 3], sizes = [1, 1], strides = [1, 1]} : vector<1x4xf32> to vector<1x1xf32>
    %cst_127 = arith.constant 1.000000e+00 : f32
    %355 = vector.broadcast %cst_127 : f32 to vector<1x1xf32>
    %356 = arith.subf %355, %354 : vector<1x1xf32>
    %357 = vector.broadcast %356 : vector<1x1xf32> to vector<16x16xf32>
    %358 = arith.mulf %357, %352 : vector<16x16xf32>
    %359 = vector.broadcast %354 : vector<1x1xf32> to vector<16x16xf32>
    %360 = arith.mulf %359, %353 : vector<16x16xf32>
    %361 = arith.addf %358, %360 : vector<16x16xf32>
    %cst_128 = arith.constant dense<0.000000e+00> : vector<16xf32>
    %362 = vector.multi_reduction <add>, %361, %cst_128 [1] : vector<16x16xf32> to vector<16xf32>
    %363 = vector.shape_cast %362 : vector<16xf32> to vector<16x1xf32>
    %364 = tpu.reciprocal %363 {approx = true} : vector<16x1xf32> -> vector<16x1xf32>
    %365 = vector.broadcast %364 : vector<16x1xf32> to vector<16x16xf32>
    %366 = arith.mulf %361, %365 : vector<16x16xf32>
    %cst_129 = arith.constant dense<0.000000e+00> : vector<16x8xf32>
    %367 = tpu.matmul %366, %341, %cst_129 {dimension_numbers = #tpu.dot_dimension_numbers<[1], [0], [0], [1], [0, 0, 1, 1], [], []>} : vector<16x16xf32>, vector<16x8xf32>, vector<16x8xf32> -> vector<16x8xf32>
    %368 = vector.extract_strided_slice %240 {offsets = [24, 0], sizes = [8, 32], strides = [1, 1]} : vector<32x32xf32> to vector<8x32xf32>
    %cst_130 = arith.constant dense<0.000000e+00> : vector<16x32xf32>
    %369 = tpu.matmul %367, %368, %cst_130 {dimension_numbers = #tpu.dot_dimension_numbers<[1], [0], [0], [1], [0, 0, 1, 1], [], []>} : vector<16x8xf32>, vector<8x32xf32>, vector<16x32xf32> -> vector<16x32xf32>
    %370 = arith.addf %338, %369 : vector<16x32xf32>
    %371 = arith.addf %211, %370 : vector<16x32xf32>
    %cst_131 = arith.constant dense<0.000000e+00> : vector<16xf32>
    %372 = vector.multi_reduction <add>, %371, %cst_131 [1] : vector<16x32xf32> to vector<16xf32>
    %373 = vector.shape_cast %372 : vector<16xf32> to vector<16x1xf32>
    %cst_132 = arith.constant 3.200000e+01 : f32
    %374 = vector.broadcast %cst_132 : f32 to vector<16x1xf32>
    %375 = arith.divf %373, %374 : vector<16x1xf32>
    %376 = vector.broadcast %375 : vector<16x1xf32> to vector<16x32xf32>
    %377 = arith.subf %371, %376 : vector<16x32xf32>
    %378 = arith.mulf %377, %377 : vector<16x32xf32>
    %cst_133 = arith.constant dense<0.000000e+00> : vector<16xf32>
    %379 = vector.multi_reduction <add>, %378, %cst_133 [1] : vector<16x32xf32> to vector<16xf32>
    %380 = vector.shape_cast %379 : vector<16xf32> to vector<16x1xf32>
    %cst_134 = arith.constant 3.200000e+01 : f32
    %381 = vector.broadcast %cst_134 : f32 to vector<16x1xf32>
    %382 = arith.divf %380, %381 : vector<16x1xf32>
    %cst_135 = arith.constant 9.99999997E-7 : f32
    %383 = vector.broadcast %cst_135 : f32 to vector<16x1xf32>
    %384 = arith.addf %382, %383 : vector<16x1xf32>
    %385 = math.rsqrt %384 : vector<16x1xf32>
    %386 = vector.broadcast %385 : vector<16x1xf32> to vector<16x32xf32>
    %387 = arith.mulf %377, %386 : vector<16x32xf32>
    %c0_136 = arith.constant 0 : index
    %c0_137 = arith.constant 0 : index
    %388 = vector.load %arg24[%c0_136, %c0_137] : memref<1x32xf32, #tpu.memory_space<vmem>>, vector<1x32xf32>
    %389 = vector.broadcast %388 : vector<1x32xf32> to vector<16x32xf32>
    %390 = arith.mulf %387, %389 : vector<16x32xf32>
    %c0_138 = arith.constant 0 : index
    %c0_139 = arith.constant 0 : index
    %391 = vector.load %arg23[%c0_138, %c0_139] : memref<1x32xf32, #tpu.memory_space<vmem>>, vector<1x32xf32>
    %392 = vector.broadcast %391 : vector<1x32xf32> to vector<16x32xf32>
    %393 = arith.addf %390, %392 : vector<16x32xf32>
    %c0_140 = arith.constant 0 : index
    %c0_141 = arith.constant 0 : index
    %394 = vector.load %arg17[%c0_140, %c0_141] : memref<32x128xf32, #tpu.memory_space<vmem>>, vector<32x128xf32>
    %cst_142 = arith.constant dense<0.000000e+00> : vector<16x128xf32>
    %395 = tpu.matmul %393, %394, %cst_142 {dimension_numbers = #tpu.dot_dimension_numbers<[1], [0], [0], [1], [0, 0, 1, 1], [], []>} : vector<16x32xf32>, vector<32x128xf32>, vector<16x128xf32> -> vector<16x128xf32>
    %c0_143 = arith.constant 0 : index
    %c0_144 = arith.constant 0 : index
    %396 = vector.load %arg16[%c0_143, %c0_144] : memref<1x128xf32, #tpu.memory_space<vmem>>, vector<1x128xf32>
    %397 = vector.broadcast %396 : vector<1x128xf32> to vector<16x128xf32>
    %398 = arith.addf %395, %397 : vector<16x128xf32>
    %cst_145 = arith.constant 5.000000e-01 : f32
    %399 = vector.broadcast %cst_145 : f32 to vector<16x128xf32>
    %400 = arith.mulf %399, %398 : vector<16x128xf32>
    %cst_146 = arith.constant 4.471500e-02 : f32
    %401 = vector.broadcast %cst_146 : f32 to vector<16x128xf32>
    %402 = arith.mulf %401, %398 : vector<16x128xf32>
    %403 = arith.mulf %402, %398 : vector<16x128xf32>
    %404 = arith.mulf %403, %398 : vector<16x128xf32>
    %405 = arith.addf %398, %404 : vector<16x128xf32>
    %cst_147 = arith.constant 0.797884583 : f32
    %406 = vector.broadcast %cst_147 : f32 to vector<16x128xf32>
    %407 = arith.mulf %406, %405 : vector<16x128xf32>
    %408 = math.tanh %407 : vector<16x128xf32>
    %cst_148 = arith.constant 1.000000e+00 : f32
    %409 = vector.broadcast %cst_148 : f32 to vector<16x128xf32>
    %410 = arith.addf %409, %408 : vector<16x128xf32>
    %411 = arith.mulf %400, %410 : vector<16x128xf32>
    %c0_149 = arith.constant 0 : index
    %c0_150 = arith.constant 0 : index
    %412 = vector.load %arg19[%c0_149, %c0_150] : memref<128x32xf32, #tpu.memory_space<vmem>>, vector<128x32xf32>
    %cst_151 = arith.constant dense<0.000000e+00> : vector<16x32xf32>
    %413 = tpu.matmul %411, %412, %cst_151 {dimension_numbers = #tpu.dot_dimension_numbers<[1], [0], [0], [1], [0, 0, 1, 1], [], []>} : vector<16x128xf32>, vector<128x32xf32>, vector<16x32xf32> -> vector<16x32xf32>
    %c0_152 = arith.constant 0 : index
    %c0_153 = arith.constant 0 : index
    %414 = vector.load %arg18[%c0_152, %c0_153] : memref<1x32xf32, #tpu.memory_space<vmem>>, vector<1x32xf32>
    %415 = vector.broadcast %414 : vector<1x32xf32> to vector<16x32xf32>
    %416 = arith.addf %413, %415 : vector<16x32xf32>
    %417 = arith.addf %371, %416 : vector<16x32xf32>
    %c0_154 = arith.constant 0 : index
    %c0_155 = arith.constant 0 : index
    %418 = vector.load %arg54[%c0_154, %c0_155] : memref<1x32xf32, #tpu.memory_space<vmem>>, vector<1x32xf32>
    %419 = tpu.concatenate %417, %418 in 0 : vector<16x32xf32>, vector<1x32xf32> -> vector<17x32xf32>
    %cst_156 = arith.constant dense<0.000000e+00> : vector<17xf32>
    %420 = vector.multi_reduction <add>, %419, %cst_156 [1] : vector<17x32xf32> to vector<17xf32>
    %421 = vector.shape_cast %420 : vector<17xf32> to vector<17x1xf32>
    %cst_157 = arith.constant 3.200000e+01 : f32
    %422 = vector.broadcast %cst_157 : f32 to vector<17x1xf32>
    %423 = arith.divf %421, %422 : vector<17x1xf32>
    %424 = vector.broadcast %423 : vector<17x1xf32> to vector<17x32xf32>
    %425 = arith.subf %419, %424 : vector<17x32xf32>
    %426 = arith.mulf %425, %425 : vector<17x32xf32>
    %cst_158 = arith.constant dense<0.000000e+00> : vector<17xf32>
    %427 = vector.multi_reduction <add>, %426, %cst_158 [1] : vector<17x32xf32> to vector<17xf32>
    %428 = vector.shape_cast %427 : vector<17xf32> to vector<17x1xf32>
    %cst_159 = arith.constant 3.200000e+01 : f32
    %429 = vector.broadcast %cst_159 : f32 to vector<17x1xf32>
    %430 = arith.divf %428, %429 : vector<17x1xf32>
    %cst_160 = arith.constant 9.99999997E-7 : f32
    %431 = vector.broadcast %cst_160 : f32 to vector<17x1xf32>
    %432 = arith.addf %430, %431 : vector<17x1xf32>
    %433 = math.rsqrt %432 : vector<17x1xf32>
    %434 = vector.broadcast %433 : vector<17x1xf32> to vector<17x32xf32>
    %435 = arith.mulf %425, %434 : vector<17x32xf32>
    %c0_161 = arith.constant 0 : index
    %c0_162 = arith.constant 0 : index
    %436 = vector.load %arg35[%c0_161, %c0_162] : memref<1x32xf32, #tpu.memory_space<vmem>>, vector<1x32xf32>
    %437 = vector.broadcast %436 : vector<1x32xf32> to vector<17x32xf32>
    %438 = arith.mulf %435, %437 : vector<17x32xf32>
    %c0_163 = arith.constant 0 : index
    %c0_164 = arith.constant 0 : index
    %439 = vector.load %arg34[%c0_163, %c0_164] : memref<1x32xf32, #tpu.memory_space<vmem>>, vector<1x32xf32>
    %440 = vector.broadcast %439 : vector<1x32xf32> to vector<17x32xf32>
    %441 = arith.addf %438, %440 : vector<17x32xf32>
    %c0_165 = arith.constant 0 : index
    %c0_166 = arith.constant 0 : index
    %442 = vector.load %arg40[%c0_165, %c0_166] : memref<32x96xf32, #tpu.memory_space<vmem>>, vector<32x96xf32>
    %cst_167 = arith.constant dense<0.000000e+00> : vector<17x96xf32>
    %443 = tpu.matmul %441, %442, %cst_167 {dimension_numbers = #tpu.dot_dimension_numbers<[1], [0], [0], [1], [0, 0, 1, 1], [], []>} : vector<17x32xf32>, vector<32x96xf32>, vector<17x96xf32> -> vector<17x96xf32>
    %c0_168 = arith.constant 0 : index
    %c0_169 = arith.constant 0 : index
    %444 = vector.load %arg39[%c0_168, %c0_169] : memref<32x32xf32, #tpu.memory_space<vmem>>, vector<32x32xf32>
    %c0_170 = arith.constant 0 : index
    %c0_171 = arith.constant 0 : index
    %445 = vector.load %arg38[%c0_170, %c0_171] : memref<1x32xf32, #tpu.memory_space<vmem>>, vector<1x32xf32>
    %446 = vector.extract_strided_slice %443 {offsets = [0, 0], sizes = [17, 8], strides = [1, 1]} : vector<17x96xf32> to vector<17x8xf32>
    %447 = vector.extract_strided_slice %443 {offsets = [0, 32], sizes = [17, 8], strides = [1, 1]} : vector<17x96xf32> to vector<17x8xf32>
    %448 = vector.extract_strided_slice %443 {offsets = [0, 64], sizes = [17, 8], strides = [1, 1]} : vector<17x96xf32> to vector<17x8xf32>
    %cst_172 = arith.constant dense<0.000000e+00> : vector<17x17xf32>
    %449 = tpu.matmul %446, %447, %cst_172 {dimension_numbers = #tpu.dot_dimension_numbers<[1], [1], [0], [0], [0, 0, 1, 0], [], []>} : vector<17x8xf32>, vector<17x8xf32>, vector<17x17xf32> -> vector<17x17xf32>
    %cst_173 = arith.constant dense<0xFF800000> : vector<17xf32>
    %450 = vector.multi_reduction <maximumf>, %449, %cst_173 [1] : vector<17x17xf32> to vector<17xf32>
    %451 = vector.shape_cast %450 : vector<17xf32> to vector<17x1xf32>
    %452 = vector.broadcast %451 : vector<17x1xf32> to vector<17x17xf32>
    %453 = arith.subf %449, %452 : vector<17x17xf32>
    %454 = math.exp %453 : vector<17x17xf32>
    %cst_174 = arith.constant dense<0.000000e+00> : vector<17xf32>
    %455 = vector.multi_reduction <add>, %454, %cst_174 [1] : vector<17x17xf32> to vector<17xf32>
    %456 = vector.shape_cast %455 : vector<17xf32> to vector<17x1xf32>
    %457 = tpu.reciprocal %456 {approx = true} : vector<17x1xf32> -> vector<17x1xf32>
    %458 = vector.broadcast %457 : vector<17x1xf32> to vector<17x17xf32>
    %459 = arith.mulf %454, %458 : vector<17x17xf32>
    %cst_175 = arith.constant dense<0.000000e+00> : vector<17x8xf32>
    %460 = tpu.matmul %459, %448, %cst_175 {dimension_numbers = #tpu.dot_dimension_numbers<[1], [0], [0], [1], [0, 0, 1, 1], [], []>} : vector<17x17xf32>, vector<17x8xf32>, vector<17x8xf32> -> vector<17x8xf32>
    %461 = vector.extract_strided_slice %444 {offsets = [0, 0], sizes = [8, 32], strides = [1, 1]} : vector<32x32xf32> to vector<8x32xf32>
    %cst_176 = arith.constant dense<0.000000e+00> : vector<17x32xf32>
    %462 = tpu.matmul %460, %461, %cst_176 {dimension_numbers = #tpu.dot_dimension_numbers<[1], [0], [0], [1], [0, 0, 1, 1], [], []>} : vector<17x8xf32>, vector<8x32xf32>, vector<17x32xf32> -> vector<17x32xf32>
    %463 = vector.broadcast %445 : vector<1x32xf32> to vector<17x32xf32>
    %464 = arith.addf %463, %462 : vector<17x32xf32>
    %465 = vector.extract_strided_slice %443 {offsets = [0, 8], sizes = [17, 8], strides = [1, 1]} : vector<17x96xf32> to vector<17x8xf32>
    %466 = vector.extract_strided_slice %443 {offsets = [0, 40], sizes = [17, 8], strides = [1, 1]} : vector<17x96xf32> to vector<17x8xf32>
    %467 = vector.extract_strided_slice %443 {offsets = [0, 72], sizes = [17, 8], strides = [1, 1]} : vector<17x96xf32> to vector<17x8xf32>
    %cst_177 = arith.constant dense<0.000000e+00> : vector<17x17xf32>
    %468 = tpu.matmul %465, %466, %cst_177 {dimension_numbers = #tpu.dot_dimension_numbers<[1], [1], [0], [0], [0, 0, 1, 0], [], []>} : vector<17x8xf32>, vector<17x8xf32>, vector<17x17xf32> -> vector<17x17xf32>
    %cst_178 = arith.constant dense<0xFF800000> : vector<17xf32>
    %469 = vector.multi_reduction <maximumf>, %468, %cst_178 [1] : vector<17x17xf32> to vector<17xf32>
    %470 = vector.shape_cast %469 : vector<17xf32> to vector<17x1xf32>
    %471 = vector.broadcast %470 : vector<17x1xf32> to vector<17x17xf32>
    %472 = arith.subf %468, %471 : vector<17x17xf32>
    %473 = math.exp %472 : vector<17x17xf32>
    %cst_179 = arith.constant dense<0.000000e+00> : vector<17xf32>
    %474 = vector.multi_reduction <add>, %473, %cst_179 [1] : vector<17x17xf32> to vector<17xf32>
    %475 = vector.shape_cast %474 : vector<17xf32> to vector<17x1xf32>
    %476 = tpu.reciprocal %475 {approx = true} : vector<17x1xf32> -> vector<17x1xf32>
    %477 = vector.broadcast %476 : vector<17x1xf32> to vector<17x17xf32>
    %478 = arith.mulf %473, %477 : vector<17x17xf32>
    %cst_180 = arith.constant dense<0.000000e+00> : vector<17x8xf32>
    %479 = tpu.matmul %478, %467, %cst_180 {dimension_numbers = #tpu.dot_dimension_numbers<[1], [0], [0], [1], [0, 0, 1, 1], [], []>} : vector<17x17xf32>, vector<17x8xf32>, vector<17x8xf32> -> vector<17x8xf32>
    %480 = vector.extract_strided_slice %444 {offsets = [8, 0], sizes = [8, 32], strides = [1, 1]} : vector<32x32xf32> to vector<8x32xf32>
    %cst_181 = arith.constant dense<0.000000e+00> : vector<17x32xf32>
    %481 = tpu.matmul %479, %480, %cst_181 {dimension_numbers = #tpu.dot_dimension_numbers<[1], [0], [0], [1], [0, 0, 1, 1], [], []>} : vector<17x8xf32>, vector<8x32xf32>, vector<17x32xf32> -> vector<17x32xf32>
    %482 = arith.addf %464, %481 : vector<17x32xf32>
    %483 = vector.extract_strided_slice %443 {offsets = [0, 16], sizes = [17, 8], strides = [1, 1]} : vector<17x96xf32> to vector<17x8xf32>
    %484 = vector.extract_strided_slice %443 {offsets = [0, 48], sizes = [17, 8], strides = [1, 1]} : vector<17x96xf32> to vector<17x8xf32>
    %485 = vector.extract_strided_slice %443 {offsets = [0, 80], sizes = [17, 8], strides = [1, 1]} : vector<17x96xf32> to vector<17x8xf32>
    %cst_182 = arith.constant dense<0.000000e+00> : vector<17x17xf32>
    %486 = tpu.matmul %483, %484, %cst_182 {dimension_numbers = #tpu.dot_dimension_numbers<[1], [1], [0], [0], [0, 0, 1, 0], [], []>} : vector<17x8xf32>, vector<17x8xf32>, vector<17x17xf32> -> vector<17x17xf32>
    %cst_183 = arith.constant dense<0xFF800000> : vector<17xf32>
    %487 = vector.multi_reduction <maximumf>, %486, %cst_183 [1] : vector<17x17xf32> to vector<17xf32>
    %488 = vector.shape_cast %487 : vector<17xf32> to vector<17x1xf32>
    %489 = vector.broadcast %488 : vector<17x1xf32> to vector<17x17xf32>
    %490 = arith.subf %486, %489 : vector<17x17xf32>
    %491 = math.exp %490 : vector<17x17xf32>
    %cst_184 = arith.constant dense<0.000000e+00> : vector<17xf32>
    %492 = vector.multi_reduction <add>, %491, %cst_184 [1] : vector<17x17xf32> to vector<17xf32>
    %493 = vector.shape_cast %492 : vector<17xf32> to vector<17x1xf32>
    %494 = tpu.reciprocal %493 {approx = true} : vector<17x1xf32> -> vector<17x1xf32>
    %495 = vector.broadcast %494 : vector<17x1xf32> to vector<17x17xf32>
    %496 = arith.mulf %491, %495 : vector<17x17xf32>
    %cst_185 = arith.constant dense<0.000000e+00> : vector<17x8xf32>
    %497 = tpu.matmul %496, %485, %cst_185 {dimension_numbers = #tpu.dot_dimension_numbers<[1], [0], [0], [1], [0, 0, 1, 1], [], []>} : vector<17x17xf32>, vector<17x8xf32>, vector<17x8xf32> -> vector<17x8xf32>
    %498 = vector.extract_strided_slice %444 {offsets = [16, 0], sizes = [8, 32], strides = [1, 1]} : vector<32x32xf32> to vector<8x32xf32>
    %cst_186 = arith.constant dense<0.000000e+00> : vector<17x32xf32>
    %499 = tpu.matmul %497, %498, %cst_186 {dimension_numbers = #tpu.dot_dimension_numbers<[1], [0], [0], [1], [0, 0, 1, 1], [], []>} : vector<17x8xf32>, vector<8x32xf32>, vector<17x32xf32> -> vector<17x32xf32>
    %500 = arith.addf %482, %499 : vector<17x32xf32>
    %501 = vector.extract_strided_slice %443 {offsets = [0, 24], sizes = [17, 8], strides = [1, 1]} : vector<17x96xf32> to vector<17x8xf32>
    %502 = vector.extract_strided_slice %443 {offsets = [0, 56], sizes = [17, 8], strides = [1, 1]} : vector<17x96xf32> to vector<17x8xf32>
    %503 = vector.extract_strided_slice %443 {offsets = [0, 88], sizes = [17, 8], strides = [1, 1]} : vector<17x96xf32> to vector<17x8xf32>
    %cst_187 = arith.constant dense<0.000000e+00> : vector<17x17xf32>
    %504 = tpu.matmul %501, %502, %cst_187 {dimension_numbers = #tpu.dot_dimension_numbers<[1], [1], [0], [0], [0, 0, 1, 0], [], []>} : vector<17x8xf32>, vector<17x8xf32>, vector<17x17xf32> -> vector<17x17xf32>
    %cst_188 = arith.constant dense<0xFF800000> : vector<17xf32>
    %505 = vector.multi_reduction <maximumf>, %504, %cst_188 [1] : vector<17x17xf32> to vector<17xf32>
    %506 = vector.shape_cast %505 : vector<17xf32> to vector<17x1xf32>
    %507 = vector.broadcast %506 : vector<17x1xf32> to vector<17x17xf32>
    %508 = arith.subf %504, %507 : vector<17x17xf32>
    %509 = math.exp %508 : vector<17x17xf32>
    %cst_189 = arith.constant dense<0.000000e+00> : vector<17xf32>
    %510 = vector.multi_reduction <add>, %509, %cst_189 [1] : vector<17x17xf32> to vector<17xf32>
    %511 = vector.shape_cast %510 : vector<17xf32> to vector<17x1xf32>
    %512 = tpu.reciprocal %511 {approx = true} : vector<17x1xf32> -> vector<17x1xf32>
    %513 = vector.broadcast %512 : vector<17x1xf32> to vector<17x17xf32>
    %514 = arith.mulf %509, %513 : vector<17x17xf32>
    %cst_190 = arith.constant dense<0.000000e+00> : vector<17x8xf32>
    %515 = tpu.matmul %514, %503, %cst_190 {dimension_numbers = #tpu.dot_dimension_numbers<[1], [0], [0], [1], [0, 0, 1, 1], [], []>} : vector<17x17xf32>, vector<17x8xf32>, vector<17x8xf32> -> vector<17x8xf32>
    %516 = vector.extract_strided_slice %444 {offsets = [24, 0], sizes = [8, 32], strides = [1, 1]} : vector<32x32xf32> to vector<8x32xf32>
    %cst_191 = arith.constant dense<0.000000e+00> : vector<17x32xf32>
    %517 = tpu.matmul %515, %516, %cst_191 {dimension_numbers = #tpu.dot_dimension_numbers<[1], [0], [0], [1], [0, 0, 1, 1], [], []>} : vector<17x8xf32>, vector<8x32xf32>, vector<17x32xf32> -> vector<17x32xf32>
    %518 = arith.addf %500, %517 : vector<17x32xf32>
    %519 = arith.addf %419, %518 : vector<17x32xf32>
    %cst_192 = arith.constant dense<0.000000e+00> : vector<17xf32>
    %520 = vector.multi_reduction <add>, %519, %cst_192 [1] : vector<17x32xf32> to vector<17xf32>
    %521 = vector.shape_cast %520 : vector<17xf32> to vector<17x1xf32>
    %cst_193 = arith.constant 3.200000e+01 : f32
    %522 = vector.broadcast %cst_193 : f32 to vector<17x1xf32>
    %523 = arith.divf %521, %522 : vector<17x1xf32>
    %524 = vector.broadcast %523 : vector<17x1xf32> to vector<17x32xf32>
    %525 = arith.subf %519, %524 : vector<17x32xf32>
    %526 = arith.mulf %525, %525 : vector<17x32xf32>
    %cst_194 = arith.constant dense<0.000000e+00> : vector<17xf32>
    %527 = vector.multi_reduction <add>, %526, %cst_194 [1] : vector<17x32xf32> to vector<17xf32>
    %528 = vector.shape_cast %527 : vector<17xf32> to vector<17x1xf32>
    %cst_195 = arith.constant 3.200000e+01 : f32
    %529 = vector.broadcast %cst_195 : f32 to vector<17x1xf32>
    %530 = arith.divf %528, %529 : vector<17x1xf32>
    %cst_196 = arith.constant 9.99999997E-7 : f32
    %531 = vector.broadcast %cst_196 : f32 to vector<17x1xf32>
    %532 = arith.addf %530, %531 : vector<17x1xf32>
    %533 = math.rsqrt %532 : vector<17x1xf32>
    %534 = vector.broadcast %533 : vector<17x1xf32> to vector<17x32xf32>
    %535 = arith.mulf %525, %534 : vector<17x32xf32>
    %c0_197 = arith.constant 0 : index
    %c0_198 = arith.constant 0 : index
    %536 = vector.load %arg37[%c0_197, %c0_198] : memref<1x32xf32, #tpu.memory_space<vmem>>, vector<1x32xf32>
    %537 = vector.broadcast %536 : vector<1x32xf32> to vector<17x32xf32>
    %538 = arith.mulf %535, %537 : vector<17x32xf32>
    %c0_199 = arith.constant 0 : index
    %c0_200 = arith.constant 0 : index
    %539 = vector.load %arg36[%c0_199, %c0_200] : memref<1x32xf32, #tpu.memory_space<vmem>>, vector<1x32xf32>
    %540 = vector.broadcast %539 : vector<1x32xf32> to vector<17x32xf32>
    %541 = arith.addf %538, %540 : vector<17x32xf32>
    %c0_201 = arith.constant 0 : index
    %c0_202 = arith.constant 0 : index
    %542 = vector.load %arg31[%c0_201, %c0_202] : memref<32x128xf32, #tpu.memory_space<vmem>>, vector<32x128xf32>
    %cst_203 = arith.constant dense<0.000000e+00> : vector<17x128xf32>
    %543 = tpu.matmul %541, %542, %cst_203 {dimension_numbers = #tpu.dot_dimension_numbers<[1], [0], [0], [1], [0, 0, 1, 1], [], []>} : vector<17x32xf32>, vector<32x128xf32>, vector<17x128xf32> -> vector<17x128xf32>
    %c0_204 = arith.constant 0 : index
    %c0_205 = arith.constant 0 : index
    %544 = vector.load %arg30[%c0_204, %c0_205] : memref<1x128xf32, #tpu.memory_space<vmem>>, vector<1x128xf32>
    %545 = vector.broadcast %544 : vector<1x128xf32> to vector<17x128xf32>
    %546 = arith.addf %543, %545 : vector<17x128xf32>
    %cst_206 = arith.constant 5.000000e-01 : f32
    %547 = vector.broadcast %cst_206 : f32 to vector<17x128xf32>
    %548 = arith.mulf %547, %546 : vector<17x128xf32>
    %cst_207 = arith.constant 4.471500e-02 : f32
    %549 = vector.broadcast %cst_207 : f32 to vector<17x128xf32>
    %550 = arith.mulf %549, %546 : vector<17x128xf32>
    %551 = arith.mulf %550, %546 : vector<17x128xf32>
    %552 = arith.mulf %551, %546 : vector<17x128xf32>
    %553 = arith.addf %546, %552 : vector<17x128xf32>
    %cst_208 = arith.constant 0.797884583 : f32
    %554 = vector.broadcast %cst_208 : f32 to vector<17x128xf32>
    %555 = arith.mulf %554, %553 : vector<17x128xf32>
    %556 = math.tanh %555 : vector<17x128xf32>
    %cst_209 = arith.constant 1.000000e+00 : f32
    %557 = vector.broadcast %cst_209 : f32 to vector<17x128xf32>
    %558 = arith.addf %557, %556 : vector<17x128xf32>
    %559 = arith.mulf %548, %558 : vector<17x128xf32>
    %c0_210 = arith.constant 0 : index
    %c0_211 = arith.constant 0 : index
    %560 = vector.load %arg33[%c0_210, %c0_211] : memref<128x32xf32, #tpu.memory_space<vmem>>, vector<128x32xf32>
    %cst_212 = arith.constant dense<0.000000e+00> : vector<17x32xf32>
    %561 = tpu.matmul %559, %560, %cst_212 {dimension_numbers = #tpu.dot_dimension_numbers<[1], [0], [0], [1], [0, 0, 1, 1], [], []>} : vector<17x128xf32>, vector<128x32xf32>, vector<17x32xf32> -> vector<17x32xf32>
    %c0_213 = arith.constant 0 : index
    %c0_214 = arith.constant 0 : index
    %562 = vector.load %arg32[%c0_213, %c0_214] : memref<1x32xf32, #tpu.memory_space<vmem>>, vector<1x32xf32>
    %563 = vector.broadcast %562 : vector<1x32xf32> to vector<17x32xf32>
    %564 = arith.addf %561, %563 : vector<17x32xf32>
    %565 = arith.addf %519, %564 : vector<17x32xf32>
    %cst_215 = arith.constant dense<0.000000e+00> : vector<17xf32>
    %566 = vector.multi_reduction <add>, %565, %cst_215 [1] : vector<17x32xf32> to vector<17xf32>
    %567 = vector.shape_cast %566 : vector<17xf32> to vector<17x1xf32>
    %cst_216 = arith.constant 3.200000e+01 : f32
    %568 = vector.broadcast %cst_216 : f32 to vector<17x1xf32>
    %569 = arith.divf %567, %568 : vector<17x1xf32>
    %570 = vector.broadcast %569 : vector<17x1xf32> to vector<17x32xf32>
    %571 = arith.subf %565, %570 : vector<17x32xf32>
    %572 = arith.mulf %571, %571 : vector<17x32xf32>
    %cst_217 = arith.constant dense<0.000000e+00> : vector<17xf32>
    %573 = vector.multi_reduction <add>, %572, %cst_217 [1] : vector<17x32xf32> to vector<17xf32>
    %574 = vector.shape_cast %573 : vector<17xf32> to vector<17x1xf32>
    %cst_218 = arith.constant 3.200000e+01 : f32
    %575 = vector.broadcast %cst_218 : f32 to vector<17x1xf32>
    %576 = arith.divf %574, %575 : vector<17x1xf32>
    %cst_219 = arith.constant 9.99999997E-7 : f32
    %577 = vector.broadcast %cst_219 : f32 to vector<17x1xf32>
    %578 = arith.addf %576, %577 : vector<17x1xf32>
    %579 = math.rsqrt %578 : vector<17x1xf32>
    %580 = vector.broadcast %579 : vector<17x1xf32> to vector<17x32xf32>
    %581 = arith.mulf %571, %580 : vector<17x32xf32>
    %c0_220 = arith.constant 0 : index
    %c0_221 = arith.constant 0 : index
    %582 = vector.load %arg46[%c0_220, %c0_221] : memref<1x32xf32, #tpu.memory_space<vmem>>, vector<1x32xf32>
    %583 = vector.broadcast %582 : vector<1x32xf32> to vector<17x32xf32>
    %584 = arith.mulf %581, %583 : vector<17x32xf32>
    %c0_222 = arith.constant 0 : index
    %c0_223 = arith.constant 0 : index
    %585 = vector.load %arg45[%c0_222, %c0_223] : memref<1x32xf32, #tpu.memory_space<vmem>>, vector<1x32xf32>
    %586 = vector.broadcast %585 : vector<1x32xf32> to vector<17x32xf32>
    %587 = arith.addf %584, %586 : vector<17x32xf32>
    %c0_224 = arith.constant 0 : index
    %c0_225 = arith.constant 0 : index
    %588 = vector.load %arg51[%c0_224, %c0_225] : memref<32x96xf32, #tpu.memory_space<vmem>>, vector<32x96xf32>
    %cst_226 = arith.constant dense<0.000000e+00> : vector<17x96xf32>
    %589 = tpu.matmul %587, %588, %cst_226 {dimension_numbers = #tpu.dot_dimension_numbers<[1], [0], [0], [1], [0, 0, 1, 1], [], []>} : vector<17x32xf32>, vector<32x96xf32>, vector<17x96xf32> -> vector<17x96xf32>
    %c0_227 = arith.constant 0 : index
    %c0_228 = arith.constant 0 : index
    %590 = vector.load %arg50[%c0_227, %c0_228] : memref<32x32xf32, #tpu.memory_space<vmem>>, vector<32x32xf32>
    %c0_229 = arith.constant 0 : index
    %c0_230 = arith.constant 0 : index
    %591 = vector.load %arg49[%c0_229, %c0_230] : memref<1x32xf32, #tpu.memory_space<vmem>>, vector<1x32xf32>
    %592 = vector.extract_strided_slice %589 {offsets = [0, 0], sizes = [17, 8], strides = [1, 1]} : vector<17x96xf32> to vector<17x8xf32>
    %593 = vector.extract_strided_slice %589 {offsets = [0, 32], sizes = [17, 8], strides = [1, 1]} : vector<17x96xf32> to vector<17x8xf32>
    %594 = vector.extract_strided_slice %589 {offsets = [0, 64], sizes = [17, 8], strides = [1, 1]} : vector<17x96xf32> to vector<17x8xf32>
    %cst_231 = arith.constant dense<0.000000e+00> : vector<17x17xf32>
    %595 = tpu.matmul %592, %593, %cst_231 {dimension_numbers = #tpu.dot_dimension_numbers<[1], [1], [0], [0], [0, 0, 1, 0], [], []>} : vector<17x8xf32>, vector<17x8xf32>, vector<17x17xf32> -> vector<17x17xf32>
    %cst_232 = arith.constant dense<0xFF800000> : vector<17xf32>
    %596 = vector.multi_reduction <maximumf>, %595, %cst_232 [1] : vector<17x17xf32> to vector<17xf32>
    %597 = vector.shape_cast %596 : vector<17xf32> to vector<17x1xf32>
    %598 = vector.broadcast %597 : vector<17x1xf32> to vector<17x17xf32>
    %599 = arith.subf %595, %598 : vector<17x17xf32>
    %600 = math.exp %599 : vector<17x17xf32>
    %cst_233 = arith.constant dense<0.000000e+00> : vector<17xf32>
    %601 = vector.multi_reduction <add>, %600, %cst_233 [1] : vector<17x17xf32> to vector<17xf32>
    %602 = vector.shape_cast %601 : vector<17xf32> to vector<17x1xf32>
    %603 = tpu.reciprocal %602 {approx = true} : vector<17x1xf32> -> vector<17x1xf32>
    %604 = vector.broadcast %603 : vector<17x1xf32> to vector<17x17xf32>
    %605 = arith.mulf %600, %604 : vector<17x17xf32>
    %cst_234 = arith.constant dense<0.000000e+00> : vector<17x8xf32>
    %606 = tpu.matmul %605, %594, %cst_234 {dimension_numbers = #tpu.dot_dimension_numbers<[1], [0], [0], [1], [0, 0, 1, 1], [], []>} : vector<17x17xf32>, vector<17x8xf32>, vector<17x8xf32> -> vector<17x8xf32>
    %607 = vector.extract_strided_slice %590 {offsets = [0, 0], sizes = [8, 32], strides = [1, 1]} : vector<32x32xf32> to vector<8x32xf32>
    %cst_235 = arith.constant dense<0.000000e+00> : vector<17x32xf32>
    %608 = tpu.matmul %606, %607, %cst_235 {dimension_numbers = #tpu.dot_dimension_numbers<[1], [0], [0], [1], [0, 0, 1, 1], [], []>} : vector<17x8xf32>, vector<8x32xf32>, vector<17x32xf32> -> vector<17x32xf32>
    %609 = vector.broadcast %591 : vector<1x32xf32> to vector<17x32xf32>
    %610 = arith.addf %609, %608 : vector<17x32xf32>
    %611 = vector.extract_strided_slice %589 {offsets = [0, 8], sizes = [17, 8], strides = [1, 1]} : vector<17x96xf32> to vector<17x8xf32>
    %612 = vector.extract_strided_slice %589 {offsets = [0, 40], sizes = [17, 8], strides = [1, 1]} : vector<17x96xf32> to vector<17x8xf32>
    %613 = vector.extract_strided_slice %589 {offsets = [0, 72], sizes = [17, 8], strides = [1, 1]} : vector<17x96xf32> to vector<17x8xf32>
    %cst_236 = arith.constant dense<0.000000e+00> : vector<17x17xf32>
    %614 = tpu.matmul %611, %612, %cst_236 {dimension_numbers = #tpu.dot_dimension_numbers<[1], [1], [0], [0], [0, 0, 1, 0], [], []>} : vector<17x8xf32>, vector<17x8xf32>, vector<17x17xf32> -> vector<17x17xf32>
    %cst_237 = arith.constant dense<0xFF800000> : vector<17xf32>
    %615 = vector.multi_reduction <maximumf>, %614, %cst_237 [1] : vector<17x17xf32> to vector<17xf32>
    %616 = vector.shape_cast %615 : vector<17xf32> to vector<17x1xf32>
    %617 = vector.broadcast %616 : vector<17x1xf32> to vector<17x17xf32>
    %618 = arith.subf %614, %617 : vector<17x17xf32>
    %619 = math.exp %618 : vector<17x17xf32>
    %cst_238 = arith.constant dense<0.000000e+00> : vector<17xf32>
    %620 = vector.multi_reduction <add>, %619, %cst_238 [1] : vector<17x17xf32> to vector<17xf32>
    %621 = vector.shape_cast %620 : vector<17xf32> to vector<17x1xf32>
    %622 = tpu.reciprocal %621 {approx = true} : vector<17x1xf32> -> vector<17x1xf32>
    %623 = vector.broadcast %622 : vector<17x1xf32> to vector<17x17xf32>
    %624 = arith.mulf %619, %623 : vector<17x17xf32>
    %cst_239 = arith.constant dense<0.000000e+00> : vector<17x8xf32>
    %625 = tpu.matmul %624, %613, %cst_239 {dimension_numbers = #tpu.dot_dimension_numbers<[1], [0], [0], [1], [0, 0, 1, 1], [], []>} : vector<17x17xf32>, vector<17x8xf32>, vector<17x8xf32> -> vector<17x8xf32>
    %626 = vector.extract_strided_slice %590 {offsets = [8, 0], sizes = [8, 32], strides = [1, 1]} : vector<32x32xf32> to vector<8x32xf32>
    %cst_240 = arith.constant dense<0.000000e+00> : vector<17x32xf32>
    %627 = tpu.matmul %625, %626, %cst_240 {dimension_numbers = #tpu.dot_dimension_numbers<[1], [0], [0], [1], [0, 0, 1, 1], [], []>} : vector<17x8xf32>, vector<8x32xf32>, vector<17x32xf32> -> vector<17x32xf32>
    %628 = arith.addf %610, %627 : vector<17x32xf32>
    %629 = vector.extract_strided_slice %589 {offsets = [0, 16], sizes = [17, 8], strides = [1, 1]} : vector<17x96xf32> to vector<17x8xf32>
    %630 = vector.extract_strided_slice %589 {offsets = [0, 48], sizes = [17, 8], strides = [1, 1]} : vector<17x96xf32> to vector<17x8xf32>
    %631 = vector.extract_strided_slice %589 {offsets = [0, 80], sizes = [17, 8], strides = [1, 1]} : vector<17x96xf32> to vector<17x8xf32>
    %cst_241 = arith.constant dense<0.000000e+00> : vector<17x17xf32>
    %632 = tpu.matmul %629, %630, %cst_241 {dimension_numbers = #tpu.dot_dimension_numbers<[1], [1], [0], [0], [0, 0, 1, 0], [], []>} : vector<17x8xf32>, vector<17x8xf32>, vector<17x17xf32> -> vector<17x17xf32>
    %cst_242 = arith.constant dense<0xFF800000> : vector<17xf32>
    %633 = vector.multi_reduction <maximumf>, %632, %cst_242 [1] : vector<17x17xf32> to vector<17xf32>
    %634 = vector.shape_cast %633 : vector<17xf32> to vector<17x1xf32>
    %635 = vector.broadcast %634 : vector<17x1xf32> to vector<17x17xf32>
    %636 = arith.subf %632, %635 : vector<17x17xf32>
    %637 = math.exp %636 : vector<17x17xf32>
    %cst_243 = arith.constant dense<0.000000e+00> : vector<17xf32>
    %638 = vector.multi_reduction <add>, %637, %cst_243 [1] : vector<17x17xf32> to vector<17xf32>
    %639 = vector.shape_cast %638 : vector<17xf32> to vector<17x1xf32>
    %640 = tpu.reciprocal %639 {approx = true} : vector<17x1xf32> -> vector<17x1xf32>
    %641 = vector.broadcast %640 : vector<17x1xf32> to vector<17x17xf32>
    %642 = arith.mulf %637, %641 : vector<17x17xf32>
    %cst_244 = arith.constant dense<0.000000e+00> : vector<17x8xf32>
    %643 = tpu.matmul %642, %631, %cst_244 {dimension_numbers = #tpu.dot_dimension_numbers<[1], [0], [0], [1], [0, 0, 1, 1], [], []>} : vector<17x17xf32>, vector<17x8xf32>, vector<17x8xf32> -> vector<17x8xf32>
    %644 = vector.extract_strided_slice %590 {offsets = [16, 0], sizes = [8, 32], strides = [1, 1]} : vector<32x32xf32> to vector<8x32xf32>
    %cst_245 = arith.constant dense<0.000000e+00> : vector<17x32xf32>
    %645 = tpu.matmul %643, %644, %cst_245 {dimension_numbers = #tpu.dot_dimension_numbers<[1], [0], [0], [1], [0, 0, 1, 1], [], []>} : vector<17x8xf32>, vector<8x32xf32>, vector<17x32xf32> -> vector<17x32xf32>
    %646 = arith.addf %628, %645 : vector<17x32xf32>
    %647 = vector.extract_strided_slice %589 {offsets = [0, 24], sizes = [17, 8], strides = [1, 1]} : vector<17x96xf32> to vector<17x8xf32>
    %648 = vector.extract_strided_slice %589 {offsets = [0, 56], sizes = [17, 8], strides = [1, 1]} : vector<17x96xf32> to vector<17x8xf32>
    %649 = vector.extract_strided_slice %589 {offsets = [0, 88], sizes = [17, 8], strides = [1, 1]} : vector<17x96xf32> to vector<17x8xf32>
    %cst_246 = arith.constant dense<0.000000e+00> : vector<17x17xf32>
    %650 = tpu.matmul %647, %648, %cst_246 {dimension_numbers = #tpu.dot_dimension_numbers<[1], [1], [0], [0], [0, 0, 1, 0], [], []>} : vector<17x8xf32>, vector<17x8xf32>, vector<17x17xf32> -> vector<17x17xf32>
    %cst_247 = arith.constant dense<0xFF800000> : vector<17xf32>
    %651 = vector.multi_reduction <maximumf>, %650, %cst_247 [1] : vector<17x17xf32> to vector<17xf32>
    %652 = vector.shape_cast %651 : vector<17xf32> to vector<17x1xf32>
    %653 = vector.broadcast %652 : vector<17x1xf32> to vector<17x17xf32>
    %654 = arith.subf %650, %653 : vector<17x17xf32>
    %655 = math.exp %654 : vector<17x17xf32>
    %cst_248 = arith.constant dense<0.000000e+00> : vector<17xf32>
    %656 = vector.multi_reduction <add>, %655, %cst_248 [1] : vector<17x17xf32> to vector<17xf32>
    %657 = vector.shape_cast %656 : vector<17xf32> to vector<17x1xf32>
    %658 = tpu.reciprocal %657 {approx = true} : vector<17x1xf32> -> vector<17x1xf32>
    %659 = vector.broadcast %658 : vector<17x1xf32> to vector<17x17xf32>
    %660 = arith.mulf %655, %659 : vector<17x17xf32>
    %cst_249 = arith.constant dense<0.000000e+00> : vector<17x8xf32>
    %661 = tpu.matmul %660, %649, %cst_249 {dimension_numbers = #tpu.dot_dimension_numbers<[1], [0], [0], [1], [0, 0, 1, 1], [], []>} : vector<17x17xf32>, vector<17x8xf32>, vector<17x8xf32> -> vector<17x8xf32>
    %662 = vector.extract_strided_slice %590 {offsets = [24, 0], sizes = [8, 32], strides = [1, 1]} : vector<32x32xf32> to vector<8x32xf32>
    %cst_250 = arith.constant dense<0.000000e+00> : vector<17x32xf32>
    %663 = tpu.matmul %661, %662, %cst_250 {dimension_numbers = #tpu.dot_dimension_numbers<[1], [0], [0], [1], [0, 0, 1, 1], [], []>} : vector<17x8xf32>, vector<8x32xf32>, vector<17x32xf32> -> vector<17x32xf32>
    %664 = arith.addf %646, %663 : vector<17x32xf32>
    %665 = arith.addf %565, %664 : vector<17x32xf32>
    %cst_251 = arith.constant dense<0.000000e+00> : vector<17xf32>
    %666 = vector.multi_reduction <add>, %665, %cst_251 [1] : vector<17x32xf32> to vector<17xf32>
    %667 = vector.shape_cast %666 : vector<17xf32> to vector<17x1xf32>
    %cst_252 = arith.constant 3.200000e+01 : f32
    %668 = vector.broadcast %cst_252 : f32 to vector<17x1xf32>
    %669 = arith.divf %667, %668 : vector<17x1xf32>
    %670 = vector.broadcast %669 : vector<17x1xf32> to vector<17x32xf32>
    %671 = arith.subf %665, %670 : vector<17x32xf32>
    %672 = arith.mulf %671, %671 : vector<17x32xf32>
    %cst_253 = arith.constant dense<0.000000e+00> : vector<17xf32>
    %673 = vector.multi_reduction <add>, %672, %cst_253 [1] : vector<17x32xf32> to vector<17xf32>
    %674 = vector.shape_cast %673 : vector<17xf32> to vector<17x1xf32>
    %cst_254 = arith.constant 3.200000e+01 : f32
    %675 = vector.broadcast %cst_254 : f32 to vector<17x1xf32>
    %676 = arith.divf %674, %675 : vector<17x1xf32>
    %cst_255 = arith.constant 9.99999997E-7 : f32
    %677 = vector.broadcast %cst_255 : f32 to vector<17x1xf32>
    %678 = arith.addf %676, %677 : vector<17x1xf32>
    %679 = math.rsqrt %678 : vector<17x1xf32>
    %680 = vector.broadcast %679 : vector<17x1xf32> to vector<17x32xf32>
    %681 = arith.mulf %671, %680 : vector<17x32xf32>
    %c0_256 = arith.constant 0 : index
    %c0_257 = arith.constant 0 : index
    %682 = vector.load %arg48[%c0_256, %c0_257] : memref<1x32xf32, #tpu.memory_space<vmem>>, vector<1x32xf32>
    %683 = vector.broadcast %682 : vector<1x32xf32> to vector<17x32xf32>
    %684 = arith.mulf %681, %683 : vector<17x32xf32>
    %c0_258 = arith.constant 0 : index
    %c0_259 = arith.constant 0 : index
    %685 = vector.load %arg47[%c0_258, %c0_259] : memref<1x32xf32, #tpu.memory_space<vmem>>, vector<1x32xf32>
    %686 = vector.broadcast %685 : vector<1x32xf32> to vector<17x32xf32>
    %687 = arith.addf %684, %686 : vector<17x32xf32>
    %c0_260 = arith.constant 0 : index
    %c0_261 = arith.constant 0 : index
    %688 = vector.load %arg42[%c0_260, %c0_261] : memref<32x128xf32, #tpu.memory_space<vmem>>, vector<32x128xf32>
    %cst_262 = arith.constant dense<0.000000e+00> : vector<17x128xf32>
    %689 = tpu.matmul %687, %688, %cst_262 {dimension_numbers = #tpu.dot_dimension_numbers<[1], [0], [0], [1], [0, 0, 1, 1], [], []>} : vector<17x32xf32>, vector<32x128xf32>, vector<17x128xf32> -> vector<17x128xf32>
    %c0_263 = arith.constant 0 : index
    %c0_264 = arith.constant 0 : index
    %690 = vector.load %arg41[%c0_263, %c0_264] : memref<1x128xf32, #tpu.memory_space<vmem>>, vector<1x128xf32>
    %691 = vector.broadcast %690 : vector<1x128xf32> to vector<17x128xf32>
    %692 = arith.addf %689, %691 : vector<17x128xf32>
    %cst_265 = arith.constant 5.000000e-01 : f32
    %693 = vector.broadcast %cst_265 : f32 to vector<17x128xf32>
    %694 = arith.mulf %693, %692 : vector<17x128xf32>
    %cst_266 = arith.constant 4.471500e-02 : f32
    %695 = vector.broadcast %cst_266 : f32 to vector<17x128xf32>
    %696 = arith.mulf %695, %692 : vector<17x128xf32>
    %697 = arith.mulf %696, %692 : vector<17x128xf32>
    %698 = arith.mulf %697, %692 : vector<17x128xf32>
    %699 = arith.addf %692, %698 : vector<17x128xf32>
    %cst_267 = arith.constant 0.797884583 : f32
    %700 = vector.broadcast %cst_267 : f32 to vector<17x128xf32>
    %701 = arith.mulf %700, %699 : vector<17x128xf32>
    %702 = math.tanh %701 : vector<17x128xf32>
    %cst_268 = arith.constant 1.000000e+00 : f32
    %703 = vector.broadcast %cst_268 : f32 to vector<17x128xf32>
    %704 = arith.addf %703, %702 : vector<17x128xf32>
    %705 = arith.mulf %694, %704 : vector<17x128xf32>
    %c0_269 = arith.constant 0 : index
    %c0_270 = arith.constant 0 : index
    %706 = vector.load %arg44[%c0_269, %c0_270] : memref<128x32xf32, #tpu.memory_space<vmem>>, vector<128x32xf32>
    %cst_271 = arith.constant dense<0.000000e+00> : vector<17x32xf32>
    %707 = tpu.matmul %705, %706, %cst_271 {dimension_numbers = #tpu.dot_dimension_numbers<[1], [0], [0], [1], [0, 0, 1, 1], [], []>} : vector<17x128xf32>, vector<128x32xf32>, vector<17x32xf32> -> vector<17x32xf32>
    %c0_272 = arith.constant 0 : index
    %c0_273 = arith.constant 0 : index
    %708 = vector.load %arg43[%c0_272, %c0_273] : memref<1x32xf32, #tpu.memory_space<vmem>>, vector<1x32xf32>
    %709 = vector.broadcast %708 : vector<1x32xf32> to vector<17x32xf32>
    %710 = arith.addf %707, %709 : vector<17x32xf32>
    %711 = arith.addf %665, %710 : vector<17x32xf32>
    %712 = vector.extract_strided_slice %711 {offsets = [16, 0], sizes = [1, 32], strides = [1, 1]} : vector<17x32xf32> to vector<1x32xf32>
    %cst_274 = arith.constant dense<0.000000e+00> : vector<1xf32>
    %713 = vector.multi_reduction <add>, %712, %cst_274 [1] : vector<1x32xf32> to vector<1xf32>
    %714 = vector.shape_cast %713 : vector<1xf32> to vector<1x1xf32>
    %cst_275 = arith.constant 3.200000e+01 : f32
    %715 = vector.broadcast %cst_275 : f32 to vector<1x1xf32>
    %716 = arith.divf %714, %715 : vector<1x1xf32>
    %717 = vector.broadcast %716 : vector<1x1xf32> to vector<1x32xf32>
    %718 = arith.subf %712, %717 : vector<1x32xf32>
    %719 = arith.mulf %718, %718 : vector<1x32xf32>
    %cst_276 = arith.constant dense<0.000000e+00> : vector<1xf32>
    %720 = vector.multi_reduction <add>, %719, %cst_276 [1] : vector<1x32xf32> to vector<1xf32>
    %721 = vector.shape_cast %720 : vector<1xf32> to vector<1x1xf32>
    %cst_277 = arith.constant 3.200000e+01 : f32
    %722 = vector.broadcast %cst_277 : f32 to vector<1x1xf32>
    %723 = arith.divf %721, %722 : vector<1x1xf32>
    %cst_278 = arith.constant 9.99999997E-7 : f32
    %724 = vector.broadcast %cst_278 : f32 to vector<1x1xf32>
    %725 = arith.addf %723, %724 : vector<1x1xf32>
    %726 = math.rsqrt %725 : vector<1x1xf32>
    %727 = vector.broadcast %726 : vector<1x1xf32> to vector<1x32xf32>
    %728 = arith.mulf %718, %727 : vector<1x32xf32>
    %c0_279 = arith.constant 0 : index
    %c0_280 = arith.constant 0 : index
    %729 = vector.load %arg60[%c0_279, %c0_280] : memref<1x32xf32, #tpu.memory_space<vmem>>, vector<1x32xf32>
    %730 = arith.mulf %728, %729 : vector<1x32xf32>
    %c0_281 = arith.constant 0 : index
    %c0_282 = arith.constant 0 : index
    %731 = vector.load %arg59[%c0_281, %c0_282] : memref<1x32xf32, #tpu.memory_space<vmem>>, vector<1x32xf32>
    %732 = arith.addf %730, %731 : vector<1x32xf32>
    %c0_283 = arith.constant 0 : index
    %c0_284 = arith.constant 0 : index
    %733 = vector.load %arg57[%c0_283, %c0_284] : memref<32x1024xf32, #tpu.memory_space<vmem>>, vector<32x1024xf32>
    %cst_285 = arith.constant dense<0.000000e+00> : vector<1x1024xf32>
    %734 = tpu.matmul %732, %733, %cst_285 {dimension_numbers = #tpu.dot_dimension_numbers<[1], [0], [0], [1], [0, 0, 1, 1], [], []>} : vector<1x32xf32>, vector<32x1024xf32>, vector<1x1024xf32> -> vector<1x1024xf32>
    %c0_286 = arith.constant 0 : index
    %c0_287 = arith.constant 0 : index
    %735 = vector.load %arg55[%c0_286, %c0_287] : memref<1x1024xf32, #tpu.memory_space<vmem>>, vector<1x1024xf32>
    %736 = arith.addf %734, %735 : vector<1x1024xf32>
    %cst_288 = arith.constant 0.000000e+00 : f32
    %737 = vector.broadcast %cst_288 : f32 to vector<1x1024xf32>
    %738 = arith.cmpf oge, %736, %737 : vector<1x1024xf32>
    %c0_289 = arith.constant 0 : index
    %c0_290 = arith.constant 0 : index
    %739 = vector.load %arg63[%c0_289, %c0_290] : memref<1x1xf32, #tpu.memory_space<vmem>>, vector<1x1xf32>
    %740 = vector.broadcast %739 : vector<1x1xf32> to vector<1x1024xf32>
    %741 = arith.mulf %740, %736 : vector<1x1024xf32>
    %742 = arith.select %738, %736, %741 : vector<1x1024xi1>, vector<1x1024xf32>
    %c0_291 = arith.constant 0 : index
    %c0_292 = arith.constant 0 : index
    %743 = vector.load %arg52[%c0_291, %c0_292] : memref<1x1024xf32, #tpu.memory_space<vmem>>, vector<1x1024xf32>
    %744 = arith.mulf %742, %743 : vector<1x1024xf32>
    %c0_293 = arith.constant 0 : index
    %c0_294 = arith.constant 0 : index
    %745 = vector.load %arg53[%c0_293, %c0_294] : memref<1x1024xf32, #tpu.memory_space<vmem>>, vector<1x1024xf32>
    %746 = arith.addf %744, %745 : vector<1x1024xf32>
    %c0_295 = arith.constant 0 : index
    %c0_296 = arith.constant 0 : index
    %747 = vector.load %arg58[%c0_295, %c0_296] : memref<1024x3xf32, #tpu.memory_space<vmem>>, vector<1024x3xf32>
    %cst_297 = arith.constant dense<0.000000e+00> : vector<1x3xf32>
    %748 = tpu.matmul %746, %747, %cst_297 {dimension_numbers = #tpu.dot_dimension_numbers<[1], [0], [0], [1], [0, 0, 1, 1], [], []>} : vector<1x1024xf32>, vector<1024x3xf32>, vector<1x3xf32> -> vector<1x3xf32>
    %c0_298 = arith.constant 0 : index
    %c0_299 = arith.constant 0 : index
    %749 = vector.load %arg56[%c0_298, %c0_299] : memref<1x3xf32, #tpu.memory_space<vmem>>, vector<1x3xf32>
    %750 = arith.addf %748, %749 : vector<1x3xf32>
    %c0_300 = arith.constant 0 : index
    %c0_301 = arith.constant 0 : index
    %c0_302 = arith.constant 0 : index
    %751 = vector.load %arg64[%c0_300, %c0_301, %c0_302] : memref<1x1x3xf32, #tpu.memory_space<vmem>>, vector<1x1x3xf32>
    %752 = vector.shape_cast %751 : vector<1x1x3xf32> to vector<1x3xf32>
    %753 = vector.shape_cast %750 : vector<1x3xf32> to vector<1x1x3xf32>
    tpu.vector_store %arg64[%c0_300, %c0_301, %c0_302], %753 {strides = array<i32>} : memref<1x1x3xf32, #tpu.memory_space<vmem>>, vector<1x1x3xf32>,
    return
  }
  func.func @transform_0(%arg0: i32) -> (i32, i32, i32) {
    %c0_i32 = arith.constant 0 : i32
    %c0_i32_0 = arith.constant 0 : i32
    %c0_i32_1 = arith.constant 0 : i32
    return %arg0, %c0_i32, %c0_i32_0 : i32, i32, i32
  }
  func.func @transform_1(%arg0: i32) -> (i32, i32) {
    %c0_i32 = arith.constant 0 : i32
    %c0_i32_0 = arith.constant 0 : i32
    %c0_i32_1 = arith.constant 0 : i32
    return %c0_i32, %c0_i32_0 : i32, i32
  }
  func.func @transform_2(%arg0: i32) -> (i32, i32) {
    %c0_i32 = arith.constant 0 : i32
    %c0_i32_0 = arith.constant 0 : i32
    %c0_i32_1 = arith.constant 0 : i32
    return %c0_i32, %c0_i32_0 : i32, i32
  }
  func.func @transform_3(%arg0: i32) -> (i32, i32) {
    %c0_i32 = arith.constant 0 : i32
    %c0_i32_0 = arith.constant 0 : i32
    %c0_i32_1 = arith.constant 0 : i32
    return %c0_i32, %c0_i32_0 : i32, i32
  }
  func.func @transform_4(%arg0: i32) -> (i32, i32) {
    %c0_i32 = arith.constant 0 : i32
    %c0_i32_0 = arith.constant 0 : i32
    %c0_i32_1 = arith.constant 0 : i32
    return %c0_i32, %c0_i32_0 : i32, i32
  }
  func.func @transform_5(%arg0: i32) -> (i32, i32) {
    %c0_i32 = arith.constant 0 : i32
    %c0_i32_0 = arith.constant 0 : i32
    %c0_i32_1 = arith.constant 0 : i32
    return %c0_i32, %c0_i32_0 : i32, i32
  }
  func.func @transform_6(%arg0: i32) -> (i32, i32) {
    %c0_i32 = arith.constant 0 : i32
    %c0_i32_0 = arith.constant 0 : i32
    %c0_i32_1 = arith.constant 0 : i32
    return %c0_i32, %c0_i32_0 : i32, i32
  }
  func.func @transform_7(%arg0: i32) -> (i32, i32) {
    %c0_i32 = arith.constant 0 : i32
    %c0_i32_0 = arith.constant 0 : i32
    %c0_i32_1 = arith.constant 0 : i32
    return %c0_i32, %c0_i32_0 : i32, i32
  }
  func.func @transform_8(%arg0: i32) -> (i32, i32) {
    %c0_i32 = arith.constant 0 : i32
    %c0_i32_0 = arith.constant 0 : i32
    %c0_i32_1 = arith.constant 0 : i32
    return %c0_i32, %c0_i32_0 : i32, i32
  }
  func.func @transform_9(%arg0: i32) -> (i32, i32) {
    %c0_i32 = arith.constant 0 : i32
    %c0_i32_0 = arith.constant 0 : i32
    %c0_i32_1 = arith.constant 0 : i32
    return %c0_i32, %c0_i32_0 : i32, i32
  }
  func.func @transform_10(%arg0: i32) -> (i32, i32) {
    %c0_i32 = arith.constant 0 : i32
    %c0_i32_0 = arith.constant 0 : i32
    %c0_i32_1 = arith.constant 0 : i32
    return %c0_i32, %c0_i32_0 : i32, i32
  }
  func.func @transform_11(%arg0: i32) -> (i32, i32) {
    %c0_i32 = arith.constant 0 : i32
    %c0_i32_0 = arith.constant 0 : i32
    %c0_i32_1 = arith.constant 0 : i32
    return %c0_i32, %c0_i32_0 : i32, i32
  }
  func.func @transform_12(%arg0: i32) -> (i32, i32) {
    %c0_i32 = arith.constant 0 : i32
    %c0_i32_0 = arith.constant 0 : i32
    %c0_i32_1 = arith.constant 0 : i32
    return %c0_i32, %c0_i32_0 : i32, i32
  }
  func.func @transform_13(%arg0: i32) -> (i32, i32) {
    %c0_i32 = arith.constant 0 : i32
    %c0_i32_0 = arith.constant 0 : i32
    %c0_i32_1 = arith.constant 0 : i32
    return %c0_i32, %c0_i32_0 : i32, i32
  }
  func.func @transform_14(%arg0: i32) -> (i32, i32) {
    %c0_i32 = arith.constant 0 : i32
    %c0_i32_0 = arith.constant 0 : i32
    %c0_i32_1 = arith.constant 0 : i32
    return %c0_i32, %c0_i32_0 : i32, i32
  }
  func.func @transform_15(%arg0: i32) -> (i32, i32) {
    %c0_i32 = arith.constant 0 : i32
    %c0_i32_0 = arith.constant 0 : i32
    %c0_i32_1 = arith.constant 0 : i32
    return %c0_i32, %c0_i32_0 : i32, i32
  }
  func.func @transform_16(%arg0: i32) -> (i32, i32) {
    %c0_i32 = arith.constant 0 : i32
    %c0_i32_0 = arith.constant 0 : i32
    %c0_i32_1 = arith.constant 0 : i32
    return %c0_i32, %c0_i32_0 : i32, i32
  }
  func.func @transform_17(%arg0: i32) -> (i32, i32) {
    %c0_i32 = arith.constant 0 : i32
    %c0_i32_0 = arith.constant 0 : i32
    %c0_i32_1 = arith.constant 0 : i32
    return %c0_i32, %c0_i32_0 : i32, i32
  }
  func.func @transform_18(%arg0: i32) -> (i32, i32) {
    %c0_i32 = arith.constant 0 : i32
    %c0_i32_0 = arith.constant 0 : i32
    %c0_i32_1 = arith.constant 0 : i32
    return %c0_i32, %c0_i32_0 : i32, i32
  }
  func.func @transform_19(%arg0: i32) -> (i32, i32) {
    %c0_i32 = arith.constant 0 : i32
    %c0_i32_0 = arith.constant 0 : i32
    %c0_i32_1 = arith.constant 0 : i32
    return %c0_i32, %c0_i32_0 : i32, i32
  }
  func.func @transform_20(%arg0: i32) -> (i32, i32) {
    %c0_i32 = arith.constant 0 : i32
    %c0_i32_0 = arith.constant 0 : i32
    %c0_i32_1 = arith.constant 0 : i32
    return %c0_i32, %c0_i32_0 : i32, i32
  }
  func.func @transform_21(%arg0: i32) -> (i32, i32) {
    %c0_i32 = arith.constant 0 : i32
    %c0_i32_0 = arith.constant 0 : i32
    %c0_i32_1 = arith.constant 0 : i32
    return %c0_i32, %c0_i32_0 : i32, i32
  }
  func.func @transform_22(%arg0: i32) -> (i32, i32) {
    %c0_i32 = arith.constant 0 : i32
    %c0_i32_0 = arith.constant 0 : i32
    %c0_i32_1 = arith.constant 0 : i32
    return %c0_i32, %c0_i32_0 : i32, i32
  }
  func.func @transform_23(%arg0: i32) -> (i32, i32) {
    %c0_i32 = arith.constant 0 : i32
    %c0_i32_0 = arith.constant 0 : i32
    %c0_i32_1 = arith.constant 0 : i32
    return %c0_i32, %c0_i32_0 : i32, i32
  }
  func.func @transform_24(%arg0: i32) -> (i32, i32) {
    %c0_i32 = arith.constant 0 : i32
    %c0_i32_0 = arith.constant 0 : i32
    %c0_i32_1 = arith.constant 0 : i32
    return %c0_i32, %c0_i32_0 : i32, i32
  }
  func.func @transform_25(%arg0: i32) -> (i32, i32) {
    %c0_i32 = arith.constant 0 : i32
    %c0_i32_0 = arith.constant 0 : i32
    %c0_i32_1 = arith.constant 0 : i32
    return %c0_i32, %c0_i32_0 : i32, i32
  }
  func.func @transform_26(%arg0: i32) -> (i32, i32) {
    %c0_i32 = arith.constant 0 : i32
    %c0_i32_0 = arith.constant 0 : i32
    %c0_i32_1 = arith.constant 0 : i32
    return %c0_i32, %c0_i32_0 : i32, i32
  }
  func.func @transform_27(%arg0: i32) -> (i32, i32) {
    %c0_i32 = arith.constant 0 : i32
    %c0_i32_0 = arith.constant 0 : i32
    %c0_i32_1 = arith.constant 0 : i32
    return %c0_i32, %c0_i32_0 : i32, i32
  }
  func.func @transform_28(%arg0: i32) -> (i32, i32) {
    %c0_i32 = arith.constant 0 : i32
    %c0_i32_0 = arith.constant 0 : i32
    %c0_i32_1 = arith.constant 0 : i32
    return %c0_i32, %c0_i32_0 : i32, i32
  }
  func.func @transform_29(%arg0: i32) -> (i32, i32) {
    %c0_i32 = arith.constant 0 : i32
    %c0_i32_0 = arith.constant 0 : i32
    %c0_i32_1 = arith.constant 0 : i32
    return %c0_i32, %c0_i32_0 : i32, i32
  }
  func.func @transform_30(%arg0: i32) -> (i32, i32) {
    %c0_i32 = arith.constant 0 : i32
    %c0_i32_0 = arith.constant 0 : i32
    %c0_i32_1 = arith.constant 0 : i32
    return %c0_i32, %c0_i32_0 : i32, i32
  }
  func.func @transform_31(%arg0: i32) -> (i32, i32) {
    %c0_i32 = arith.constant 0 : i32
    %c0_i32_0 = arith.constant 0 : i32
    %c0_i32_1 = arith.constant 0 : i32
    return %c0_i32, %c0_i32_0 : i32, i32
  }
  func.func @transform_32(%arg0: i32) -> (i32, i32) {
    %c0_i32 = arith.constant 0 : i32
    %c0_i32_0 = arith.constant 0 : i32
    %c0_i32_1 = arith.constant 0 : i32
    return %c0_i32, %c0_i32_0 : i32, i32
  }
  func.func @transform_33(%arg0: i32) -> (i32, i32) {
    %c0_i32 = arith.constant 0 : i32
    %c0_i32_0 = arith.constant 0 : i32
    %c0_i32_1 = arith.constant 0 : i32
    return %c0_i32, %c0_i32_0 : i32, i32
  }
  func.func @transform_34(%arg0: i32) -> (i32, i32) {
    %c0_i32 = arith.constant 0 : i32
    %c0_i32_0 = arith.constant 0 : i32
    %c0_i32_1 = arith.constant 0 : i32
    return %c0_i32, %c0_i32_0 : i32, i32
  }
  func.func @transform_35(%arg0: i32) -> (i32, i32) {
    %c0_i32 = arith.constant 0 : i32
    %c0_i32_0 = arith.constant 0 : i32
    %c0_i32_1 = arith.constant 0 : i32
    return %c0_i32, %c0_i32_0 : i32, i32
  }
  func.func @transform_36(%arg0: i32) -> (i32, i32) {
    %c0_i32 = arith.constant 0 : i32
    %c0_i32_0 = arith.constant 0 : i32
    %c0_i32_1 = arith.constant 0 : i32
    return %c0_i32, %c0_i32_0 : i32, i32
  }
  func.func @transform_37(%arg0: i32) -> (i32, i32) {
    %c0_i32 = arith.constant 0 : i32
    %c0_i32_0 = arith.constant 0 : i32
    %c0_i32_1 = arith.constant 0 : i32
    return %c0_i32, %c0_i32_0 : i32, i32
  }
  func.func @transform_38(%arg0: i32) -> (i32, i32) {
    %c0_i32 = arith.constant 0 : i32
    %c0_i32_0 = arith.constant 0 : i32
    %c0_i32_1 = arith.constant 0 : i32
    return %c0_i32, %c0_i32_0 : i32, i32
  }
  func.func @transform_39(%arg0: i32) -> (i32, i32) {
    %c0_i32 = arith.constant 0 : i32
    %c0_i32_0 = arith.constant 0 : i32
    %c0_i32_1 = arith.constant 0 : i32
    return %c0_i32, %c0_i32_0 : i32, i32
  }
  func.func @transform_40(%arg0: i32) -> (i32, i32) {
    %c0_i32 = arith.constant 0 : i32
    %c0_i32_0 = arith.constant 0 : i32
    %c0_i32_1 = arith.constant 0 : i32
    return %c0_i32, %c0_i32_0 : i32, i32
  }
  func.func @transform_41(%arg0: i32) -> (i32, i32) {
    %c0_i32 = arith.constant 0 : i32
    %c0_i32_0 = arith.constant 0 : i32
    %c0_i32_1 = arith.constant 0 : i32
    return %c0_i32, %c0_i32_0 : i32, i32
  }
  func.func @transform_42(%arg0: i32) -> (i32, i32) {
    %c0_i32 = arith.constant 0 : i32
    %c0_i32_0 = arith.constant 0 : i32
    %c0_i32_1 = arith.constant 0 : i32
    return %c0_i32, %c0_i32_0 : i32, i32
  }
  func.func @transform_43(%arg0: i32) -> (i32, i32) {
    %c0_i32 = arith.constant 0 : i32
    %c0_i32_0 = arith.constant 0 : i32
    %c0_i32_1 = arith.constant 0 : i32
    return %c0_i32, %c0_i32_0 : i32, i32
  }
  func.func @transform_44(%arg0: i32) -> (i32, i32) {
    %c0_i32 = arith.constant 0 : i32
    %c0_i32_0 = arith.constant 0 : i32
    %c0_i32_1 = arith.constant 0 : i32
    return %c0_i32, %c0_i32_0 : i32, i32
  }
  func.func @transform_45(%arg0: i32) -> (i32, i32) {
    %c0_i32 = arith.constant 0 : i32
    %c0_i32_0 = arith.constant 0 : i32
    %c0_i32_1 = arith.constant 0 : i32
    return %c0_i32, %c0_i32_0 : i32, i32
  }
  func.func @transform_46(%arg0: i32) -> (i32, i32) {
    %c0_i32 = arith.constant 0 : i32
    %c0_i32_0 = arith.constant 0 : i32
    %c0_i32_1 = arith.constant 0 : i32
    return %c0_i32, %c0_i32_0 : i32, i32
  }
  func.func @transform_47(%arg0: i32) -> (i32, i32) {
    %c0_i32 = arith.constant 0 : i32
    %c0_i32_0 = arith.constant 0 : i32
    %c0_i32_1 = arith.constant 0 : i32
    return %c0_i32, %c0_i32_0 : i32, i32
  }
  func.func @transform_48(%arg0: i32) -> (i32, i32) {
    %c0_i32 = arith.constant 0 : i32
    %c0_i32_0 = arith.constant 0 : i32
    %c0_i32_1 = arith.constant 0 : i32
    return %c0_i32, %c0_i32_0 : i32, i32
  }
  func.func @transform_49(%arg0: i32) -> (i32, i32) {
    %c0_i32 = arith.constant 0 : i32
    %c0_i32_0 = arith.constant 0 : i32
    %c0_i32_1 = arith.constant 0 : i32
    return %c0_i32, %c0_i32_0 : i32, i32
  }
  func.func @transform_50(%arg0: i32) -> (i32, i32) {
    %c0_i32 = arith.constant 0 : i32
    %c0_i32_0 = arith.constant 0 : i32
    %c0_i32_1 = arith.constant 0 : i32
    return %c0_i32, %c0_i32_0 : i32, i32
  }
  func.func @transform_51(%arg0: i32) -> (i32, i32) {
    %c0_i32 = arith.constant 0 : i32
    %c0_i32_0 = arith.constant 0 : i32
    %c0_i32_1 = arith.constant 0 : i32
    return %c0_i32, %c0_i32_0 : i32, i32
  }
  func.func @transform_52(%arg0: i32) -> (i32, i32) {
    %c0_i32 = arith.constant 0 : i32
    %c0_i32_0 = arith.constant 0 : i32
    %c0_i32_1 = arith.constant 0 : i32
    return %c0_i32, %c0_i32_0 : i32, i32
  }
  func.func @transform_53(%arg0: i32) -> (i32, i32) {
    %c0_i32 = arith.constant 0 : i32
    %c0_i32_0 = arith.constant 0 : i32
    %c0_i32_1 = arith.constant 0 : i32
    return %c0_i32, %c0_i32_0 : i32, i32
  }
  func.func @transform_54(%arg0: i32) -> (i32, i32) {
    %c0_i32 = arith.constant 0 : i32
    %c0_i32_0 = arith.constant 0 : i32
    %c0_i32_1 = arith.constant 0 : i32
    return %c0_i32, %c0_i32_0 : i32, i32
  }
  func.func @transform_55(%arg0: i32) -> (i32, i32) {
    %c0_i32 = arith.constant 0 : i32
    %c0_i32_0 = arith.constant 0 : i32
    %c0_i32_1 = arith.constant 0 : i32
    return %c0_i32, %c0_i32_0 : i32, i32
  }
  func.func @transform_56(%arg0: i32) -> (i32, i32) {
    %c0_i32 = arith.constant 0 : i32
    %c0_i32_0 = arith.constant 0 : i32
    %c0_i32_1 = arith.constant 0 : i32
    return %c0_i32, %c0_i32_0 : i32, i32
  }
  func.func @transform_57(%arg0: i32) -> (i32, i32) {
    %c0_i32 = arith.constant 0 : i32
    %c0_i32_0 = arith.constant 0 : i32
    %c0_i32_1 = arith.constant 0 : i32
    return %c0_i32, %c0_i32_0 : i32, i32
  }
  func.func @transform_58(%arg0: i32) -> (i32, i32) {
    %c0_i32 = arith.constant 0 : i32
    %c0_i32_0 = arith.constant 0 : i32
    %c0_i32_1 = arith.constant 0 : i32
    return %c0_i32, %c0_i32_0 : i32, i32
  }
  func.func @transform_59(%arg0: i32) -> (i32, i32) {
    %c0_i32 = arith.constant 0 : i32
    %c0_i32_0 = arith.constant 0 : i32
    %c0_i32_1 = arith.constant 0 : i32
    return %c0_i32, %c0_i32_0 : i32, i32
  }
  func.func @transform_60(%arg0: i32) -> (i32, i32) {
    %c0_i32 = arith.constant 0 : i32
    %c0_i32_0 = arith.constant 0 : i32
    %c0_i32_1 = arith.constant 0 : i32
    return %c0_i32, %c0_i32_0 : i32, i32
  }
  func.func @transform_61(%arg0: i32) -> (i32, i32) {
    %c0_i32 = arith.constant 0 : i32
    %c0_i32_0 = arith.constant 0 : i32
    %c0_i32_1 = arith.constant 0 : i32
    return %c0_i32, %c0_i32_0 : i32, i32
  }
  func.func @transform_62(%arg0: i32) -> (i32, i32) {
    %c0_i32 = arith.constant 0 : i32
    %c0_i32_0 = arith.constant 0 : i32
    %c0_i32_1 = arith.constant 0 : i32
    return %c0_i32, %c0_i32_0 : i32, i32
  }
  func.func @transform_63(%arg0: i32) -> (i32, i32, i32) {
    %c0_i32 = arith.constant 0 : i32
    %c0_i32_0 = arith.constant 0 : i32
    %c0_i32_1 = arith.constant 0 : i32
    return %arg0, %c0_i32, %c0_i32_0 : i32, i32, i32
  }
}

</mosaic_0001>

<bundles_post_ra>
// kernel: convit_forward.1
= control target key start
LH: loop header
LB: loop body
LE: loop exit
PB: predicated region body
PF: predicated region fallthrough
CT: control target
= control target key end

     0   :  { %s13614_s6 = smov 1   ;;  %s13615_s10 = smov 2   ;;  %s15779_s0 = inlined_call_operand.smem [shape: u32[64], index: -1, kind: input, shape index: {}] }
   0x1   :  { %s13720_s5 = sld [smem:[%s15779_s0]]   ;;  %s13616_s14 = smov 3  }
   0x2   :  { %s13725_s9 = sld [smem:[%s15779_s0 + %s13614_s6]]   ;;  %s13617_s18 = smov 4  }
   0x3   :  { %s13730_s13 = sld [smem:[%s15779_s0 + %s13615_s10]]   ;;  %s13618_s22 = smov 5  }
   0x4   :  { %s13735_s17 = sld [smem:[%s15779_s0 + %s13616_s14]]   ;;  %s13619_s26 = smov 6  }
   0x5   :  { %s13740_s21 = sld [smem:[%s15779_s0 + %s13617_s18]]   ;;  %s13620_s30 = smov 7  }
   0x6   :  { %s13745_s25 = sld [smem:[%s15779_s0 + %s13618_s22]]   ;;  %s13621_s4 = smov 8  }
   0x7   :  { %15857 = sst [smem:[#allocation40_spill]] %s13720_s5  ;;  %s13622_s10 = smov 9  }
   0x8   :  { %15858 = sst [smem:[#allocation41_spill]] %s13725_s9  ;;  %s13623_s15 = smov 10  }
   0x9   :  { %15859 = sst [smem:[#allocation42_spill]] %s13730_s13  ;;  %s13624_s20 = smov 11  }
   0xa   :  { %15860 = sst [smem:[#allocation43_spill]] %s13735_s17  ;;  %s13626_s1 = smov 13  }
   0xb   :  { %15861 = sst [smem:[#allocation44_spill]] %s13740_s21  ;;  %s13627_s7 = smov 14  }
   0xc   :  { %15862 = sst [smem:[#allocation45_spill]] %s13745_s25  ;;  %s13629_s22 = smov 16  }
   0xd   :  { %s13750_s29 = sld [smem:[%s15779_s0 + %s13619_s26]]   ;;  %s13625_s26 = smov 12  }
   0xe   :  { %s13755_s3 = sld [smem:[%s15779_s0 + %s13620_s30]]   ;;  %s13630_s28 = smov 17  }
   0xf   :  { %s13760_s8 = sld [smem:[%s15779_s0 + %s13621_s4]]   ;;  %s13676_s16 = smov 63  }
  0x10   :  { %s13765_s14 = sld [smem:[%s15779_s0 + %s13622_s10]]  }
  0x11   :  { %s13770_s19 = sld [smem:[%s15779_s0 + %s13623_s15]]   ;;  %s13628_s15 = smov 15  }
  0x12   :  { %s13775_s24 = sld [smem:[%s15779_s0 + %s13624_s20]]  }
  0x13   :  { %15863 = sst [smem:[#allocation46_spill]] %s13750_s29 }
  0x14   :  { %15864 = sst [smem:[#allocation47_spill]] %s13755_s3 }
  0x15   :  { %15865 = sst [smem:[#allocation48_spill]] %s13760_s8 }
  0x16   :  { %15866 = sst [smem:[#allocation49_spill]] %s13765_s14 }
  0x17   :  { %15867 = sst [smem:[#allocation50_spill]] %s13770_s19 }
  0x18   :  { %15868 = sst [smem:[#allocation51_spill]] %s13775_s24 }
  0x19   :  { %s13780_s30 = sld [smem:[%s15779_s0 + %s13625_s26]]  }
  0x1a   :  { %s13785_s6 = sld [smem:[%s15779_s0 + %s13626_s1]]  }
  0x1b   :  { %s13790_s12 = sld [smem:[%s15779_s0 + %s13627_s7]]   ;;  %s13631_s7 = smov 18  }
  0x1c   :  { %s13795_s20 = sld [smem:[%s15779_s0 + %s13628_s15]]   ;;  %s13632_s15 = smov 19  }
  0x1d   :  { %s13800_s27 = sld [smem:[%s15779_s0 + %s13629_s22]]   ;;  %s13633_s22 = smov 20  }
  0x1e   :  { %s13805_s4 = sld [smem:[%s15779_s0 + %s13630_s28]]   ;;  %s13634_s28 = smov 21  }
  0x1f   :  { %15869 = sst [smem:[#allocation52_spill]] %s13780_s30 }
  0x20   :  { %15870 = sst [smem:[#allocation53_spill]] %s13785_s6 }
  0x21   :  { %15871 = sst [smem:[#allocation54_spill]] %s13790_s12 }
  0x22   :  { %15872 = sst [smem:[#allocation55_spill]] %s13795_s20 }
  0x23   :  { %15873 = sst [smem:[#allocation56_spill]] %s13800_s27 }
  0x24   :  { %15874 = sst [smem:[#allocation57_spill]] %s13805_s4 }
  0x25   :  { %s13810_s17 = sld [smem:[%s15779_s0 + %s13631_s7]]   ;;  %s13635_s7 = smov 22  }
  0x26   :  { %s13815_s20 = sld [smem:[%s15779_s0 + %s13632_s15]]   ;;  %s13636_s15 = smov 23  }
  0x27   :  { %s13820_s27 = sld [smem:[%s15779_s0 + %s13633_s22]]   ;;  %s13637_s22 = smov 24  }
  0x28   :  { %s13825_s4 = sld [smem:[%s15779_s0 + %s13634_s28]]   ;;  %s13638_s28 = smov 25  }
  0x2b   :  { %15875 = sst [smem:[#allocation58_spill]] %s13810_s17 }
  0x2c   :  { %15876 = sst [smem:[#allocation59_spill]] %s13815_s20 }
  0x2d   :  { %15877 = sst [smem:[#allocation60_spill]] %s13820_s27 }
  0x2e   :  { %15878 = sst [smem:[#allocation61_spill]] %s13825_s4 }
  0x2f   :  { %s13830_s17 = sld [smem:[%s15779_s0 + %s13635_s7]]   ;;  %s13639_s7 = smov 26  }
  0x30   :  { %s13835_s20 = sld [smem:[%s15779_s0 + %s13636_s15]]   ;;  %s13640_s15 = smov 27  }
  0x31   :  { %s13840_s27 = sld [smem:[%s15779_s0 + %s13637_s22]]   ;;  %s13641_s22 = smov 28  }
  0x32   :  { %s13845_s4 = sld [smem:[%s15779_s0 + %s13638_s28]]   ;;  %s13642_s28 = smov 29  }
  0x35   :  { %15879 = sst [smem:[#allocation62_spill]] %s13830_s17 }
  0x36   :  { %15880 = sst [smem:[#allocation63_spill]] %s13835_s20 }
  0x37   :  { %15881 = sst [smem:[#allocation64_spill]] %s13840_s27 }
  0x38   :  { %15882 = sst [smem:[#allocation65_spill]] %s13845_s4 }
  0x39   :  { %s13850_s17 = sld [smem:[%s15779_s0 + %s13639_s7]]   ;;  %s13643_s7 = smov 30  }
  0x3a   :  { %s13855_s20 = sld [smem:[%s15779_s0 + %s13640_s15]]   ;;  %s13644_s15 = smov 31  }
  0x3b   :  { %s13860_s27 = sld [smem:[%s15779_s0 + %s13641_s22]]   ;;  %s13645_s22 = smov 32  }
  0x3c   :  { %s13865_s4 = sld [smem:[%s15779_s0 + %s13642_s28]]   ;;  %s13646_s28 = smov 33  }
  0x3f   :  { %15883 = sst [smem:[#allocation66_spill]] %s13850_s17 }
  0x40   :  { %15884 = sst [smem:[#allocation67_spill]] %s13855_s20 }
  0x41   :  { %15885 = sst [smem:[#allocation68_spill]] %s13860_s27 }
  0x42   :  { %15886 = sst [smem:[#allocation69_spill]] %s13865_s4 }
  0x43   :  { %s13870_s17 = sld [smem:[%s15779_s0 + %s13643_s7]]   ;;  %s13647_s7 = smov 34  }
  0x44   :  { %s13875_s20 = sld [smem:[%s15779_s0 + %s13644_s15]]   ;;  %s13648_s15 = smov 35  }
  0x45   :  { %s13880_s27 = sld [smem:[%s15779_s0 + %s13645_s22]]   ;;  %s13649_s22 = smov 36  }
  0x46   :  { %s13885_s4 = sld [smem:[%s15779_s0 + %s13646_s28]]   ;;  %s13650_s28 = smov 37  }
  0x47   :  { %s13905_s9 = sld [smem:[%s15779_s0 + %s13650_s28]]   ;;  %s13654_s28 = smov 41  }
  0x48   :  { %s13925_s13 = sld [smem:[%s15779_s0 + %s13654_s28]]   ;;  %s13658_s28 = smov 45  }
  0x49   :  { %15887 = sst [smem:[#allocation70_spill]] %s13870_s17 }
  0x4a   :  { %15888 = sst [smem:[#allocation71_spill]] %s13875_s20 }
  0x4b   :  { %15889 = sst [smem:[#allocation72_spill]] %s13880_s27 }
  0x4c   :  { %15890 = sst [smem:[#allocation73_spill]] %s13885_s4 }
  0x4d   :  { %s13890_s17 = sld [smem:[%s15779_s0 + %s13647_s7]]   ;;  %s13651_s7 = smov 38  }
  0x4e   :  { %s13895_s20 = sld [smem:[%s15779_s0 + %s13648_s15]]   ;;  %s13652_s15 = smov 39  }
  0x4f   :  { %s13900_s27 = sld [smem:[%s15779_s0 + %s13649_s22]]   ;;  %s13653_s22 = smov 40  }
  0x50   :  { %15893 = sst [smem:[#allocation76_spill]] %s13905_s9 }
  0x51   :  { %s13910_s8 = sld [smem:[%s15779_s0 + %s13651_s7]]   ;;  %s13655_s7 = smov 42  }
  0x52   :  { %s13915_s14 = sld [smem:[%s15779_s0 + %s13652_s15]]   ;;  %s13656_s15 = smov 43  }
  0x53   :  { %15891 = sst [smem:[#allocation74_spill]] %s13890_s17 }
  0x54   :  { %s13920_s21 = sld [smem:[%s15779_s0 + %s13653_s22]]   ;;  %s13657_s22 = smov 44  }
  0x55   :  { %15892 = sst [smem:[#allocation75_spill]] %s13900_s27 }
  0x56   :  { %15896 = sst [smem:[#allocation79_spill]] %s13925_s13 }
  0x57   :  { %15894 = sst [smem:[#allocation77_spill]] %s13910_s8 }
  0x58   :  { %15895 = sst [smem:[#allocation78_spill]] %s13915_s14 }
  0x59   :  { %s13930_s8 = sld [smem:[%s15779_s0 + %s13655_s7]]   ;;  %s13659_s7 = smov 46  }
  0x5a   :  { %s13935_s14 = sld [smem:[%s15779_s0 + %s13656_s15]]   ;;  %s13660_s15 = smov 47  }
  0x5b   :  { %s13940_s24 = sld [smem:[%s15779_s0 + %s13657_s22]]   ;;  %s13661_s22 = smov 48  }
  0x5c   :  { %s13945_s13 = sld [smem:[%s15779_s0 + %s13658_s28]]   ;;  %s13662_s28 = smov 49  }
  0x5d   :  { %s13950_s30 = sld [smem:[%s15779_s0 + %s13659_s7]]   ;;  %s13663_s7 = smov 50  }
  0x5e   :  { %s13960_s19 = sld [smem:[%s15779_s0 + %s13661_s22]]   ;;  %s13665_s22 = smov 52  }
  0x5f   :  { %15897 = sst [smem:[#allocation80_spill]] %s13930_s8 }
  0x60   :  { %15898 = sst [smem:[#allocation81_spill]] %s13935_s14 }
  0x61   :  { %s13955_s14 = sld [smem:[%s15779_s0 + %s13660_s15]]   ;;  %s13664_s15 = smov 51  }
  0x62   :  { %s13965_s25 = sld [smem:[%s15779_s0 + %s13662_s28]]   ;;  %s13666_s28 = smov 53  }
  0x63   :  { %s13970_s29 = sld [smem:[%s15779_s0 + %s13663_s7]]   ;;  %s13667_s7 = smov 54  }
  0x64   :  { %s13975_s3 = sld [smem:[%s15779_s0 + %s13664_s15]]   ;;  %s13668_s15 = smov 55  }
  0x65   :  { %s13980_s12 = sld [smem:[%s15779_s0 + %s13665_s22]]   ;;  %s13669_s22 = smov 56  }
  0x68   :  { %15899 = sst [smem:[#allocation82_spill]] %s13965_s25 }
  0x69   :  { %15900 = sst [smem:[#allocation83_spill]] %s13970_s29 }
  0x6a   :  { %15901 = sst [smem:[#allocation84_spill]] %s13975_s3 }
  0x6b   :  { %15902 = sst [smem:[#allocation85_spill]] %s13980_s12 }
  0x6c   :  { %s13985_s25 = sld [smem:[%s15779_s0 + %s13666_s28]]   ;;  %s13670_s28 = smov 57  }
  0x6d   :  { %s13990_s29 = sld [smem:[%s15779_s0 + %s13667_s7]]   ;;  %s13671_s7 = smov 58  }
  0x6e   :  { %s13995_s3 = sld [smem:[%s15779_s0 + %s13668_s15]]   ;;  %s13672_s15 = smov 59  }
  0x6f   :  { %s14000_s12 = sld [smem:[%s15779_s0 + %s13669_s22]]   ;;  %s13673_s22 = smov 60  }
  0x70   :  { %s14005_s6 = sld [smem:[%s15779_s0 + %s13670_s28]]   ;;  %s13674_s28 = smov 61  }
  0x71   :  { %s14015_s5 = sld [smem:[%s15779_s0 + %s13672_s15]]  }
  0x73   :  { %15903 = sst [smem:[#allocation86_spill]] %s13990_s29 }
  0x74   :  { %15904 = sst [smem:[#allocation87_spill]] %s13995_s3 }
  0x75   :  { %15905 = sst [smem:[#allocation88_spill]] %s14000_s12 }
  0x76   :  { %15906 = sst [smem:[#allocation89_spill]] %s14005_s6 }
  0x77   :  { %s14010_s29 = sld [smem:[%s15779_s0 + %s13671_s7]]   ;;  %s13675_s7 = smov 62  }
  0x78   :  { %15908 = sst [smem:[#allocation91_spill]] %s14015_s5 }
  0x79   :  { %s14020_s12 = sld [smem:[%s15779_s0 + %s13673_s22]]  }
  0x7a   :  { %s14025_s6 = sld [smem:[%s15779_s0 + %s13674_s28]]  }
  0x7b   :  { %s14033_s5 = sld [smem:[%s15779_s0 + %s13676_s16]]  }
  0x7d   :  { %15907 = sst [smem:[#allocation90_spill]] %s14010_s29 }
  0x7e   :  { %s10321_s29 = sld [smem:[%s15779_s0 + %s13675_s7]]  }
  0x7f   :  { %15909 = sst [smem:[#allocation92_spill]] %s14020_s12 }
  0x80   :  { %15910 = sst [smem:[#allocation93_spill]] %s14025_s6 }
  0x84   :  { %v132_v0 = vstv %s10321_s29 }
  0x85   :  { %133 = vst [vmem:[#allocation2] sm:$0x1] %v132_v0 }
  0x86   :  { %134 = vsyncpa [#allocation4], 0 }
  0x87   :  { %135 = vsyncpa [#allocation7], 0 }
  0x88   :  { %136 = vsyncpa [#allocation10], 0 }
  0x89   :  { %137 = vsyncpa [#allocation13], 0 }
  0x8a   :  { %138 = vsyncpa [#allocation16], 0 }
  0x8b   :  { %139 = vsyncpa [#allocation19], 0 }
  0x8c   :  { %140 = vsyncpa [#allocation22], 0 }
  0x8d   :  { %141 = vsyncpa [#allocation25], 0 }
  0x8e   :  { %142 = vsyncpa [#allocation28], 0 }
  0x8f   :  { %143 = vsyncpa [#allocation5], 0 }
  0x90   :  { %145 = vsyncpa [#allocation5 + $0x1], 0  ;;  %s14035_s22 = smov 0   ;;  %s14037_s23 = smov 0  }
  0x91   :  { %s14039_s26 = smov 0   ;;  %s14041_s0 = smov 0  }
  0x92 LB: > { %s15911_s12 = sld [smem:[#allocation92_spill]]  ;;  %s15913_s8 = sld [smem:[#allocation80_spill]]  ;;  %s13612_s0 = sphi %s14041_s0, %s16012_s0   ;;  %s13608_s26 = sphi %s14039_s26, %s16017_s26   ;;  %s13604_s23 = sphi %s14037_s23, %s16016_s23   ;;  %s13600_s22 = sphi %s14035_s22, %s16015_s22  }
  0x93   : > { %s15912_s9 = sld [smem:[#allocation76_spill]]  ;;  %s15914_s6 = sld [smem:[#allocation93_spill]] }
  0x94   : > { %s15915_s4 = sld [smem:[#allocation73_spill]]  ;;  %s15916_s3 = sld [smem:[#allocation87_spill]] }
  0x95   : > { %s15917_s27 = sld [smem:[#allocation75_spill]]  ;;  %s15918_s17 = sld [smem:[#allocation74_spill]] }
  0x96   : > { %15919 = sst [smem:[#allocation94_spill]] %s13608_s26  ;;  %s14056_s29 = sadd.s32 4294967295, %s13612_s0  }
  0x97   : > { %s10324_s28 = sadd.s32 4294967294, %s13612_s0   ;;  %s14060_s1 = sadd.s32 1, %s13612_s0  }
  0x98   : > { %15920 = sst [smem:[#allocation95_spill]] %s14060_s1  ;;  %s1486_s2 = sadd.s32 1, %s13608_s26 }
  0x99   : > { %s1483_s7 = ssub.s32 %s13612_s0, %s14060_s1  ;;  %p1496_p0 = scmp.ne.s32.totalorder %s13608_s26, %s13604_s23 }
  0x9a   : > { %p1484_p1 = scmp.eq.s32.totalorder %s1483_s7, 0  ;;  %p1497_p2 = scmp.eq.s32.totalorder %s14056_s29, 1 }
  0x9b   : > { %p1502_p3 = scmp.ne.s32.totalorder %s13604_s23, %s13600_s22  ;;  %p1503_p4 = scmp.eq.s32.totalorder %s10324_s28, 1 }
  0x9c   : > { %s14071_s10 = scalar_select %p1484_p1, %s13608_s26, %s1486_s2  }
  0x9d   : > { %p14073_p5 = por %p1497_p2, %p1496_p0  ;;  %p14077_p6 = por %p1503_p4, %p1502_p3 }
  0x9e   : > { %15921 = sst [smem:[#allocation96_spill]] %s14071_s10  ;;  %p10325_p7 = scmp.ge.s32.totalorder %s13612_s0, 1 }
  0x9f   : > { %s15922_s11 = scalar_select %p14073_p5, 1, 0 }
  0xa0   : > { %s15923_s16 = scalar_select %p14077_p6, 1, 0 }
  0xa1   : > { %p1510_p8 = scmp.lt.s32.totalorder %s13612_s0, 3  ;;  %p15808_p9 = scmp.eq.s32.totalorder %s14056_s29, 0 }
  0xa2   : > { %15924 = sst [smem:[#allocation97_spill]] %s15923_s16  ;;  %s13677_s18 = smov [#allocation6]  }
  0xa3   : > { %p14084_p10 = pnand %p10325_p7, %p1510_p8  ;;  %s1630_s28 = sshll.u32 %s13677_s18, 4  ;;  %s1631_s28 = int_to_ptr.vmem [resolvable:$true] %s1630_s28 }
  0xa4   : > { %s13678_s2 = smov [#allocation9]   ;;  %s13679_s26 = smov [#allocation12]  }
  0xa5   : > { %s15925_s15 = scalar_select %p14084_p10, 1, 0 }
  0xa6   : > { %p12429_p11 = pneg %p14084_p10  ;;  %s1652_s7 = sshll.u32 %s13678_s2, 4  ;;  %s14096_s7 = int_to_ptr.vmem [resolvable:$true] %s1652_s7 }
  0xa7   : > { %s1680_s1 = sshll.u32 %s13679_s26, 4  ;;  %s13066_s16 = scalar_lea.hbm %s15918_s17, 16  ;;  %s14098_s1 = int_to_ptr.vmem [resolvable:$true] %s1680_s1 }
  0xa8   : > { %p14092_p12 = pnand %p15808_p9, %p12429_p11  ;;  %p13067_p13 = scmp.ne.s32.totalorder %s15918_s17, %s13066_s16 }
  0xa9   : > { %p13073_p3 = scmp.lt.u32.totalorder %s13066_s16, %s15918_s17 }
  0xaa   : > { %p14104_p0 = pneg %p14092_p12 }
  0xac   : > { %p13069_p1 = pnand %p14104_p0, %p13067_p13 }
  0xae   : > { %p13070_p2 = pneg %p13069_p1 }
  0xb0   : > { %p13075_p4 = pnand %p13073_p3, %p13070_p2 }
  0xb2   : > { %13078 = shalt.err (!%p13075_p4)
}
  0xb3   : > { %s13079_s2 = scalar_lea.vmem %s1631_s28, 16  ;;  %s13086_s26 = scalar_lea.vmem %s1631_s28, 32 }
  0xb4   : > { %p13080_p7 = scmp.ne.s32.totalorder %s1631_s28, %s13079_s2  ;;  %p13087_p9 = scmp.lt.s32.totalorder %s1631_s28, %s1631_s28 }
  0xb5   : > { %p13088_p6 = scmp.lt.s32.totalorder %s13086_s26, %s13079_s2 }
  0xb6   : > { %p13082_p8 = pnand %p13080_p7, %p14104_p0 }
  0xb7   : > { %p13089_p5 = por %p13088_p6, %p13087_p9 }
  0xb8   : > { %p13083_p11 = pneg %p13082_p8 }
  0xba   : > { %p13090_p10 = pnand %p13089_p5, %p13083_p11 }
  0xbc   : > { %13093 = shalt.err (!%p13090_p10)
}
  0xbd   : > { %12435 = dma.hbm_to_vmem [thread:$0]  (!%p14092_p12), %s15918_s17, 16, %s1631_s28, [#allocation7]  }
  0xbe   : > { %s13094_s16 = scalar_lea.hbm %s15917_s27, 16 }
  0xbf   : > { %p13095_p13 = scmp.ne.s32.totalorder %s15917_s27, %s13094_s16  ;;  %p13101_p3 = scmp.lt.u32.totalorder %s13094_s16, %s15917_s27 }
  0xc1   : > { %p13097_p1 = pnand %p13095_p13, %p14104_p0 }
  0xc3   : > { %p13098_p2 = pneg %p13097_p1 }
  0xc5   : > { %p13103_p4 = pnand %p13101_p3, %p13098_p2 }
  0xc7   : > { %13106 = shalt.err (!%p13103_p4)
}
  0xc8   : > { %s13107_s2 = scalar_lea.vmem %s14096_s7, 16  ;;  %s13114_s26 = scalar_lea.vmem %s14096_s7, 32 }
  0xc9   : > { %p13108_p5 = scmp.ne.s32.totalorder %s14096_s7, %s13107_s2  ;;  %p13115_p10 = scmp.lt.s32.totalorder %s14096_s7, %s14096_s7 }
  0xca   : > { %p13116_p7 = scmp.lt.s32.totalorder %s13114_s26, %s13107_s2 }
  0xcb   : > { %p13110_p6 = pnand %p13108_p5, %p14104_p0 }
  0xcc   : > { %p13117_p8 = por %p13116_p7, %p13115_p10 }
  0xcd   : > { %p13111_p9 = pneg %p13110_p6 }
  0xcf   : > { %p13118_p11 = pnand %p13117_p8, %p13111_p9 }
  0xd1   : > { %13121 = shalt.err (!%p13118_p11)
}
  0xd2   : > { %12441 = dma.hbm_to_vmem [thread:$0]  (!%p14092_p12), %s15917_s27, 16, %s14096_s7, [#allocation10]  }
  0xd3   : > { %s13122_s28 = scalar_lea.hbm %s13920_s21, 16 }
  0xd4   : > { %p13123_p13 = scmp.ne.s32.totalorder %s13920_s21, %s13122_s28  ;;  %p13129_p3 = scmp.lt.u32.totalorder %s13122_s28, %s13920_s21 }
  0xd6   : > { %p13125_p1 = pnand %p13123_p13, %p14104_p0 }
  0xd8   : > { %p13126_p2 = pneg %p13125_p1 }
  0xda   : > { %p13131_p4 = pnand %p13129_p3, %p13126_p2 }
  0xdc   : > { %13134 = shalt.err (!%p13131_p4)
}
  0xdd   : > { %s13135_s16 = scalar_lea.vmem %s14098_s1, 16  ;;  %s13142_s2 = scalar_lea.vmem %s14098_s1, 32 }
  0xde   : > { %p13136_p5 = scmp.ne.s32.totalorder %s14098_s1, %s13135_s16  ;;  %p13143_p10 = scmp.lt.s32.totalorder %s14098_s1, %s14098_s1 }
  0xdf   : > { %p13144_p7 = scmp.lt.s32.totalorder %s13142_s2, %s13135_s16 }
  0xe0   : > { %p13138_p6 = pnand %p13136_p5, %p14104_p0 }
  0xe1   : > { %p13145_p8 = por %p13144_p7, %p13143_p10 }
  0xe2   : > { %p13139_p9 = pneg %p13138_p6 }
  0xe4   : > { %p13146_p11 = pnand %p13145_p8, %p13139_p9 }
  0xe6   : > { %13149 = shalt.err (!%p13146_p11)
}
  0xe7   : > { %12447 = dma.hbm_to_vmem [thread:$0]  (!%p14092_p12), %s13920_s21, 16, %s14098_s1, [#allocation13]  }
  0xe8   : > { %s13680_s7 = smov [#allocation15]   ;;  %s13681_s28 = smov [#allocation18]  }
  0xe9   : > { %s1708_s26 = sshll.u32 %s13680_s7, 4  ;;  %s1730_s17 = sshll.u32 %s13681_s28, 4  ;;  %s1709_s26 = int_to_ptr.vmem [resolvable:$true] %s1708_s26  ;;  %s1731_s17 = int_to_ptr.vmem [resolvable:$true] %s1730_s17 }
  0xea   : > { %s13150_s27 = scalar_lea.hbm %s13940_s24, 16 }
  0xeb   : > { %p13151_p13 = scmp.ne.s32.totalorder %s13940_s24, %s13150_s27  ;;  %p13157_p3 = scmp.lt.u32.totalorder %s13150_s27, %s13940_s24 }
  0xed   : > { %p13153_p1 = pnand %p13151_p13, %p14104_p0 }
  0xef   : > { %p13154_p2 = pneg %p13153_p1 }
  0xf1   : > { %p13159_p4 = pnand %p13157_p3, %p13154_p2 }
  0xf3   : > { %13162 = shalt.err (!%p13159_p4)
}
  0xf4   : > { %s13163_s16 = scalar_lea.vmem %s1709_s26, 16  ;;  %s13170_s1 = scalar_lea.vmem %s1709_s26, 32 }
  0xf5   : > { %p13164_p5 = scmp.ne.s32.totalorder %s1709_s26, %s13163_s16  ;;  %p13171_p10 = scmp.lt.s32.totalorder %s1709_s26, %s1709_s26 }
  0xf6   : > { %p13172_p7 = scmp.lt.s32.totalorder %s13170_s1, %s13163_s16 }
  0xf7   : > { %p13166_p6 = pnand %p13164_p5, %p14104_p0 }
  0xf8   : > { %p13173_p8 = por %p13172_p7, %p13171_p10 }
  0xf9   : > { %p13167_p9 = pneg %p13166_p6 }
  0xfb   : > { %p13174_p11 = pnand %p13173_p8, %p13167_p9 }
  0xfd   : > { %13177 = shalt.err (!%p13174_p11)
}
  0xfe   : > { %12453 = dma.hbm_to_vmem [thread:$0]  (!%p14092_p12), %s13940_s24, 16, %s1709_s26, [#allocation16]  }
  0xff   : > { %s13178_s27 = scalar_lea.hbm %s13950_s30, 16 }
 0x100   : > { %p13179_p13 = scmp.ne.s32.totalorder %s13950_s30, %s13178_s27  ;;  %p13185_p3 = scmp.lt.u32.totalorder %s13178_s27, %s13950_s30 }
 0x102   : > { %p13181_p1 = pnand %p13179_p13, %p14104_p0 }
 0x104   : > { %p13182_p2 = pneg %p13181_p1 }
 0x106   : > { %p13187_p4 = pnand %p13185_p3, %p13182_p2 }
 0x108   : > { %13190 = shalt.err (!%p13187_p4)
}
 0x109   : > { %s13191_s2 = scalar_lea.vmem %s1731_s17, 16  ;;  %s13198_s7 = scalar_lea.vmem %s1731_s17, 32 }
 0x10a   : > { %p13192_p5 = scmp.ne.s32.totalorder %s1731_s17, %s13191_s2  ;;  %p13199_p10 = scmp.lt.s32.totalorder %s1731_s17, %s1731_s17 }
 0x10b   : > { %p13200_p7 = scmp.lt.s32.totalorder %s13198_s7, %s13191_s2 }
 0x10c   : > { %p13194_p6 = pnand %p13192_p5, %p14104_p0 }
 0x10d   : > { %p13201_p8 = por %p13200_p7, %p13199_p10 }
 0x10e   : > { %p13195_p9 = pneg %p13194_p6 }
 0x110   : > { %p13202_p11 = pnand %p13201_p8, %p13195_p9 }
 0x112   : > { %13205 = shalt.err (!%p13202_p11)
}
 0x113   : > { %12459 = dma.hbm_to_vmem [thread:$0]  (!%p14092_p12), %s13950_s30, 16, %s1731_s17, [#allocation19]  }
 0x114   : > { %s13682_s26 = smov [#allocation21]   ;;  %s13683_s16 = smov [#allocation24]  }
 0x115   : > { %s1752_s28 = sshll.u32 %s13682_s26, 4  ;;  %s1789_s1 = sshll.u32 %s13683_s16, 4  ;;  %s1753_s28 = int_to_ptr.vmem [resolvable:$true] %s1752_s28  ;;  %s1790_s1 = int_to_ptr.vmem [resolvable:$true] %s1789_s1 }
 0x116   : > { %s13206_s27 = scalar_lea.hbm %s13960_s19, 16 }
 0x117   : > { %p13207_p13 = scmp.ne.s32.totalorder %s13960_s19, %s13206_s27  ;;  %p13213_p3 = scmp.lt.u32.totalorder %s13206_s27, %s13960_s19 }
 0x119   : > { %p13209_p1 = pnand %p13207_p13, %p14104_p0 }
 0x11b   : > { %p13210_p2 = pneg %p13209_p1 }
 0x11d   : > { %p13215_p4 = pnand %p13213_p3, %p13210_p2 }
 0x11f   : > { %13218 = shalt.err (!%p13215_p4)
}
 0x120   : > { %s13219_s2 = scalar_lea.vmem %s1753_s28, 16  ;;  %s13226_s17 = scalar_lea.vmem %s1753_s28, 32 }
 0x121   : > { %p13220_p5 = scmp.ne.s32.totalorder %s1753_s28, %s13219_s2  ;;  %p13227_p10 = scmp.lt.s32.totalorder %s1753_s28, %s1753_s28 }
 0x122   : > { %p13228_p7 = scmp.lt.s32.totalorder %s13226_s17, %s13219_s2 }
 0x123   : > { %p13222_p6 = pnand %p13220_p5, %p14104_p0 }
 0x124   : > { %p13229_p8 = por %p13228_p7, %p13227_p10 }
 0x125   : > { %p13223_p9 = pneg %p13222_p6 }
 0x127   : > { %p13230_p11 = pnand %p13229_p8, %p13223_p9 }
 0x129   : > { %13233 = shalt.err (!%p13230_p11)
}
 0x12a   : > { %12465 = dma.hbm_to_vmem [thread:$0]  (!%p14092_p12), %s13960_s19, 16, %s1753_s28, [#allocation22]  }
 0x12b   : > { %s13234_s7 = scalar_lea.hbm %s15916_s3, 16 }
 0x12c   : > { %p13235_p13 = scmp.ne.s32.totalorder %s15916_s3, %s13234_s7  ;;  %p13241_p3 = scmp.lt.u32.totalorder %s13234_s7, %s15916_s3 }
 0x12e   : > { %p13237_p1 = pnand %p13235_p13, %p14104_p0 }
 0x130   : > { %p13238_p2 = pneg %p13237_p1 }
 0x132   : > { %p13243_p4 = pnand %p13241_p3, %p13238_p2 }
 0x134   : > { %13246 = shalt.err (!%p13243_p4)
}
 0x135   : > { %s13247_s26 = scalar_lea.vmem %s1790_s1, 16  ;;  %s13254_s16 = scalar_lea.vmem %s1790_s1, 32 }
 0x136   : > { %p13248_p5 = scmp.ne.s32.totalorder %s1790_s1, %s13247_s26  ;;  %p13255_p10 = scmp.lt.s32.totalorder %s1790_s1, %s1790_s1 }
 0x137   : > { %p13256_p7 = scmp.lt.s32.totalorder %s13254_s16, %s13247_s26 }
 0x138   : > { %p13250_p6 = pnand %p13248_p5, %p14104_p0 }
 0x139   : > { %p13257_p8 = por %p13256_p7, %p13255_p10 }
 0x13a   : > { %p13251_p9 = pneg %p13250_p6 }
 0x13c   : > { %p13258_p11 = pnand %p13257_p8, %p13251_p9 }
 0x13e   : > { %13261 = shalt.err (!%p13258_p11)
}
 0x13f   : > { %12471 = dma.hbm_to_vmem [thread:$0]  (!%p14092_p12), %s15916_s3, 16, %s1790_s1, [#allocation25]  }
 0x140   : > { %s13684_s28 = smov [#allocation3]   ;;  %s13685_s2 = smov [#allocation8]  }
 0x141   : > { %s1619_s27 = sshll.u32 %s13684_s28, 4  ;;  %s1641_s17 = sshll.u32 %s13685_s2, 4  ;;  %s1620_s27 = int_to_ptr.vmem [resolvable:$true] %s1619_s27  ;;  %s1642_s17 = int_to_ptr.vmem [resolvable:$true] %s1641_s17 }
 0x142   : > { %s13262_s7 = scalar_lea.hbm %s15915_s4, 16 }
 0x143   : > { %p13263_p13 = scmp.ne.s32.totalorder %s15915_s4, %s13262_s7  ;;  %p13269_p3 = scmp.lt.u32.totalorder %s13262_s7, %s15915_s4 }
 0x145   : > { %p13265_p1 = pnand %p13263_p13, %p14104_p0 }
 0x147   : > { %p13266_p2 = pneg %p13265_p1 }
 0x149   : > { %p13271_p4 = pnand %p13269_p3, %p13266_p2 }
 0x14b   : > { %13274 = shalt.err (!%p13271_p4)
}
 0x14c   : > { %s13275_s26 = scalar_lea.vmem %s1620_s27, 16  ;;  %s13282_s1 = scalar_lea.vmem %s1620_s27, 32 }
 0x14d   : > { %p13276_p5 = scmp.ne.s32.totalorder %s1620_s27, %s13275_s26  ;;  %p13283_p10 = scmp.lt.s32.totalorder %s1620_s27, %s1620_s27 }
 0x14e   : > { %p13284_p7 = scmp.lt.s32.totalorder %s13282_s1, %s13275_s26 }
 0x14f   : > { %p13278_p6 = pnand %p13276_p5, %p14104_p0 }
 0x150   : > { %p13285_p8 = por %p13284_p7, %p13283_p10 }
 0x151   : > { %p13279_p9 = pneg %p13278_p6 }
 0x153   : > { %p13286_p11 = pnand %p13285_p8, %p13279_p9 }
 0x155   : > { %13289 = shalt.err (!%p13286_p11)
}
 0x156   : > { %12432 = dma.hbm_to_vmem [thread:$0]  (!%p14092_p12), %s15915_s4, 16, %s1620_s27, [#allocation4]  }
 0x157   : > { %s13290_s16 = scalar_lea.hbm %s13895_s20, 16 }
 0x158   : > { %p13291_p13 = scmp.ne.s32.totalorder %s13895_s20, %s13290_s16  ;;  %p13297_p3 = scmp.lt.u32.totalorder %s13290_s16, %s13895_s20 }
 0x15a   : > { %p13293_p1 = pnand %p13291_p13, %p14104_p0 }
 0x15c   : > { %p13294_p2 = pneg %p13293_p1 }
 0x15e   : > { %p13299_p4 = pnand %p13297_p3, %p13294_p2 }
 0x160   : > { %13302 = shalt.err (!%p13299_p4)
}
 0x161   : > { %s13303_s28 = scalar_lea.vmem %s1642_s17, 16  ;;  %s13310_s2 = scalar_lea.vmem %s1642_s17, 32 }
 0x162   : > { %p13304_p5 = scmp.ne.s32.totalorder %s1642_s17, %s13303_s28  ;;  %p13311_p10 = scmp.lt.s32.totalorder %s1642_s17, %s1642_s17 }
 0x163   : > { %p13312_p7 = scmp.lt.s32.totalorder %s13310_s2, %s13303_s28 }
 0x164   : > { %p13306_p6 = pnand %p13304_p5, %p14104_p0 }
 0x165   : > { %p13313_p8 = por %p13312_p7, %p13311_p10 }
 0x166   : > { %p13307_p9 = pneg %p13306_p6 }
 0x168   : > { %p13314_p11 = pnand %p13313_p8, %p13307_p9 }
 0x16a   : > { %13317 = shalt.err (!%p13314_p11)
}
 0x16b   : > { %12438 = dma.hbm_to_vmem [thread:$0]  (!%p14092_p12), %s13895_s20, 16, %s1642_s17, [#allocation7]  }
 0x16c   : > { %s13686_s27 = smov [#allocation11]   ;;  %s13687_s26 = smov [#allocation14]  }
 0x16d   : > { %s1663_s7 = sshll.u32 %s13686_s27, 4  ;;  %s1694_s1 = sshll.u32 %s13687_s26, 4  ;;  %s1664_s7 = int_to_ptr.vmem [resolvable:$true] %s1663_s7  ;;  %s1695_s1 = int_to_ptr.vmem [resolvable:$true] %s1694_s1 }
 0x16e   : > { %s13318_s16 = scalar_lea.hbm %s15912_s9, 16 }
 0x16f   : > { %p13319_p13 = scmp.ne.s32.totalorder %s15912_s9, %s13318_s16  ;;  %p13325_p3 = scmp.lt.u32.totalorder %s13318_s16, %s15912_s9 }
 0x171   : > { %p13321_p1 = pnand %p13319_p13, %p14104_p0 }
 0x173   : > { %p13322_p2 = pneg %p13321_p1 }
 0x175   : > { %p13327_p4 = pnand %p13325_p3, %p13322_p2 }
 0x177   : > { %13330 = shalt.err (!%p13327_p4)
}
 0x178   : > { %s13331_s28 = scalar_lea.vmem %s1664_s7, 16  ;;  %s13338_s17 = scalar_lea.vmem %s1664_s7, 32 }
 0x179   : > { %p13332_p5 = scmp.ne.s32.totalorder %s1664_s7, %s13331_s28  ;;  %p13339_p10 = scmp.lt.s32.totalorder %s1664_s7, %s1664_s7 }
 0x17a   : > { %p13340_p7 = scmp.lt.s32.totalorder %s13338_s17, %s13331_s28 }
 0x17b   : > { %p13334_p6 = pnand %p13332_p5, %p14104_p0 }
 0x17c   : > { %p13341_p8 = por %p13340_p7, %p13339_p10 }
 0x17d   : > { %p13335_p9 = pneg %p13334_p6 }
 0x17f   : > { %p13342_p11 = pnand %p13341_p8, %p13335_p9 }
 0x181   : > { %13345 = shalt.err (!%p13342_p11)
}
 0x182   : > { %12444 = dma.hbm_to_vmem [thread:$0]  (!%p14092_p12), %s15912_s9, 16, %s1664_s7, [#allocation10]  }
 0x183   : > { %s13346_s2 = scalar_lea.hbm %s15913_s8, 16 }
 0x184   : > { %p13347_p13 = scmp.ne.s32.totalorder %s15913_s8, %s13346_s2  ;;  %p13353_p3 = scmp.lt.u32.totalorder %s13346_s2, %s15913_s8 }
 0x186   : > { %p13349_p1 = pnand %p13347_p13, %p14104_p0 }
 0x188   : > { %p13350_p2 = pneg %p13349_p1 }
 0x18a   : > { %p13355_p4 = pnand %p13353_p3, %p13350_p2 }
 0x18c   : > { %13358 = shalt.err (!%p13355_p4)
}
 0x18d   : > { %s13359_s27 = scalar_lea.vmem %s1695_s1, 16  ;;  %s13366_s26 = scalar_lea.vmem %s1695_s1, 32 }
 0x18e   : > { %p13360_p5 = scmp.ne.s32.totalorder %s1695_s1, %s13359_s27  ;;  %p13367_p10 = scmp.lt.s32.totalorder %s1695_s1, %s1695_s1 }
 0x18f   : > { %p13368_p7 = scmp.lt.s32.totalorder %s13366_s26, %s13359_s27 }
 0x190   : > { %p13362_p6 = pnand %p13360_p5, %p14104_p0 }
 0x191   : > { %p13369_p8 = por %p13368_p7, %p13367_p10 }
 0x192   : > { %p13363_p9 = pneg %p13362_p6 }
 0x194   : > { %p13370_p11 = pnand %p13369_p8, %p13363_p9 }
 0x196   : > { %13373 = shalt.err (!%p13370_p11)
}
 0x197   : > { %12450 = dma.hbm_to_vmem [thread:$0]  (!%p14092_p12), %s15913_s8, 16, %s1695_s1, [#allocation13]  }
 0x198   : > { %s13688_s7 = smov [#allocation17]   ;;  %s13689_s28 = smov [#allocation20]  }
 0x199   : > { %s1719_s16 = sshll.u32 %s13688_s7, 4  ;;  %s1741_s17 = sshll.u32 %s13689_s28, 4  ;;  %s1720_s16 = int_to_ptr.vmem [resolvable:$true] %s1719_s16  ;;  %s1742_s17 = int_to_ptr.vmem [resolvable:$true] %s1741_s17 }
 0x19a   : > { %s13374_s2 = scalar_lea.hbm %s13945_s13, 16 }
 0x19b   : > { %p13375_p13 = scmp.ne.s32.totalorder %s13945_s13, %s13374_s2  ;;  %p13381_p3 = scmp.lt.u32.totalorder %s13374_s2, %s13945_s13 }
 0x19d   : > { %p13377_p1 = pnand %p13375_p13, %p14104_p0 }
 0x19f   : > { %p13378_p2 = pneg %p13377_p1 }
 0x1a1   : > { %p13383_p4 = pnand %p13381_p3, %p13378_p2 }
 0x1a3   : > { %13386 = shalt.err (!%p13383_p4)
}
 0x1a4   : > { %s13387_s27 = scalar_lea.vmem %s1720_s16, 16  ;;  %s13394_s1 = scalar_lea.vmem %s1720_s16, 32 }
 0x1a5   : > { %p13388_p5 = scmp.ne.s32.totalorder %s1720_s16, %s13387_s27  ;;  %p13395_p10 = scmp.lt.s32.totalorder %s1720_s16, %s1720_s16 }
 0x1a6   : > { %p13396_p7 = scmp.lt.s32.totalorder %s13394_s1, %s13387_s27 }
 0x1a7   : > { %p13390_p6 = pnand %p13388_p5, %p14104_p0 }
 0x1a8   : > { %p13397_p8 = por %p13396_p7, %p13395_p10 }
 0x1a9   : > { %p13391_p9 = pneg %p13390_p6 }
 0x1ab   : > { %p13398_p11 = pnand %p13397_p8, %p13391_p9 }
 0x1ad   : > { %13401 = shalt.err (!%p13398_p11)
}
 0x1ae   : > { %12456 = dma.hbm_to_vmem [thread:$0]  (!%p14092_p12), %s13945_s13, 16, %s1720_s16, [#allocation16]  }
 0x1af   : > { %s13402_s26 = scalar_lea.hbm %s13955_s14, 16 }
 0x1b0   : > { %p13403_p13 = scmp.ne.s32.totalorder %s13955_s14, %s13402_s26  ;;  %p13409_p3 = scmp.lt.u32.totalorder %s13402_s26, %s13955_s14 }
 0x1b2   : > { %p13405_p1 = pnand %p13403_p13, %p14104_p0 }
 0x1b4   : > { %p13406_p2 = pneg %p13405_p1 }
 0x1b6   : > { %p13411_p4 = pnand %p13409_p3, %p13406_p2 }
 0x1b8   : > { %13414 = shalt.err (!%p13411_p4)
}
 0x1b9   : > { %s13415_s7 = scalar_lea.vmem %s1742_s17, 16  ;;  %s13422_s28 = scalar_lea.vmem %s1742_s17, 32 }
 0x1ba   : > { %p13416_p5 = scmp.ne.s32.totalorder %s1742_s17, %s13415_s7  ;;  %p13423_p10 = scmp.lt.s32.totalorder %s1742_s17, %s1742_s17 }
 0x1bb   : > { %p13424_p7 = scmp.lt.s32.totalorder %s13422_s28, %s13415_s7 }
 0x1bc   : > { %p13418_p6 = pnand %p13416_p5, %p14104_p0 }
 0x1bd   : > { %p13425_p8 = por %p13424_p7, %p13423_p10 }
 0x1be   : > { %p13419_p9 = pneg %p13418_p6 }
 0x1c0   : > { %p13426_p11 = pnand %p13425_p8, %p13419_p9 }
 0x1c2   : > { %13429 = shalt.err (!%p13426_p11)
}
 0x1c3   : > { %12462 = dma.hbm_to_vmem [thread:$0]  (!%p14092_p12), %s13955_s14, 16, %s1742_s17, [#allocation19]  }
 0x1c4   : > { %s13690_s16 = smov [#allocation23]   ;;  %s13691_s27 = smov [#allocation26]  }
 0x1c5   : > { %s1775_s2 = sshll.u32 %s13690_s16, 4  ;;  %s1806_s1 = sshll.u32 %s13691_s27, 4  ;;  %s1776_s2 = int_to_ptr.vmem [resolvable:$true] %s1775_s2  ;;  %s1807_s1 = int_to_ptr.vmem [resolvable:$true] %s1806_s1 }
 0x1c6   : > { %s13430_s26 = scalar_lea.hbm %s13985_s25, 16 }
 0x1c7   : > { %p13431_p13 = scmp.ne.s32.totalorder %s13985_s25, %s13430_s26  ;;  %p13437_p3 = scmp.lt.u32.totalorder %s13430_s26, %s13985_s25 }
 0x1c9   : > { %p13433_p1 = pnand %p13431_p13, %p14104_p0 }
 0x1cb   : > { %p13434_p2 = pneg %p13433_p1 }
 0x1cd   : > { %p13439_p4 = pnand %p13437_p3, %p13434_p2 }
 0x1cf   : > { %13442 = shalt.err (!%p13439_p4)
}
 0x1d0   : > { %s13443_s7 = scalar_lea.vmem %s1776_s2, 16  ;;  %s13450_s17 = scalar_lea.vmem %s1776_s2, 32 }
 0x1d1   : > { %p13444_p5 = scmp.ne.s32.totalorder %s1776_s2, %s13443_s7  ;;  %p13451_p10 = scmp.lt.s32.totalorder %s1776_s2, %s1776_s2 }
 0x1d2   : > { %p13452_p7 = scmp.lt.s32.totalorder %s13450_s17, %s13443_s7 }
 0x1d3   : > { %p13446_p6 = pnand %p13444_p5, %p14104_p0 }
 0x1d4   : > { %p13453_p8 = por %p13452_p7, %p13451_p10 }
 0x1d5   : > { %p13447_p9 = pneg %p13446_p6 }
 0x1d7   : > { %p13454_p11 = pnand %p13453_p8, %p13447_p9 }
 0x1d9   : > { %13457 = shalt.err (!%p13454_p11)
}
 0x1da   : > { %s15928_s28 = sld [smem:[#allocation90_spill]] }
 0x1db   : > { %12468 = dma.hbm_to_vmem [thread:$0]  (!%p14092_p12), %s13985_s25, 16, %s1776_s2, [#allocation22]  }
 0x1e0   : > { %s13458_s16 = scalar_lea.hbm %s15928_s28, 16 }
 0x1e1   : > { %p13459_p13 = scmp.ne.s32.totalorder %s15928_s28, %s13458_s16  ;;  %p13465_p3 = scmp.lt.u32.totalorder %s13458_s16, %s15928_s28 }
 0x1e3   : > { %p13461_p1 = pnand %p13459_p13, %p14104_p0 }
 0x1e5   : > { %p13462_p2 = pneg %p13461_p1 }
 0x1e7   : > { %p13467_p4 = pnand %p13465_p3, %p13462_p2 }
 0x1e9   : > { %13470 = shalt.err (!%p13467_p4)
}
 0x1ea   : > { %s13471_s27 = scalar_lea.vmem %s1807_s1, 16  ;;  %s13478_s26 = scalar_lea.vmem %s1807_s1, 32 }
 0x1eb   : > { %p13472_p5 = scmp.ne.s32.totalorder %s1807_s1, %s13471_s27  ;;  %p13479_p10 = scmp.lt.s32.totalorder %s1807_s1, %s1807_s1 }
 0x1ec   : > { %p13480_p7 = scmp.lt.s32.totalorder %s13478_s26, %s13471_s27 }
 0x1ed   : > { %p13474_p6 = pnand %p13472_p5, %p14104_p0 }
 0x1ee   : > { %p13481_p8 = por %p13480_p7, %p13479_p10 }
 0x1ef   : > { %p13475_p9 = pneg %p13474_p6 }
 0x1f1   : > { %p13482_p11 = pnand %p13481_p8, %p13475_p9 }
 0x1f3   : > { %13485 = shalt.err (!%p13482_p11)
}
 0x1f4   : > { %s15929_s2 = sld [smem:[#allocation91_spill]]  ;;  %s13692_s7 = smov [#allocation27]  }
 0x1f5   : > { %12474 = dma.hbm_to_vmem [thread:$0]  (!%p14092_p12), %s15928_s28, 16, %s1807_s1, [#allocation25]  }
 0x1f6   : > { %s1817_s17 = sshll.u32 %s13692_s7, 4  ;;  %s1818_s17 = int_to_ptr.vmem [resolvable:$true] %s1817_s17 }
 0x1fa   : > { %s13486_s16 = scalar_lea.hbm %s15929_s2, 16 }
 0x1fb   : > { %p13487_p13 = scmp.ne.s32.totalorder %s15929_s2, %s13486_s16  ;;  %p13493_p3 = scmp.lt.u32.totalorder %s13486_s16, %s15929_s2 }
 0x1fd   : > { %p13489_p1 = pnand %p13487_p13, %p14104_p0 }
 0x1ff   : > { %p13490_p2 = pneg %p13489_p1 }
 0x201   : > { %p13495_p4 = pnand %p13493_p3, %p13490_p2 }
 0x203   : > { %13498 = shalt.err (!%p13495_p4)
}
 0x204   : > { %s13499_s27 = scalar_lea.vmem %s1818_s17, 16  ;;  %s13506_s26 = scalar_lea.vmem %s1818_s17, 32 }
 0x205   : > { %p13500_p5 = scmp.ne.s32.totalorder %s1818_s17, %s13499_s27  ;;  %p13507_p10 = scmp.lt.s32.totalorder %s1818_s17, %s1818_s17 }
 0x206   : > { %p13508_p7 = scmp.lt.s32.totalorder %s13506_s26, %s13499_s27 }
 0x207   : > { %p13502_p6 = pnand %p13500_p5, %p14104_p0 }
 0x208   : > { %p13509_p8 = por %p13508_p7, %p13507_p10 }
 0x209   : > { %p13503_p9 = pneg %p13502_p6 }
 0x20b   : > { %p13510_p11 = pnand %p13509_p8, %p13503_p9 }
 0x20d   : > { %13513 = shalt.err (!%p13510_p11)
}
 0x20e   : > { %12477 = dma.hbm_to_vmem [thread:$0]  (!%p14092_p12), %s15929_s2, 16, %s1818_s17, [#allocation28]  }
 0x20f   : > { %p15930_p13 = scmp.ne.s32.totalorder %s15925_s15, 0 }
 0x210   : > { %p15931_p1 = scmp.eq.s32.totalorder (!%p15930_p13), %s14056_s29, 0 }
 0x211   : > { %1847 = sbr.rel (%p15930_p13) target bundleno = 17491 (0x4453), region = 272 }
 0x218   : > { %13559 = dma.done.wait (%p15931_p1), [#allocation4], 16   ;;  %p15932_p2 = pmov %p15931_p1 }
 0x219   : > { %p15933_p0 = pmov %p15931_p1 }
 0x21a   : > { %13561 = vsyncadd (%p15932_p2), [#allocation4], 4294967280 }
 0x21b   : > { %13563 = dma.done.wait (%p15933_p0), [#allocation7], 32   ;;  %p15934_p3 = pmov %p15933_p0 }
 0x21c   : > { %p15935_p4 = pmov %p15933_p0 }
 0x21d   : > { %13565 = vsyncadd (%p15934_p3), [#allocation7], 4294967264 }
 0x21e   : > { %13567 = dma.done.wait (%p15935_p4), [#allocation10], 32   ;;  %p15936_p12 = pmov %p15933_p0 }
 0x21f   : > { %p15937_p5 = pmov %p15933_p0 }
 0x220   : > { %13569 = vsyncadd (%p15936_p12), [#allocation10], 4294967264 }
 0x221   : > { %13571 = dma.done.wait (%p15937_p5), [#allocation13], 32   ;;  %p15938_p6 = pmov %p15933_p0 }
 0x222   : > { %p15939_p9 = pmov %p15933_p0 }
 0x223   : > { %13573 = vsyncadd (%p15938_p6), [#allocation13], 4294967264 }
 0x224   : > { %13575 = dma.done.wait (%p15939_p9), [#allocation16], 32   ;;  %p15940_p10 = pmov %p15933_p0 }
 0x225   : > { %p15941_p7 = pmov %p15933_p0 }
 0x226   : > { %13577 = vsyncadd (%p15940_p10), [#allocation16], 4294967264 }
 0x227   : > { %13579 = dma.done.wait (%p15941_p7), [#allocation19], 32   ;;  %p15942_p8 = pmov %p15933_p0 }
 0x228   : > { %p15943_p11 = pmov %p15933_p0 }
 0x229   : > { %13581 = vsyncadd (%p15942_p8), [#allocation19], 4294967264 }
 0x22a   : > { %13583 = dma.done.wait (%p15943_p11), [#allocation22], 32   ;;  %p15944_p13 = pmov %p15933_p0 }
 0x22b   : > { %p15945_p1 = pmov %p15933_p0 }
 0x22c   : > { %13585 = vsyncadd (%p15944_p13), [#allocation22], 4294967264 }
 0x22d   : > { %13587 = dma.done.wait (%p15945_p1), [#allocation25], 32   ;;  %p15946_p2 = pmov %p15933_p0 }
 0x22f   : > { %13589 = vsyncadd (%p15946_p2), [#allocation25], 4294967264 }
 0x230   : > { %13591 = dma.done.wait (%p15933_p0), [#allocation28], 16   ;;  %p15947_p3 = pmov %p15933_p0 }
 0x231   : > { %s15948_s10 = sld [smem:[#allocation40_spill]]  ;;  %p2050_p4 = scmp.lt.s32.totalorder %s14056_s29, 1  ;;  %vm2061_vm0 = vcmask 130048   ;;  %v2057_v1 = vld [vmem:[%s15911_s12] sm:$0xff]  ;;  %v2058_v2 = vld [vmem:[%s15911_s12 + $0x8] sm:$0xff]  ;;  %vm2143_vm1 = vcmask 261120  }
 0x232   : > { %13593 = vsyncadd (%p15947_p3), [#allocation28], 4294967280  ;;  %v11863_v4 = vpack.c.bf16 %v2058_v2, %v2057_v1  ;;  %v2059_v6 = vld [vmem:[%s15914_s6] sm:$0xff]  ;;  %v2060_v8 = vld [vmem:[%s15914_s6 + $0x8] sm:$0xff]  ;;  %s15949_s7 = sld [smem:[#allocation53_spill]]  ;;  %s15950_s17 = sld [smem:[#allocation54_spill]] }
 0x233   : > { %s2051_s15 = scalar_select %p2050_p4, %s14056_s29, 1  ;;  %vm2373_vm2 = vcmask 64512   ;;  %vm5587_vm4 = vcmask 253952   ;;  %vm13705_vm5 = vmmov 0   ;;  %vm5840_vm6 = vcmask 138240  }
 0x234   : > { %11864 = vmatprep.subr.bf16.mxu1 %v11863_v4  ;;  %s15951_s16 = sld [smem:[#allocation47_spill]]  ;;  %s15952_s27 = sld [smem:[#allocation46_spill]]  ;;  %vm14373_vm3 = vmpackc.low %vm2373_vm2, %vm2373_vm2  ;;  %vm5847_vm7 = vcmask 131072   ;;  %vm5892_vm8 = vcmask 1040384  }
 0x235   : > { %s10591_s18 = sshll.u32 %s2051_s15, 4  ;;  %11866 = vmatpush3.bf16.msra.mxu1 %v11863_v4  ;;  %s15815_s26 = smov 88  }
 0x236   : > { %s15823_s15 = smov 120   ;;  %s15970_s2 = sld [smem:[#allocation60_spill]] }
 0x237   : > { %s2054_s1 = scalar_lea.vmem %s15948_s10, %s10591_s18  ;;  %s15825_s10 = smov 96  }
 0x238   : > { %v2055_v3 = vld [vmem:[%s2054_s1] sm:$0xff]  ;;  %v2056_v5 = vld [vmem:[%s2054_s1 + $0x8] sm:$0xff]  ;;  %v2191_v29 = vld [vmem:[%s15949_s7 + $0x10] sm:$0xff]  ;;  %s15955_s18 = sld [smem:[#allocation45_spill]]  ;;  %s15813_s1 = smov 80  }
 0x239   : > { %11094 = vmatprep.mubr.msk.f32.mxu1 %vm2061_vm0, %v2055_v3  ;;  %v2189_v24 = vld [vmem:[%s15949_s7] sm:$0xff]  ;;  %v2190_v25 = vld [vmem:[%s15949_s7 + $0x8] sm:$0xff]  ;;  %v2192_v30 = vld [vmem:[%s15949_s7 + $0x18] sm:$0xff]  ;;  %s15977_s4 = smov 112   ;;  %s15978_s6 = smov 80  }
 0x23a   : > { %11095 = vmatmul.mubr.msk.f32.vlgmr.msra.gmra.mrb[0].mxu1 %vm2061_vm0, %v2056_v5  ;;  %v2274_v26 = vld [vmem:[%s15950_s17] sm:$0xff]  ;;  %v11867_v27 = vpack.c.bf16 %v2190_v25, %v2189_v24  ;;  %v2275_v28 = vld [vmem:[%s15950_s17 + $0x8] sm:$0xff]  ;;  %v11871_v32 = vpack.c.bf16 %v2192_v30, %v2191_v29  ;;  %v2276_v33 = vld [vmem:[%s15950_s17 + $0x10] sm:$0xff]  ;;  %s15979_s7 = sld [smem:[#allocation66_spill]]  ;;  %s15980_s8 = smov 72  }
 0x23b   : > { %v11875_v31 = vpack.c.bf16 %v2275_v28, %v2274_v26  ;;  %v2277_v34 = vld [vmem:[%s15950_s17 + $0x18] sm:$0xff]  ;;  %v10364_v43 = vld [vmem:[%s15951_s16] ss:$0 sm:$0xff]  ;;  %s15821_s16 = smov 112   ;;  %s15981_s9 = smov 104  }
 0x23c   : > { %11868 = vmatprep.subr.bf16.mxu1 %v11867_v27  ;;  %v11879_v35 = vpack.c.bf16 %v2277_v34, %v2276_v33  ;;  %v10365_v45 = vld [vmem:[%s15952_s27] ss:$0 sm:$0xff]  ;;  %s15956_s27 = sld [smem:[#allocation50_spill]]  ;;  %s15986_s12 = sld [smem:[#allocation62_spill]] }
 0x23d   : > { %11876 = vmatprep.subr.bf16.mxu0 %v11875_v31  ;;  %11870 = vmatpush3.bf16.msra.mxu1 %v11867_v27  ;;  %p16009_p5 = scmp.ne.s32.totalorder %s15922_s11, 0 }
 0x23e   : > { %11878 = vmatpush3.bf16.msra.mxu0 %v11875_v31  ;;  %11872 = vmatprep.subr.bf16.mxu1 %v11871_v32 }
 0x23f   : > { %11880 = vmatprep.subr.bf16.mxu0 %v11879_v35 }
 0x241   : > { %11874 = vmatpush3.bf16.msra.mxu1 %v11871_v32 }
 0x242   : > { %11882 = vmatpush3.bf16.msra.mxu0 %v11879_v35 }
 0x30d   : > { %v11096_v7 = vpop.f32.mrb[0].mxu1 }
 0x30e   : > { %v2134_v9 = vpop.f32.mrb[1].mxu1  ;;  %v14327_v11 = vadd.f32 %v11096_v7, %v2060_v8 }
 0x30f   : > { %v14325_v10 = vadd.f32 %v2134_v9, %v2059_v6  ;;  %v13696_v6 = vmov 0  }
 0x310   : > { %v2147_v13 = vsel %vm2143_vm1, %v14327_v11, 0.0  ;;  %12655 = vset.pattern.permute.xlu1 %v13696_v6  ;;  %12654 = vset.pattern.permute.xlu0 %v13696_v6 }
 0x311   : > { %v2144_v12 = vsel %vm2143_vm1, %v14325_v10, 0.0 }
 0x312   : > { %2145 = vadd.xlane.f32.xlu0 %v2144_v12 }
 0x316   : > { %2148 = vadd.xlane.f32.xlu0 %v2147_v13  ;;  %v2481_v13 = vlaneseq }
 0x39f   : > { %v2146_v14 = vpop.xlane.xlu0 %2145 }
 0x3a0   : > { %v2151_v15 = vmul.f32 0.03125, %v2146_v14  ;;  %v14393_v14 = vshrl.u32 %v2481_v13, 7 }
 0x3a2   : > { %v2153_v16 = vsub.f32 %v14325_v10, %v2151_v15 }
 0x3a3   : > { %v2149_v17 = vpop.xlane.xlu0 %2148 }
 0x3a4   : > { %v2152_v18 = vmul.f32 0.03125, %v2149_v17  ;;  %v2155_v19 = vmul.f32 %v2153_v16, %v2153_v16  ;;  %v14400_v17 = vsub.s32 0, %v14393_v14 }
 0x3a6   : > { %v2154_v20 = vsub.f32 %v14327_v11, %v2152_v18  ;;  %v2157_v21 = vsel %vm2143_vm1, %v2155_v19, 0.0  ;;  %v2353_v18 = vld [vmem:[%s15955_s18] sm:$0x1]  ;;  %s15957_s18 = sld [smem:[#allocation52_spill]] }
 0x3a7   : > { %2158 = vadd.xlane.f32.xlu1 %v2157_v21  ;;  %v14404_v19 = vrot.slane %v2353_v18, %v14400_v17 }
 0x3a8   : > { %v2156_v22 = vmul.f32 %v2154_v20, %v2154_v20 }
 0x3aa   : > { %v2160_v23 = vsel %vm2143_vm1, %v2156_v22, 0.0 }
 0x3ab   : > { %2161 = vadd.xlane.f32.xlu1 %v2160_v23 }
 0x434   : > { %v2159_v36 = vpop.xlane.xlu1 %2158 }
 0x435   : > { %v2163_v37 = vmul.f32 0.03125, %v2159_v36 }
 0x437   : > { %v2165_v38 = vadd.f32 1e-06, %v2163_v37  ;;  %v2479_v37 = vsub.f32 1.0, %v2353_v18 }
 0x438   : > { %v2162_v39 = vpop.xlane.xlu1 %2161 }
 0x439   : > { %12811 = vrsqrt.f32 %v2165_v38  ;;  %v2164_v40 = vmul.f32 0.03125, %v2162_v39  ;;  %v14422_v38 = vrot.slane %v2479_v37, %v14400_v17 }
 0x43b   : > { %v2166_v41 = vadd.f32 1e-06, %v2164_v40 }
 0x43d   : > { %12813 = vrsqrt.f32 %v2166_v41  ;;  %v2355_v41 = vld [vmem:[%s15956_s27 + $0x8] sm:$0xff] }
 0x443   : > { %v12812_v42 = vpop.eup %12811 }
 0x444   : > { %v2169_v44 = vmul.f32 %v12812_v42, %v2153_v16 }
 0x446   : > { %v2178_v46 = vmul.f32 %v10364_v43, %v2169_v44 }
 0x447   : > { %v12814_v47 = vpop.eup %12813 }
 0x448   : > { %v2170_v48 = vmul.f32 %v12814_v47, %v2154_v20  ;;  %v2187_v49 = vadd.f32 %v10365_v45, %v2178_v46  ;;  %v2354_v46 = vld [vmem:[%s15956_s27] sm:$0xff] }
 0x44a   : > { %v2179_v50 = vmul.f32 %v10364_v43, %v2170_v48  ;;  %11105 = vmatprep.mubr.msk.f32.mxu1 %vm2143_vm1, %v2187_v49  ;;  %11116 = vmatprep.mubr.msk.f32.mxu0 %vm2143_vm1, %v2187_v49 }
 0x44c   : > { %v2188_v51 = vadd.f32 %v10365_v45, %v2179_v50 }
 0x44e   : > { %11106 = vmatmul.mubr.msk.f32.vlgmr.msra.gmra.mrb[2].mxu1 %vm2143_vm1, %v2188_v51  ;;  %11117 = vmatmul.mubr.msk.f32.vlgmr.msra.gmra.mrb[0].mxu0 %vm2143_vm1, %v2188_v51 }
 0x521   : > { %v14351_v52 = vpop.f32.mrb[2].mxu1  ;;  %v11118_v53 = vpop.f32.mrb[0].mxu0 }
 0x522   : > { %v14353_v54 = vpop.f32.mrb[3].mxu1  ;;  %v2344_v55 = vpop.f32.mrb[1].mxu0 }
 0x523   : > { %11123 = vmatprep.mubr.msk.f32.mxu1 %vm2373_vm2, %v14353_v54  ;;  %v11889_v56 = vpack.c.bf16 %v11118_v53, %v2344_v55  ;;  %v14359_v57 = vpack.i.bf16 %v14351_v52, %v14353_v54  ;;  %v14361_v58 = vpack.i.bf16 %v11118_v53, %v2344_v55 }
 0x525   : > { %11890 = vmatprep.subr.bf16.mxu0 %v11889_v56  ;;  %12650 = vrot.lane.b32.xlu1 %v14359_v57, %s15815_s26  ;;  %s15819_s26 = smov 104  }
 0x526   : > { %12645 = vrot.lane.b32.xlu0 %v14359_v57, %s15825_s10  ;;  %11892 = vmatpush3.bf16.msra.mxu0 %v11889_v56  ;;  %s15963_s10 = sld [smem:[#allocation48_spill]] }
 0x529   : > { %2684 = vrot.lane.b32.xlu1 %v14353_v54, %s15823_s15 }
 0x52d   : > { %2686 = vrot.lane.b32.xlu1 %v14351_v52, %s15823_s15 }
 0x597   : > { %v12651_v59 = vpop.permute.xlu1 %12650 }
 0x598   : > { %v12646_v60 = vpop.permute.xlu0 %12645  ;;  %v12653_v61 = vunpack.i.h.bf16 %v12651_v59  ;;  %v12652_v62 = vunpack.i.l.bf16 %v12651_v59 }
 0x599   : > { %v12648_v63 = vunpack.i.h.bf16 %v12646_v60  ;;  %v12647_v0 = vunpack.i.l.bf16 %v12646_v60 }
 0x59a   : > { %v11893_v3 = vpack.c.bf16 %v12653_v61, %v12652_v62  ;;  %v13699_v62 = vmov 1  }
 0x59b   : > { %v11883_v2 = vpack.c.bf16 %v12648_v63, %v12647_v0  ;;  %v2685_v4 = vpop.permute.xlu1 %2684 }
 0x59d   : > { %11885 = vmatprep.subr.msk.bf16.mxu1 %vm14373_vm3, %v11883_v2 }
 0x59e   : > { %11888 = vmatpush3.bf16.xpose.msk.msra.mxu1 %vm14373_vm3, %v11883_v2 }
 0x59f   : > { %11895 = vmatprep.subr.msk.bf16.mxu1 %vm14373_vm3, %v11893_v3  ;;  %v2687_v5 = vpop.permute.xlu1 %2686 }
 0x5a5   : > { %11124 = vmatmul.mubr.msk.f32.vlgmr.msra.gmra.mrb[4].mxu1 %vm2373_vm2, %v14351_v52 }
 0x5a6   : > { %11898 = vmatpush3.bf16.xpose.msk.msra.mxu1 %vm14373_vm3, %v11893_v3  ;;  %11142 = vmatprep.mubr.msk.f32.mxu1 %vm2373_vm2, %v2685_v4 }
 0x5ad   : > { %11143 = vmatmul.mubr.msk.f32.vlgmr.msra.gmra.mrb[6].mxu1 %vm2373_vm2, %v2687_v5 }
 0x678   : > { %v11125_v7 = vpop.f32.mrb[4].mxu1 }
 0x679   : > { %v2448_v8 = vpop.f32.mrb[5].mxu1  ;;  %v2460_v9 = vsel %vm2061_vm0, %v11125_v7, -inf }
 0x67a   : > { %2461 = vmax.xlane.f32.xlu1 %v2460_v9  ;;  %v2457_v12 = vsel %vm2061_vm0, %v2448_v8, -inf }
 0x67b   : > { %2458 = vmax.xlane.f32.xlu0 %v2457_v12 }
 0x680   : > { %v14395_v15 = vpop.f32.mrb[6].mxu1 }
 0x681   : > { %v14397_v16 = vpop.f32.mrb[7].mxu1  ;;  %v2778_v61 = vsel %vm2061_vm0, %v14395_v15, -inf }
 0x682   : > { %v2775_v60 = vsel %vm2061_vm0, %v14397_v16, -inf }
 0x68b   : > { %2497 = vperm.xlu1 %12655, %v14404_v19  }
 0x68f   : > { %12657 = vrot.lane.b32.xlu1 %v14359_v57, %s15813_s1  ;;  %s15817_s1 = smov 72  }
 0x690   : > { %12661 = vset.pattern.permute.xlu1 %v13699_v62 }
 0x693   : > { %2993 = vrot.lane.b32.xlu1 %v14353_v54, %s15821_s16 }
 0x697   : > { %2995 = vrot.lane.b32.xlu1 %v14351_v52, %s15821_s16 }
 0x707   : > { %v2462_v20 = vpop.xlane.xlu1 %2461 }
 0x708   : > { %v2464_v21 = vsub.f32 %v11125_v7, %v2462_v20  ;;  %v2459_v22 = vpop.xlane.xlu0 %2458 }
 0x709   : > { %v2463_v23 = vsub.f32 %v2448_v8, %v2459_v22 }
 0x70a   : > { %v2467_v24 = vmul.f32 1.442695, %v2464_v21 }
 0x70b   : > { %v2465_v25 = vmul.f32 1.442695, %v2463_v23  ;;  %v2498_v26 = vpop.permute.xlu1 %2497 }
 0x70c   : > { %12815 = vpow2.f32 %v2467_v24  ;;  %v2501_v43 = vmul.f32 %v2498_v26, %v2355_v41  ;;  %v2500_v49 = vmul.f32 %v2498_v26, %v2354_v46 }
 0x70d   : > { %12817 = vpow2.f32 %v2465_v25 }
 0x70f   : > { %v12658_v27 = vpop.permute.xlu1 %12657 }
 0x710   : > { %v12660_v28 = vunpack.i.h.bf16 %v12658_v27  ;;  %v12659_v29 = vunpack.i.l.bf16 %v12658_v27 }
 0x712   : > { %v11903_v30 = vpack.c.bf16 %v12660_v28, %v12659_v29 }
 0x713   : > { %v2994_v31 = vpop.permute.xlu1 %2993 }
 0x714   : > { %11905 = vmatprep.subr.msk.bf16.mxu1 %vm14373_vm3, %v11903_v30  ;;  %11161 = vmatprep.mubr.msk.f32.mxu1 %vm2373_vm2, %v2994_v31 }
 0x715   : > { %11908 = vmatpush3.bf16.xpose.msk.msra.mxu1 %vm14373_vm3, %v11903_v30  ;;  %v2356_v30 = vld [vmem:[%s15956_s27 + $0x10] sm:$0xff] }
 0x716   : > { %v12816_v32 = vpop.eup %12815 }
 0x717   : > { %v2472_v33 = vsel %vm2061_vm0, %v12816_v32, 0.0  ;;  %v12818_v34 = vpop.eup %12817  ;;  %v2996_v35 = vpop.permute.xlu1 %2995 }
 0x718   : > { %2473 = vadd.xlane.f32.xlu0 %v2472_v33  ;;  %v2469_v36 = vsel %vm2061_vm0, %v12818_v34, 0.0 }
 0x71c   : > { %11162 = vmatmul.mubr.msk.f32.vlgmr.msra.gmra.mrb[8].mxu1 %vm2373_vm2, %v2996_v35  ;;  %2470 = vadd.xlane.f32.xlu0 %v2469_v36  ;;  %v2357_v35 = vld [vmem:[%s15956_s27 + $0x18] sm:$0xff] }
 0x732   : > { %2486 = vperm.xlu0 %12654, %v14422_v38  }
 0x736   : > { %12662 = vset.pattern.permute.xlu0 %v13699_v62 }
 0x7a5   : > { %v2474_v39 = vpop.xlane.xlu0 %2473 }
 0x7a6   : > { %12819 = vrcp.f32 %v2474_v39 }
 0x7a9   : > { %v2471_v40 = vpop.xlane.xlu0 %2470 }
 0x7aa   : > { %12821 = vrcp.f32 %v2471_v40 }
 0x7b0   : > { %v12820_v42 = vpop.eup %12819 }
 0x7b1   : > { %v2478_v44 = vmul.f32 %v12820_v42, %v12816_v32  ;;  %v2487_v45 = vpop.permute.xlu0 %2486 }
 0x7b3   : > { %v2490_v47 = vmul.f32 %v2487_v45, %v2478_v44 }
 0x7b4   : > { %v12822_v48 = vpop.eup %12821 }
 0x7b5   : > { %v2477_v50 = vmul.f32 %v12822_v48, %v12818_v34  ;;  %v2503_v51 = vadd.f32 %v2501_v43, %v2490_v47 }
 0x7b7   : > { %v2489_v53 = vmul.f32 %v2487_v45, %v2477_v50  ;;  %v2507_v55 = vsel %vm2061_vm0, %v2503_v51, 0.0 }
 0x7b8   : > { %2508 = vadd.xlane.f32.xlu0 %v2507_v55 }
 0x7b9   : > { %v2502_v56 = vadd.f32 %v2500_v49, %v2489_v53  ;;  %v13702_v49 = vmov 2  }
 0x7bb   : > { %v2504_v59 = vsel %vm2061_vm0, %v2502_v56, 0.0 }
 0x7bc   : > { %2505 = vadd.xlane.f32.xlu1 %v2504_v59 }
 0x7c0   : > { %2776 = vmax.xlane.f32.xlu1 %v2775_v60 }
 0x7c4   : > { %2779 = vmax.xlane.f32.xlu1 %v2778_v61 }
 0x7ef   : > { %v14435_v63 = vpop.f32.mrb[8].mxu1 }
 0x7f0   : > { %v14437_v0 = vpop.f32.mrb[9].mxu1  ;;  %v3087_v48 = vsel %vm2061_vm0, %v14435_v63, -inf }
 0x7f1   : > { %v3084_v47 = vsel %vm2061_vm0, %v14437_v0, -inf }
 0x845   : > { %v2509_v2 = vpop.xlane.xlu0 %2508 }
 0x846   : > { %12823 = vrcp.f32 %v2509_v2 }
 0x849   : > { %v2506_v3 = vpop.xlane.xlu1 %2505 }
 0x84a   : > { %12825 = vrcp.f32 %v2506_v3 }
 0x84d   : > { %v2777_v4 = vpop.xlane.xlu1 %2776 }
 0x84e   : > { %v2781_v5 = vsub.f32 %v14397_v16, %v2777_v4 }
 0x850   : > { %v2783_v7 = vmul.f32 1.442695, %v2781_v5  ;;  %v12824_v12 = vpop.eup %12823 }
 0x851   : > { %v2780_v8 = vpop.xlane.xlu1 %2779  ;;  %v2513_v21 = vmul.f32 %v12824_v12, %v2503_v51 }
 0x852   : > { %12827 = vpow2.f32 %v2783_v7  ;;  %v2782_v9 = vsub.f32 %v14395_v15, %v2780_v8  ;;  %v2362_v15 = vld [vmem:[%s15957_s18] sm:$0xff] }
 0x853   : > { %11133 = vmatprep.subr.mxu0 %v2362_v15 }
 0x854   : > { %v12826_v13 = vpop.eup %12825  ;;  %v2785_v18 = vmul.f32 1.442695, %v2782_v9 }
 0x855   : > { %v2512_v20 = vmul.f32 %v12826_v13, %v2502_v56 }
 0x856   : > { %12829 = vpow2.f32 %v2785_v18 }
 0x857   : > { %11130 = vmatprep.mubr.msk.f32.mxu0 %vm2061_vm0, %v2512_v20 }
 0x858   : > { %11131 = vmatmul.mubr.msk.f32.vlgmr.msra.gmra.mrb[2].mxu0 %vm2061_vm0, %v2513_v21 }
 0x859   : > { %11134 = vmatpush3.msra.mxu0 %v2362_v15 }
 0x85c   : > { %v12828_v22 = vpop.eup %12827 }
 0x85d   : > { %v2787_v23 = vsel %vm2061_vm0, %v12828_v22, 0.0 }
 0x85e   : > { %2788 = vadd.xlane.f32.xlu1 %v2787_v23 }
 0x860   : > { %v12830_v16 = vpop.eup %12829 }
 0x861   : > { %v2790_v24 = vsel %vm2061_vm0, %v12830_v16, 0.0 }
 0x862   : > { %2791 = vadd.xlane.f32.xlu0 %v2790_v24 }
 0x86f   : > { %2798 = vperm.xlu1 %12661, %v14422_v38  }
 0x873   : > { %12664 = vrot.lane.b32.xlu1 %v14359_v57, %s15817_s1  ;;  %s15958_s1 = sld [smem:[#allocation51_spill]] }
 0x874   : > { %12674 = vset.pattern.permute.xlu1 %v13702_v49 }
 0x877   : > { %3300 = vrot.lane.b32.xlu1 %v14353_v54, %s15819_s26 }
 0x878   : > { %2804 = vperm.xlu0 %12662, %v14404_v19  }
 0x87b   : > { %3302 = vrot.lane.b32.xlu1 %v14351_v52, %s15819_s26 }
 0x87c   : > { %12673 = vset.pattern.permute.xlu0 %v13702_v49 }
 0x8eb   : > { %v2789_v25 = vpop.xlane.xlu1 %2788 }
 0x8ec   : > { %12831 = vrcp.f32 %v2789_v25  ;;  %v2358_v25 = vld [vmem:[%s15956_s27 + $0x20] sm:$0xff] }
 0x8ef   : > { %v2792_v26 = vpop.xlane.xlu0 %2791  ;;  %v2799_v27 = vpop.permute.xlu1 %2798 }
 0x8f0   : > { %12833 = vrcp.f32 %v2792_v26 }
 0x8f3   : > { %v12665_v57 = vpop.permute.xlu1 %12664 }
 0x8f4   : > { %v12667_v28 = vunpack.i.h.bf16 %v12665_v57  ;;  %v12666_v29 = vunpack.i.l.bf16 %v12665_v57 }
 0x8f6   : > { %v12832_v31 = vpop.eup %12831  ;;  %v11913_v54 = vpack.c.bf16 %v12667_v28, %v12666_v29 }
 0x8f7   : > { %v2795_v32 = vmul.f32 %v12832_v31, %v12828_v22  ;;  %v3301_v33 = vpop.permute.xlu1 %3300  ;;  %v2805_v34 = vpop.permute.xlu0 %2804 }
 0x8f8   : > { %v2807_v52 = vmul.f32 %v2805_v34, %v2356_v30  ;;  %11915 = vmatprep.subr.msk.bf16.mxu1 %vm14373_vm3, %v11913_v54  ;;  %11180 = vmatprep.mubr.msk.f32.mxu1 %vm2373_vm2, %v3301_v33  ;;  %v2808_v40 = vmul.f32 %v2805_v34, %v2357_v35  ;;  %v2359_v30 = vld [vmem:[%s15956_s27 + $0x28] sm:$0xff] }
 0x8f9   : > { %v2801_v36 = vmul.f32 %v2799_v27, %v2795_v32  ;;  %11918 = vmatpush3.bf16.xpose.msk.msra.mxu1 %vm14373_vm3, %v11913_v54 }
 0x8fa   : > { %v12834_v37 = vpop.eup %12833 }
 0x8fb   : > { %v2796_v39 = vmul.f32 %v12834_v37, %v12830_v16  ;;  %v2809_v41 = vadd.f32 %v2807_v52, %v2801_v36  ;;  %v3303_v44 = vpop.permute.xlu1 %3302  ;;  %v2363_v16 = vld [vmem:[%s15957_s18 + $0x8] sm:$0xff] }
 0x8fd   : > { %v2802_v42 = vmul.f32 %v2799_v27, %v2796_v39  ;;  %v2811_v43 = vsel %vm2061_vm0, %v2809_v41, 0.0 }
 0x8fe   : > { %2812 = vadd.xlane.f32.xlu1 %v2811_v43 }
 0x8ff   : > { %v2810_v45 = vadd.f32 %v2808_v40, %v2802_v42 }
 0x900   : > { %11181 = vmatmul.mubr.msk.f32.vlgmr.msra.gmra.mrb[10].mxu1 %vm2373_vm2, %v3303_v44 }
 0x901   : > { %v2814_v46 = vsel %vm2061_vm0, %v2810_v45, 0.0 }
 0x902   : > { %2815 = vadd.xlane.f32.xlu0 %v2814_v46 }
 0x906   : > { %3085 = vmax.xlane.f32.xlu0 %v3084_v47 }
 0x90a   : > { %3088 = vmax.xlane.f32.xlu0 %v3087_v48 }
 0x90f   : > { %12669 = vrot.lane.b32.xlu1 %v14361_v58, %s15823_s15  ;;  %s15962_s15 = sld [smem:[#allocation49_spill]] }
 0x92b   : > { %v11132_v50 = vpop.f32.mrb[2].mxu0 }
 0x92c   : > { %v2586_v51 = vpop.f32.mrb[3].mxu0 }
 0x92d   : > { %11135 = vmatprep.mubr.msk.f32.mxu0 %vm2373_vm2, %v2586_v51 }
 0x92e   : > { %11136 = vmatmul.mubr.msk.f32.vlgmr.msra.gmra.mrb[4].mxu0 %vm2373_vm2, %v11132_v50 }
 0x98b   : > { %v2813_v53 = vpop.xlane.xlu1 %2812 }
 0x98c   : > { %12835 = vrcp.f32 %v2813_v53 }
 0x98f   : > { %v2816_v55 = vpop.xlane.xlu0 %2815  ;;  %v12670_v56 = vpop.permute.xlu1 %12669 }
 0x990   : > { %12837 = vrcp.f32 %v2816_v55  ;;  %v12672_v59 = vunpack.i.h.bf16 %v12670_v56  ;;  %v12671_v60 = vunpack.i.l.bf16 %v12670_v56 }
 0x992   : > { %v11899_v61 = vpack.c.bf16 %v12672_v59, %v12671_v60 }
 0x993   : > { %v3086_v2 = vpop.xlane.xlu0 %3085 }
 0x994   : > { %v3090_v3 = vsub.f32 %v14437_v0, %v3086_v2  ;;  %11900 = vmatprep.subr.bf16.mxu0 %v11899_v61 }
 0x995   : > { %11902 = vmatpush3.bf16.msra.mxu0 %v11899_v61 }
 0x996   : > { %v12836_v4 = vpop.eup %12835  ;;  %v3092_v5 = vmul.f32 1.442695, %v3090_v3  ;;  %11152 = vmatprep.subr.mxu0 %v2363_v16 }
 0x997   : > { %v3089_v7 = vpop.xlane.xlu0 %3088  ;;  %v2819_v8 = vmul.f32 %v12836_v4, %v2809_v41  ;;  %v13703_v41 = vmov 3  }
 0x998   : > { %12839 = vpow2.f32 %v3092_v5  ;;  %v3091_v9 = vsub.f32 %v14435_v63, %v3089_v7 }
 0x999   : > { %11149 = vmatprep.mubr.msk.f32.mxu0 %vm2061_vm0, %v2819_v8 }
 0x99a   : > { %v12838_v12 = vpop.eup %12837  ;;  %v3094_v13 = vmul.f32 1.442695, %v3091_v9  ;;  %v2364_v9 = vld [vmem:[%s15957_s18 + $0x10] sm:$0xff] }
 0x99b   : > { %v2820_v18 = vmul.f32 %v12838_v12, %v2810_v45 }
 0x99c   : > { %12841 = vpow2.f32 %v3094_v13 }
 0x99d   : > { %11150 = vmatmul.mubr.msk.f32.vlgmr.msra.gmra.mrb[6].mxu0 %vm2061_vm0, %v2820_v18  ;;  %v2360_v18 = vld [vmem:[%s15956_s27 + $0x30] sm:$0xff] }
 0x99e   : > { %11153 = vmatpush3.msra.mxu0 %v2363_v16 }
 0x9a2   : > { %v12840_v20 = vpop.eup %12839 }
 0x9a3   : > { %v3096_v0 = vsel %vm2061_vm0, %v12840_v20, 0.0 }
 0x9a4   : > { %3097 = vadd.xlane.f32.xlu1 %v3096_v0 }
 0x9a6   : > { %v12842_v21 = vpop.eup %12841 }
 0x9a7   : > { %v3099_v22 = vsel %vm2061_vm0, %v12842_v21, 0.0 }
 0x9a8   : > { %3100 = vadd.xlane.f32.xlu0 %v3099_v22 }
 0x9b5   : > { %3113 = vperm.xlu1 %12674, %v14404_v19  }
 0x9b9   : > { %12681 = vset.pattern.permute.xlu1 %v13703_v41 }
 0x9be   : > { %3107 = vperm.xlu0 %12673, %v14422_v38  }
 0x9c2   : > { %12680 = vset.pattern.permute.xlu0 %v13703_v41 }
 0x9d3   : > { %v11182_v63 = vpop.f32.mrb[10].mxu1 }
 0x9d4   : > { %v3382_v23 = vpop.f32.mrb[11].mxu1  ;;  %v3394_v40 = vsel %vm2061_vm0, %v11182_v63, -inf }
 0x9d5   : > { %v3391_v39 = vsel %vm2061_vm0, %v3382_v23, -inf }
 0xa31   : > { %v3098_v24 = vpop.xlane.xlu1 %3097 }
 0xa32   : > { %12843 = vrcp.f32 %v3098_v24 }
 0xa35   : > { %v3101_v15 = vpop.xlane.xlu0 %3100  ;;  %v3114_v26 = vpop.permute.xlu1 %3113 }
 0xa36   : > { %12845 = vrcp.f32 %v3101_v15  ;;  %v3116_v29 = vmul.f32 %v3114_v26, %v2358_v25  ;;  %v3117_v33 = vmul.f32 %v3114_v26, %v2359_v30 }
 0xa3c   : > { %v12844_v27 = vpop.eup %12843 }
 0xa3d   : > { %v3108_v57 = vpop.permute.xlu0 %3107  ;;  %v3104_v28 = vmul.f32 %v12844_v27, %v12840_v20 }
 0xa3f   : > { %v3110_v31 = vmul.f32 %v3108_v57, %v3104_v28 }
 0xa40   : > { %v12846_v54 = vpop.eup %12845 }
 0xa41   : > { %v3105_v32 = vmul.f32 %v12846_v54, %v12842_v21  ;;  %v3118_v34 = vadd.f32 %v3116_v29, %v3110_v31 }
 0xa43   : > { %v3111_v35 = vmul.f32 %v3108_v57, %v3105_v32  ;;  %v3120_v52 = vsel %vm2061_vm0, %v3118_v34, 0.0 }
 0xa44   : > { %3121 = vadd.xlane.f32.xlu0 %v3120_v52 }
 0xa45   : > { %v3119_v36 = vadd.f32 %v3117_v33, %v3111_v35 }
 0xa47   : > { %v3123_v37 = vsel %vm2061_vm0, %v3119_v36, 0.0 }
 0xa48   : > { %3124 = vadd.xlane.f32.xlu1 %v3123_v37 }
 0xa4c   : > { %3392 = vmax.xlane.f32.xlu1 %v3391_v39  ;;  %v2365_v39 = vld [vmem:[%s15957_s18 + $0x18] sm:$0xff] }
 0xa50   : > { %3395 = vmax.xlane.f32.xlu1 %v3394_v40 }
 0xa5a   : > { %12676 = vrot.lane.b32.xlu0 %v14361_v58, %s15821_s16 }
 0xa5e   : > { %3414 = vperm.xlu0 %12680, %v14422_v38  }
 0xa62   : > { %12692 = vset.pattern.permute.xlu0 %v13696_v6 }
 0xa70   : > { %v11151_v42 = vpop.f32.mrb[6].mxu0 }
 0xa71   : > { %v2901_v43 = vpop.f32.mrb[7].mxu0 }
 0xa72   : > { %11154 = vmatprep.mubr.msk.f32.mxu0 %vm2373_vm2, %v2901_v43  ;;  %v10378_v43 = vld [vmem:[%s15958_s1] ss:$0 sm:$0xff]  ;;  %s15961_s1 = sld [smem:[#allocation44_spill]] }
 0xa73   : > { %11155 = vmatmul.mubr.msk.f32.vlgmr.msra.gmra.mrb[4].mxu0 %vm2373_vm2, %v11151_v42 }
 0xad1   : > { %v3122_v44 = vpop.xlane.xlu0 %3121 }
 0xad2   : > { %12847 = vrcp.f32 %v3122_v44 }
 0xad5   : > { %v3125_v45 = vpop.xlane.xlu1 %3124  ;;  %v12677_v46 = vpop.permute.xlu0 %12676 }
 0xad6   : > { %12849 = vrcp.f32 %v3125_v45  ;;  %v12679_v47 = vunpack.i.h.bf16 %v12677_v46  ;;  %v12678_v48 = vunpack.i.l.bf16 %v12677_v46 }
 0xad8   : > { %v11909_v50 = vpack.c.bf16 %v12679_v47, %v12678_v48 }
 0xad9   : > { %v3393_v51 = vpop.xlane.xlu1 %3392 }
 0xada   : > { %v3397_v53 = vsub.f32 %v3382_v23, %v3393_v51  ;;  %11910 = vmatprep.subr.bf16.mxu0 %v11909_v50  ;;  %v2361_v23 = vld [vmem:[%s15956_s27 + $0x38] sm:$0xff] }
 0xadb   : > { %11912 = vmatpush3.bf16.msra.mxu0 %v11909_v50 }
 0xadc   : > { %v12848_v38 = vpop.eup %12847  ;;  %v3399_v55 = vmul.f32 1.442695, %v3397_v53  ;;  %11171 = vmatprep.subr.mxu0 %v2364_v9 }
 0xadd   : > { %v3396_v56 = vpop.xlane.xlu1 %3395  ;;  %v3128_v59 = vmul.f32 %v12848_v38, %v3118_v34  ;;  %v3415_v21 = vpop.permute.xlu0 %3414 }
 0xade   : > { %12851 = vpow2.f32 %v3399_v55  ;;  %v3398_v60 = vsub.f32 %v11182_v63, %v3396_v56 }
 0xadf   : > { %11168 = vmatprep.mubr.msk.f32.mxu0 %vm2061_vm0, %v3128_v59 }
 0xae0   : > { %v12850_v61 = vpop.eup %12849  ;;  %v3401_v2 = vmul.f32 1.442695, %v3398_v60 }
 0xae1   : > { %v3129_v3 = vmul.f32 %v12850_v61, %v3119_v36 }
 0xae2   : > { %12853 = vpow2.f32 %v3401_v2 }
 0xae3   : > { %11169 = vmatmul.mubr.msk.f32.vlgmr.msra.gmra.mrb[8].mxu0 %vm2061_vm0, %v3129_v3 }
 0xae4   : > { %11172 = vmatpush3.msra.mxu0 %v2364_v9 }
 0xae8   : > { %v12852_v4 = vpop.eup %12851 }
 0xae9   : > { %v3403_v5 = vsel %vm2061_vm0, %v12852_v4, 0.0 }
 0xaea   : > { %3404 = vadd.xlane.f32.xlu1 %v3403_v5 }
 0xaec   : > { %v12854_v7 = vpop.eup %12853 }
 0xaed   : > { %v3406_v8 = vsel %vm2061_vm0, %v12854_v7, 0.0 }
 0xaee   : > { %3407 = vadd.xlane.f32.xlu1 %v3406_v8 }
 0xaff   : > { %3420 = vperm.xlu1 %12681, %v14404_v19  }
 0xb03   : > { %12693 = vset.pattern.permute.xlu1 %v13696_v6 }
 0xb77   : > { %v3405_v12 = vpop.xlane.xlu1 %3404 }
 0xb78   : > { %12855 = vrcp.f32 %v3405_v12 }
 0xb7b   : > { %v3408_v13 = vpop.xlane.xlu1 %3407 }
 0xb7c   : > { %12857 = vrcp.f32 %v3408_v13  ;;  %v3763_v13 = vld [vmem:[%s15961_s1] sm:$0xff] }
 0xb7f   : > { %v3421_v20 = vpop.permute.xlu1 %3420 }
 0xb80   : > { %v3423_v63 = vmul.f32 %v3421_v20, %v2360_v18  ;;  %v3424_v19 = vmul.f32 %v3421_v20, %v2361_v23  ;;  %v3764_v18 = vld [vmem:[%s15961_s1 + $0x8] sm:$0xff] }
 0xb81   : > { %v11931_v20 = vpack.c.bf16 %v3764_v18, %v3763_v13 }
 0xb82   : > { %v12856_v0 = vpop.eup %12855 }
 0xb83   : > { %v3411_v22 = vmul.f32 %v12856_v0, %v12852_v4 }
 0xb85   : > { %v3417_v16 = vmul.f32 %v3415_v21, %v3411_v22 }
 0xb86   : > { %v12858_v24 = vpop.eup %12857 }
 0xb87   : > { %v3412_v15 = vmul.f32 %v12858_v24, %v12854_v7  ;;  %v3425_v25 = vadd.f32 %v3423_v63, %v3417_v16 }
 0xb89   : > { %v3418_v26 = vmul.f32 %v3415_v21, %v3412_v15  ;;  %v3427_v27 = vsel %vm2061_vm0, %v3425_v25, 0.0  ;;  %v10403_v15 = vld [vmem:[%s15962_s15] ss:$0 sm:$0xff]  ;;  %s15966_s15 = sld [smem:[#allocation67_spill]] }
 0xb8a   : > { %3428 = vadd.xlane.f32.xlu0 %v3427_v27 }
 0xb8b   : > { %v3426_v57 = vadd.f32 %v3424_v19, %v3418_v26 }
 0xb8d   : > { %v3430_v28 = vsel %vm2061_vm0, %v3426_v57, 0.0 }
 0xb8e   : > { %3431 = vadd.xlane.f32.xlu1 %v3430_v28 }
 0xba0   : > { %12683 = vrot.lane.b32.xlu0 %v14361_v58, %s15819_s26  ;;  %s15959_s26 = sld [smem:[#allocation42_spill]] }
 0xba6   : > { %s15960_s16 = smov %s15959_s26  ;;  %v3653_v4 = vld [vmem:[%s15959_s26] sm:$0xff]  ;;  %s15964_s26 = sld [smem:[#allocation41_spill]] }
 0xba7   : > { %v3654_v5 = vld [vmem:[%s15960_s16 + $0x8] sm:$0xff]  ;;  %v3655_v7 = vld [vmem:[%s15960_s16 + $0x10] sm:$0xff]  ;;  %v3656_v9 = vld [vmem:[%s15960_s16 + $0x18] sm:$0xff] }
 0xba8   : > { %v11923_v8 = vpack.c.bf16 %v3654_v5, %v3653_v4  ;;  %v11927_v12 = vpack.c.bf16 %v3656_v9, %v3655_v7 }
 0xbaa   : > { %11924 = vmatprep.subr.bf16.mxu1 %v11923_v8 }
 0xbab   : > { %11926 = vmatpush3.bf16.msra.mxu1 %v11923_v8 }
 0xbac   : > { %11928 = vmatprep.subr.bf16.mxu1 %v11927_v12 }
 0xbaf   : > { %11930 = vmatpush3.bf16.msra.mxu1 %v11927_v12 }
 0xbb6   : > { %v11170_v29 = vpop.f32.mrb[8].mxu0 }
 0xbb7   : > { %v3208_v30 = vpop.f32.mrb[9].mxu0 }
 0xbb8   : > { %11173 = vmatprep.mubr.msk.f32.mxu0 %vm2373_vm2, %v3208_v30 }
 0xbb9   : > { %11174 = vmatmul.mubr.msk.f32.vlgmr.msra.gmra.mrb[4].mxu0 %vm2373_vm2, %v11170_v29 }
 0xc17   : > { %v3429_v31 = vpop.xlane.xlu0 %3428 }
 0xc18   : > { %12859 = vrcp.f32 %v3429_v31  ;;  %v3765_v31 = vld [vmem:[%s15961_s1 + $0x10] sm:$0xff] }
 0xc1b   : > { %v3432_v54 = vpop.xlane.xlu1 %3431  ;;  %v12684_v32 = vpop.permute.xlu0 %12683 }
 0xc1c   : > { %12861 = vrcp.f32 %v3432_v54  ;;  %v12686_v33 = vunpack.i.h.bf16 %v12684_v32  ;;  %v12685_v34 = vunpack.i.l.bf16 %v12684_v32  ;;  %v3766_v54 = vld [vmem:[%s15961_s1 + $0x18] sm:$0xff] }
 0xc1d   : > { %v11935_v32 = vpack.c.bf16 %v3766_v54, %v3765_v31 }
 0xc1e   : > { %v11919_v35 = vpack.c.bf16 %v12686_v33, %v12685_v34  ;;  %v3767_v33 = vld [vmem:[%s15961_s1 + $0x20] sm:$0xff]  ;;  %v3768_v34 = vld [vmem:[%s15961_s1 + $0x28] sm:$0xff] }
 0xc20   : > { %11920 = vmatprep.subr.bf16.mxu0 %v11919_v35 }
 0xc21   : > { %11922 = vmatpush3.bf16.msra.mxu0 %v11919_v35  ;;  %v11939_v35 = vpack.c.bf16 %v3768_v34, %v3767_v33 }
 0xc22   : > { %v12860_v52 = vpop.eup %12859  ;;  %11190 = vmatprep.subr.mxu0 %v2365_v39 }
 0xc23   : > { %v3435_v58 = vmul.f32 %v12860_v52, %v3425_v25  ;;  %v10404_v25 = vld [vmem:[%s15963_s10] ss:$0 sm:$0xff]  ;;  %v3769_v52 = vld [vmem:[%s15961_s1 + $0x30] sm:$0xff]  ;;  %s15965_s10 = sld [smem:[#allocation43_spill]] }
 0xc25   : > { %11187 = vmatprep.mubr.msk.f32.mxu0 %vm2061_vm0, %v3435_v58  ;;  %v3770_v58 = vld [vmem:[%s15961_s1 + $0x38] sm:$0xff] }
 0xc26   : > { %v12862_v36 = vpop.eup %12861 }
 0xc27   : > { %v3436_v37 = vmul.f32 %v12862_v36, %v3426_v57  ;;  %v11943_v36 = vpack.c.bf16 %v3770_v58, %v3769_v52  ;;  %v3907_v52 = vld [vmem:[%s15966_s15] sm:$0xff]  ;;  %v3908_v58 = vld [vmem:[%s15966_s15 + $0x8] sm:$0xff] }
 0xc29   : > { %11188 = vmatmul.mubr.msk.f32.vlgmr.msra.gmra.mrb[10].mxu0 %vm2061_vm0, %v3436_v37  ;;  %v3771_v37 = vld [vmem:[%s15961_s1 + $0x40] sm:$0xff] }
 0xc2a   : > { %11191 = vmatpush3.msra.mxu0 %v2365_v39  ;;  %v3772_v39 = vld [vmem:[%s15961_s1 + $0x48] sm:$0xff] }
 0xc2b   : > { %11932 = vmatprep.subr.bf16.mxu0 %v11931_v20 }
 0xcfc   : > { %v11189_v40 = vpop.f32.mrb[10].mxu0 }
 0xcfd   : > { %v3515_v42 = vpop.f32.mrb[11].mxu0 }
 0xcfe   : > { %11192 = vmatprep.mubr.msk.f32.mxu0 %vm2373_vm2, %v3515_v42  ;;  %v11947_v42 = vpack.c.bf16 %v3772_v39, %v3771_v37  ;;  %v11963_v37 = vpack.c.bf16 %v3908_v58, %v3907_v52  ;;  %v3910_v39 = vld [vmem:[%s15966_s15 + $0x18] sm:$0xff] }
 0xcff   : > { %11193 = vmatmul.mubr.msk.f32.vlgmr.msra.gmra.mrb[4].mxu0 %vm2373_vm2, %v11189_v40  ;;  %v3773_v40 = vld [vmem:[%s15961_s1 + $0x50] sm:$0xff] }
 0xd00   : > { %11934 = vmatpush3.bf16.msra.mxu0 %v11931_v20  ;;  %11964 = vmatprep.subr.bf16.mxu1 %v11963_v37 }
 0xd01   : > { %11936 = vmatprep.subr.bf16.mxu0 %v11935_v32 }
 0xd04   : > { %11938 = vmatpush3.bf16.msra.mxu0 %v11935_v32 }
 0xd05   : > { %11940 = vmatprep.subr.bf16.mxu0 %v11939_v35 }
 0xd08   : > { %11942 = vmatpush3.bf16.msra.mxu0 %v11939_v35 }
 0xd09   : > { %11944 = vmatprep.subr.bf16.mxu0 %v11943_v36 }
 0xd0c   : > { %11946 = vmatpush3.bf16.msra.mxu0 %v11943_v36  ;;  %v3909_v36 = vld [vmem:[%s15966_s15 + $0x10] sm:$0xff] }
 0xd0d   : > { %11948 = vmatprep.subr.bf16.mxu0 %v11947_v42 }
 0xd10   : > { %11950 = vmatpush3.bf16.msra.mxu0 %v11947_v42 }
 0xdd2   : > { %v11194_v44 = vpop.f32.mrb[4].mxu0 }
 0xdd3   : > { %v3596_v45 = vpop.f32.mrb[5].mxu0  ;;  %v12347_v46 = vadd.f32 %v11194_v44, %v10378_v43 }
 0xdd4   : > { %v12348_v47 = vadd.f32 %v10378_v43, %v3596_v45  ;;  %v3774_v43 = vld [vmem:[%s15961_s1 + $0x58] sm:$0xff]  ;;  %v3775_v45 = vld [vmem:[%s15961_s1 + $0x60] sm:$0xff] }
 0xdd5   : > { %v14522_v50 = vadd.f32 %v12347_v46, %v14327_v11  ;;  %v11951_v44 = vpack.c.bf16 %v3774_v43, %v3773_v40  ;;  %v3776_v46 = vld [vmem:[%s15961_s1 + $0x68] sm:$0xff]  ;;  %v11967_v40 = vpack.c.bf16 %v3910_v39, %v3909_v36 }
 0xdd6   : > { %v14519_v48 = vadd.f32 %v12348_v47, %v14325_v10  ;;  %v11955_v47 = vpack.c.bf16 %v3776_v46, %v3775_v45 }
 0xdd7   : > { %v3612_v53 = vsel %vm2143_vm1, %v14522_v50, 0.0  ;;  %11952 = vmatprep.subr.bf16.mxu0 %v11951_v44 }
 0xdd8   : > { %v3609_v51 = vsel %vm2143_vm1, %v14519_v48, 0.0  ;;  %11954 = vmatpush3.bf16.msra.mxu0 %v11951_v44 }
 0xdd9   : > { %3610 = vadd.xlane.f32.xlu1 %v3609_v51  ;;  %v3777_v51 = vld [vmem:[%s15961_s1 + $0x70] sm:$0xff]  ;;  %11956 = vmatprep.subr.bf16.mxu0 %v11955_v47 }
 0xddc   : > { %11958 = vmatpush3.bf16.msra.mxu0 %v11955_v47 }
 0xddd   : > { %3613 = vadd.xlane.f32.xlu1 %v3612_v53  ;;  %v3778_v53 = vld [vmem:[%s15961_s1 + $0x78] sm:$0xff]  ;;  %s15969_s1 = sld [smem:[#allocation61_spill]] }
 0xe66   : > { %v3611_v38 = vpop.xlane.xlu1 %3610 }
 0xe67   : > { %v3615_v55 = vmul.f32 0.03125, %v3611_v38  ;;  %v11959_v38 = vpack.c.bf16 %v3778_v53, %v3777_v51 }
 0xe69   : > { %v3617_v10 = vsub.f32 %v14519_v48, %v3615_v55  ;;  %11960 = vmatprep.subr.bf16.mxu0 %v11959_v38  ;;  %v10405_v55 = vld [vmem:[%s15964_s26] ss:$0 sm:$0xff]  ;;  %s15967_s26 = sld [smem:[#allocation68_spill]] }
 0xe6a   : > { %v3614_v56 = vpop.xlane.xlu1 %3613  ;;  %11962 = vmatpush3.bf16.msra.mxu0 %v11959_v38 }
 0xe6b   : > { %v3616_v59 = vmul.f32 0.03125, %v3614_v56  ;;  %v3619_v11 = vmul.f32 %v3617_v10, %v3617_v10 }
 0xe6d   : > { %v3618_v60 = vsub.f32 %v14522_v50, %v3616_v59  ;;  %v3621_v61 = vsel %vm2143_vm1, %v3619_v11, 0.0 }
 0xe6e   : > { %3622 = vadd.xlane.f32.xlu0 %v3621_v61 }
 0xe6f   : > { %v3620_v2 = vmul.f32 %v3618_v60, %v3618_v60  ;;  %v3992_v42 = vld [vmem:[%s15967_s26] sm:$0xff] }
 0xe71   : > { %v3624_v3 = vsel %vm2143_vm1, %v3620_v2, 0.0 }
 0xe72   : > { %3625 = vadd.xlane.f32.xlu1 %v3624_v3 }
 0xefb   : > { %v3623_v0 = vpop.xlane.xlu0 %3622 }
 0xefc   : > { %v3627_v21 = vmul.f32 0.03125, %v3623_v0 }
 0xefe   : > { %v3629_v22 = vadd.f32 1e-06, %v3627_v21 }
 0xeff   : > { %v3626_v63 = vpop.xlane.xlu1 %3625 }
 0xf00   : > { %12863 = vrsqrt.f32 %v3629_v22  ;;  %v3628_v23 = vmul.f32 0.03125, %v3626_v63 }
 0xf02   : > { %v3630_v16 = vadd.f32 1e-06, %v3628_v23 }
 0xf04   : > { %12865 = vrsqrt.f32 %v3630_v16  ;;  %v10408_v16 = vld [vmem:[%s15965_s10] ss:$0 sm:$0xff]  ;;  %s15968_s10 = smov %s15967_s26  ;;  %s15973_s26 = sld [smem:[#allocation64_spill]] }
 0xf05   : > { %v3993_v43 = vld [vmem:[%s15968_s10 + $0x8] sm:$0xff] }
 0xf06   : > { %v11971_v44 = vpack.c.bf16 %v3993_v43, %v3992_v42 }
 0xf0a   : > { %v12864_v24 = vpop.eup %12863  ;;  %s15974_s3 = smov %s15973_s26  ;;  %v4072_v39 = vld [vmem:[%s15973_s26] sm:$0xff]  ;;  %s15976_s26 = smov 88  }
 0xf0b   : > { %v3633_v19 = vmul.f32 %v12864_v24, %v3617_v10 }
 0xf0d   : > { %v3642_v26 = vmul.f32 %v10403_v15, %v3633_v19 }
 0xf0e   : > { %v12866_v27 = vpop.eup %12865 }
 0xf0f   : > { %v3634_v57 = vmul.f32 %v12866_v27, %v3618_v60  ;;  %v3651_v28 = vadd.f32 %v10404_v25, %v3642_v26 }
 0xf11   : > { %v3643_v29 = vmul.f32 %v10403_v15, %v3634_v57  ;;  %11203 = vmatprep.mubr.msk.f32.mxu1 %vm2143_vm1, %v3651_v28 }
 0xf13   : > { %v3652_v30 = vadd.f32 %v10404_v25, %v3643_v29 }
 0xf15   : > { %11204 = vmatmul.mubr.msk.f32.vlgmr.msra.gmra.mrb[12].mxu1 %vm2143_vm1, %v3652_v30 }
 0xf16   : > { %11966 = vmatpush3.bf16.msra.mxu1 %v11963_v37 }
 0xf17   : > { %11968 = vmatprep.subr.bf16.mxu1 %v11967_v40 }
 0xf1a   : > { %11970 = vmatpush3.bf16.msra.mxu1 %v11967_v40 }
 0xf1b   : > { %11972 = vmatprep.subr.bf16.mxu1 %v11971_v44 }
 0xfe8   : > { %v11205_v10 = vpop.f32.mrb[12].mxu1 }
 0xfe9   : > { %v3742_v56 = vadd.f32 %v11205_v10, %v10405_v55  ;;  %v3736_v59 = vpop.f32.mrb[13].mxu1  ;;  %v10409_v10 = vld [vmem:[%s15969_s1] ss:$0 sm:$0xff]  ;;  %s15972_s1 = sld [smem:[#allocation59_spill]] }
 0xfea   : > { %v3737_v11 = vadd.f32 %v10405_v55, %v3736_v59  ;;  %v10410_v59 = vld [vmem:[%s15970_s2] ss:$0 sm:$0xff]  ;;  %s15971_s2 = smov 96  }
 0xfeb   : > { %v3748_v60 = vmul.f32 0.044715, %v3742_v56  ;;  %v3746_v22 = vmul.f32 0.5, %v3742_v56 }
 0xfec   : > { %v3747_v61 = vmul.f32 0.044715, %v3737_v11  ;;  %v3745_v0 = vmul.f32 0.5, %v3737_v11 }
 0xfed   : > { %v3750_v2 = vmul.f32 %v3748_v60, %v3742_v56 }
 0xfee   : > { %v3749_v3 = vmul.f32 %v3747_v61, %v3737_v11 }
 0xfef   : > { %v3752_v4 = vmul.f32 %v3750_v2, %v3742_v56 }
 0xff0   : > { %v3751_v5 = vmul.f32 %v3749_v3, %v3737_v11  ;;  %v3994_v3 = vld [vmem:[%s15968_s10 + $0x10] sm:$0xff] }
 0xff1   : > { %v3754_v7 = vadd.f32 %v3752_v4, %v3742_v56  ;;  %v3995_v4 = vld [vmem:[%s15968_s10 + $0x18] sm:$0xff]  ;;  %s15985_s10 = sld [smem:[#allocation63_spill]] }
 0xff2   : > { %v3753_v8 = vadd.f32 %v3751_v5, %v3737_v11 }
 0xff3   : > { %v3756_v9 = vmul.f32 0.7978846, %v3754_v7 }
 0xff4   : > { %v3755_v12 = vmul.f32 0.7978846, %v3753_v8  ;;  %v11975_v8 = vpack.c.bf16 %v3995_v4, %v3994_v3 }
 0xff5   : > { %12867 = vtanh.f32 %v3756_v9 }
 0xff6   : > { %12869 = vtanh.f32 %v3755_v12 }
 0xfff   : > { %v12868_v13 = vpop.eup %12867 }
0x1000   : > { %v12870_v18 = vpop.eup %12869  ;;  %v3760_v20 = vadd.f32 1.0, %v12868_v13 }
0x1001   : > { %v3759_v21 = vadd.f32 1.0, %v12870_v18 }
0x1002   : > { %v3762_v23 = vmul.f32 %v3760_v20, %v3746_v22 }
0x1003   : > { %v3761_v63 = vmul.f32 %v3759_v21, %v3745_v0 }
0x1005   : > { %11238 = vmatprep.mubr.f32.mxu0 %v3761_v63 }
0x1006   : > { %11239 = vmatmul.mubr.f32.vlgmr.msra.gmra.mrb[12].mxu0 %v3762_v23 }
0x10d9   : > { %v11240_v24 = vpop.f32.mrb[12].mxu0 }
0x10da   : > { %v3852_v15 = vpop.f32.mrb[13].mxu0  ;;  %v3858_v19 = vadd.f32 %v11240_v24, %v10408_v16 }
0x10db   : > { %v3853_v25 = vadd.f32 %v10408_v16, %v3852_v15 }
0x10dc   : > { %v14562_v27 = vadd.f32 %v3858_v19, %v14522_v50 }
0x10dd   : > { %v14559_v26 = vadd.f32 %v3853_v25, %v14519_v48 }
0x10de   : > { %v3866_v28 = vsel %vm2143_vm1, %v14562_v27, 0.0 }
0x10df   : > { %v3863_v57 = vsel %vm2143_vm1, %v14559_v26, 0.0 }
0x10e0   : > { %3864 = vadd.xlane.f32.xlu1 %v3863_v57 }
0x10e4   : > { %3867 = vadd.xlane.f32.xlu1 %v3866_v28 }
0x116d   : > { %v3865_v29 = vpop.xlane.xlu1 %3864 }
0x116e   : > { %v3869_v30 = vmul.f32 0.03125, %v3865_v29 }
0x1170   : > { %v3871_v48 = vsub.f32 %v14559_v26, %v3869_v30 }
0x1171   : > { %v3868_v31 = vpop.xlane.xlu1 %3867 }
0x1172   : > { %v3870_v54 = vmul.f32 0.03125, %v3868_v31  ;;  %v3873_v50 = vmul.f32 %v3871_v48, %v3871_v48 }
0x1174   : > { %v3872_v32 = vsub.f32 %v14562_v27, %v3870_v54  ;;  %v3875_v33 = vsel %vm2143_vm1, %v3873_v50, 0.0 }
0x1175   : > { %3876 = vadd.xlane.f32.xlu1 %v3875_v33 }
0x1176   : > { %v3874_v34 = vmul.f32 %v3872_v32, %v3872_v32 }
0x1178   : > { %v3878_v35 = vsel %vm2143_vm1, %v3874_v34, 0.0  ;;  %v4071_v34 = vld [vmem:[%s15972_s1] sm:$0x1]  ;;  %s15975_s1 = smov 120  }
0x1179   : > { %3879 = vadd.xlane.f32.xlu1 %v3878_v35  ;;  %v14612_v35 = vrot.slane %v4071_v34, %v14400_v17  ;;  %v4196_v52 = vsub.f32 1.0, %v4071_v34 }
0x117b   : > { %v14617_v58 = vrot.slane %v4196_v52, %v14400_v17 }
0x1202   : > { %v3877_v45 = vpop.xlane.xlu1 %3876 }
0x1203   : > { %v3881_v46 = vmul.f32 0.03125, %v3877_v45 }
0x1205   : > { %v3883_v47 = vadd.f32 1e-06, %v3881_v46  ;;  %v4073_v46 = vld [vmem:[%s15974_s3 + $0x8] sm:$0xff] }
0x1206   : > { %v3880_v51 = vpop.xlane.xlu1 %3879 }
0x1207   : > { %12871 = vrsqrt.f32 %v3883_v47  ;;  %v3882_v53 = vmul.f32 0.03125, %v3880_v51 }
0x1209   : > { %v3884_v38 = vadd.f32 1e-06, %v3882_v53 }
0x120b   : > { %12873 = vrsqrt.f32 %v3884_v38 }
0x1211   : > { %v12872_v55 = vpop.eup %12871 }
0x1212   : > { %v3887_v56 = vmul.f32 %v12872_v55, %v3871_v48 }
0x1214   : > { %v3896_v11 = vmul.f32 %v10409_v10, %v3887_v56 }
0x1215   : > { %v12874_v60 = vpop.eup %12873 }
0x1216   : > { %v3888_v61 = vmul.f32 %v12874_v60, %v3872_v32  ;;  %v3905_v2 = vadd.f32 %v10410_v59, %v3896_v11 }
0x1218   : > { %v3897_v5 = vmul.f32 %v10409_v10, %v3888_v61  ;;  %11249 = vmatprep.mubr.msk.f32.mxu1 %vm2143_vm1, %v3905_v2 }
0x121a   : > { %v3906_v7 = vadd.f32 %v10410_v59, %v3897_v5 }
0x121c   : > { %11250 = vmatmul.mubr.msk.f32.vlgmr.msra.gmra.mrb[14].mxu1 %vm2143_vm1, %v3906_v7 }
0x121d   : > { %11974 = vmatpush3.bf16.msra.mxu1 %v11971_v44  ;;  %11260 = vmatprep.mubr.msk.f32.mxu1 %vm2143_vm1, %v3905_v2 }
0x121e   : > { %11976 = vmatprep.subr.bf16.mxu1 %v11975_v8 }
0x1221   : > { %11978 = vmatpush3.bf16.msra.mxu1 %v11975_v8 }
0x1224   : > { %11261 = vmatmul.mubr.msk.f32.vlgmr.msra.gmra.mrb[16].mxu1 %vm2143_vm1, %v3906_v7 }
0x12ef   : > { %v14586_v9 = vpop.f32.mrb[14].mxu1 }
0x12f0   : > { %v14588_v12 = vpop.f32.mrb[15].mxu1 }
0x12f1   : > { %11267 = vmatprep.mubr.msk.f32.mxu1 %vm2373_vm2, %v14588_v12  ;;  %v14594_v13 = vpack.i.bf16 %v14586_v9, %v14588_v12 }
0x12f3   : > { %12688 = vrot.lane.b32.xlu1 %v14594_v13, %s15971_s2 }
0x12f7   : > { %v11262_v18 = vpop.f32.mrb[16].mxu1 }
0x12f8   : > { %v4062_v20 = vpop.f32.mrb[17].mxu1 }
0x12f9   : > { %v14598_v0 = vpack.i.bf16 %v11262_v18, %v4062_v20  ;;  %v11985_v21 = vpack.c.bf16 %v11262_v18, %v4062_v20 }
0x1365   : > { %v12689_v22 = vpop.permute.xlu1 %12688 }
0x1366   : > { %v12691_v63 = vunpack.i.h.bf16 %v12689_v22  ;;  %v12690_v23 = vunpack.i.l.bf16 %v12689_v22 }
0x1368   : > { %v11979_v16 = vpack.c.bf16 %v12691_v63, %v12690_v23 }
0x136a   : > { %11981 = vmatprep.subr.msk.bf16.mxu1 %vm14373_vm3, %v11979_v16 }
0x136b   : > { %11984 = vmatpush3.bf16.xpose.msk.msra.mxu1 %vm14373_vm3, %v11979_v16 }
0x136c   : > { %11986 = vmatprep.subr.bf16.mxu1 %v11985_v21 }
0x1372   : > { %11268 = vmatmul.mubr.msk.f32.vlgmr.msra.gmra.mrb[18].mxu1 %vm2373_vm2, %v14586_v9 }
0x1373   : > { %11988 = vmatpush3.bf16.msra.mxu1 %v11985_v21 }
0x1445   : > { %v11269_v24 = vpop.f32.mrb[18].mxu1 }
0x1446   : > { %v4165_v15 = vpop.f32.mrb[19].mxu1  ;;  %v4177_v25 = vsel %vm2061_vm0, %v11269_v24, -inf }
0x1447   : > { %v4174_v19 = vsel %vm2061_vm0, %v4165_v15, -inf }
0x1448   : > { %4175 = vmax.xlane.f32.xlu0 %v4174_v19  ;;  %v4080_v19 = vld [vmem:[%s15979_s7] sm:$0xff] }
0x1449   : > { %11277 = vmatprep.subr.mxu0 %v4080_v19 }
0x144a   : > { %11278 = vmatpush3.msra.mxu0 %v4080_v19 }
0x144c   : > { %4178 = vmax.xlane.f32.xlu0 %v4177_v25 }
0x14d5   : > { %v4176_v57 = vpop.xlane.xlu0 %4175 }
0x14d6   : > { %v4180_v28 = vsub.f32 %v4165_v15, %v4176_v57 }
0x14d8   : > { %v4182_v29 = vmul.f32 1.442695, %v4180_v28 }
0x14d9   : > { %v4179_v30 = vpop.xlane.xlu0 %4178 }
0x14da   : > { %12875 = vpow2.f32 %v4182_v29  ;;  %v4181_v48 = vsub.f32 %v11269_v24, %v4179_v30 }
0x14dc   : > { %v4184_v31 = vmul.f32 1.442695, %v4181_v48 }
0x14de   : > { %12877 = vpow2.f32 %v4184_v31 }
0x14e4   : > { %v12876_v54 = vpop.eup %12875 }
0x14e5   : > { %v4186_v50 = vsel %vm2061_vm0, %v12876_v54, 0.0 }
0x14e6   : > { %4187 = vadd.xlane.f32.xlu1 %v4186_v50 }
0x14e8   : > { %v12878_v32 = vpop.eup %12877 }
0x14e9   : > { %v4189_v33 = vsel %vm2061_vm0, %v12878_v32, 0.0 }
0x14ea   : > { %4190 = vadd.xlane.f32.xlu0 %v4189_v33 }
0x14f7   : > { %4214 = vperm.xlu1 %12693, %v14612_v35  }
0x14fb   : > { %12705 = vset.pattern.permute.xlu1 %v13699_v62 }
0x1500   : > { %4203 = vperm.xlu0 %12692, %v14617_v58  }
0x1504   : > { %12704 = vset.pattern.permute.xlu0 %v13699_v62 }
0x1573   : > { %v4188_v36 = vpop.xlane.xlu1 %4187 }
0x1574   : > { %12879 = vrcp.f32 %v4188_v36 }
0x1577   : > { %v4191_v37 = vpop.xlane.xlu0 %4190  ;;  %v4215_v40 = vpop.permute.xlu1 %4214 }
0x1578   : > { %12881 = vrcp.f32 %v4191_v37  ;;  %v4217_v43 = vmul.f32 %v4215_v40, %v4072_v39  ;;  %v4218_v53 = vmul.f32 %v4215_v40, %v4073_v46 }
0x157e   : > { %v12880_v42 = vpop.eup %12879 }
0x157f   : > { %v4194_v44 = vmul.f32 %v12880_v42, %v12876_v54  ;;  %v4204_v45 = vpop.permute.xlu0 %4203 }
0x1581   : > { %v4206_v47 = vmul.f32 %v4204_v45, %v4194_v44 }
0x1582   : > { %v12882_v51 = vpop.eup %12881 }
0x1583   : > { %v4195_v38 = vmul.f32 %v12882_v51, %v12878_v32  ;;  %v4219_v55 = vadd.f32 %v4217_v43, %v4206_v47  ;;  %v4075_v47 = vld [vmem:[%s15974_s3 + $0x18] sm:$0xff] }
0x1585   : > { %v4207_v10 = vmul.f32 %v4204_v45, %v4195_v38  ;;  %v4221_v56 = vsel %vm2061_vm0, %v4219_v55, 0.0 }
0x1586   : > { %4222 = vadd.xlane.f32.xlu0 %v4221_v56 }
0x1587   : > { %v4220_v62 = vadd.f32 %v4218_v53, %v4207_v10  ;;  %v4074_v53 = vld [vmem:[%s15974_s3 + $0x10] sm:$0xff] }
0x1589   : > { %v4224_v59 = vsel %vm2061_vm0, %v4220_v62, 0.0 }
0x158a   : > { %4225 = vadd.xlane.f32.xlu1 %v4224_v59 }
0x159b   : > { %4401 = vrot.lane.b32.xlu1 %v14588_v12, %s15975_s1 }
0x159c   : > { %12695 = vrot.lane.b32.xlu0 %v14594_v13, %s15976_s26 }
0x159f   : > { %4710 = vrot.lane.b32.xlu1 %v14588_v12, %s15977_s4 }
0x15a0   : > { %4403 = vrot.lane.b32.xlu0 %v14586_v9, %s15975_s1 }
0x15a4   : > { %12700 = vrot.lane.b32.xlu0 %v14594_v13, %s15978_s6 }
0x15a8   : > { %4712 = vrot.lane.b32.xlu0 %v14586_v9, %s15977_s4 }
0x1613   : > { %v4223_v11 = vpop.xlane.xlu0 %4222 }
0x1614   : > { %12883 = vrcp.f32 %v4223_v11 }
0x1617   : > { %v4226_v60 = vpop.xlane.xlu1 %4225  ;;  %v12696_v61 = vpop.permute.xlu0 %12695 }
0x1618   : > { %12885 = vrcp.f32 %v4226_v60  ;;  %v12698_v2 = vunpack.i.h.bf16 %v12696_v61  ;;  %v12697_v3 = vunpack.i.l.bf16 %v12696_v61 }
0x161a   : > { %v11989_v4 = vpack.c.bf16 %v12698_v2, %v12697_v3 }
0x161b   : > { %v4404_v5 = vpop.permute.xlu0 %4403  ;;  %v4402_v23 = vpop.permute.xlu1 %4401 }
0x161c   : > { %11991 = vmatprep.subr.msk.bf16.mxu1 %vm14373_vm3, %v11989_v4 }
0x161e   : > { %v12884_v7 = vpop.eup %12883 }
0x161f   : > { %v12701_v8 = vpop.permute.xlu0 %12700  ;;  %v4229_v18 = vmul.f32 %v12884_v7, %v4219_v55  ;;  %v4711_v24 = vpop.permute.xlu1 %4710 }
0x1620   : > { %v12703_v20 = vunpack.i.h.bf16 %v12701_v8  ;;  %v12702_v21 = vunpack.i.l.bf16 %v12701_v8 }
0x1621   : > { %11274 = vmatprep.mubr.msk.f32.mxu1 %vm2061_vm0, %v4229_v18 }
0x1622   : > { %v12886_v22 = vpop.eup %12885  ;;  %v11999_v16 = vpack.c.bf16 %v12703_v20, %v12702_v21 }
0x1623   : > { %v4230_v63 = vmul.f32 %v12886_v22, %v4220_v62  ;;  %v4713_v15 = vpop.permute.xlu0 %4712 }
0x1625   : > { %11275 = vmatmul.mubr.msk.f32.vlgmr.msra.gmra.mrb[20].mxu1 %vm2061_vm0, %v4230_v63 }
0x1626   : > { %11994 = vmatpush3.bf16.xpose.msk.msra.mxu1 %vm14373_vm3, %v11989_v4  ;;  %11286 = vmatprep.mubr.msk.f32.mxu1 %vm2373_vm2, %v4402_v23 }
0x1627   : > { %12001 = vmatprep.subr.msk.bf16.mxu1 %vm14373_vm3, %v11999_v16 }
0x162d   : > { %11287 = vmatmul.mubr.msk.f32.vlgmr.msra.gmra.mrb[22].mxu1 %vm2373_vm2, %v4404_v5 }
0x162e   : > { %12004 = vmatpush3.bf16.xpose.msk.msra.mxu1 %vm14373_vm3, %v11999_v16  ;;  %11305 = vmatprep.mubr.msk.f32.mxu1 %vm2373_vm2, %v4711_v24 }
0x1635   : > { %11306 = vmatmul.mubr.msk.f32.vlgmr.msra.gmra.mrb[24].mxu1 %vm2373_vm2, %v4713_v15 }
0x16f8   : > { %v11276_v25 = vpop.f32.mrb[20].mxu1 }
0x16f9   : > { %v4303_v57 = vpop.f32.mrb[21].mxu1 }
0x16fa   : > { %11279 = vmatprep.mubr.msk.f32.mxu0 %vm2373_vm2, %v4303_v57 }
0x16fb   : > { %11280 = vmatmul.mubr.msk.f32.vlgmr.msra.gmra.mrb[14].mxu0 %vm2373_vm2, %v11276_v25 }
0x1700   : > { %v11288_v28 = vpop.f32.mrb[22].mxu1 }
0x1701   : > { %v4483_v29 = vpop.f32.mrb[23].mxu1  ;;  %v4495_v30 = vsel %vm2061_vm0, %v11288_v28, -inf }
0x1702   : > { %4496 = vmax.xlane.f32.xlu0 %v4495_v30  ;;  %v4492_v48 = vsel %vm2061_vm0, %v4483_v29, -inf }
0x1703   : > { %4493 = vmax.xlane.f32.xlu1 %v4492_v48 }
0x1708   : > { %v14656_v31 = vpop.f32.mrb[24].mxu1 }
0x1709   : > { %v14658_v54 = vpop.f32.mrb[25].mxu1  ;;  %v4804_v8 = vsel %vm2061_vm0, %v14656_v31, -inf }
0x170a   : > { %v4801_v7 = vsel %vm2061_vm0, %v14658_v54, -inf }
0x178f   : > { %v4497_v50 = vpop.xlane.xlu0 %4496 }
0x1790   : > { %v4499_v32 = vsub.f32 %v11288_v28, %v4497_v50  ;;  %v4494_v33 = vpop.xlane.xlu1 %4493 }
0x1791   : > { %v4498_v34 = vsub.f32 %v4483_v29, %v4494_v33 }
0x1792   : > { %v4502_v52 = vmul.f32 1.442695, %v4499_v32 }
0x1793   : > { %v4500_v36 = vmul.f32 1.442695, %v4498_v34 }
0x1794   : > { %12887 = vpow2.f32 %v4502_v52  ;;  %v4081_v52 = vld [vmem:[%s15979_s7 + $0x8] sm:$0xff] }
0x1795   : > { %12889 = vpow2.f32 %v4500_v36 }
0x179e   : > { %v12888_v37 = vpop.eup %12887 }
0x179f   : > { %v12890_v39 = vpop.eup %12889  ;;  %v4507_v40 = vsel %vm2061_vm0, %v12888_v37, 0.0 }
0x17a0   : > { %4508 = vadd.xlane.f32.xlu1 %v4507_v40  ;;  %v4504_v42 = vsel %vm2061_vm0, %v12890_v39, 0.0 }
0x17a1   : > { %4505 = vadd.xlane.f32.xlu0 %v4504_v42 }
0x17b1   : > { %4521 = vperm.xlu1 %12705, %v14612_v35  }
0x17b5   : > { %12707 = vrot.lane.b32.xlu1 %v14594_v13, %s15980_s8 }
0x17b6   : > { %12717 = vset.pattern.permute.xlu1 %v13702_v49 }
0x17b7   : > { %4515 = vperm.xlu0 %12704, %v14617_v58  }
0x17b9   : > { %5017 = vrot.lane.b32.xlu1 %v14588_v12, %s15981_s9 }
0x17bb   : > { %12716 = vset.pattern.permute.xlu0 %v13702_v49 }
0x17bd   : > { %5019 = vrot.lane.b32.xlu1 %v14586_v9, %s15981_s9 }
0x182d   : > { %v4509_v43 = vpop.xlane.xlu1 %4508 }
0x182e   : > { %12891 = vrcp.f32 %v4509_v43  ;;  %v4506_v44 = vpop.xlane.xlu0 %4505 }
0x182f   : > { %12893 = vrcp.f32 %v4506_v44 }
0x1831   : > { %v4522_v45 = vpop.permute.xlu1 %4521 }
0x1832   : > { %v4525_v12 = vmul.f32 %v4522_v45, %v4075_v47  ;;  %v4524_v59 = vmul.f32 %v4522_v45, %v4074_v53 }
0x1835   : > { %v12708_v46 = vpop.permute.xlu1 %12707 }
0x1836   : > { %v12710_v13 = vunpack.i.h.bf16 %v12708_v46  ;;  %v12709_v51 = vunpack.i.l.bf16 %v12708_v46  ;;  %v4516_v10 = vpop.permute.xlu0 %4515  ;;  %v4077_v46 = vld [vmem:[%s15974_s3 + $0x28] sm:$0xff] }
0x1838   : > { %v12892_v38 = vpop.eup %12891  ;;  %v12009_v55 = vpack.c.bf16 %v12710_v13, %v12709_v51 }
0x1839   : > { %v12894_v56 = vpop.eup %12893  ;;  %v5018_v62 = vpop.permute.xlu1 %5017  ;;  %v4513_v49 = vmul.f32 %v12892_v38, %v12888_v37 }
0x183a   : > { %v4512_v11 = vmul.f32 %v12894_v56, %v12890_v39  ;;  %12011 = vmatprep.subr.msk.bf16.mxu1 %vm14373_vm3, %v12009_v55  ;;  %11324 = vmatprep.mubr.msk.f32.mxu1 %vm2373_vm2, %v5018_v62  ;;  %v4076_v39 = vld [vmem:[%s15974_s3 + $0x20] sm:$0xff] }
0x183b   : > { %v4519_v9 = vmul.f32 %v4516_v10, %v4513_v49  ;;  %12014 = vmatpush3.bf16.xpose.msk.msra.mxu1 %vm14373_vm3, %v12009_v55 }
0x183c   : > { %v4518_v60 = vmul.f32 %v4516_v10, %v4512_v11 }
0x183d   : > { %v4527_v61 = vadd.f32 %v4525_v12, %v4519_v9  ;;  %v5020_v5 = vpop.permute.xlu1 %5019 }
0x183e   : > { %v4526_v2 = vadd.f32 %v4524_v59, %v4518_v60 }
0x183f   : > { %v4531_v3 = vsel %vm2061_vm0, %v4527_v61, 0.0 }
0x1840   : > { %4532 = vadd.xlane.f32.xlu0 %v4531_v3  ;;  %v4528_v4 = vsel %vm2061_vm0, %v4526_v2, 0.0 }
0x1841   : > { %4529 = vadd.xlane.f32.xlu1 %v4528_v4 }
0x1842   : > { %11325 = vmatmul.mubr.msk.f32.vlgmr.msra.gmra.mrb[26].mxu1 %vm2373_vm2, %v5020_v5 }
0x1844   : > { %4802 = vmax.xlane.f32.xlu0 %v4801_v7 }
0x1848   : > { %4805 = vmax.xlane.f32.xlu0 %v4804_v8 }
0x1852   : > { %12712 = vrot.lane.b32.xlu1 %v14598_v0, %s15975_s1 }
0x18cd   : > { %v4533_v18 = vpop.xlane.xlu0 %4532 }
0x18ce   : > { %12895 = vrcp.f32 %v4533_v18  ;;  %v4530_v20 = vpop.xlane.xlu1 %4529 }
0x18cf   : > { %12897 = vrcp.f32 %v4530_v20 }
0x18d1   : > { %v4803_v21 = vpop.xlane.xlu0 %4802 }
0x18d2   : > { %v4807_v22 = vsub.f32 %v14658_v54, %v4803_v21  ;;  %v12713_v63 = vpop.permute.xlu1 %12712 }
0x18d3   : > { %v12715_v23 = vunpack.i.h.bf16 %v12713_v63  ;;  %v12714_v16 = vunpack.i.l.bf16 %v12713_v63 }
0x18d4   : > { %v4809_v24 = vmul.f32 1.442695, %v4807_v22 }
0x18d5   : > { %v4806_v15 = vpop.xlane.xlu0 %4805  ;;  %v11995_v19 = vpack.c.bf16 %v12715_v23, %v12714_v16 }
0x18d6   : > { %12899 = vpow2.f32 %v4809_v24  ;;  %v4808_v25 = vsub.f32 %v14656_v31, %v4806_v15 }
0x18d7   : > { %11996 = vmatprep.subr.bf16.mxu0 %v11995_v19 }
0x18d8   : > { %v12896_v57 = vpop.eup %12895  ;;  %v4811_v28 = vmul.f32 1.442695, %v4808_v25  ;;  %11998 = vmatpush3.bf16.msra.mxu0 %v11995_v19  ;;  %v4082_v25 = vld [vmem:[%s15979_s7 + $0x10] sm:$0xff] }
0x18d9   : > { %v12898_v29 = vpop.eup %12897  ;;  %v4537_v48 = vmul.f32 %v12896_v57, %v4527_v61  ;;  %11296 = vmatprep.subr.mxu0 %v4081_v52 }
0x18da   : > { %12901 = vpow2.f32 %v4811_v28  ;;  %v4536_v30 = vmul.f32 %v12898_v29, %v4526_v2 }
0x18dc   : > { %11293 = vmatprep.mubr.msk.f32.mxu0 %vm2061_vm0, %v4536_v30  ;;  %v4078_v30 = vld [vmem:[%s15974_s3 + $0x30] sm:$0xff] }
0x18dd   : > { %11294 = vmatmul.mubr.msk.f32.vlgmr.msra.gmra.mrb[16].mxu0 %vm2061_vm0, %v4537_v48 }
0x18de   : > { %11297 = vmatpush3.msra.mxu0 %v4081_v52 }
0x18e0   : > { %v12900_v54 = vpop.eup %12899 }
0x18e1   : > { %v4813_v50 = vsel %vm2061_vm0, %v12900_v54, 0.0 }
0x18e2   : > { %4814 = vadd.xlane.f32.xlu0 %v4813_v50 }
0x18e4   : > { %v12902_v32 = vpop.eup %12901 }
0x18e5   : > { %v4816_v31 = vsel %vm2061_vm0, %v12902_v32, 0.0 }
0x18e6   : > { %4817 = vadd.xlane.f32.xlu1 %v4816_v31 }
0x18f7   : > { %4830 = vperm.xlu1 %12717, %v14612_v35  }
0x18f8   : > { %4824 = vperm.xlu0 %12716, %v14617_v58  }
0x18fb   : > { %12723 = vset.pattern.permute.xlu1 %v13703_v41 }
0x18fc   : > { %12810 = vset.pattern.permute.xlu0 %v13696_v6 }
0x1915   : > { %v11326_v33 = vpop.f32.mrb[26].mxu1 }
0x1916   : > { %v5099_v34 = vpop.f32.mrb[27].mxu1  ;;  %v5111_v62 = vsel %vm2061_vm0, %v11326_v33, -inf }
0x1917   : > { %v5108_v12 = vsel %vm2061_vm0, %v5099_v34, -inf }
0x196f   : > { %v4815_v36 = vpop.xlane.xlu0 %4814 }
0x1970   : > { %12903 = vrcp.f32 %v4815_v36 }
0x1973   : > { %v4818_v37 = vpop.xlane.xlu1 %4817 }
0x1974   : > { %12905 = vrcp.f32 %v4818_v37 }
0x1977   : > { %v4831_v40 = vpop.permute.xlu1 %4830  ;;  %v4825_v43 = vpop.permute.xlu0 %4824 }
0x1978   : > { %v4833_v45 = vmul.f32 %v4831_v40, %v4076_v39  ;;  %v4834_v51 = vmul.f32 %v4831_v40, %v4077_v46 }
0x197a   : > { %v12904_v42 = vpop.eup %12903 }
0x197b   : > { %v4821_v44 = vmul.f32 %v12904_v42, %v12900_v54 }
0x197d   : > { %v4827_v41 = vmul.f32 %v4825_v43, %v4821_v44 }
0x197e   : > { %v12906_v47 = vpop.eup %12905 }
0x197f   : > { %v4822_v13 = vmul.f32 %v12906_v47, %v12902_v32  ;;  %v4835_v53 = vadd.f32 %v4833_v45, %v4827_v41 }
0x1981   : > { %v4828_v38 = vmul.f32 %v4825_v43, %v4822_v13  ;;  %v4837_v55 = vsel %vm2061_vm0, %v4835_v53, 0.0 }
0x1982   : > { %4838 = vadd.xlane.f32.xlu0 %v4837_v55 }
0x1983   : > { %v4836_v10 = vadd.f32 %v4834_v51, %v4828_v38  ;;  %v4083_v38 = vld [vmem:[%s15979_s7 + $0x18] sm:$0xff]  ;;  %s15983_s7 = sld [smem:[#allocation56_spill]] }
0x1985   : > { %v4840_v56 = vsel %vm2061_vm0, %v4836_v10, 0.0 }
0x1986   : > { %4841 = vadd.xlane.f32.xlu1 %v4840_v56 }
0x198a   : > { %5109 = vmax.xlane.f32.xlu1 %v5108_v12 }
0x198e   : > { %5112 = vmax.xlane.f32.xlu1 %v5111_v62 }
0x1998   : > { %12719 = vrot.lane.b32.xlu0 %v14598_v0, %s15977_s4 }
0x19b0   : > { %v11295_v49 = vpop.f32.mrb[16].mxu0 }
0x19b1   : > { %v4618_v59 = vpop.f32.mrb[17].mxu0 }
0x19b2   : > { %11298 = vmatprep.mubr.msk.f32.mxu0 %vm2373_vm2, %v4618_v59 }
0x19b3   : > { %11299 = vmatmul.mubr.msk.f32.vlgmr.msra.gmra.mrb[14].mxu0 %vm2373_vm2, %v11295_v49 }
0x1a0f   : > { %v4839_v11 = vpop.xlane.xlu0 %4838 }
0x1a10   : > { %12907 = vrcp.f32 %v4839_v11 }
0x1a13   : > { %v4842_v9 = vpop.xlane.xlu1 %4841  ;;  %v12720_v60 = vpop.permute.xlu0 %12719 }
0x1a14   : > { %12909 = vrcp.f32 %v4842_v9  ;;  %v12722_v61 = vunpack.i.h.bf16 %v12720_v60  ;;  %v12721_v2 = vunpack.i.l.bf16 %v12720_v60 }
0x1a16   : > { %v12005_v3 = vpack.c.bf16 %v12722_v61, %v12721_v2 }
0x1a17   : > { %v5110_v4 = vpop.xlane.xlu1 %5109 }
0x1a18   : > { %v5114_v5 = vsub.f32 %v5099_v34, %v5110_v4  ;;  %12006 = vmatprep.subr.bf16.mxu0 %v12005_v3 }
0x1a19   : > { %12008 = vmatpush3.bf16.msra.mxu0 %v12005_v3 }
0x1a1a   : > { %v12908_v7 = vpop.eup %12907  ;;  %v5116_v8 = vmul.f32 1.442695, %v5114_v5  ;;  %11315 = vmatprep.subr.mxu0 %v4082_v25 }
0x1a1b   : > { %v5113_v18 = vpop.xlane.xlu1 %5112  ;;  %v4845_v20 = vmul.f32 %v12908_v7, %v4835_v53 }
0x1a1c   : > { %12911 = vpow2.f32 %v5116_v8  ;;  %v5115_v21 = vsub.f32 %v11326_v33, %v5113_v18  ;;  %v4079_v33 = vld [vmem:[%s15974_s3 + $0x38] sm:$0xff]  ;;  %s15982_s3 = sld [smem:[#allocation65_spill]] }
0x1a1d   : > { %11312 = vmatprep.mubr.msk.f32.mxu0 %vm2061_vm0, %v4845_v20 }
0x1a1e   : > { %v12910_v22 = vpop.eup %12909  ;;  %v5118_v63 = vmul.f32 1.442695, %v5115_v21  ;;  %v5370_v21 = vld [vmem:[%s15983_s7] sm:$0xff] }
0x1a1f   : > { %v4846_v23 = vmul.f32 %v12910_v22, %v4836_v10  ;;  %v5371_v22 = vld [vmem:[%s15983_s7 + $0x8] sm:$0xff] }
0x1a20   : > { %12913 = vpow2.f32 %v5118_v63  ;;  %v5372_v63 = vld [vmem:[%s15983_s7 + $0x10] sm:$0xff] }
0x1a21   : > { %11313 = vmatmul.mubr.msk.f32.vlgmr.msra.gmra.mrb[18].mxu0 %vm2061_vm0, %v4846_v23  ;;  %v12019_v23 = vpack.c.bf16 %v5371_v22, %v5370_v21 }
0x1a22   : > { %11316 = vmatpush3.msra.mxu0 %v4082_v25  ;;  %v10423_v56 = vld [vmem:[%s15982_s3] ss:$0 sm:$0xff]  ;;  %s15984_s3 = sld [smem:[#allocation58_spill]] }
0x1a23   : > { %12020 = vmatprep.subr.bf16.mxu1 %v12019_v23 }
0x1a24   : > { %12022 = vmatpush3.bf16.msra.mxu1 %v12019_v23 }
0x1a26   : > { %v12912_v16 = vpop.eup %12911 }
0x1a27   : > { %v5120_v24 = vsel %vm2061_vm0, %v12912_v16, 0.0 }
0x1a28   : > { %5121 = vadd.xlane.f32.xlu1 %v5120_v24 }
0x1a2a   : > { %v12914_v15 = vpop.eup %12913 }
0x1a2b   : > { %v5123_v19 = vsel %vm2061_vm0, %v12914_v15, 0.0 }
0x1a2c   : > { %5124 = vadd.xlane.f32.xlu0 %v5123_v19  ;;  %v5481_v19 = vld [vmem:[%s15984_s3 + $0x8] sm:$0xff] }
0x1a39   : > { %5131 = vperm.xlu1 %12723, %v14617_v58  }
0x1a3d   : > { %5137 = vperm.xlu1 %12723, %v14612_v35  }
0x1a41   : > { %12809 = vset.pattern.permute.xlu1 %v13696_v6 }
0x1ab5   : > { %v5122_v57 = vpop.xlane.xlu1 %5121 }
0x1ab6   : > { %12915 = vrcp.f32 %v5122_v57 }
0x1ab9   : > { %v5125_v28 = vpop.xlane.xlu0 %5124  ;;  %v5132_v29 = vpop.permute.xlu1 %5131 }
0x1aba   : > { %12917 = vrcp.f32 %v5125_v28 }
0x1abd   : > { %v5138_v48 = vpop.permute.xlu1 %5137 }
0x1abe   : > { %v5140_v32 = vmul.f32 %v5138_v48, %v4078_v30  ;;  %v5141_v52 = vmul.f32 %v5138_v48, %v4079_v33 }
0x1ac0   : > { %v12916_v54 = vpop.eup %12915 }
0x1ac1   : > { %v5128_v50 = vmul.f32 %v12916_v54, %v12912_v16  ;;  %v5373_v16 = vld [vmem:[%s15983_s7 + $0x18] sm:$0xff]  ;;  %s15992_s7 = sld [smem:[#allocation72_spill]] }
0x1ac2   : > { %v12023_v24 = vpack.c.bf16 %v5373_v16, %v5372_v63 }
0x1ac3   : > { %v5134_v31 = vmul.f32 %v5132_v29, %v5128_v50 }
0x1ac4   : > { %v12918_v58 = vpop.eup %12917  ;;  %12024 = vmatprep.subr.bf16.mxu1 %v12023_v24 }
0x1ac5   : > { %v5129_v35 = vmul.f32 %v12918_v58, %v12914_v15  ;;  %v5142_v34 = vadd.f32 %v5140_v32, %v5134_v31  ;;  %12026 = vmatpush3.bf16.msra.mxu1 %v12023_v24  ;;  %v5480_v15 = vld [vmem:[%s15984_s3] sm:$0xff] }
0x1ac6   : > { %v12027_v25 = vpack.c.bf16 %v5481_v19, %v5480_v15  ;;  %v10448_v32 = vld [vmem:[%s15985_s10] ss:$0 sm:$0xff]  ;;  %s15988_s10 = sld [smem:[#allocation57_spill]] }
0x1ac7   : > { %v5135_v6 = vmul.f32 %v5132_v29, %v5129_v35  ;;  %v5144_v36 = vsel %vm2061_vm0, %v5142_v34, 0.0  ;;  %v10449_v58 = vld [vmem:[%s15986_s12] ss:$0 sm:$0xff]  ;;  %s15987_s12 = sld [smem:[#allocation55_spill]] }
0x1ac8   : > { %5145 = vadd.xlane.f32.xlu1 %v5144_v36 }
0x1ac9   : > { %v5143_v37 = vadd.f32 %v5141_v52, %v5135_v6 }
0x1acb   : > { %v5147_v39 = vsel %vm2061_vm0, %v5143_v37, 0.0 }
0x1acc   : > { %5148 = vadd.xlane.f32.xlu0 %v5147_v39  ;;  %v5483_v39 = vld [vmem:[%s15984_s3 + $0x18] sm:$0xff] }
0x1ae2   : > { %12725 = vrot.lane.b32.xlu0 %v14598_v0, %s15981_s9 }
0x1af4   : > { %v11314_v40 = vpop.f32.mrb[18].mxu0 }
0x1af5   : > { %v4925_v42 = vpop.f32.mrb[19].mxu0 }
0x1af6   : > { %11317 = vmatprep.mubr.msk.f32.mxu0 %vm2373_vm2, %v4925_v42  ;;  %v5484_v42 = vld [vmem:[%s15984_s3 + $0x20] sm:$0xff] }
0x1af7   : > { %11318 = vmatmul.mubr.msk.f32.vlgmr.msra.gmra.mrb[14].mxu0 %vm2373_vm2, %v11314_v40 }
0x1b55   : > { %v5146_v43 = vpop.xlane.xlu1 %5145 }
0x1b56   : > { %12919 = vrcp.f32 %v5146_v43  ;;  %v5485_v43 = vld [vmem:[%s15984_s3 + $0x28] sm:$0xff] }
0x1b59   : > { %v5149_v44 = vpop.xlane.xlu0 %5148 }
0x1b5a   : > { %12921 = vrcp.f32 %v5149_v44  ;;  %v12035_v44 = vpack.c.bf16 %v5485_v43, %v5484_v42 }
0x1b5d   : > { %v12726_v45 = vpop.permute.xlu0 %12725 }
0x1b5e   : > { %v12728_v46 = vunpack.i.h.bf16 %v12726_v45  ;;  %v12727_v41 = vunpack.i.l.bf16 %v12726_v45  ;;  %v5486_v45 = vld [vmem:[%s15984_s3 + $0x30] sm:$0xff] }
0x1b60   : > { %v12920_v47 = vpop.eup %12919  ;;  %v12015_v13 = vpack.c.bf16 %v12728_v46, %v12727_v41  ;;  %v5487_v46 = vld [vmem:[%s15984_s3 + $0x38] sm:$0xff] }
0x1b61   : > { %v5152_v51 = vmul.f32 %v12920_v47, %v5142_v34  ;;  %v12039_v41 = vpack.c.bf16 %v5487_v46, %v5486_v45  ;;  %v5488_v47 = vld [vmem:[%s15984_s3 + $0x40] sm:$0xff] }
0x1b62   : > { %12016 = vmatprep.subr.bf16.mxu0 %v12015_v13 }
0x1b63   : > { %12018 = vmatpush3.bf16.msra.mxu0 %v12015_v13  ;;  %11331 = vmatprep.mubr.msk.f32.mxu0 %vm2061_vm0, %v5152_v51  ;;  %v5489_v13 = vld [vmem:[%s15984_s3 + $0x48] sm:$0xff]  ;;  %v5490_v51 = vld [vmem:[%s15984_s3 + $0x50] sm:$0xff] }
0x1b64   : > { %v12922_v0 = vpop.eup %12921  ;;  %11334 = vmatprep.subr.mxu0 %v4083_v38 }
0x1b65   : > { %v5153_v53 = vmul.f32 %v12922_v0, %v5143_v37  ;;  %v5482_v37 = vld [vmem:[%s15984_s3 + $0x10] sm:$0xff]  ;;  %v12043_v0 = vpack.c.bf16 %v5489_v13, %v5488_v47 }
0x1b66   : > { %v12031_v40 = vpack.c.bf16 %v5483_v39, %v5482_v37 }
0x1b67   : > { %11332 = vmatmul.mubr.msk.f32.vlgmr.msra.gmra.mrb[20].mxu0 %vm2061_vm0, %v5153_v53  ;;  %v5491_v53 = vld [vmem:[%s15984_s3 + $0x58] sm:$0xff] }
0x1b68   : > { %11335 = vmatpush3.msra.mxu0 %v4083_v38  ;;  %v12047_v38 = vpack.c.bf16 %v5491_v53, %v5490_v51 }
0x1b69   : > { %12028 = vmatprep.subr.bf16.mxu0 %v12027_v25 }
0x1c3a   : > { %v11333_v55 = vpop.f32.mrb[20].mxu0 }
0x1c3b   : > { %v5232_v10 = vpop.f32.mrb[21].mxu0 }
0x1c3c   : > { %11336 = vmatprep.mubr.msk.f32.mxu0 %vm2373_vm2, %v5232_v10  ;;  %v5493_v10 = vld [vmem:[%s15984_s3 + $0x68] sm:$0xff] }
0x1c3d   : > { %11337 = vmatmul.mubr.msk.f32.vlgmr.msra.gmra.mrb[14].mxu0 %vm2373_vm2, %v11333_v55  ;;  %v5492_v55 = vld [vmem:[%s15984_s3 + $0x60] sm:$0xff] }
0x1c3e   : > { %12030 = vmatpush3.bf16.msra.mxu0 %v12027_v25 }
0x1c3f   : > { %12032 = vmatprep.subr.bf16.mxu0 %v12031_v40 }
0x1c42   : > { %12034 = vmatpush3.bf16.msra.mxu0 %v12031_v40 }
0x1c43   : > { %12036 = vmatprep.subr.bf16.mxu0 %v12035_v44 }
0x1c46   : > { %12038 = vmatpush3.bf16.msra.mxu0 %v12035_v44 }
0x1c47   : > { %12040 = vmatprep.subr.bf16.mxu0 %v12039_v41 }
0x1c4a   : > { %12042 = vmatpush3.bf16.msra.mxu0 %v12039_v41 }
0x1c4b   : > { %12044 = vmatprep.subr.bf16.mxu0 %v12043_v0 }
0x1c4e   : > { %12046 = vmatpush3.bf16.msra.mxu0 %v12043_v0  ;;  %v13704_v0 = vmov 0.0|0.0  }
0x1c4f   : > { %12048 = vmatprep.subr.bf16.mxu0 %v12047_v38  ;;  %12059 = vmatprep.subr.bf16.mxu1 %v13704_v0 }
0x1c52   : > { %12050 = vmatpush3.bf16.msra.mxu0 %v12047_v38 }
0x1d10   : > { %v11338_v12 = vpop.f32.mrb[14].mxu0 }
0x1d11   : > { %v12349_v62 = vadd.f32 %v11338_v12, %v10423_v56  ;;  %v5313_v49 = vpop.f32.mrb[15].mxu0  ;;  %v5494_v12 = vld [vmem:[%s15984_s3 + $0x70] sm:$0xff] }
0x1d12   : > { %v12350_v59 = vadd.f32 %v10423_v56, %v5313_v49  ;;  %v12051_v56 = vpack.c.bf16 %v5493_v10, %v5492_v55  ;;  %v13706_v10 = vmov 0.0  }
0x1d13   : > { %v14732_v11 = vadd.f32 %v12349_v62, %v14562_v27  ;;  %v5495_v62 = vld [vmem:[%s15984_s3 + $0x78] sm:$0xff]  ;;  %s15840_s3 = smov 64  }
0x1d14   : > { %v14735_v9 = vadd.f32 %v12350_v59, %v14559_v26  ;;  %12052 = vmatprep.subr.bf16.mxu0 %v12051_v56  ;;  %v12055_v49 = vpack.c.bf16 %v5495_v62, %v5494_v12  ;;  %v10450_v59 = vld [vmem:[%s15987_s12] ss:$0 sm:$0xff]  ;;  %s15989_s12 = sld [smem:[#allocation78_spill]] }
0x1d15   : > { %v5329_v60 = vsel %vm2143_vm1, %v14732_v11, 0.0  ;;  %12054 = vmatpush3.bf16.msra.mxu0 %v12051_v56 }
0x1d16   : > { %5330 = vadd.xlane.f32.xlu1 %v5329_v60  ;;  %v5326_v61 = vsel %vm2143_vm1, %v14735_v9, 0.0  ;;  %12056 = vmatprep.subr.bf16.mxu0 %v12055_v49 }
0x1d17   : > { %5327 = vadd.xlane.f32.xlu0 %v5326_v61 }
0x1d19   : > { %12058 = vmatpush3.bf16.msra.mxu0 %v12055_v49 }
0x1d1a   : > { %v5641_v47 = vld [vmem:[%s15989_s12] sm:$0xff]  ;;  %v5642_v13 = vld [vmem:[%s15989_s12 + $0x8] sm:$0xff]  ;;  %v5643_v53 = vld [vmem:[%s15989_s12 + $0x10] sm:$0xff]  ;;  %11432 = vmatprep.subr.mxu0 %v13706_v10 }
0x1d1b   : > { %v12060_v51 = vpack.c.bf16 %v5642_v13, %v5641_v47  ;;  %v5644_v38 = vld [vmem:[%s15989_s12 + $0x18] sm:$0xff] }
0x1d1c   : > { %v12063_v55 = vpack.c.bf16 %v5644_v38, %v5643_v53 }
0x1da3   : > { %v5331_v2 = vpop.xlane.xlu1 %5330 }
0x1da4   : > { %v5333_v3 = vmul.f32 0.03125, %v5331_v2  ;;  %v5328_v4 = vpop.xlane.xlu0 %5327 }
0x1da5   : > { %v5332_v27 = vmul.f32 0.03125, %v5328_v4 }
0x1da6   : > { %v5335_v5 = vsub.f32 %v14732_v11, %v5333_v3 }
0x1da7   : > { %v5334_v26 = vsub.f32 %v14735_v9, %v5332_v27 }
0x1da8   : > { %v5337_v18 = vmul.f32 %v5335_v5, %v5335_v5 }
0x1da9   : > { %v5336_v7 = vmul.f32 %v5334_v26, %v5334_v26 }
0x1daa   : > { %v5341_v20 = vsel %vm2143_vm1, %v5337_v18, 0.0 }
0x1dab   : > { %v5338_v8 = vsel %vm2143_vm1, %v5336_v7, 0.0 }
0x1dac   : > { %5339 = vadd.xlane.f32.xlu1 %v5338_v8 }
0x1db0   : > { %5342 = vadd.xlane.f32.xlu1 %v5341_v20 }
0x1e39   : > { %v5340_v57 = vpop.xlane.xlu1 %5339 }
0x1e3a   : > { %v5344_v28 = vmul.f32 0.03125, %v5340_v57 }
0x1e3c   : > { %v5346_v29 = vadd.f32 1e-06, %v5344_v28  ;;  %v10453_v28 = vld [vmem:[%s15988_s10] ss:$0 sm:$0xff]  ;;  %s15990_s10 = sld [smem:[#allocation77_spill]] }
0x1e3d   : > { %v5343_v30 = vpop.xlane.xlu1 %5342 }
0x1e3e   : > { %12923 = vrsqrt.f32 %v5346_v29  ;;  %v5345_v48 = vmul.f32 0.03125, %v5343_v30 }
0x1e40   : > { %v5347_v54 = vadd.f32 1e-06, %v5345_v48 }
0x1e42   : > { %12925 = vrsqrt.f32 %v5347_v54 }
0x1e48   : > { %v12924_v50 = vpop.eup %12923 }
0x1e49   : > { %v5350_v31 = vmul.f32 %v12924_v50, %v5334_v26 }
0x1e4b   : > { %v5359_v33 = vmul.f32 %v10448_v32, %v5350_v31 }
0x1e4c   : > { %v12926_v35 = vpop.eup %12925 }
0x1e4d   : > { %v5351_v34 = vmul.f32 %v12926_v35, %v5335_v5  ;;  %v5368_v6 = vadd.f32 %v10449_v58, %v5359_v33 }
0x1e4f   : > { %v5360_v52 = vmul.f32 %v10448_v32, %v5351_v34  ;;  %11347 = vmatprep.mubr.msk.f32.mxu1 %vm2143_vm1, %v5368_v6 }
0x1e51   : > { %v5369_v36 = vadd.f32 %v10449_v58, %v5360_v52  ;;  %v5580_v58 = vld [vmem:[#allocation23] sm:$0x1] }
0x1e52   : > { %v5588_v35 = vsel %vm5587_vm4, %v5580_v58, 0.0 }
0x1e53   : > { %11348 = vmatmul.mubr.msk.f32.vlgmr.msra.gmra.mrb[28].mxu1 %vm2143_vm1, %v5369_v36 }
0x1e54   : > { %12061 = vmatpush3.bf16.msra.mxu1 %v12060_v51  ;;  %11393 = vmatprep.mubr.msk.f32.mxu1 %vm13705_vm5, %v13706_v10 }
0x1e55   : > { %12062 = vmatprep.subr.bf16.mxu1 %v13704_v0 }
0x1e58   : > { %12064 = vmatpush3.bf16.msra.mxu1 %v12063_v55 }
0x1e59   : > { %12065 = vmatprep.subr.bf16.mxu1 %v13704_v0 }
0x1f26   : > { %v11349_v60 = vpop.f32.mrb[28].mxu1 }
0x1f27   : > { %v5459_v61 = vadd.f32 %v11349_v60, %v10450_v59  ;;  %v5453_v2 = vpop.f32.mrb[29].mxu1 }
0x1f28   : > { %v5454_v3 = vadd.f32 %v10450_v59, %v5453_v2 }
0x1f29   : > { %v5465_v4 = vmul.f32 0.044715, %v5459_v61  ;;  %v5463_v19 = vmul.f32 0.5, %v5459_v61 }
0x1f2a   : > { %v5464_v27 = vmul.f32 0.044715, %v5454_v3  ;;  %v5462_v24 = vmul.f32 0.5, %v5454_v3 }
0x1f2b   : > { %v5467_v5 = vmul.f32 %v5465_v4, %v5459_v61 }
0x1f2c   : > { %v5466_v26 = vmul.f32 %v5464_v27, %v5454_v3  ;;  %v10454_v27 = vld [vmem:[#allocation6] ss:$0 sm:$0xff] }
0x1f2d   : > { %v5469_v7 = vmul.f32 %v5467_v5, %v5459_v61 }
0x1f2e   : > { %v5468_v8 = vmul.f32 %v5466_v26, %v5454_v3  ;;  %v10455_v26 = vld [vmem:[#allocation3] ss:$0 sm:$0xff] }
0x1f2f   : > { %v5471_v18 = vadd.f32 %v5469_v7, %v5459_v61 }
0x1f30   : > { %v5470_v20 = vadd.f32 %v5468_v8, %v5454_v3 }
0x1f31   : > { %v5473_v21 = vmul.f32 0.7978846, %v5471_v18 }
0x1f32   : > { %v5472_v22 = vmul.f32 0.7978846, %v5470_v20 }
0x1f33   : > { %12927 = vtanh.f32 %v5473_v21 }
0x1f34   : > { %12929 = vtanh.f32 %v5472_v22 }
0x1f3d   : > { %v12928_v63 = vpop.eup %12927 }
0x1f3e   : > { %v12930_v23 = vpop.eup %12929  ;;  %v5477_v16 = vadd.f32 1.0, %v12928_v63 }
0x1f3f   : > { %v5476_v15 = vadd.f32 1.0, %v12930_v23 }
0x1f40   : > { %v5479_v57 = vmul.f32 %v5477_v16, %v5463_v19 }
0x1f41   : > { %v5478_v25 = vmul.f32 %v5476_v15, %v5462_v24 }
0x1f43   : > { %11382 = vmatprep.mubr.f32.mxu0 %v5478_v25 }
0x1f44   : > { %11383 = vmatmul.mubr.f32.vlgmr.msra.gmra.mrb[22].mxu0 %v5479_v57 }
0x1f45   : > { %11434 = vmatprep.mubr.msk.f32.mxu0 %vm13705_vm5, %v13706_v10 }
0x2017   : > { %v11384_v29 = vpop.f32.mrb[22].mxu0 }
0x2018   : > { %v5569_v30 = vpop.f32.mrb[23].mxu0  ;;  %v5575_v48 = vadd.f32 %v11384_v29, %v10453_v28 }
0x2019   : > { %v5570_v54 = vadd.f32 %v10453_v28, %v5569_v30 }
0x201a   : > { %v14775_v32 = vadd.f32 %v5575_v48, %v14732_v11 }
0x201b   : > { %v14772_v50 = vadd.f32 %v5570_v54, %v14735_v9 }
0x201c   : > { %v5584_v33 = vsel %vm2143_vm1, %v14775_v32, 0.0 }
0x201d   : > { %v5581_v31 = vsel %vm2143_vm1, %v14772_v50, 0.0 }
0x201e   : > { %5582 = vadd.xlane.f32.xlu1 %v5581_v31 }
0x2022   : > { %5585 = vadd.xlane.f32.xlu1 %v5584_v33 }
0x2026   : > { %5589 = vadd.xlane.f32.xlu1 %v5588_v35 }
0x20ab   : > { %v5583_v34 = vpop.xlane.xlu1 %5582 }
0x20ac   : > { %v5591_v6 = vmul.f32 0.03125, %v5583_v34 }
0x20ae   : > { %v5594_v9 = vsub.f32 %v14772_v50, %v5591_v6 }
0x20af   : > { %v5586_v11 = vpop.xlane.xlu1 %5585 }
0x20b0   : > { %v5592_v52 = vmul.f32 0.03125, %v5586_v11  ;;  %v5597_v36 = vmul.f32 %v5594_v9, %v5594_v9 }
0x20b2   : > { %v5595_v37 = vsub.f32 %v14775_v32, %v5592_v52  ;;  %v5600_v39 = vsel %vm2143_vm1, %v5597_v36, 0.0 }
0x20b3   : > { %5601 = vadd.xlane.f32.xlu1 %v5600_v39  ;;  %v5590_v40 = vpop.xlane.xlu1 %5589 }
0x20b4   : > { %v5593_v42 = vmul.f32 0.03125, %v5590_v40  ;;  %v5598_v43 = vmul.f32 %v5595_v37, %v5595_v37 }
0x20b6   : > { %v5596_v44 = vsub.f32 %v5580_v58, %v5593_v42  ;;  %v5603_v45 = vsel %vm2143_vm1, %v5598_v43, 0.0 }
0x20b7   : > { %5604 = vadd.xlane.f32.xlu1 %v5603_v45 }
0x20b8   : > { %v5599_v46 = vmul.f32 %v5596_v44, %v5596_v44 }
0x20ba   : > { %v5606_v41 = vsel %vm5587_vm4, %v5599_v46, 0.0 }
0x20bb   : > { %5607 = vadd.xlane.f32.xlu0 %v5606_v41 }
0x2140   : > { %v5602_v56 = vpop.xlane.xlu1 %5601 }
0x2141   : > { %v5609_v12 = vmul.f32 0.03125, %v5602_v56 }
0x2143   : > { %v5612_v62 = vadd.f32 1e-06, %v5609_v12 }
0x2144   : > { %v5605_v49 = vpop.xlane.xlu1 %5604 }
0x2145   : > { %12931 = vrsqrt.f32 %v5612_v62  ;;  %v5610_v59 = vmul.f32 0.03125, %v5605_v49  ;;  %v5734_v62 = vld [vmem:[%s15990_s10] sm:$0xff] }
0x2146   : > { %11433 = vmatpush3.msra.mxu0 %v5734_v62 }
0x2147   : > { %v5613_v60 = vadd.f32 1e-06, %v5610_v59  ;;  %12072 = vmatprep.subr.bf16.mxu0 %v13704_v0 }
0x2148   : > { %v5608_v61 = vpop.xlane.xlu0 %5607 }
0x2149   : > { %12933 = vrsqrt.f32 %v5613_v60  ;;  %v5611_v2 = vmul.f32 0.03125, %v5608_v61 }
0x214b   : > { %v5614_v3 = vadd.f32 1e-06, %v5611_v2 }
0x214d   : > { %12935 = vrsqrt.f32 %v5614_v3 }
0x214f   : > { %v12932_v4 = vpop.eup %12931 }
0x2150   : > { %v5618_v5 = vmul.f32 %v12932_v4, %v5594_v9 }
0x2152   : > { %v5628_v7 = vmul.f32 %v10454_v27, %v5618_v5 }
0x2153   : > { %v12934_v8 = vpop.eup %12933 }
0x2154   : > { %v5638_v18 = vadd.f32 %v10455_v26, %v5628_v7  ;;  %v5619_v20 = vmul.f32 %v12934_v8, %v5595_v37 }
0x2156   : > { %11394 = vmatmul.mubr.msk.f32.vlgmr.msra.gmra.mrb[30].mxu1 %vm2143_vm1, %v5638_v18  ;;  %v5629_v21 = vmul.f32 %v10454_v27, %v5619_v20 }
0x2157   : > { %v12936_v22 = vpop.eup %12935  ;;  %11396 = vmatprep.mubr.msk.f32.mxu1 %vm13705_vm5, %v13706_v10 }
0x2158   : > { %v5639_v63 = vadd.f32 %v10455_v26, %v5629_v21  ;;  %v5620_v23 = vmul.f32 %v12936_v22, %v5596_v44 }
0x215a   : > { %11397 = vmatmul.mubr.msk.f32.gmra.mrb[32].mxu1 %vm2143_vm1, %v5639_v63  ;;  %v5630_v16 = vmul.f32 %v10454_v27, %v5620_v23 }
0x215b   : > { %11399 = vmatprep.mubr.msk.f32.mxu1 %vm13705_vm5, %v13706_v10 }
0x215c   : > { %v5640_v24 = vadd.f32 %v10455_v26, %v5630_v16 }
0x215e   : > { %11400 = vmatmul.mubr.msk.f32.gmra.mrb[34].mxu1 %vm2143_vm1, %v5640_v24 }
0x215f   : > { %11408 = vmatprep.mubr.msk.f32.mxu1 %vm13705_vm5, %v13706_v10 }
0x2229   : > { %v14808_v15 = vpop.f32.mrb[30].mxu1 }
0x222a   : > { %v11395_v19 = vpop.f32.mrb[31].mxu1 }
0x222d   : > { %v14810_v25 = vpop.f32.mrb[32].mxu1 }
0x222e   : > { %v11398_v57 = vpop.f32.mrb[33].mxu1  ;;  %v14814_v28 = vpack.i.bf16 %v14810_v25, %v14808_v15 }
0x2230   : > { %12730 = vrot.lane.b32.xlu1 %v14814_v28, %s15971_s2 }
0x2231   : > { %v14818_v29 = vpop.f32.mrb[34].mxu1 }
0x2232   : > { %5746 = vrot.lane.b32.xlu0 %v14818_v29, %s15971_s2  ;;  %v11401_v30 = vpop.f32.mrb[35].mxu1 }
0x22a2   : > { %v12731_v48 = vpop.permute.xlu1 %12730 }
0x22a3   : > { %v12733_v54 = vunpack.i.h.bf16 %v12731_v48  ;;  %v12732_v31 = vunpack.i.l.bf16 %v12731_v48 }
0x22a4   : > { %v5747_v33 = vpop.permute.xlu0 %5746 }
0x22a5   : > { %v12066_v58 = vpack.c.bf16 %v12733_v54, %v12732_v31 }
0x22a7   : > { %12068 = vmatpush3.bf16.xpose.msk.msra.mxu1 %vm14373_vm3, %v12066_v58 }
0x22a8   : > { %11406 = vmatprep.subr.mxu1 %v13706_v10 }
0x22af   : > { %11407 = vmatpush3.xpose.msk.msra.mxu1 %vm2373_vm2, %v5747_v33 }
0x22b0   : > { %12069 = vmatprep.subr.bf16.mxu1 %v13704_v0 }
0x22b2   : > { %11409 = vmatmul.mubr.msk.f32.vlgmr.msra.gmra.mrb[36].mxu1 %vm2373_vm2, %v14808_v15 }
0x22b3   : > { %11411 = vmatprep.mubr.msk.f32.mxu1 %vm13705_vm5, %v13706_v10 }
0x22b6   : > { %11412 = vmatmul.mubr.msk.f32.gmra.mrb[38].mxu1 %vm2373_vm2, %v14810_v25 }
0x22b7   : > { %11414 = vmatprep.mubr.msk.f32.mxu1 %vm13705_vm5, %v13706_v10 }
0x22ba   : > { %11415 = vmatmul.mubr.msk.f32.gmra.mrb[40].mxu1 %vm2373_vm2, %v14818_v29 }
0x22bb   : > { %11423 = vmatprep.mubr.msk.f32.mxu1 %vm13705_vm5, %v13706_v10 }
0x2385   : > { %v5826_v35 = vpop.f32.mrb[36].mxu1 }
0x2386   : > { %v11410_v34 = vpop.f32.mrb[37].mxu1  ;;  %v5841_v6 = vsel %vm5840_vm6, %v5826_v35, -inf }
0x2387   : > { %5842 = vmax.xlane.f32.xlu1 %v5841_v6 }
0x2389   : > { %v5831_v9 = vpop.f32.mrb[38].mxu1 }
0x238a   : > { %v11413_v11 = vpop.f32.mrb[39].mxu1  ;;  %v5844_v52 = vsel %vm5840_vm6, %v5831_v9, -inf }
0x238b   : > { %5845 = vmax.xlane.f32.xlu0 %v5844_v52 }
0x238d   : > { %v5836_v36 = vpop.f32.mrb[40].mxu1 }
0x238e   : > { %v11416_v37 = vpop.f32.mrb[41].mxu1  ;;  %v5848_v39 = vsel %vm5847_vm7, %v5836_v36, -inf }
0x238f   : > { %5849 = vmax.xlane.f32.xlu1 %v5848_v39 }
0x2414   : > { %v5843_v40 = vpop.xlane.xlu1 %5842 }
0x2415   : > { %v5851_v42 = vsub.f32 %v5826_v35, %v5843_v40 }
0x2417   : > { %v5854_v43 = vmul.f32 1.442695, %v5851_v42 }
0x2418   : > { %v5846_v44 = vpop.xlane.xlu0 %5845 }
0x2419   : > { %12937 = vpow2.f32 %v5854_v43  ;;  %v5852_v45 = vsub.f32 %v5831_v9, %v5846_v44 }
0x241b   : > { %v5856_v46 = vmul.f32 1.442695, %v5852_v45 }
0x241c   : > { %v5850_v41 = vpop.xlane.xlu1 %5849 }
0x241d   : > { %12939 = vpow2.f32 %v5856_v46  ;;  %v5853_v47 = vsub.f32 %v5836_v36, %v5850_v41 }
0x241f   : > { %v5858_v13 = vmul.f32 1.442695, %v5853_v47 }
0x2421   : > { %12941 = vpow2.f32 %v5858_v13 }
0x2423   : > { %v12938_v51 = vpop.eup %12937 }
0x2424   : > { %v5860_v53 = vsel %vm5840_vm6, %v12938_v51, 0.0 }
0x2425   : > { %5861 = vadd.xlane.f32.xlu0 %v5860_v53 }
0x2427   : > { %v12940_v38 = vpop.eup %12939 }
0x2428   : > { %v5863_v55 = vsel %vm5840_vm6, %v12940_v38, 0.0 }
0x2429   : > { %5864 = vadd.xlane.f32.xlu1 %v5863_v55 }
0x242b   : > { %v12942_v56 = vpop.eup %12941 }
0x242c   : > { %v5866_v12 = vsel %vm5847_vm7, %v12942_v56, 0.0 }
0x242d   : > { %5867 = vadd.xlane.f32.xlu0 %v5866_v12 }
0x243a   : > { %12735 = vrot.lane.b32.xlu1 %v14814_v28, %s15840_s3 }
0x243e   : > { %12740 = vrot.lane.b32.xlu1 %v14814_v28, %s15976_s26 }
0x2442   : > { %6083 = vrot.lane.b32.xlu1 %v14818_v29, %s15976_s26 }
0x2443   : > { %5879 = vrot.lane.b32.xlu0 %v14818_v29, %s15840_s3  ;;  %s15842_s3 = smov 56  }
0x2446   : > { %6075 = vrot.lane.b32.xlu1 %v14810_v25, %s15975_s1 }
0x2447   : > { %6073 = vrot.lane.b32.xlu0 %v14808_v15, %s15975_s1 }
0x244b   : > { %6077 = vrot.lane.b32.xlu0 %v14818_v29, %s15975_s1 }
0x24b2   : > { %v5862_v49 = vpop.xlane.xlu0 %5861 }
0x24b3   : > { %12943 = vrcp.f32 %v5862_v49 }
0x24b6   : > { %v5865_v59 = vpop.xlane.xlu1 %5864 }
0x24b7   : > { %12945 = vrcp.f32 %v5865_v59 }
0x24ba   : > { %v5868_v60 = vpop.xlane.xlu0 %5867  ;;  %v12736_v61 = vpop.permute.xlu1 %12735 }
0x24bb   : > { %v12738_v2 = vunpack.i.h.bf16 %v12736_v61  ;;  %v12737_v3 = vunpack.i.l.bf16 %v12736_v61  ;;  %12947 = vrcp.f32 %v5868_v60 }
0x24bd   : > { %v12070_v4 = vpack.c.bf16 %v12738_v2, %v12737_v3  ;;  %v12944_v27 = vpop.eup %12943 }
0x24be   : > { %v5872_v5 = vmul.f32 %v12944_v27, %v12938_v51  ;;  %v5880_v26 = vpop.permute.xlu0 %5879  ;;  %v12741_v21 = vpop.permute.xlu1 %12740 }
0x24bf   : > { %12071 = vmatpush3.bf16.msra.mxu1 %v12070_v4  ;;  %v12743_v22 = vunpack.i.h.bf16 %v12741_v21  ;;  %v12742_v63 = vunpack.i.l.bf16 %v12741_v21 }
0x24c0   : > { %11421 = vmatprep.subr.mxu1 %v13706_v10 }
0x24c1   : > { %v12946_v7 = vpop.eup %12945  ;;  %v12073_v23 = vpack.c.bf16 %v12743_v22, %v12742_v63 }
0x24c2   : > { %v5873_v8 = vmul.f32 %v12946_v7, %v12940_v38  ;;  %v6084_v48 = vpop.permute.xlu1 %6083  ;;  %v6074_v31 = vpop.permute.xlu0 %6073 }
0x24c3   : > { %11422 = vmatpush3.msk.msra.mxu1 %vm5892_vm8, %v5880_v26 }
0x24c4   : > { %11424 = vmatmul.mubr.msk.f32.vlgmr.msra.gmra.mrb[42].mxu1 %vm5840_vm6, %v5872_v5  ;;  %12076 = vmatprep.subr.bf16.mxu1 %v13704_v0 }
0x24c5   : > { %11426 = vmatprep.mubr.msk.f32.mxu1 %vm13705_vm5, %v13706_v10  ;;  %v12948_v18 = vpop.eup %12947 }
0x24c6   : > { %v5874_v20 = vmul.f32 %v12948_v18, %v12942_v56  ;;  %v6076_v58 = vpop.permute.xlu1 %6075  ;;  %v6078_v33 = vpop.permute.xlu0 %6077 }
0x24c8   : > { %11427 = vmatmul.mubr.msk.f32.gmra.mrb[44].mxu1 %vm5840_vm6, %v5873_v8 }
0x24c9   : > { %11429 = vmatprep.mubr.msk.f32.mxu1 %vm13705_vm5, %v13706_v10 }
0x24cc   : > { %11430 = vmatmul.mubr.msk.f32.gmra.mrb[46].mxu1 %vm5840_vm6, %v5874_v20 }
0x24cd   : > { %11464 = vmatprep.mubr.msk.f32.mxu1 %vm13705_vm5, %v13706_v10 }
0x2597   : > { %v5961_v16 = vpop.f32.mrb[42].mxu1 }
0x2598   : > { %v11425_v24 = vpop.f32.mrb[43].mxu1  ;;  %11435 = vmatmul.mubr.msk.f32.vlgmr.msra.gmra.mrb[24].mxu0 %vm2373_vm2, %v5961_v16 }
0x2599   : > { %12075 = vmatpush3.bf16.xpose.msk.msra.mxu0 %vm14373_vm3, %v12073_v23  ;;  %11437 = vmatprep.mubr.msk.f32.mxu0 %vm13705_vm5, %v13706_v10 }
0x259a   : > { %11447 = vmatprep.subr.mxu0 %v13706_v10 }
0x259b   : > { %v5966_v19 = vpop.f32.mrb[44].mxu1 }
0x259c   : > { %v11428_v57 = vpop.f32.mrb[45].mxu1  ;;  %11438 = vmatmul.mubr.msk.f32.gmra.mrb[26].mxu0 %vm2373_vm2, %v5966_v19 }
0x259d   : > { %11440 = vmatprep.mubr.msk.f32.mxu0 %vm13705_vm5, %v13706_v10 }
0x259f   : > { %v5971_v30 = vpop.f32.mrb[46].mxu1 }
0x25a0   : > { %v11431_v54 = vpop.f32.mrb[47].mxu1  ;;  %11441 = vmatmul.mubr.msk.f32.gmra.mrb[28].mxu0 %vm2373_vm2, %v5971_v30 }
0x25a1   : > { %11448 = vmatpush3.xpose.msk.msra.mxu0 %vm2373_vm2, %v6084_v48  ;;  %11449 = vmatprep.mubr.msk.f32.mxu0 %vm13705_vm5, %v13706_v10 }
0x25a2   : > { %11473 = vmatprep.subr.mxu0 %v13706_v10 }
0x25a4   : > { %11450 = vmatmul.mubr.msk.f32.vlgmr.msra.gmra.mrb[30].mxu0 %vm2373_vm2, %v6074_v31 }
0x25a5   : > { %11452 = vmatprep.mubr.msk.f32.mxu0 %vm13705_vm5, %v13706_v10 }
0x25a8   : > { %11453 = vmatmul.mubr.msk.f32.gmra.mrb[32].mxu0 %vm2373_vm2, %v6076_v58 }
0x25a9   : > { %11455 = vmatprep.mubr.msk.f32.mxu0 %vm13705_vm5, %v13706_v10 }
0x25ac   : > { %11456 = vmatmul.mubr.msk.f32.gmra.mrb[34].mxu0 %vm2373_vm2, %v6078_v33  ;;  %v5735_v33 = vld [vmem:[%s15990_s10 + $0x8] sm:$0xff] }
0x25ad   : > { %11475 = vmatprep.mubr.msk.f32.mxu0 %vm13705_vm5, %v13706_v10  ;;  %11474 = vmatpush3.msra.mxu0 %v5735_v33 }
0x25ae   : > { %12083 = vmatprep.subr.bf16.mxu0 %v13704_v0 }
0x266b   : > { %v14896_v35 = vpop.f32.mrb[24].mxu0 }
0x266c   : > { %v11436_v34 = vpop.f32.mrb[25].mxu0 }
0x266f   : > { %v14898_v6 = vpop.f32.mrb[26].mxu0 }
0x2670   : > { %v11439_v9 = vpop.f32.mrb[27].mxu0 }
0x2673   : > { %v14900_v11 = vpop.f32.mrb[28].mxu0 }
0x2674   : > { %v11442_v52 = vpop.f32.mrb[29].mxu0 }
0x2677   : > { %v6163_v36 = vpop.f32.mrb[30].mxu0 }
0x2678   : > { %v11451_v37 = vpop.f32.mrb[31].mxu0  ;;  %v6177_v39 = vsel %vm5840_vm6, %v6163_v36, -inf }
0x2679   : > { %6178 = vmax.xlane.f32.xlu1 %v6177_v39 }
0x267b   : > { %v6168_v40 = vpop.f32.mrb[32].mxu0 }
0x267c   : > { %v11454_v42 = vpop.f32.mrb[33].mxu0  ;;  %v6180_v43 = vsel %vm5840_vm6, %v6168_v40, -inf }
0x267d   : > { %6181 = vmax.xlane.f32.xlu0 %v6180_v43 }
0x267f   : > { %v6173_v44 = vpop.f32.mrb[34].mxu0 }
0x2680   : > { %v11457_v45 = vpop.f32.mrb[35].mxu0  ;;  %v6183_v46 = vsel %vm5847_vm7, %v6173_v44, -inf }
0x2681   : > { %6184 = vmax.xlane.f32.xlu0 %v6183_v46 }
0x2706   : > { %v6179_v41 = vpop.xlane.xlu1 %6178 }
0x2707   : > { %v6186_v47 = vsub.f32 %v6163_v36, %v6179_v41 }
0x2709   : > { %v6189_v13 = vmul.f32 1.442695, %v6186_v47 }
0x270a   : > { %v6182_v51 = vpop.xlane.xlu0 %6181 }
0x270b   : > { %12949 = vpow2.f32 %v6189_v13  ;;  %v6187_v53 = vsub.f32 %v6168_v40, %v6182_v51 }
0x270d   : > { %v6191_v38 = vmul.f32 1.442695, %v6187_v53 }
0x270e   : > { %v6185_v49 = vpop.xlane.xlu0 %6184 }
0x270f   : > { %12951 = vpow2.f32 %v6191_v38  ;;  %v6188_v59 = vsub.f32 %v6173_v44, %v6185_v49 }
0x2711   : > { %v6193_v60 = vmul.f32 1.442695, %v6188_v59 }
0x2713   : > { %12953 = vpow2.f32 %v6193_v60 }
0x2715   : > { %v12950_v55 = vpop.eup %12949 }
0x2716   : > { %v6195_v56 = vsel %vm5840_vm6, %v12950_v55, 0.0 }
0x2717   : > { %6196 = vadd.xlane.f32.xlu1 %v6195_v56 }
0x2719   : > { %v12952_v12 = vpop.eup %12951 }
0x271a   : > { %v6198_v62 = vsel %vm5840_vm6, %v12952_v12, 0.0 }
0x271b   : > { %6199 = vadd.xlane.f32.xlu0 %v6198_v62  ;;  %v10472_v62 = vld [vmem:[#allocation11] ss:$0 sm:$0xff] }
0x271d   : > { %v12954_v61 = vpop.eup %12953 }
0x271e   : > { %v6201_v2 = vsel %vm5847_vm7, %v12954_v61, 0.0 }
0x2728   : > { %6214 = vrot.lane.b32.xlu1 %v14818_v29, %s15842_s3 }
0x272c   : > { %12750 = vrot.lane.b32.xlu1 %v14814_v28, %s15978_s6 }
0x2731   : > { %12745 = vrot.lane.b32.xlu0 %v14814_v28, %s15842_s3  ;;  %s15844_s3 = smov 48  }
0x2735   : > { %6411 = vrot.lane.b32.xlu0 %v14818_v29, %s15978_s6 }
0x2739   : > { %6403 = vrot.lane.b32.xlu0 %v14810_v25, %s15977_s4 }
0x2750   : > { %6202 = vadd.xlane.f32.xlu1 %v6201_v2 }
0x2761   : > { %6401 = vrot.lane.b32.xlu1 %v14808_v15, %s15977_s4 }
0x2765   : > { %6405 = vrot.lane.b32.xlu1 %v14818_v29, %s15977_s4 }
0x27a4   : > { %v6197_v3 = vpop.xlane.xlu1 %6196 }
0x27a5   : > { %12955 = vrcp.f32 %v6197_v3 }
0x27a8   : > { %v6200_v4 = vpop.xlane.xlu0 %6199  ;;  %v6215_v5 = vpop.permute.xlu1 %6214 }
0x27a9   : > { %12957 = vrcp.f32 %v6200_v4 }
0x27ac   : > { %v12746_v27 = vpop.permute.xlu0 %12745  ;;  %v12751_v20 = vpop.permute.xlu1 %12750 }
0x27ad   : > { %v12748_v26 = vunpack.i.h.bf16 %v12746_v27  ;;  %v12747_v7 = vunpack.i.l.bf16 %v12746_v27  ;;  %v12753_v63 = vunpack.i.h.bf16 %v12751_v20  ;;  %v12752_v23 = vunpack.i.l.bf16 %v12751_v20 }
0x27af   : > { %v12077_v8 = vpack.c.bf16 %v12748_v26, %v12747_v7  ;;  %v12956_v18 = vpop.eup %12955  ;;  %v12080_v24 = vpack.c.bf16 %v12753_v63, %v12752_v23  ;;  %v6071_v26 = vadd.f32 %v10472_v62, %v14898_v6  ;;  %v6072_v23 = vadd.f32 %v10472_v62, %v14900_v11 }
0x27b0   : > { %v6207_v21 = vmul.f32 %v12956_v18, %v12950_v55  ;;  %v6412_v19 = vpop.permute.xlu0 %6411 }
0x27b1   : > { %12078 = vmatpush3.bf16.msra.mxu1 %v12077_v8 }
0x27b2   : > { %11462 = vmatprep.subr.mxu1 %v13706_v10 }
0x27b3   : > { %v12958_v22 = vpop.eup %12957 }
0x27b4   : > { %v6208_v16 = vmul.f32 %v12958_v22, %v12952_v12  ;;  %v6404_v31 = vpop.permute.xlu0 %6403 }
0x27b5   : > { %11463 = vmatpush3.msk.msra.mxu1 %vm5892_vm8, %v6215_v5 }
0x27b6   : > { %11465 = vmatmul.mubr.msk.f32.vlgmr.msra.gmra.mrb[48].mxu1 %vm5840_vm6, %v6207_v21  ;;  %12079 = vmatprep.subr.bf16.mxu1 %v13704_v0 }
0x27b7   : > { %11467 = vmatprep.mubr.msk.f32.mxu1 %vm13705_vm5, %v13706_v10 }
0x27ba   : > { %11468 = vmatmul.mubr.msk.f32.gmra.mrb[50].mxu1 %vm5840_vm6, %v6208_v16 }
0x27bb   : > { %11470 = vmatprep.mubr.msk.f32.mxu1 %vm13705_vm5, %v13706_v10 }
0x27bc   : > { %12082 = vmatpush3.bf16.xpose.msk.msra.mxu1 %vm14373_vm3, %v12080_v24 }
0x27bd   : > { %11488 = vmatprep.subr.mxu1 %v13706_v10 }
0x27c4   : > { %11489 = vmatpush3.xpose.msk.msra.mxu1 %vm2373_vm2, %v6412_v19 }
0x27c5   : > { %11514 = vmatprep.subr.mxu1 %v13706_v10 }
0x27dd   : > { %v6203_v57 = vpop.xlane.xlu1 %6202 }
0x27de   : > { %12959 = vrcp.f32 %v6203_v57 }
0x27e1   : > { %v6402_v54 = vpop.permute.xlu1 %6401 }
0x27e5   : > { %v6406_v58 = vpop.permute.xlu1 %6405 }
0x27e8   : > { %v12960_v30 = vpop.eup %12959 }
0x27e9   : > { %v6209_v48 = vmul.f32 %v12960_v30, %v12954_v61  ;;  %v6070_v61 = vadd.f32 %v10472_v62, %v14896_v35 }
0x27eb   : > { %11471 = vmatmul.mubr.msk.f32.gmra.mrb[52].mxu1 %vm5840_vm6, %v6209_v48 }
0x27ec   : > { %11490 = vmatprep.mubr.msk.f32.mxu1 %vm13705_vm5, %v13706_v10 }
0x27ef   : > { %11491 = vmatmul.mubr.msk.f32.vlgmr.msra.gmra.mrb[54].mxu1 %vm2373_vm2, %v6402_v54 }
0x27f0   : > { %11493 = vmatprep.mubr.msk.f32.mxu1 %vm13705_vm5, %v13706_v10 }
0x27f3   : > { %11494 = vmatmul.mubr.msk.f32.gmra.mrb[56].mxu1 %vm2373_vm2, %v6404_v31 }
0x27f4   : > { %11496 = vmatprep.mubr.msk.f32.mxu1 %vm13705_vm5, %v13706_v10 }
0x27f7   : > { %11497 = vmatmul.mubr.msk.f32.gmra.mrb[58].mxu1 %vm2373_vm2, %v6406_v58 }
0x27f8   : > { %11516 = vmatprep.mubr.msk.f32.mxu1 %vm13705_vm5, %v13706_v10 }
0x2889   : > { %v6295_v34 = vpop.f32.mrb[48].mxu1 }
0x288a   : > { %v11466_v9 = vpop.f32.mrb[49].mxu1  ;;  %11476 = vmatmul.mubr.msk.f32.vlgmr.msra.gmra.mrb[36].mxu0 %vm2373_vm2, %v6295_v34 }
0x288b   : > { %11478 = vmatprep.mubr.msk.f32.mxu0 %vm13705_vm5, %v13706_v10 }
0x288d   : > { %v6300_v52 = vpop.f32.mrb[50].mxu1 }
0x288e   : > { %v11469_v36 = vpop.f32.mrb[51].mxu1  ;;  %11479 = vmatmul.mubr.msk.f32.gmra.mrb[38].mxu0 %vm2373_vm2, %v6300_v52 }
0x288f   : > { %11481 = vmatprep.mubr.msk.f32.mxu0 %vm13705_vm5, %v13706_v10 }
0x28be   : > { %v6305_v37 = vpop.f32.mrb[52].mxu1 }
0x28bf   : > { %v11472_v39 = vpop.f32.mrb[53].mxu1  ;;  %11482 = vmatmul.mubr.msk.f32.gmra.mrb[40].mxu0 %vm2373_vm2, %v6305_v37 }
0x28c0   : > { %11505 = vmatprep.mubr.msk.f32.mxu0 %vm13705_vm5, %v13706_v10 }
0x28c2   : > { %v6491_v40 = vpop.f32.mrb[54].mxu1 }
0x28c3   : > { %v11492_v42 = vpop.f32.mrb[55].mxu1  ;;  %v6505_v43 = vsel %vm5840_vm6, %v6491_v40, -inf }
0x28c4   : > { %6506 = vmax.xlane.f32.xlu0 %v6505_v43 }
0x28c6   : > { %v6496_v44 = vpop.f32.mrb[56].mxu1 }
0x28c7   : > { %v11495_v45 = vpop.f32.mrb[57].mxu1  ;;  %v6508_v46 = vsel %vm5840_vm6, %v6496_v44, -inf }
0x28c8   : > { %6509 = vmax.xlane.f32.xlu1 %v6508_v46  ;;  %v5736_v45 = vld [vmem:[%s15990_s10 + $0x10] sm:$0xff] }
0x28c9   : > { %11515 = vmatpush3.msra.mxu1 %v5736_v45 }
0x28ca   : > { %v6501_v41 = vpop.f32.mrb[58].mxu1  ;;  %12090 = vmatprep.subr.bf16.mxu1 %v13704_v0 }
0x28cb   : > { %v11498_v47 = vpop.f32.mrb[59].mxu1  ;;  %v6511_v13 = vsel %vm5847_vm7, %v6501_v41, -inf }
0x28cc   : > { %6512 = vmax.xlane.f32.xlu0 %v6511_v13 }
0x28d9   : > { %12755 = vrot.lane.b32.xlu1 %v14814_v28, %s15844_s3 }
0x28dd   : > { %12760 = vrot.lane.b32.xlu1 %v14814_v28, %s15980_s8 }
0x2951   : > { %v6507_v51 = vpop.xlane.xlu0 %6506 }
0x2952   : > { %v6514_v53 = vsub.f32 %v6491_v40, %v6507_v51 }
0x2954   : > { %v6517_v38 = vmul.f32 1.442695, %v6514_v53 }
0x2955   : > { %v6510_v55 = vpop.xlane.xlu1 %6509 }
0x2956   : > { %12961 = vpow2.f32 %v6517_v38  ;;  %v6515_v56 = vsub.f32 %v6496_v44, %v6510_v55 }
0x2958   : > { %v6519_v12 = vmul.f32 1.442695, %v6515_v56 }
0x2959   : > { %v12756_v49 = vpop.permute.xlu1 %12755  ;;  %v6513_v6 = vpop.xlane.xlu0 %6512 }
0x295a   : > { %12963 = vpow2.f32 %v6519_v12  ;;  %v12758_v59 = vunpack.i.h.bf16 %v12756_v49  ;;  %v12757_v60 = vunpack.i.l.bf16 %v12756_v49  ;;  %v6516_v22 = vsub.f32 %v6501_v41, %v6513_v6 }
0x295c   : > { %v12084_v2 = vpack.c.bf16 %v12758_v59, %v12757_v60  ;;  %v6521_v63 = vmul.f32 1.442695, %v6516_v22 }
0x295d   : > { %v6384_v3 = vpop.f32.mrb[36].mxu0 }
0x295e   : > { %v14967_v4 = vadd.f32 %v6384_v3, %v6070_v61  ;;  %v11477_v27 = vpop.f32.mrb[37].mxu0  ;;  %12085 = vmatpush3.bf16.msra.mxu0 %v12084_v2  ;;  %12965 = vpow2.f32 %v6521_v63 }
0x295f   : > { %11503 = vmatprep.subr.mxu0 %v13706_v10 }
0x2960   : > { %v12962_v5 = vpop.eup %12961 }
0x2961   : > { %v6389_v7 = vpop.f32.mrb[38].mxu0  ;;  %v6523_v8 = vsel %vm5840_vm6, %v12962_v5, 0.0 }
0x2962   : > { %v14972_v18 = vadd.f32 %v6389_v7, %v6071_v26  ;;  %v11480_v20 = vpop.f32.mrb[39].mxu0  ;;  %6524 = vadd.xlane.f32.xlu0 %v6523_v8 }
0x2964   : > { %v12964_v21 = vpop.eup %12963 }
0x2965   : > { %v6526_v35 = vsel %vm5840_vm6, %v12964_v21, 0.0 }
0x2966   : > { %6527 = vadd.xlane.f32.xlu1 %v6526_v35 }
0x2968   : > { %v12966_v24 = vpop.eup %12965 }
0x2969   : > { %v6529_v30 = vsel %vm5847_vm7, %v12966_v24, 0.0 }
0x2977   : > { %6739 = vrot.lane.b32.xlu1 %v14818_v29, %s15980_s8 }
0x2978   : > { %6542 = vrot.lane.b32.xlu0 %v14818_v29, %s15844_s3  ;;  %s15846_s3 = smov 40  }
0x297b   : > { %6731 = vrot.lane.b32.xlu1 %v14810_v25, %s15981_s9  ;;  %v12761_v25 = vpop.permute.xlu1 %12760 }
0x297c   : > { %v12763_v11 = vunpack.i.h.bf16 %v12761_v25  ;;  %v12762_v58 = vunpack.i.l.bf16 %v12761_v25 }
0x297e   : > { %v12087_v9 = vpack.c.bf16 %v12763_v11, %v12762_v58 }
0x2992   : > { %v6394_v16 = vpop.f32.mrb[40].mxu0 }
0x2993   : > { %v14982_v19 = vadd.f32 %v6394_v16, %v6072_v23  ;;  %v11483_v57 = vpop.f32.mrb[41].mxu0 }
0x2997   : > { %6530 = vadd.xlane.f32.xlu0 %v6529_v30 }
0x29ad   : > { %6729 = vrot.lane.b32.xlu0 %v14808_v15, %s15981_s9 }
0x29b1   : > { %6733 = vrot.lane.b32.xlu0 %v14818_v29, %s15981_s9 }
0x29ef   : > { %v6525_v48 = vpop.xlane.xlu0 %6524 }
0x29f0   : > { %12967 = vrcp.f32 %v6525_v48 }
0x29f3   : > { %v6528_v54 = vpop.xlane.xlu1 %6527  ;;  %v6543_v31 = vpop.permute.xlu0 %6542 }
0x29f4   : > { %12969 = vrcp.f32 %v6528_v54  ;;  %11504 = vmatpush3.msk.msra.mxu0 %vm5892_vm8, %v6543_v31 }
0x29f5   : > { %12086 = vmatprep.subr.bf16.mxu0 %v13704_v0 }
0x29f7   : > { %v6740_v36 = vpop.permute.xlu1 %6739 }
0x29fa   : > { %v12968_v33 = vpop.eup %12967 }
0x29fb   : > { %v6535_v34 = vmul.f32 %v12968_v33, %v12962_v5  ;;  %v6732_v43 = vpop.permute.xlu1 %6731 }
0x29fd   : > { %11506 = vmatmul.mubr.msk.f32.vlgmr.msra.gmra.mrb[42].mxu0 %vm5840_vm6, %v6535_v34 }
0x29fe   : > { %v12970_v15 = vpop.eup %12969  ;;  %12089 = vmatpush3.bf16.xpose.msk.msra.mxu0 %vm14373_vm3, %v12087_v9  ;;  %11508 = vmatprep.mubr.msk.f32.mxu0 %vm13705_vm5, %v13706_v10 }
0x29ff   : > { %v6536_v52 = vmul.f32 %v12970_v15, %v12964_v21  ;;  %11529 = vmatprep.subr.mxu0 %v13706_v10 }
0x2a01   : > { %11509 = vmatmul.mubr.msk.f32.gmra.mrb[44].mxu0 %vm5840_vm6, %v6536_v52 }
0x2a02   : > { %11511 = vmatprep.mubr.msk.f32.mxu0 %vm13705_vm5, %v13706_v10 }
0x2a06   : > { %11530 = vmatpush3.xpose.msk.msra.mxu0 %vm2373_vm2, %v6740_v36 }
0x2a07   : > { %11555 = vmatprep.subr.mxu0 %v13706_v10 }
0x2a24   : > { %v6531_v37 = vpop.xlane.xlu0 %6530 }
0x2a25   : > { %12971 = vrcp.f32 %v6531_v37 }
0x2a28   : > { %v6730_v42 = vpop.permute.xlu0 %6729 }
0x2a2c   : > { %v6734_v44 = vpop.permute.xlu0 %6733 }
0x2a2f   : > { %v12972_v39 = vpop.eup %12971 }
0x2a30   : > { %v6537_v40 = vmul.f32 %v12972_v39, %v12966_v24 }
0x2a32   : > { %11512 = vmatmul.mubr.msk.f32.gmra.mrb[46].mxu0 %vm5840_vm6, %v6537_v40 }
0x2a33   : > { %11531 = vmatprep.mubr.msk.f32.mxu0 %vm13705_vm5, %v13706_v10 }
0x2a36   : > { %11532 = vmatmul.mubr.msk.f32.vlgmr.msra.gmra.mrb[48].mxu0 %vm2373_vm2, %v6730_v42 }
0x2a37   : > { %11534 = vmatprep.mubr.msk.f32.mxu0 %vm13705_vm5, %v13706_v10 }
0x2a3a   : > { %11535 = vmatmul.mubr.msk.f32.gmra.mrb[50].mxu0 %vm2373_vm2, %v6732_v43 }
0x2a3b   : > { %11537 = vmatprep.mubr.msk.f32.mxu0 %vm13705_vm5, %v13706_v10 }
0x2a3e   : > { %11538 = vmatmul.mubr.msk.f32.gmra.mrb[52].mxu0 %vm2373_vm2, %v6734_v44 }
0x2a3f   : > { %11557 = vmatprep.mubr.msk.f32.mxu0 %vm13705_vm5, %v13706_v10 }
0x2ad0   : > { %v6623_v46 = vpop.f32.mrb[42].mxu0 }
0x2ad1   : > { %v11507_v41 = vpop.f32.mrb[43].mxu0  ;;  %11517 = vmatmul.mubr.msk.f32.vlgmr.msra.gmra.mrb[60].mxu1 %vm2373_vm2, %v6623_v46 }
0x2ad2   : > { %11519 = vmatprep.mubr.msk.f32.mxu1 %vm13705_vm5, %v13706_v10 }
0x2ad4   : > { %v6628_v47 = vpop.f32.mrb[44].mxu0 }
0x2ad5   : > { %v11510_v13 = vpop.f32.mrb[45].mxu0  ;;  %11520 = vmatmul.mubr.msk.f32.gmra.mrb[62].mxu1 %vm2373_vm2, %v6628_v47 }
0x2ad6   : > { %11522 = vmatprep.mubr.msk.f32.mxu1 %vm13705_vm5, %v13706_v10 }
0x2b05   : > { %v6633_v51 = vpop.f32.mrb[46].mxu0 }
0x2b06   : > { %v11513_v53 = vpop.f32.mrb[47].mxu0  ;;  %11523 = vmatmul.mubr.msk.f32.gmra.mrb[64].mxu1 %vm2373_vm2, %v6633_v51 }
0x2b07   : > { %11546 = vmatprep.mubr.msk.f32.mxu1 %vm13705_vm5, %v13706_v10 }
0x2b09   : > { %v6819_v38 = vpop.f32.mrb[48].mxu0 }
0x2b0a   : > { %v11533_v55 = vpop.f32.mrb[49].mxu0  ;;  %v6833_v56 = vsel %vm5840_vm6, %v6819_v38, -inf }
0x2b0b   : > { %6834 = vmax.xlane.f32.xlu1 %v6833_v56 }
0x2b0d   : > { %v6824_v12 = vpop.f32.mrb[50].mxu0 }
0x2b0e   : > { %v11536_v62 = vpop.f32.mrb[51].mxu0  ;;  %v6836_v49 = vsel %vm5840_vm6, %v6824_v12, -inf }
0x2b0f   : > { %6837 = vmax.xlane.f32.xlu0 %v6836_v49 }
0x2b11   : > { %v6829_v59 = vpop.f32.mrb[52].mxu0 }
0x2b12   : > { %v11539_v60 = vpop.f32.mrb[53].mxu0  ;;  %v6839_v61 = vsel %vm5847_vm7, %v6829_v59, -inf }
0x2b13   : > { %6840 = vmax.xlane.f32.xlu0 %v6839_v61 }
0x2b98   : > { %v6835_v2 = vpop.xlane.xlu1 %6834 }
0x2b99   : > { %v6842_v3 = vsub.f32 %v6819_v38, %v6835_v2 }
0x2b9b   : > { %v6845_v27 = vmul.f32 1.442695, %v6842_v3  ;;  %v13065_v3 = vld [vmem:[#allocation23] sm:$0x1] }
0x2b9c   : > { %v6838_v5 = vpop.xlane.xlu0 %6837 }
0x2b9d   : > { %12973 = vpow2.f32 %v6845_v27  ;;  %v6843_v26 = vsub.f32 %v6824_v12, %v6838_v5 }
0x2b9f   : > { %v6847_v7 = vmul.f32 1.442695, %v6843_v26 }
0x2ba0   : > { %v6841_v8 = vpop.xlane.xlu0 %6840 }
0x2ba1   : > { %12975 = vpow2.f32 %v6847_v7  ;;  %v6844_v20 = vsub.f32 %v6829_v59, %v6841_v8 }
0x2ba3   : > { %v6849_v21 = vmul.f32 1.442695, %v6844_v20 }
0x2ba4   : > { %v6712_v35 = vpop.f32.mrb[60].mxu1 }
0x2ba5   : > { %12977 = vpow2.f32 %v6849_v21  ;;  %v15029_v6 = vadd.f32 %v6712_v35, %v14967_v4  ;;  %v11518_v22 = vpop.f32.mrb[61].mxu1  ;;  %v5737_v4 = vld [vmem:[%s15990_s10 + $0x18] sm:$0xff] }
0x2ba6   : > { %11556 = vmatpush3.msra.mxu0 %v5737_v4 }
0x2ba7   : > { %v12974_v63 = vpop.eup %12973  ;;  %12099 = vmatprep.subr.bf16.mxu0 %v13704_v0 }
0x2ba8   : > { %v6717_v23 = vpop.f32.mrb[62].mxu1  ;;  %v6851_v16 = vsel %vm5840_vm6, %v12974_v63, 0.0 }
0x2ba9   : > { %v6727_v24 = vadd.f32 %v6717_v23, %v14972_v18  ;;  %6852 = vadd.xlane.f32.xlu1 %v6851_v16  ;;  %v11521_v57 = vpop.f32.mrb[63].mxu1 }
0x2bab   : > { %v12976_v30 = vpop.eup %12975 }
0x2bac   : > { %v6854_v25 = vsel %vm5840_vm6, %v12976_v30, 0.0 }
0x2bad   : > { %6855 = vadd.xlane.f32.xlu0 %v6854_v25 }
0x2baf   : > { %v12978_v48 = vpop.eup %12977 }
0x2bb0   : > { %v6857_v54 = vsel %vm5847_vm7, %v12978_v48, 0.0 }
0x2bb1   : > { %6858 = vadd.xlane.f32.xlu1 %v6857_v54 }
0x2bc2   : > { %6870 = vrot.lane.b32.xlu1 %v14818_v29, %s15846_s3 }
0x2bc3   : > { %12765 = vrot.lane.b32.xlu0 %v14814_v28, %s15846_s3  ;;  %s15991_s3 = sld [smem:[#allocation70_spill]] }
0x2bc9   : > { %v7120_v25 = vld [vmem:[%s15991_s3 + $0x8] sm:$0xff]  ;;  %v7121_v54 = vld [vmem:[%s15991_s3 + $0x10] sm:$0xff]  ;;  %v7122_v4 = vld [vmem:[%s15991_s3 + $0x18] sm:$0xff] }
0x2bd9   : > { %v6722_v18 = vpop.f32.mrb[64].mxu1 }
0x2bda   : > { %v6728_v31 = vadd.f32 %v6722_v18, %v14982_v19  ;;  %v11524_v11 = vpop.f32.mrb[65].mxu1  ;;  %v12097_v18 = vpack.c.bf16 %v7122_v4, %v7121_v54 }
0x2bdb   : > { %v7247_v11 = vld [vmem:[%s15992_s7 + $0x8] sm:$0xff] }
0x2c36   : > { %v6853_v58 = vpop.xlane.xlu1 %6852 }
0x2c37   : > { %12979 = vrcp.f32 %v6853_v58 }
0x2c3a   : > { %v6856_v33 = vpop.xlane.xlu0 %6855 }
0x2c3b   : > { %12981 = vrcp.f32 %v6856_v33 }
0x2c3e   : > { %v6859_v34 = vpop.xlane.xlu1 %6858  ;;  %v12766_v9 = vpop.permute.xlu0 %12765 }
0x2c3f   : > { %v12768_v15 = vunpack.i.h.bf16 %v12766_v9  ;;  %v12767_v52 = vunpack.i.l.bf16 %v12766_v9  ;;  %12983 = vrcp.f32 %v6859_v34 }
0x2c41   : > { %v12091_v29 = vpack.c.bf16 %v12768_v15, %v12767_v52  ;;  %v12980_v36 = vpop.eup %12979 }
0x2c42   : > { %v6863_v28 = vmul.f32 %v12980_v36, %v12974_v63  ;;  %v6871_v37 = vpop.permute.xlu1 %6870 }
0x2c43   : > { %12092 = vmatpush3.bf16.msra.mxu1 %v12091_v29 }
0x2c44   : > { %11544 = vmatprep.subr.mxu1 %v13706_v10 }
0x2c45   : > { %v12982_v39 = vpop.eup %12981 }
0x2c46   : > { %v6864_v19 = vmul.f32 %v12982_v39, %v12976_v30  ;;  %v7119_v30 = vld [vmem:[%s15991_s3] sm:$0xff]  ;;  %s15993_s3 = sld [smem:[#allocation69_spill]] }
0x2c47   : > { %11545 = vmatpush3.msk.msra.mxu1 %vm5892_vm8, %v6871_v37 }
0x2c48   : > { %11547 = vmatmul.mubr.msk.f32.vlgmr.msra.gmra.mrb[66].mxu1 %vm5840_vm6, %v6863_v28  ;;  %12093 = vmatprep.subr.bf16.mxu1 %v13704_v0 }
0x2c49   : > { %11549 = vmatprep.mubr.msk.f32.mxu1 %vm13705_vm5, %v13706_v10  ;;  %v12984_v40 = vpop.eup %12983 }
0x2c4a   : > { %v6865_v42 = vmul.f32 %v12984_v40, %v12978_v48  ;;  %v12094_v48 = vpack.c.bf16 %v7120_v25, %v7119_v30 }
0x2c4c   : > { %11550 = vmatmul.mubr.msk.f32.gmra.mrb[68].mxu1 %vm5840_vm6, %v6864_v19  ;;  %v10512_v19 = vld [vmem:[#allocation9] ss:$0 sm:$0xff] }
0x2c4d   : > { %11552 = vmatprep.mubr.msk.f32.mxu1 %vm13705_vm5, %v13706_v10  ;;  %12095 = vmatpush3.bf16.msra.mxu1 %v12094_v48 }
0x2c4e   : > { %12096 = vmatprep.subr.bf16.mxu1 %v13704_v0 }
0x2c50   : > { %11553 = vmatmul.mubr.msk.f32.gmra.mrb[70].mxu1 %vm5840_vm6, %v6865_v42  ;;  %v10513_v42 = vld [vmem:[#allocation8] ss:$0 sm:$0xff] }
0x2c51   : > { %11574 = vmatprep.mubr.msk.f32.mxu1 %vm13705_vm5, %v13706_v10  ;;  %12098 = vmatpush3.bf16.msra.mxu1 %v12097_v18 }
0x2c52   : > { %12123 = vmatprep.subr.bf16.mxu1 %v13704_v0 }
0x2d1b   : > { %v6951_v43 = vpop.f32.mrb[66].mxu1 }
0x2d1c   : > { %v11548_v44 = vpop.f32.mrb[67].mxu1  ;;  %11558 = vmatmul.mubr.msk.f32.vlgmr.msra.gmra.mrb[54].mxu0 %vm2373_vm2, %v6951_v43 }
0x2d1d   : > { %11560 = vmatprep.mubr.msk.f32.mxu0 %vm13705_vm5, %v13706_v10 }
0x2d1f   : > { %v6956_v45 = vpop.f32.mrb[68].mxu1 }
0x2d20   : > { %v11551_v46 = vpop.f32.mrb[69].mxu1  ;;  %11561 = vmatmul.mubr.msk.f32.gmra.mrb[56].mxu0 %vm2373_vm2, %v6956_v45 }
0x2d21   : > { %11563 = vmatprep.mubr.msk.f32.mxu0 %vm13705_vm5, %v13706_v10 }
0x2d23   : > { %v6961_v41 = vpop.f32.mrb[70].mxu1 }
0x2d24   : > { %v11554_v47 = vpop.f32.mrb[71].mxu1  ;;  %11564 = vmatmul.mubr.msk.f32.gmra.mrb[58].mxu0 %vm2373_vm2, %v6961_v41 }
0x2d25   : > { %11615 = vmatprep.mubr.msk.f32.mxu0 %vm13705_vm5, %v13706_v10 }
0x2def   : > { %v7040_v13 = vpop.f32.mrb[54].mxu0 }
0x2df0   : > { %v7054_v51 = vadd.f32 %v7040_v13, %v15029_v6  ;;  %v11559_v53 = vpop.f32.mrb[55].mxu0 }
0x2df2   : > { %v15065_v38 = vadd.f32 %v7054_v51, %v14772_v50 }
0x2df3   : > { %v7045_v55 = vpop.f32.mrb[56].mxu0 }
0x2df4   : > { %v7055_v56 = vadd.f32 %v7045_v55, %v6727_v24  ;;  %v11562_v12 = vpop.f32.mrb[57].mxu0  ;;  %v7060_v62 = vsel %vm2143_vm1, %v15065_v38, 0.0 }
0x2df5   : > { %7061 = vadd.xlane.f32.xlu1 %v7060_v62  ;;  %v7249_v12 = vld [vmem:[%s15992_s7 + $0x18] sm:$0xff] }
0x2df6   : > { %v15070_v49 = vadd.f32 %v7055_v56, %v14775_v32  ;;  %v7248_v56 = vld [vmem:[%s15992_s7 + $0x10] sm:$0xff] }
0x2df7   : > { %v7050_v59 = vpop.f32.mrb[58].mxu0  ;;  %v12103_v62 = vpack.c.bf16 %v7249_v12, %v7248_v56 }
0x2df8   : > { %v7056_v60 = vadd.f32 %v7050_v59, %v6728_v31  ;;  %v11565_v61 = vpop.f32.mrb[59].mxu0  ;;  %v7063_v2 = vsel %vm2143_vm1, %v15070_v49, 0.0  ;;  %v7246_v31 = vld [vmem:[%s15992_s7] sm:$0xff] }
0x2df9   : > { %7064 = vadd.xlane.f32.xlu0 %v7063_v2  ;;  %v12100_v58 = vpack.c.bf16 %v7247_v11, %v7246_v31  ;;  %v7250_v59 = vld [vmem:[%s15992_s7 + $0x20] sm:$0xff]  ;;  %v7252_v2 = vld [vmem:[%s15992_s7 + $0x30] sm:$0xff] }
0x2dfa   : > { %v15074_v50 = vadd.f32 %v13065_v3, %v7056_v60  ;;  %v7251_v60 = vld [vmem:[%s15992_s7 + $0x28] sm:$0xff]  ;;  %v7253_v3 = vld [vmem:[%s15992_s7 + $0x38] sm:$0xff] }
0x2dfb   : > { %12101 = vmatpush3.bf16.msra.mxu0 %v12100_v58  ;;  %v12106_v61 = vpack.c.bf16 %v7251_v60, %v7250_v59 }
0x2dfc   : > { %v7066_v27 = vsel %vm5587_vm4, %v15074_v50, 0.0  ;;  %12102 = vmatprep.subr.bf16.mxu0 %v13704_v0 }
0x2dfd   : > { %7067 = vadd.xlane.f32.xlu0 %v7066_v27  ;;  %v12109_v27 = vpack.c.bf16 %v7253_v3, %v7252_v2 }
0x2dff   : > { %12104 = vmatpush3.bf16.msra.mxu0 %v12103_v62 }
0x2e00   : > { %12105 = vmatprep.subr.bf16.mxu0 %v13704_v0 }
0x2e03   : > { %12107 = vmatpush3.bf16.msra.mxu0 %v12106_v61 }
0x2e04   : > { %12108 = vmatprep.subr.bf16.mxu0 %v13704_v0 }
0x2e07   : > { %12110 = vmatpush3.bf16.msra.mxu0 %v12109_v27 }
0x2e08   : > { %12111 = vmatprep.subr.bf16.mxu0 %v13704_v0 }
0x2e82   : > { %v7062_v5 = vpop.xlane.xlu1 %7061 }
0x2e83   : > { %v7069_v26 = vmul.f32 0.03125, %v7062_v5  ;;  %v7254_v5 = vld [vmem:[%s15992_s7 + $0x40] sm:$0xff] }
0x2e85   : > { %v7072_v7 = vsub.f32 %v15065_v38, %v7069_v26  ;;  %v7255_v26 = vld [vmem:[%s15992_s7 + $0x48] sm:$0xff] }
0x2e86   : > { %v7065_v32 = vpop.xlane.xlu0 %7064 }
0x2e87   : > { %v7070_v8 = vmul.f32 0.03125, %v7065_v32  ;;  %v7075_v20 = vmul.f32 %v7072_v7, %v7072_v7  ;;  %v7256_v32 = vld [vmem:[%s15992_s7 + $0x50] sm:$0xff] }
0x2e89   : > { %v7073_v21 = vsub.f32 %v15070_v49, %v7070_v8  ;;  %v7078_v35 = vsel %vm2143_vm1, %v7075_v20, 0.0  ;;  %v7257_v8 = vld [vmem:[%s15992_s7 + $0x58] sm:$0xff] }
0x2e8a   : > { %7079 = vadd.xlane.f32.xlu1 %v7078_v35  ;;  %v7068_v6 = vpop.xlane.xlu0 %7067  ;;  %v12115_v20 = vpack.c.bf16 %v7257_v8, %v7256_v32  ;;  %v7259_v35 = vld [vmem:[%s15992_s7 + $0x68] sm:$0xff] }
0x2e8b   : > { %v7071_v22 = vmul.f32 0.03125, %v7068_v6  ;;  %v7076_v63 = vmul.f32 %v7073_v21, %v7073_v21 }
0x2e8d   : > { %v7074_v23 = vsub.f32 %v15074_v50, %v7071_v22  ;;  %v7081_v16 = vsel %vm2143_vm1, %v7076_v63, 0.0  ;;  %v7260_v22 = vld [vmem:[%s15992_s7 + $0x70] sm:$0xff]  ;;  %v7261_v63 = vld [vmem:[%s15992_s7 + $0x78] sm:$0xff] }
0x2e8e   : > { %7082 = vadd.xlane.f32.xlu0 %v7081_v16  ;;  %v10514_v16 = vld [vmem:[%s15993_s3] ss:$0 sm:$0xff]  ;;  %s15994_s3 = sld [smem:[#allocation71_spill]] }
0x2e8f   : > { %v7077_v24 = vmul.f32 %v7074_v23, %v7074_v23 }
0x2e91   : > { %v7084_v57 = vsel %vm5587_vm4, %v7077_v24, 0.0 }
0x2e92   : > { %7085 = vadd.xlane.f32.xlu1 %v7084_v57 }
0x2e94   : > { %v10518_v62 = vld [vmem:[%s15994_s3] ss:$0 sm:$0xff]  ;;  %s15995_s3 = sld [smem:[#allocation83_spill]] }
0x2f17   : > { %v7080_v33 = vpop.xlane.xlu1 %7079 }
0x2f18   : > { %v7087_v34 = vmul.f32 0.03125, %v7080_v33 }
0x2f1a   : > { %v7090_v9 = vadd.f32 1e-06, %v7087_v34 }
0x2f1b   : > { %v7083_v15 = vpop.xlane.xlu0 %7082 }
0x2f1c   : > { %12985 = vrsqrt.f32 %v7090_v9  ;;  %v7088_v52 = vmul.f32 0.03125, %v7083_v15 }
0x2f1e   : > { %v7091_v29 = vadd.f32 1e-06, %v7088_v52 }
0x2f1f   : > { %v7086_v36 = vpop.xlane.xlu1 %7085 }
0x2f20   : > { %12987 = vrsqrt.f32 %v7091_v29  ;;  %v7089_v28 = vmul.f32 0.03125, %v7086_v36 }
0x2f22   : > { %v7092_v37 = vadd.f32 1e-06, %v7089_v28 }
0x2f24   : > { %12989 = vrsqrt.f32 %v7092_v37 }
0x2f26   : > { %v12986_v39 = vpop.eup %12985 }
0x2f27   : > { %v7096_v40 = vmul.f32 %v12986_v39, %v7072_v7  ;;  %v12112_v7 = vpack.c.bf16 %v7255_v26, %v7254_v5 }
0x2f29   : > { %v7106_v43 = vmul.f32 %v10512_v19, %v7096_v40  ;;  %12113 = vmatpush3.bf16.msra.mxu0 %v12112_v7 }
0x2f2a   : > { %v12988_v44 = vpop.eup %12987  ;;  %12114 = vmatprep.subr.bf16.mxu0 %v13704_v0 }
0x2f2b   : > { %v7116_v45 = vadd.f32 %v10513_v42, %v7106_v43  ;;  %v7097_v46 = vmul.f32 %v12988_v44, %v7073_v21  ;;  %v7258_v21 = vld [vmem:[%s15992_s7 + $0x60] sm:$0xff] }
0x2f2c   : > { %v12118_v6 = vpack.c.bf16 %v7259_v35, %v7258_v21 }
0x2f2d   : > { %11575 = vmatmul.mubr.msk.f32.vlgmr.msra.gmra.mrb[72].mxu1 %vm2143_vm1, %v7116_v45  ;;  %v7107_v41 = vmul.f32 %v10512_v19, %v7097_v46  ;;  %12116 = vmatpush3.bf16.msra.mxu0 %v12115_v20 }
0x2f2e   : > { %v12990_v47 = vpop.eup %12989  ;;  %11577 = vmatprep.mubr.msk.f32.mxu1 %vm13705_vm5, %v13706_v10  ;;  %12117 = vmatprep.subr.bf16.mxu0 %v13704_v0 }
0x2f2f   : > { %v7117_v13 = vadd.f32 %v10513_v42, %v7107_v41  ;;  %v7098_v51 = vmul.f32 %v12990_v47, %v7074_v23  ;;  %v12121_v23 = vpack.c.bf16 %v7261_v63, %v7260_v22 }
0x2f31   : > { %11578 = vmatmul.mubr.msk.f32.gmra.mrb[74].mxu1 %vm2143_vm1, %v7117_v13  ;;  %v7108_v53 = vmul.f32 %v10512_v19, %v7098_v51  ;;  %12119 = vmatpush3.bf16.msra.mxu0 %v12118_v6 }
0x2f32   : > { %11580 = vmatprep.mubr.msk.f32.mxu1 %vm13705_vm5, %v13706_v10  ;;  %12120 = vmatprep.subr.bf16.mxu0 %v13704_v0 }
0x2f33   : > { %v7118_v55 = vadd.f32 %v10513_v42, %v7108_v53 }
0x2f35   : > { %11581 = vmatmul.mubr.msk.f32.gmra.mrb[76].mxu1 %vm2143_vm1, %v7118_v55  ;;  %12122 = vmatpush3.bf16.msra.mxu0 %v12121_v23 }
0x2f36   : > { %11632 = vmatprep.mubr.msk.f32.mxu1 %vm13705_vm5, %v13706_v10  ;;  %11671 = vmatprep.subr.mxu0 %v13706_v10 }
0x3000   : > { %v7205_v24 = vpop.f32.mrb[72].mxu1 }
0x3001   : > { %v7206_v57 = vadd.f32 %v10514_v16, %v7205_v24  ;;  %v11576_v30 = vpop.f32.mrb[73].mxu1 }
0x3003   : > { %v7222_v25 = vmul.f32 0.044715, %v7206_v57  ;;  %v7219_v44 = vmul.f32 0.5, %v7206_v57 }
0x3004   : > { %v7210_v48 = vpop.f32.mrb[74].mxu1 }
0x3005   : > { %v7225_v54 = vmul.f32 %v7222_v25, %v7206_v57  ;;  %v7211_v4 = vadd.f32 %v10514_v16, %v7210_v48  ;;  %v11579_v18 = vpop.f32.mrb[75].mxu1 }
0x3007   : > { %v7228_v31 = vmul.f32 %v7225_v54, %v7206_v57  ;;  %v7223_v11 = vmul.f32 0.044715, %v7211_v4  ;;  %v7220_v47 = vmul.f32 0.5, %v7211_v4 }
0x3008   : > { %v7215_v58 = vpop.f32.mrb[76].mxu1 }
0x3009   : > { %v7231_v33 = vadd.f32 %v7228_v31, %v7206_v57  ;;  %v7226_v34 = vmul.f32 %v7223_v11, %v7211_v4  ;;  %v7216_v9 = vadd.f32 %v10514_v16, %v7215_v58  ;;  %v11582_v15 = vpop.f32.mrb[77].mxu1  ;;  %v7411_v31 = vld [vmem:[%s15995_s3] sm:$0xff]  ;;  %v7412_v11 = vld [vmem:[%s15995_s3 + $0x8] sm:$0xff] }
0x300a   : > { %v12124_v58 = vpack.c.bf16 %v7412_v11, %v7411_v31 }
0x300b   : > { %v7234_v52 = vmul.f32 0.7978846, %v7231_v33  ;;  %v7224_v29 = vmul.f32 0.044715, %v7216_v9  ;;  %v7229_v36 = vmul.f32 %v7226_v34, %v7211_v4  ;;  %v7221_v55 = vmul.f32 0.5, %v7216_v9  ;;  %v7413_v33 = vld [vmem:[%s15995_s3 + $0x10] sm:$0xff] }
0x300c   : > { %12125 = vmatpush3.bf16.msra.mxu1 %v12124_v58  ;;  %v7414_v34 = vld [vmem:[%s15995_s3 + $0x18] sm:$0xff] }
0x300d   : > { %12991 = vtanh.f32 %v7234_v52  ;;  %v7227_v28 = vmul.f32 %v7224_v29, %v7216_v9  ;;  %v7232_v37 = vadd.f32 %v7229_v36, %v7211_v4  ;;  %12126 = vmatprep.subr.bf16.mxu1 %v13704_v0 }
0x300f   : > { %v7235_v39 = vmul.f32 0.7978846, %v7232_v37  ;;  %v7230_v19 = vmul.f32 %v7227_v28, %v7216_v9 }
0x3011   : > { %12993 = vtanh.f32 %v7235_v39  ;;  %v7233_v40 = vadd.f32 %v7230_v19, %v7216_v9  ;;  %v12127_v9 = vpack.c.bf16 %v7414_v34, %v7413_v33 }
0x3013   : > { %v7236_v42 = vmul.f32 0.7978846, %v7233_v40  ;;  %12128 = vmatpush3.bf16.msra.mxu1 %v12127_v9 }
0x3014   : > { %12129 = vmatprep.subr.bf16.mxu1 %v13704_v0 }
0x3015   : > { %12995 = vtanh.f32 %v7236_v42 }
0x3017   : > { %v12992_v43 = vpop.eup %12991 }
0x3018   : > { %v7240_v45 = vadd.f32 1.0, %v12992_v43  ;;  %v10519_v43 = vld [vmem:[#allocation17] ss:$0 sm:$0xff] }
0x301a   : > { %v7243_v46 = vmul.f32 %v7240_v45, %v7219_v44  ;;  %v10520_v45 = vld [vmem:[#allocation15] ss:$0 sm:$0xff] }
0x301b   : > { %v12994_v41 = vpop.eup %12993 }
0x301c   : > { %11616 = vmatmul.mubr.f32.vlgmr.msra.gmra.mrb[60].mxu0 %v7243_v46  ;;  %v7241_v13 = vadd.f32 1.0, %v12994_v41 }
0x301d   : > { %11618 = vmatprep.mubr.msk.f32.mxu0 %vm13705_vm5, %v13706_v10 }
0x301e   : > { %v7244_v51 = vmul.f32 %v7241_v13, %v7220_v47 }
0x301f   : > { %v12996_v53 = vpop.eup %12995 }
0x3020   : > { %11619 = vmatmul.mubr.f32.gmra.mrb[62].mxu0 %v7244_v51  ;;  %v7242_v56 = vadd.f32 1.0, %v12996_v53 }
0x3021   : > { %11621 = vmatprep.mubr.msk.f32.mxu0 %vm13705_vm5, %v13706_v10 }
0x3022   : > { %v7245_v12 = vmul.f32 %v7242_v56, %v7221_v55 }
0x3024   : > { %11622 = vmatmul.mubr.f32.gmra.mrb[64].mxu0 %v7245_v12 }
0x3025   : > { %11673 = vmatprep.mubr.msk.f32.mxu0 %vm13705_vm5, %v13706_v10 }
0x30ef   : > { %v7335_v59 = vpop.f32.mrb[60].mxu0 }
0x30f0   : > { %v7336_v60 = vadd.f32 %v10518_v62, %v7335_v59  ;;  %v11617_v61 = vpop.f32.mrb[61].mxu0 }
0x30f2   : > { %v15132_v2 = vadd.f32 %v7336_v60, %v15065_v38 }
0x30f3   : > { %v7340_v3 = vpop.f32.mrb[62].mxu0 }
0x30f4   : > { %v7341_v27 = vadd.f32 %v10518_v62, %v7340_v3  ;;  %v11620_v5 = vpop.f32.mrb[63].mxu0  ;;  %v7352_v26 = vsel %vm2143_vm1, %v15132_v2, 0.0 }
0x30f5   : > { %7353 = vadd.xlane.f32.xlu0 %v7352_v26 }
0x30f6   : > { %v15137_v7 = vadd.f32 %v7341_v27, %v15070_v49 }
0x30f7   : > { %v7345_v32 = vpop.f32.mrb[64].mxu0 }
0x30f8   : > { %v7346_v8 = vadd.f32 %v10518_v62, %v7345_v32  ;;  %v11623_v20 = vpop.f32.mrb[65].mxu0  ;;  %v7355_v21 = vsel %vm2143_vm1, %v15137_v7, 0.0 }
0x30f9   : > { %7356 = vadd.xlane.f32.xlu1 %v7355_v21 }
0x30fa   : > { %v15142_v38 = vadd.f32 %v7346_v8, %v15074_v50 }
0x30fc   : > { %v7358_v35 = vsel %vm5587_vm4, %v15142_v38, 0.0 }
0x30fd   : > { %7359 = vadd.xlane.f32.xlu0 %v7358_v35 }
0x3182   : > { %v7354_v6 = vpop.xlane.xlu0 %7353 }
0x3183   : > { %v7361_v22 = vmul.f32 0.03125, %v7354_v6 }
0x3185   : > { %v7364_v63 = vsub.f32 %v15132_v2, %v7361_v22 }
0x3186   : > { %v7357_v49 = vpop.xlane.xlu1 %7356 }
0x3187   : > { %v7362_v23 = vmul.f32 0.03125, %v7357_v49  ;;  %v7367_v16 = vmul.f32 %v7364_v63, %v7364_v63 }
0x3189   : > { %v7365_v24 = vsub.f32 %v15137_v7, %v7362_v23  ;;  %v7370_v57 = vsel %vm2143_vm1, %v7367_v16, 0.0 }
0x318a   : > { %7371 = vadd.xlane.f32.xlu1 %v7370_v57  ;;  %v7360_v50 = vpop.xlane.xlu0 %7359 }
0x318b   : > { %v7363_v30 = vmul.f32 0.03125, %v7360_v50  ;;  %v7368_v25 = vmul.f32 %v7365_v24, %v7365_v24 }
0x318d   : > { %v7366_v48 = vsub.f32 %v15142_v38, %v7363_v30  ;;  %v7373_v54 = vsel %vm2143_vm1, %v7368_v25, 0.0 }
0x318e   : > { %7374 = vadd.xlane.f32.xlu0 %v7373_v54 }
0x318f   : > { %v7369_v4 = vmul.f32 %v7366_v48, %v7366_v48 }
0x3191   : > { %v7376_v18 = vsel %vm5587_vm4, %v7369_v4, 0.0 }
0x3192   : > { %7377 = vadd.xlane.f32.xlu1 %v7376_v18 }
0x3217   : > { %v7372_v15 = vpop.xlane.xlu1 %7371 }
0x3218   : > { %v7379_v52 = vmul.f32 0.03125, %v7372_v15 }
0x321a   : > { %v7382_v29 = vadd.f32 1e-06, %v7379_v52 }
0x321b   : > { %v7375_v36 = vpop.xlane.xlu0 %7374 }
0x321c   : > { %12997 = vrsqrt.f32 %v7382_v29  ;;  %v7380_v28 = vmul.f32 0.03125, %v7375_v36 }
0x321e   : > { %v7383_v37 = vadd.f32 1e-06, %v7380_v28 }
0x321f   : > { %v7378_v39 = vpop.xlane.xlu1 %7377 }
0x3220   : > { %12999 = vrsqrt.f32 %v7383_v37  ;;  %v7381_v19 = vmul.f32 0.03125, %v7378_v39 }
0x3222   : > { %v7384_v40 = vadd.f32 1e-06, %v7381_v19 }
0x3224   : > { %13001 = vrsqrt.f32 %v7384_v40 }
0x3226   : > { %v12998_v42 = vpop.eup %12997 }
0x3227   : > { %v7388_v44 = vmul.f32 %v12998_v42, %v7364_v63 }
0x3229   : > { %v7398_v46 = vmul.f32 %v10519_v43, %v7388_v44 }
0x322a   : > { %v13000_v41 = vpop.eup %12999 }
0x322b   : > { %v7408_v47 = vadd.f32 %v10520_v45, %v7398_v46  ;;  %v7389_v13 = vmul.f32 %v13000_v41, %v7365_v24 }
0x322d   : > { %11633 = vmatmul.mubr.msk.f32.vlgmr.msra.gmra.mrb[78].mxu1 %vm2143_vm1, %v7408_v47  ;;  %v7399_v51 = vmul.f32 %v10519_v43, %v7389_v13 }
0x322e   : > { %v13002_v53 = vpop.eup %13001  ;;  %11635 = vmatprep.mubr.msk.f32.mxu1 %vm13705_vm5, %v13706_v10 }
0x322f   : > { %v7409_v55 = vadd.f32 %v10520_v45, %v7399_v51  ;;  %v7390_v56 = vmul.f32 %v13002_v53, %v7366_v48 }
0x3231   : > { %11636 = vmatmul.mubr.msk.f32.gmra.mrb[80].mxu1 %vm2143_vm1, %v7409_v55  ;;  %v7400_v12 = vmul.f32 %v10519_v43, %v7390_v56 }
0x3232   : > { %11638 = vmatprep.mubr.msk.f32.mxu1 %vm13705_vm5, %v13706_v10 }
0x3233   : > { %v7410_v62 = vadd.f32 %v10520_v45, %v7400_v12 }
0x3235   : > { %11639 = vmatmul.mubr.msk.f32.gmra.mrb[82].mxu1 %vm2143_vm1, %v7410_v62 }
0x3236   : > { %11647 = vmatprep.mubr.msk.f32.mxu1 %vm13705_vm5, %v13706_v10 }
0x3300   : > { %v15167_v59 = vpop.f32.mrb[78].mxu1 }
0x3301   : > { %v11634_v60 = vpop.f32.mrb[79].mxu1 }
0x3304   : > { %v15169_v61 = vpop.f32.mrb[80].mxu1 }
0x3305   : > { %v11637_v3 = vpop.f32.mrb[81].mxu1  ;;  %v15173_v27 = vpack.i.bf16 %v15169_v61, %v15167_v59 }
0x3307   : > { %12770 = vrot.lane.b32.xlu0 %v15173_v27, %s15971_s2 }
0x3308   : > { %v15177_v5 = vpop.f32.mrb[82].mxu1 }
0x3309   : > { %7516 = vrot.lane.b32.xlu1 %v15177_v5, %s15971_s2  ;;  %v11640_v26 = vpop.f32.mrb[83].mxu1  ;;  %s15996_s2 = smov 64  }
0x3379   : > { %v12771_v32 = vpop.permute.xlu0 %12770 }
0x337a   : > { %v12773_v8 = vunpack.i.h.bf16 %v12771_v32  ;;  %v12772_v20 = vunpack.i.l.bf16 %v12771_v32 }
0x337b   : > { %v7517_v35 = vpop.permute.xlu1 %7516 }
0x337c   : > { %v12130_v21 = vpack.c.bf16 %v12773_v8, %v12772_v20 }
0x337e   : > { %12132 = vmatpush3.bf16.xpose.msk.msra.mxu1 %vm14373_vm3, %v12130_v21 }
0x337f   : > { %11645 = vmatprep.subr.mxu1 %v13706_v10 }
0x3386   : > { %11646 = vmatpush3.xpose.msk.msra.mxu1 %vm2373_vm2, %v7517_v35 }
0x3387   : > { %12133 = vmatprep.subr.bf16.mxu1 %v13704_v0 }
0x3389   : > { %11648 = vmatmul.mubr.msk.f32.vlgmr.msra.gmra.mrb[84].mxu1 %vm2373_vm2, %v15167_v59 }
0x338a   : > { %11650 = vmatprep.mubr.msk.f32.mxu1 %vm13705_vm5, %v13706_v10 }
0x338d   : > { %11651 = vmatmul.mubr.msk.f32.gmra.mrb[86].mxu1 %vm2373_vm2, %v15169_v61 }
0x338e   : > { %11653 = vmatprep.mubr.msk.f32.mxu1 %vm13705_vm5, %v13706_v10 }
0x3391   : > { %11654 = vmatmul.mubr.msk.f32.gmra.mrb[88].mxu1 %vm2373_vm2, %v15177_v5 }
0x3392   : > { %11662 = vmatprep.mubr.msk.f32.mxu1 %vm13705_vm5, %v13706_v10 }
0x345c   : > { %v7596_v6 = vpop.f32.mrb[84].mxu1 }
0x345d   : > { %v11649_v22 = vpop.f32.mrb[85].mxu1  ;;  %v7610_v63 = vsel %vm5840_vm6, %v7596_v6, -inf }
0x345e   : > { %7611 = vmax.xlane.f32.xlu1 %v7610_v63 }
0x3460   : > { %v7601_v49 = vpop.f32.mrb[86].mxu1 }
0x3461   : > { %v11652_v23 = vpop.f32.mrb[87].mxu1  ;;  %v7613_v16 = vsel %vm5840_vm6, %v7601_v49, -inf }
0x3462   : > { %7614 = vmax.xlane.f32.xlu0 %v7613_v16 }
0x3464   : > { %v7606_v24 = vpop.f32.mrb[88].mxu1 }
0x3465   : > { %v11655_v57 = vpop.f32.mrb[89].mxu1  ;;  %v7616_v50 = vsel %vm5847_vm7, %v7606_v24, -inf }
0x3466   : > { %7617 = vmax.xlane.f32.xlu0 %v7616_v50 }
0x34eb   : > { %v7612_v30 = vpop.xlane.xlu1 %7611 }
0x34ec   : > { %v7619_v25 = vsub.f32 %v7596_v6, %v7612_v30 }
0x34ee   : > { %v7622_v48 = vmul.f32 1.442695, %v7619_v25 }
0x34ef   : > { %v7615_v54 = vpop.xlane.xlu0 %7614 }
0x34f0   : > { %13003 = vpow2.f32 %v7622_v48  ;;  %v7620_v4 = vsub.f32 %v7601_v49, %v7615_v54 }
0x34f2   : > { %v7624_v18 = vmul.f32 1.442695, %v7620_v4 }
0x34f3   : > { %v7618_v34 = vpop.xlane.xlu0 %7617 }
0x34f4   : > { %13005 = vpow2.f32 %v7624_v18  ;;  %v7621_v9 = vsub.f32 %v7606_v24, %v7618_v34 }
0x34f6   : > { %v7626_v15 = vmul.f32 1.442695, %v7621_v9 }
0x34f8   : > { %13007 = vpow2.f32 %v7626_v15 }
0x34fa   : > { %v13004_v31 = vpop.eup %13003 }
0x34fb   : > { %v7628_v11 = vsel %vm5840_vm6, %v13004_v31, 0.0 }
0x34fc   : > { %7629 = vadd.xlane.f32.xlu1 %v7628_v11 }
0x34fe   : > { %v13006_v58 = vpop.eup %13005 }
0x34ff   : > { %v7631_v33 = vsel %vm5840_vm6, %v13006_v58, 0.0 }
0x3500   : > { %7632 = vadd.xlane.f32.xlu0 %v7631_v33 }
0x3502   : > { %v13008_v52 = vpop.eup %13007 }
0x3503   : > { %v7634_v29 = vsel %vm5847_vm7, %v13008_v52, 0.0 }
0x350d   : > { %7647 = vrot.lane.b32.xlu1 %v15177_v5, %s15996_s2 }
0x3511   : > { %12780 = vrot.lane.b32.xlu1 %v15173_v27, %s15976_s26 }
0x3516   : > { %12775 = vrot.lane.b32.xlu0 %v15173_v27, %s15996_s2  ;;  %s16003_s2 = sld [smem:[#allocation88_spill]] }
0x351a   : > { %7850 = vrot.lane.b32.xlu0 %v15177_v5, %s15976_s26  ;;  %s15998_s26 = smov 56  }
0x351e   : > { %7842 = vrot.lane.b32.xlu0 %v15169_v61, %s15975_s1 }
0x3535   : > { %7635 = vadd.xlane.f32.xlu1 %v7634_v29 }
0x3546   : > { %7840 = vrot.lane.b32.xlu1 %v15167_v59, %s15975_s1 }
0x354a   : > { %7844 = vrot.lane.b32.xlu1 %v15177_v5, %s15975_s1  ;;  %s15997_s1 = sld [smem:[#allocation82_spill]] }
0x3550   : > { %v7504_v26 = vld [vmem:[%s15997_s1] sm:$0xff] }
0x3551   : > { %11672 = vmatpush3.msra.mxu0 %v7504_v26 }
0x3552   : > { %12140 = vmatprep.subr.bf16.mxu0 %v13704_v0 }
0x3589   : > { %v7630_v36 = vpop.xlane.xlu1 %7629 }
0x358a   : > { %13009 = vrcp.f32 %v7630_v36 }
0x358d   : > { %v7633_v28 = vpop.xlane.xlu0 %7632  ;;  %v7648_v39 = vpop.permute.xlu1 %7647 }
0x358e   : > { %13011 = vrcp.f32 %v7633_v28 }
0x3591   : > { %v12776_v37 = vpop.permute.xlu0 %12775  ;;  %v12781_v44 = vpop.permute.xlu1 %12780 }
0x3592   : > { %v12778_v19 = vunpack.i.h.bf16 %v12776_v37  ;;  %v12777_v40 = vunpack.i.l.bf16 %v12776_v37  ;;  %v12783_v41 = vunpack.i.h.bf16 %v12781_v44  ;;  %v12782_v47 = vunpack.i.l.bf16 %v12781_v44 }
0x3594   : > { %v12134_v42 = vpack.c.bf16 %v12778_v19, %v12777_v40  ;;  %v13010_v43 = vpop.eup %13009  ;;  %v12137_v51 = vpack.c.bf16 %v12783_v41, %v12782_v47 }
0x3595   : > { %v7640_v45 = vmul.f32 %v13010_v43, %v13004_v31  ;;  %v7851_v53 = vpop.permute.xlu0 %7850 }
0x3596   : > { %12135 = vmatpush3.bf16.msra.mxu1 %v12134_v42 }
0x3597   : > { %11660 = vmatprep.subr.mxu1 %v13706_v10 }
0x3598   : > { %v13012_v46 = vpop.eup %13011 }
0x3599   : > { %v7641_v13 = vmul.f32 %v13012_v46, %v13006_v58  ;;  %v7843_v60 = vpop.permute.xlu0 %7842 }
0x359a   : > { %11661 = vmatpush3.msk.msra.mxu1 %vm5892_vm8, %v7648_v39 }
0x359b   : > { %11663 = vmatmul.mubr.msk.f32.vlgmr.msra.gmra.mrb[90].mxu1 %vm5840_vm6, %v7640_v45  ;;  %12136 = vmatprep.subr.bf16.mxu1 %v13704_v0 }
0x359c   : > { %11665 = vmatprep.mubr.msk.f32.mxu1 %vm13705_vm5, %v13706_v10 }
0x359f   : > { %11666 = vmatmul.mubr.msk.f32.gmra.mrb[92].mxu1 %vm5840_vm6, %v7641_v13 }
0x35a0   : > { %11668 = vmatprep.mubr.msk.f32.mxu1 %vm13705_vm5, %v13706_v10 }
0x35a1   : > { %12139 = vmatpush3.bf16.xpose.msk.msra.mxu1 %vm14373_vm3, %v12137_v51 }
0x35a2   : > { %11686 = vmatprep.subr.mxu1 %v13706_v10 }
0x35a9   : > { %11687 = vmatpush3.xpose.msk.msra.mxu1 %vm2373_vm2, %v7851_v53 }
0x35aa   : > { %11712 = vmatprep.subr.mxu1 %v13706_v10 }
0x35c2   : > { %v7636_v55 = vpop.xlane.xlu1 %7635 }
0x35c3   : > { %13013 = vrcp.f32 %v7636_v55 }
0x35c6   : > { %v7841_v62 = vpop.permute.xlu1 %7840 }
0x35ca   : > { %v7845_v3 = vpop.permute.xlu1 %7844 }
0x35cd   : > { %v13014_v56 = vpop.eup %13013 }
0x35ce   : > { %v7642_v12 = vmul.f32 %v13014_v56, %v13008_v52 }
0x35d0   : > { %11669 = vmatmul.mubr.msk.f32.gmra.mrb[94].mxu1 %vm5840_vm6, %v7642_v12 }
0x35d1   : > { %11688 = vmatprep.mubr.msk.f32.mxu1 %vm13705_vm5, %v13706_v10 }
0x35d4   : > { %11689 = vmatmul.mubr.msk.f32.vlgmr.msra.gmra.mrb[96].mxu1 %vm2373_vm2, %v7841_v62 }
0x35d5   : > { %11691 = vmatprep.mubr.msk.f32.mxu1 %vm13705_vm5, %v13706_v10 }
0x35d8   : > { %11692 = vmatmul.mubr.msk.f32.gmra.mrb[98].mxu1 %vm2373_vm2, %v7843_v60 }
0x35d9   : > { %11694 = vmatprep.mubr.msk.f32.mxu1 %vm13705_vm5, %v13706_v10 }
0x35dc   : > { %11695 = vmatmul.mubr.msk.f32.gmra.mrb[100].mxu1 %vm2373_vm2, %v7845_v3 }
0x35dd   : > { %11714 = vmatprep.mubr.msk.f32.mxu1 %vm13705_vm5, %v13706_v10 }
0x366e   : > { %v7728_v32 = vpop.f32.mrb[90].mxu1 }
0x366f   : > { %v11664_v8 = vpop.f32.mrb[91].mxu1  ;;  %11674 = vmatmul.mubr.msk.f32.vlgmr.msra.gmra.mrb[66].mxu0 %vm2373_vm2, %v7728_v32 }
0x3670   : > { %11676 = vmatprep.mubr.msk.f32.mxu0 %vm13705_vm5, %v13706_v10 }
0x3672   : > { %v7733_v20 = vpop.f32.mrb[92].mxu1 }
0x3673   : > { %v11667_v21 = vpop.f32.mrb[93].mxu1  ;;  %11677 = vmatmul.mubr.msk.f32.gmra.mrb[68].mxu0 %vm2373_vm2, %v7733_v20 }
0x3674   : > { %11679 = vmatprep.mubr.msk.f32.mxu0 %vm13705_vm5, %v13706_v10 }
0x36a3   : > { %v7738_v35 = vpop.f32.mrb[94].mxu1 }
0x36a4   : > { %v11670_v6 = vpop.f32.mrb[95].mxu1  ;;  %11680 = vmatmul.mubr.msk.f32.gmra.mrb[70].mxu0 %vm2373_vm2, %v7738_v35 }
0x36a5   : > { %11703 = vmatprep.mubr.msk.f32.mxu0 %vm13705_vm5, %v13706_v10 }
0x36a7   : > { %v7930_v22 = vpop.f32.mrb[96].mxu1 }
0x36a8   : > { %v11690_v63 = vpop.f32.mrb[97].mxu1  ;;  %v7944_v49 = vsel %vm5840_vm6, %v7930_v22, -inf }
0x36a9   : > { %7945 = vmax.xlane.f32.xlu0 %v7944_v49 }
0x36ab   : > { %v7935_v23 = vpop.f32.mrb[98].mxu1 }
0x36ac   : > { %v11693_v16 = vpop.f32.mrb[99].mxu1  ;;  %v7947_v24 = vsel %vm5840_vm6, %v7935_v23, -inf }
0x36ad   : > { %7948 = vmax.xlane.f32.xlu1 %v7947_v24 }
0x36af   : > { %v7940_v57 = vpop.f32.mrb[100].mxu1 }
0x36b0   : > { %v11696_v50 = vpop.f32.mrb[101].mxu1  ;;  %v7950_v30 = vsel %vm5847_vm7, %v7940_v57, -inf }
0x36b1   : > { %7951 = vmax.xlane.f32.xlu0 %v7950_v30 }
0x36be   : > { %12785 = vrot.lane.b32.xlu1 %v15173_v27, %s15998_s26 }
0x36c2   : > { %12790 = vrot.lane.b32.xlu1 %v15173_v27, %s15978_s6 }
0x3736   : > { %v7946_v25 = vpop.xlane.xlu0 %7945 }
0x3737   : > { %v7953_v48 = vsub.f32 %v7930_v22, %v7946_v25  ;;  %v7505_v22 = vld [vmem:[%s15997_s1 + $0x8] sm:$0xff] }
0x3738   : > { %11713 = vmatpush3.msra.mxu1 %v7505_v22 }
0x3739   : > { %v7956_v54 = vmul.f32 1.442695, %v7953_v48  ;;  %12147 = vmatprep.subr.bf16.mxu1 %v13704_v0 }
0x373a   : > { %v7949_v4 = vpop.xlane.xlu1 %7948 }
0x373b   : > { %13015 = vpow2.f32 %v7956_v54  ;;  %v7954_v18 = vsub.f32 %v7935_v23, %v7949_v4 }
0x373d   : > { %v7958_v31 = vmul.f32 1.442695, %v7954_v18 }
0x373e   : > { %v12786_v11 = vpop.permute.xlu1 %12785  ;;  %v7952_v19 = vpop.xlane.xlu0 %7951 }
0x373f   : > { %13017 = vpow2.f32 %v7958_v31  ;;  %v12788_v58 = vunpack.i.h.bf16 %v12786_v11  ;;  %v12787_v33 = vunpack.i.l.bf16 %v12786_v11  ;;  %v7955_v40 = vsub.f32 %v7940_v57, %v7952_v19 }
0x3741   : > { %v12141_v34 = vpack.c.bf16 %v12788_v58, %v12787_v33  ;;  %v7960_v42 = vmul.f32 1.442695, %v7955_v40 }
0x3742   : > { %v15262_v9 = vpop.f32.mrb[66].mxu0  ;;  %v12791_v41 = vpop.permute.xlu1 %12790 }
0x3743   : > { %v11675_v15 = vpop.f32.mrb[67].mxu0  ;;  %12142 = vmatpush3.bf16.msra.mxu0 %v12141_v34  ;;  %13019 = vpow2.f32 %v7960_v42  ;;  %v12793_v53 = vunpack.i.h.bf16 %v12791_v41  ;;  %v12792_v55 = vunpack.i.l.bf16 %v12791_v41 }
0x3744   : > { %11701 = vmatprep.subr.mxu0 %v13706_v10 }
0x3745   : > { %v13016_v52 = vpop.eup %13015  ;;  %v12144_v62 = vpack.c.bf16 %v12793_v53, %v12792_v55 }
0x3746   : > { %v15265_v29 = vpop.f32.mrb[68].mxu0  ;;  %v7962_v36 = vsel %vm5840_vm6, %v13016_v52, 0.0 }
0x3747   : > { %v11678_v28 = vpop.f32.mrb[69].mxu0  ;;  %7963 = vadd.xlane.f32.xlu0 %v7962_v36 }
0x3748   : > { %v10537_v28 = vld [vmem:[#allocation21] ss:$0 sm:$0xff] }
0x3749   : > { %v13018_v37 = vpop.eup %13017 }
0x374a   : > { %v7965_v39 = vsel %vm5840_vm6, %v13018_v37, 0.0 }
0x374b   : > { %7966 = vadd.xlane.f32.xlu1 %v7965_v39 }
0x374d   : > { %v13020_v44 = vpop.eup %13019 }
0x374e   : > { %v7968_v46 = vsel %vm5847_vm7, %v13020_v44, 0.0 }
0x375c   : > { %8178 = vrot.lane.b32.xlu1 %v15177_v5, %s15978_s6  ;;  %s15999_s6 = smov 48  }
0x375d   : > { %7981 = vrot.lane.b32.xlu0 %v15177_v5, %s15998_s26  ;;  %s16004_s26 = sld [smem:[#allocation89_spill]] }
0x3760   : > { %8170 = vrot.lane.b32.xlu1 %v15169_v61, %s15977_s4 }
0x3777   : > { %v15275_v43 = vpop.f32.mrb[70].mxu0 }
0x3778   : > { %v11681_v45 = vpop.f32.mrb[71].mxu0  ;;  %v7839_v55 = vadd.f32 %v10537_v28, %v15275_v43 }
0x377c   : > { %7969 = vadd.xlane.f32.xlu0 %v7968_v46 }
0x3792   : > { %8168 = vrot.lane.b32.xlu0 %v15167_v59, %s15977_s4 }
0x3796   : > { %8172 = vrot.lane.b32.xlu0 %v15177_v5, %s15977_s4  ;;  %s16002_s4 = sld [smem:[#allocation81_spill]] }
0x37d4   : > { %v7964_v47 = vpop.xlane.xlu0 %7963 }
0x37d5   : > { %13021 = vrcp.f32 %v7964_v47 }
0x37d8   : > { %v7967_v13 = vpop.xlane.xlu1 %7966  ;;  %v7982_v51 = vpop.permute.xlu0 %7981 }
0x37d9   : > { %13023 = vrcp.f32 %v7967_v13  ;;  %11702 = vmatpush3.msk.msra.mxu0 %vm5892_vm8, %v7982_v51 }
0x37da   : > { %12143 = vmatprep.subr.bf16.mxu0 %v13704_v0 }
0x37dc   : > { %v8179_v26 = vpop.permute.xlu1 %8178 }
0x37df   : > { %v13022_v56 = vpop.eup %13021 }
0x37e0   : > { %v7974_v12 = vmul.f32 %v13022_v56, %v13016_v52  ;;  %v8171_v35 = vpop.permute.xlu1 %8170 }
0x37e2   : > { %11704 = vmatmul.mubr.msk.f32.vlgmr.msra.gmra.mrb[72].mxu0 %vm5840_vm6, %v7974_v12 }
0x37e3   : > { %v13024_v60 = vpop.eup %13023  ;;  %12146 = vmatpush3.bf16.xpose.msk.msra.mxu0 %vm14373_vm3, %v12144_v62  ;;  %11706 = vmatprep.mubr.msk.f32.mxu0 %vm13705_vm5, %v13706_v10 }
0x37e4   : > { %v7975_v3 = vmul.f32 %v13024_v60, %v13018_v37  ;;  %11727 = vmatprep.subr.mxu0 %v13706_v10  ;;  %v7837_v37 = vadd.f32 %v10537_v28, %v15262_v9 }
0x37e6   : > { %11707 = vmatmul.mubr.msk.f32.gmra.mrb[74].mxu0 %vm5840_vm6, %v7975_v3 }
0x37e7   : > { %11709 = vmatprep.mubr.msk.f32.mxu0 %vm13705_vm5, %v13706_v10 }
0x37eb   : > { %11728 = vmatpush3.xpose.msk.msra.mxu0 %vm2373_vm2, %v8179_v26 }
0x37ec   : > { %11753 = vmatprep.subr.mxu0 %v13706_v10 }
0x3809   : > { %v7970_v32 = vpop.xlane.xlu0 %7969 }
0x380a   : > { %13025 = vrcp.f32 %v7970_v32 }
0x380d   : > { %v8169_v21 = vpop.permute.xlu0 %8168 }
0x3811   : > { %v8173_v6 = vpop.permute.xlu0 %8172 }
0x3814   : > { %v13026_v8 = vpop.eup %13025 }
0x3815   : > { %v7976_v20 = vmul.f32 %v13026_v8, %v13020_v44  ;;  %v7838_v44 = vadd.f32 %v10537_v28, %v15265_v29 }
0x3817   : > { %11710 = vmatmul.mubr.msk.f32.gmra.mrb[76].mxu0 %vm5840_vm6, %v7976_v20 }
0x3818   : > { %11729 = vmatprep.mubr.msk.f32.mxu0 %vm13705_vm5, %v13706_v10 }
0x381b   : > { %11730 = vmatmul.mubr.msk.f32.vlgmr.msra.gmra.mrb[78].mxu0 %vm2373_vm2, %v8169_v21 }
0x381c   : > { %11732 = vmatprep.mubr.msk.f32.mxu0 %vm13705_vm5, %v13706_v10 }
0x381f   : > { %11733 = vmatmul.mubr.msk.f32.gmra.mrb[80].mxu0 %vm2373_vm2, %v8171_v35 }
0x3820   : > { %11735 = vmatprep.mubr.msk.f32.mxu0 %vm13705_vm5, %v13706_v10 }
0x3823   : > { %11736 = vmatmul.mubr.msk.f32.gmra.mrb[82].mxu0 %vm2373_vm2, %v8173_v6 }
0x3824   : > { %11755 = vmatprep.mubr.msk.f32.mxu0 %vm13705_vm5, %v13706_v10 }
0x38b5   : > { %v8062_v63 = vpop.f32.mrb[72].mxu0 }
0x38b6   : > { %v11705_v49 = vpop.f32.mrb[73].mxu0  ;;  %11715 = vmatmul.mubr.msk.f32.vlgmr.msra.gmra.mrb[102].mxu1 %vm2373_vm2, %v8062_v63 }
0x38b7   : > { %11717 = vmatprep.mubr.msk.f32.mxu1 %vm13705_vm5, %v13706_v10 }
0x38b9   : > { %v8067_v23 = vpop.f32.mrb[74].mxu0 }
0x38ba   : > { %v11708_v16 = vpop.f32.mrb[75].mxu0  ;;  %11718 = vmatmul.mubr.msk.f32.gmra.mrb[104].mxu1 %vm2373_vm2, %v8067_v23 }
0x38bb   : > { %11720 = vmatprep.mubr.msk.f32.mxu1 %vm13705_vm5, %v13706_v10 }
0x38ea   : > { %v8072_v24 = vpop.f32.mrb[76].mxu0 }
0x38eb   : > { %v11711_v57 = vpop.f32.mrb[77].mxu0  ;;  %11721 = vmatmul.mubr.msk.f32.gmra.mrb[106].mxu1 %vm2373_vm2, %v8072_v24 }
0x38ec   : > { %11744 = vmatprep.mubr.msk.f32.mxu1 %vm13705_vm5, %v13706_v10 }
0x38ee   : > { %v8258_v50 = vpop.f32.mrb[78].mxu0 }
0x38ef   : > { %v11731_v30 = vpop.f32.mrb[79].mxu0  ;;  %v8272_v25 = vsel %vm5840_vm6, %v8258_v50, -inf }
0x38f0   : > { %8273 = vmax.xlane.f32.xlu1 %v8272_v25 }
0x38f2   : > { %v8263_v48 = vpop.f32.mrb[80].mxu0 }
0x38f3   : > { %v11734_v54 = vpop.f32.mrb[81].mxu0  ;;  %v8275_v4 = vsel %vm5840_vm6, %v8263_v48, -inf }
0x38f4   : > { %8276 = vmax.xlane.f32.xlu0 %v8275_v4  ;;  %v7506_v54 = vld [vmem:[%s15997_s1 + $0x10] sm:$0xff] }
0x38f5   : > { %11754 = vmatpush3.msra.mxu0 %v7506_v54 }
0x38f6   : > { %v8268_v18 = vpop.f32.mrb[82].mxu0  ;;  %12154 = vmatprep.subr.bf16.mxu0 %v13704_v0 }
0x38f7   : > { %v11737_v31 = vpop.f32.mrb[83].mxu0  ;;  %v8278_v11 = vsel %vm5847_vm7, %v8268_v18, -inf }
0x38f8   : > { %8279 = vmax.xlane.f32.xlu0 %v8278_v11 }
0x397d   : > { %v8274_v58 = vpop.xlane.xlu1 %8273 }
0x397e   : > { %v8281_v33 = vsub.f32 %v8258_v50, %v8274_v58 }
0x3980   : > { %v8284_v34 = vmul.f32 1.442695, %v8281_v33 }
0x3981   : > { %v8277_v15 = vpop.xlane.xlu0 %8276 }
0x3982   : > { %13027 = vpow2.f32 %v8284_v34  ;;  %v8282_v52 = vsub.f32 %v8263_v48, %v8277_v15 }
0x3984   : > { %v8286_v36 = vmul.f32 1.442695, %v8282_v52 }
0x3985   : > { %v8280_v9 = vpop.xlane.xlu0 %8279 }
0x3986   : > { %13029 = vpow2.f32 %v8286_v36  ;;  %v8283_v29 = vsub.f32 %v8268_v18, %v8280_v9 }
0x3988   : > { %v8288_v53 = vmul.f32 1.442695, %v8283_v29 }
0x3989   : > { %v8151_v39 = vpop.f32.mrb[102].mxu1 }
0x398a   : > { %v15322_v19 = vadd.f32 %v8151_v39, %v7837_v37  ;;  %v11716_v40 = vpop.f32.mrb[103].mxu1  ;;  %13031 = vpow2.f32 %v8288_v53 }
0x398c   : > { %v13028_v42 = vpop.eup %13027 }
0x398d   : > { %v8156_v45 = vpop.f32.mrb[104].mxu1  ;;  %v8290_v46 = vsel %vm5840_vm6, %v13028_v42, 0.0 }
0x398e   : > { %v15326_v41 = vadd.f32 %v8156_v45, %v7838_v44  ;;  %8291 = vadd.xlane.f32.xlu1 %v8290_v46  ;;  %v11719_v47 = vpop.f32.mrb[105].mxu1 }
0x3990   : > { %v13030_v13 = vpop.eup %13029 }
0x3991   : > { %v8293_v51 = vsel %vm5840_vm6, %v13030_v13, 0.0 }
0x3992   : > { %8294 = vadd.xlane.f32.xlu0 %v8293_v51 }
0x3994   : > { %v13032_v60 = vpop.eup %13031 }
0x3995   : > { %v8296_v3 = vsel %vm5847_vm7, %v13032_v60, 0.0 }
0x399f   : > { %8309 = vrot.lane.b32.xlu1 %v15177_v5, %s15999_s6 }
0x39a3   : > { %12800 = vrot.lane.b32.xlu1 %v15173_v27, %s15980_s8 }
0x39a8   : > { %12795 = vrot.lane.b32.xlu0 %v15173_v27, %s15999_s6  ;;  %s16005_s6 = smov %s16004_s26 }
0x39ac   : > { %8506 = vrot.lane.b32.xlu0 %v15177_v5, %s15980_s8  ;;  %s16001_s8 = sld [smem:[#allocation79_spill]] }
0x39b0   : > { %8498 = vrot.lane.b32.xlu0 %v15169_v61, %s15981_s9 }
0x39be   : > { %v8161_v56 = vpop.f32.mrb[106].mxu1 }
0x39bf   : > { %v15340_v12 = vadd.f32 %v8161_v56, %v7839_v55  ;;  %v11722_v62 = vpop.f32.mrb[107].mxu1 }
0x39c7   : > { %8297 = vadd.xlane.f32.xlu1 %v8296_v3 }
0x39d8   : > { %8496 = vrot.lane.b32.xlu1 %v15167_v59, %s15981_s9 }
0x39dc   : > { %8500 = vrot.lane.b32.xlu1 %v15177_v5, %s15981_s9  ;;  %s16000_s9 = smov 40  }
0x3a1b   : > { %v8292_v61 = vpop.xlane.xlu1 %8291 }
0x3a1c   : > { %13033 = vrcp.f32 %v8292_v61 }
0x3a1f   : > { %v8295_v26 = vpop.xlane.xlu0 %8294  ;;  %v8310_v43 = vpop.permute.xlu1 %8309 }
0x3a20   : > { %13035 = vrcp.f32 %v8295_v26 }
0x3a23   : > { %v12796_v32 = vpop.permute.xlu0 %12795  ;;  %v12801_v6 = vpop.permute.xlu1 %12800 }
0x3a24   : > { %v12798_v8 = vunpack.i.h.bf16 %v12796_v32  ;;  %v12797_v20 = vunpack.i.l.bf16 %v12796_v32  ;;  %v12803_v59 = vunpack.i.h.bf16 %v12801_v6  ;;  %v12802_v49 = vunpack.i.l.bf16 %v12801_v6 }
0x3a26   : > { %v12148_v21 = vpack.c.bf16 %v12798_v8, %v12797_v20  ;;  %v13034_v35 = vpop.eup %13033  ;;  %v12151_v16 = vpack.c.bf16 %v12803_v59, %v12802_v49 }
0x3a27   : > { %v8302_v22 = vmul.f32 %v13034_v35, %v13028_v42  ;;  %v8507_v24 = vpop.permute.xlu0 %8506 }
0x3a28   : > { %12149 = vmatpush3.bf16.msra.mxu1 %v12148_v21 }
0x3a29   : > { %11742 = vmatprep.subr.mxu1 %v13706_v10 }
0x3a2a   : > { %v13036_v63 = vpop.eup %13035 }
0x3a2b   : > { %v8303_v23 = vmul.f32 %v13036_v63, %v13030_v13  ;;  %v8499_v1 = vpop.permute.xlu0 %8498 }
0x3a2c   : > { %11743 = vmatpush3.msk.msra.mxu1 %vm5892_vm8, %v8310_v43 }
0x3a2d   : > { %11745 = vmatmul.mubr.msk.f32.vlgmr.msra.gmra.mrb[108].mxu1 %vm5840_vm6, %v8302_v22  ;;  %12150 = vmatprep.subr.bf16.mxu1 %v13704_v0 }
0x3a2e   : > { %11747 = vmatprep.mubr.msk.f32.mxu1 %vm13705_vm5, %v13706_v10 }
0x3a31   : > { %11748 = vmatmul.mubr.msk.f32.gmra.mrb[110].mxu1 %vm5840_vm6, %v8303_v23 }
0x3a32   : > { %11750 = vmatprep.mubr.msk.f32.mxu1 %vm13705_vm5, %v13706_v10 }
0x3a33   : > { %12153 = vmatpush3.bf16.xpose.msk.msra.mxu1 %vm14373_vm3, %v12151_v16 }
0x3a34   : > { %11768 = vmatprep.subr.mxu1 %v13706_v10 }
0x3a3b   : > { %11769 = vmatpush3.xpose.msk.msra.mxu1 %vm2373_vm2, %v8507_v24 }
0x3a3c   : > { %11794 = vmatprep.subr.mxu1 %v13706_v10 }
0x3a54   : > { %v8298_v57 = vpop.xlane.xlu1 %8297 }
0x3a55   : > { %13037 = vrcp.f32 %v8298_v57 }
0x3a58   : > { %v8497_v25 = vpop.permute.xlu1 %8496 }
0x3a5c   : > { %v8501_v48 = vpop.permute.xlu1 %8500 }
0x3a5f   : > { %v13038_v50 = vpop.eup %13037 }
0x3a60   : > { %v8304_v30 = vmul.f32 %v13038_v50, %v13032_v60 }
0x3a62   : > { %11751 = vmatmul.mubr.msk.f32.gmra.mrb[112].mxu1 %vm5840_vm6, %v8304_v30 }
0x3a63   : > { %11770 = vmatprep.mubr.msk.f32.mxu1 %vm13705_vm5, %v13706_v10 }
0x3a66   : > { %11771 = vmatmul.mubr.msk.f32.vlgmr.msra.gmra.mrb[114].mxu1 %vm2373_vm2, %v8497_v25 }
0x3a67   : > { %11773 = vmatprep.mubr.msk.f32.mxu1 %vm13705_vm5, %v13706_v10 }
0x3a6a   : > { %11774 = vmatmul.mubr.msk.f32.gmra.mrb[116].mxu1 %vm2373_vm2, %v8499_v1 }
0x3a6b   : > { %11776 = vmatprep.mubr.msk.f32.mxu1 %vm13705_vm5, %v13706_v10 }
0x3a6e   : > { %11777 = vmatmul.mubr.msk.f32.gmra.mrb[118].mxu1 %vm2373_vm2, %v8501_v48 }
0x3a6f   : > { %11796 = vmatprep.mubr.msk.f32.mxu1 %vm13705_vm5, %v13706_v10 }
0x3b00   : > { %v8390_v4 = vpop.f32.mrb[108].mxu1 }
0x3b01   : > { %v11746_v18 = vpop.f32.mrb[109].mxu1  ;;  %11756 = vmatmul.mubr.msk.f32.vlgmr.msra.gmra.mrb[84].mxu0 %vm2373_vm2, %v8390_v4 }
0x3b02   : > { %11758 = vmatprep.mubr.msk.f32.mxu0 %vm13705_vm5, %v13706_v10 }
0x3b04   : > { %v8395_v31 = vpop.f32.mrb[110].mxu1 }
0x3b05   : > { %v11749_v11 = vpop.f32.mrb[111].mxu1  ;;  %11759 = vmatmul.mubr.msk.f32.gmra.mrb[86].mxu0 %vm2373_vm2, %v8395_v31 }
0x3b06   : > { %11761 = vmatprep.mubr.msk.f32.mxu0 %vm13705_vm5, %v13706_v10 }
0x3b35   : > { %v8400_v58 = vpop.f32.mrb[112].mxu1 }
0x3b36   : > { %v11752_v33 = vpop.f32.mrb[113].mxu1  ;;  %11762 = vmatmul.mubr.msk.f32.gmra.mrb[88].mxu0 %vm2373_vm2, %v8400_v58 }
0x3b37   : > { %11785 = vmatprep.mubr.msk.f32.mxu0 %vm13705_vm5, %v13706_v10 }
0x3b39   : > { %v8586_v34 = vpop.f32.mrb[114].mxu1 }
0x3b3a   : > { %v11772_v15 = vpop.f32.mrb[115].mxu1  ;;  %v8600_v52 = vsel %vm5840_vm6, %v8586_v34, -inf }
0x3b3b   : > { %8601 = vmax.xlane.f32.xlu0 %v8600_v52 }
0x3b3d   : > { %v8591_v36 = vpop.f32.mrb[116].mxu1 }
0x3b3e   : > { %v11775_v28 = vpop.f32.mrb[117].mxu1  ;;  %v8603_v37 = vsel %vm5840_vm6, %v8591_v36, -inf }
0x3b3f   : > { %8604 = vmax.xlane.f32.xlu1 %v8603_v37 }
0x3b41   : > { %v8596_v39 = vpop.f32.mrb[118].mxu1 }
0x3b42   : > { %v11778_v40 = vpop.f32.mrb[119].mxu1  ;;  %v8606_v42 = vsel %vm5847_vm7, %v8596_v39, -inf }
0x3b43   : > { %8607 = vmax.xlane.f32.xlu0 %v8606_v42 }
0x3bc8   : > { %v8602_v44 = vpop.xlane.xlu0 %8601 }
0x3bc9   : > { %v8609_v45 = vsub.f32 %v8586_v34, %v8602_v44 }
0x3bcb   : > { %v8612_v46 = vmul.f32 1.442695, %v8609_v45 }
0x3bcc   : > { %v8605_v47 = vpop.xlane.xlu1 %8604 }
0x3bcd   : > { %13039 = vpow2.f32 %v8612_v46  ;;  %v8610_v13 = vsub.f32 %v8591_v36, %v8605_v47 }
0x3bcf   : > { %v8614_v51 = vmul.f32 1.442695, %v8610_v13 }
0x3bd0   : > { %v8608_v9 = vpop.xlane.xlu0 %8607 }
0x3bd1   : > { %13041 = vpow2.f32 %v8614_v51  ;;  %v8611_v29 = vsub.f32 %v8596_v39, %v8608_v9 }
0x3bd3   : > { %v8616_v53 = vmul.f32 1.442695, %v8611_v29 }
0x3bd4   : > { %v8479_v55 = vpop.f32.mrb[84].mxu0 }
0x3bd5   : > { %13043 = vpow2.f32 %v8616_v53  ;;  %v8493_v56 = vadd.f32 %v8479_v55, %v15322_v19  ;;  %v11757_v62 = vpop.f32.mrb[85].mxu0  ;;  %v7507_v19 = vld [vmem:[%s15997_s1 + $0x18] sm:$0xff]  ;;  %s16008_s1 = sld [smem:[#allocation85_spill]] }
0x3bd6   : > { %11795 = vmatpush3.msra.mxu1 %v7507_v19  ;;  %v9013_v19 = vld [vmem:[%s16002_s4] sm:$0xff] }
0x3bd7   : > { %v13040_v60 = vpop.eup %13039  ;;  %12163 = vmatprep.subr.bf16.mxu1 %v13704_v0 }
0x3bd8   : > { %v8484_v3 = vpop.f32.mrb[86].mxu0  ;;  %v8618_v61 = vsel %vm5840_vm6, %v13040_v60, 0.0 }
0x3bd9   : > { %v8494_v26 = vadd.f32 %v8484_v3, %v15326_v41  ;;  %v11760_v32 = vpop.f32.mrb[87].mxu0  ;;  %8619 = vadd.xlane.f32.xlu0 %v8618_v61 }
0x3bda   : > { %v8887_v32 = vld [vmem:[%s16001_s8 + $0x8] sm:$0xff] }
0x3bdb   : > { %v13042_v43 = vpop.eup %13041 }
0x3bdc   : > { %v8621_v8 = vsel %vm5840_vm6, %v13042_v43, 0.0 }
0x3bdd   : > { %8622 = vadd.xlane.f32.xlu1 %v8621_v8  ;;  %v8888_v8 = vld [vmem:[%s16001_s8 + $0x10] sm:$0xff] }
0x3bdf   : > { %v13044_v20 = vpop.eup %13043 }
0x3be0   : > { %v8624_v21 = vsel %vm5847_vm7, %v13044_v20, 0.0 }
0x3be1   : > { %8625 = vadd.xlane.f32.xlu0 %v8624_v21 }
0x3bee   : > { %12805 = vrot.lane.b32.xlu1 %v15173_v27, %s16000_s9 }
0x3bf7   : > { %8637 = vrot.lane.b32.xlu0 %v15177_v5, %s16000_s9  ;;  %s16006_s9 = sld [smem:[#allocation86_spill]] }
0x3c09   : > { %v8489_v41 = vpop.f32.mrb[88].mxu0 }
0x3c0a   : > { %v8495_v35 = vadd.f32 %v8489_v41, %v15340_v12  ;;  %v11763_v6 = vpop.f32.mrb[89].mxu0  ;;  %v9014_v41 = vld [vmem:[%s16002_s4 + $0x8] sm:$0xff] }
0x3c66   : > { %v8620_v22 = vpop.xlane.xlu0 %8619 }
0x3c67   : > { %13045 = vrcp.f32 %v8620_v22 }
0x3c6a   : > { %v8623_v63 = vpop.xlane.xlu1 %8622 }
0x3c6b   : > { %13047 = vrcp.f32 %v8623_v63 }
0x3c6e   : > { %v12806_v59 = vpop.permute.xlu1 %12805  ;;  %v8626_v49 = vpop.xlane.xlu0 %8625 }
0x3c6f   : > { %v12808_v23 = vunpack.i.h.bf16 %v12806_v59  ;;  %v12807_v16 = vunpack.i.l.bf16 %v12806_v59  ;;  %13049 = vrcp.f32 %v8626_v49 }
0x3c71   : > { %v12155_v27 = vpack.c.bf16 %v12808_v23, %v12807_v16  ;;  %v13046_v24 = vpop.eup %13045 }
0x3c72   : > { %v8630_v5 = vmul.f32 %v13046_v24, %v13040_v60  ;;  %v8638_v57 = vpop.permute.xlu0 %8637 }
0x3c73   : > { %12156 = vmatpush3.bf16.msra.mxu0 %v12155_v27 }
0x3c74   : > { %11783 = vmatprep.subr.mxu0 %v13706_v10 }
0x3c75   : > { %v13048_v50 = vpop.eup %13047 }
0x3c76   : > { %v8631_v12 = vmul.f32 %v13048_v50, %v13042_v43 }
0x3c77   : > { %11784 = vmatpush3.msk.msra.mxu0 %vm5892_vm8, %v8638_v57  ;;  %v10577_v57 = vld [vmem:[#allocation20] ss:$0 sm:$0xff] }
0x3c78   : > { %11786 = vmatmul.mubr.msk.f32.vlgmr.msra.gmra.mrb[90].mxu0 %vm5840_vm6, %v8630_v5  ;;  %12157 = vmatprep.subr.bf16.mxu0 %v13704_v0 }
0x3c79   : > { %11788 = vmatprep.mubr.msk.f32.mxu0 %vm13705_vm5, %v13706_v10  ;;  %v13050_v30 = vpop.eup %13049 }
0x3c7a   : > { %v8632_v25 = vmul.f32 %v13050_v30, %v13044_v20  ;;  %v8889_v20 = vld [vmem:[%s16001_s8 + $0x18] sm:$0xff] }
0x3c7b   : > { %v12161_v21 = vpack.c.bf16 %v8889_v20, %v8888_v8 }
0x3c7c   : > { %11789 = vmatmul.mubr.msk.f32.gmra.mrb[92].mxu0 %vm5840_vm6, %v8631_v12  ;;  %v10578_v12 = vld [vmem:[#allocation18] ss:$0 sm:$0xff] }
0x3c7d   : > { %11791 = vmatprep.mubr.msk.f32.mxu0 %vm13705_vm5, %v13706_v10 }
0x3c80   : > { %11792 = vmatmul.mubr.msk.f32.gmra.mrb[94].mxu0 %vm5840_vm6, %v8632_v25 }
0x3c81   : > { %11813 = vmatprep.mubr.msk.f32.mxu0 %vm13705_vm5, %v13706_v10 }
0x3d4b   : > { %v8718_v1 = vpop.f32.mrb[90].mxu0 }
0x3d4c   : > { %v11787_v48 = vpop.f32.mrb[91].mxu0  ;;  %11797 = vmatmul.mubr.msk.f32.vlgmr.msra.gmra.mrb[120].mxu1 %vm2373_vm2, %v8718_v1 }
0x3d4d   : > { %11799 = vmatprep.mubr.msk.f32.mxu1 %vm13705_vm5, %v13706_v10 }
0x3d4f   : > { %v8723_v54 = vpop.f32.mrb[92].mxu0 }
0x3d50   : > { %v11790_v4 = vpop.f32.mrb[93].mxu0  ;;  %11800 = vmatmul.mubr.msk.f32.gmra.mrb[122].mxu1 %vm2373_vm2, %v8723_v54 }
0x3d51   : > { %11802 = vmatprep.mubr.msk.f32.mxu1 %vm13705_vm5, %v13706_v10 }
0x3d53   : > { %v8728_v18 = vpop.f32.mrb[94].mxu0 }
0x3d54   : > { %v11793_v31 = vpop.f32.mrb[95].mxu0  ;;  %11803 = vmatmul.mubr.msk.f32.gmra.mrb[124].mxu1 %vm2373_vm2, %v8728_v18 }
0x3d55   : > { %11854 = vmatprep.mubr.msk.f32.mxu1 %vm13705_vm5, %v13706_v10 }
0x3e1f   : > { %v8807_v11 = vpop.f32.mrb[120].mxu1 }
0x3e20   : > { %v8821_v58 = vadd.f32 %v8807_v11, %v8493_v56  ;;  %v11798_v33 = vpop.f32.mrb[121].mxu1 }
0x3e21   : > { %v9015_v33 = vld [vmem:[%s16002_s4 + $0x10] sm:$0xff] }
0x3e22   : > { %v8824_v34 = vadd.f32 %v8821_v58, %v15132_v2 }
0x3e23   : > { %v8812_v15 = vpop.f32.mrb[122].mxu1 }
0x3e24   : > { %v8822_v52 = vadd.f32 %v8812_v15, %v8494_v26  ;;  %v11801_v36 = vpop.f32.mrb[123].mxu1  ;;  %v8827_v28 = vsel %vm2143_vm1, %v8824_v34, 0.0  ;;  %v8886_v26 = vld [vmem:[%s16001_s8] sm:$0xff] }
0x3e25   : > { %8828 = vadd.xlane.f32.xlu1 %v8827_v28  ;;  %v12158_v43 = vpack.c.bf16 %v8887_v32, %v8886_v26  ;;  %v9018_v36 = vld [vmem:[%s16002_s4 + $0x28] sm:$0xff] }
0x3e26   : > { %v8825_v37 = vadd.f32 %v8822_v52, %v15137_v7  ;;  %v9017_v52 = vld [vmem:[%s16002_s4 + $0x20] sm:$0xff] }
0x3e27   : > { %v8817_v39 = vpop.f32.mrb[124].mxu1  ;;  %12159 = vmatpush3.bf16.msra.mxu0 %v12158_v43  ;;  %v12170_v28 = vpack.c.bf16 %v9018_v36, %v9017_v52 }
0x3e28   : > { %v8823_v40 = vadd.f32 %v8817_v39, %v8495_v35  ;;  %v11804_v42 = vpop.f32.mrb[125].mxu1  ;;  %v8830_v44 = vsel %vm2143_vm1, %v8825_v37, 0.0  ;;  %12160 = vmatprep.subr.bf16.mxu0 %v13704_v0  ;;  %v12164_v35 = vpack.c.bf16 %v9014_v41, %v9013_v19  ;;  %v9020_v39 = vld [vmem:[%s16002_s4 + $0x38] sm:$0xff] }
0x3e29   : > { %8831 = vadd.xlane.f32.xlu0 %v8830_v44  ;;  %v9021_v42 = vld [vmem:[%s16002_s4 + $0x40] sm:$0xff]  ;;  %v9022_v44 = vld [vmem:[%s16002_s4 + $0x48] sm:$0xff] }
0x3e2a   : > { %v15425_v45 = vadd.f32 %v8823_v40, %v15142_v38  ;;  %12165 = vmatpush3.bf16.msra.mxu1 %v12164_v35 }
0x3e2b   : > { %12162 = vmatpush3.bf16.msra.mxu0 %v12161_v21  ;;  %12166 = vmatprep.subr.bf16.mxu1 %v13704_v0 }
0x3e2c   : > { %v8833_v2 = vsel %vm5587_vm4, %v15425_v45, 0.0 }
0x3e2d   : > { %8834 = vadd.xlane.f32.xlu1 %v8833_v2  ;;  %v12176_v2 = vpack.c.bf16 %v9022_v44, %v9021_v42 }
0x3eb2   : > { %v8829_v46 = vpop.xlane.xlu1 %8828 }
0x3eb3   : > { %v8836_v47 = vmul.f32 0.03125, %v8829_v46  ;;  %v9023_v46 = vld [vmem:[%s16002_s4 + $0x50] sm:$0xff] }
0x3eb5   : > { %v8839_v13 = vsub.f32 %v8824_v34, %v8836_v47  ;;  %v9016_v34 = vld [vmem:[%s16002_s4 + $0x18] sm:$0xff] }
0x3eb6   : > { %v8832_v51 = vpop.xlane.xlu0 %8831  ;;  %v12167_v15 = vpack.c.bf16 %v9016_v34, %v9015_v33  ;;  %v9024_v47 = vld [vmem:[%s16002_s4 + $0x58] sm:$0xff] }
0x3eb7   : > { %v8837_v7 = vmul.f32 0.03125, %v8832_v51  ;;  %v8842_v9 = vmul.f32 %v8839_v13, %v8839_v13  ;;  %v9025_v51 = vld [vmem:[%s16002_s4 + $0x60] sm:$0xff] }
0x3eb8   : > { %12168 = vmatpush3.bf16.msra.mxu1 %v12167_v15  ;;  %v10583_v15 = vld [vmem:[#allocation14] ss:$0 sm:$0xff] }
0x3eb9   : > { %v8840_v29 = vsub.f32 %v8825_v37, %v8837_v7  ;;  %v8845_v53 = vsel %vm2143_vm1, %v8842_v9, 0.0  ;;  %12169 = vmatprep.subr.bf16.mxu1 %v13704_v0  ;;  %v9019_v37 = vld [vmem:[%s16002_s4 + $0x30] sm:$0xff]  ;;  %v9026_v7 = vld [vmem:[%s16002_s4 + $0x68] sm:$0xff] }
0x3eba   : > { %8846 = vadd.xlane.f32.xlu0 %v8845_v53  ;;  %v8835_v38 = vpop.xlane.xlu1 %8834  ;;  %v12173_v40 = vpack.c.bf16 %v9020_v39, %v9019_v37  ;;  %v12182_v9 = vpack.c.bf16 %v9026_v7, %v9025_v51  ;;  %v9028_v53 = vld [vmem:[%s16002_s4 + $0x78] sm:$0xff]  ;;  %v9132_v51 = vld [vmem:[%s16003_s2] sm:$0xff] }
0x3ebb   : > { %v8838_v55 = vmul.f32 0.03125, %v8835_v38  ;;  %v8843_v56 = vmul.f32 %v8840_v29, %v8840_v29  ;;  %v9140_v7 = vld [vmem:[%s16003_s2 + $0x40] sm:$0xff] }
0x3ebc   : > { %12171 = vmatpush3.bf16.msra.mxu1 %v12170_v28 }
0x3ebd   : > { %v8841_v62 = vsub.f32 %v15425_v45, %v8838_v55  ;;  %v8848_v60 = vsel %vm2143_vm1, %v8843_v56, 0.0  ;;  %12172 = vmatprep.subr.bf16.mxu1 %v13704_v0  ;;  %v10579_v55 = vld [vmem:[#allocation12] ss:$0 sm:$0xff] }
0x3ebe   : > { %8849 = vadd.xlane.f32.xlu1 %v8848_v60 }
0x3ebf   : > { %v8844_v3 = vmul.f32 %v8841_v62, %v8841_v62 }
0x3ec0   : > { %12174 = vmatpush3.bf16.msra.mxu1 %v12173_v40 }
0x3ec1   : > { %v8851_v61 = vsel %vm5587_vm4, %v8844_v3, 0.0  ;;  %12175 = vmatprep.subr.bf16.mxu1 %v13704_v0 }
0x3ec2   : > { %8852 = vadd.xlane.f32.xlu0 %v8851_v61 }
0x3ec4   : > { %12177 = vmatpush3.bf16.msra.mxu1 %v12176_v2 }
0x3ec5   : > { %12178 = vmatprep.subr.bf16.mxu1 %v13704_v0 }
0x3f47   : > { %v8847_v6 = vpop.xlane.xlu0 %8846 }
0x3f48   : > { %v8854_v22 = vmul.f32 0.03125, %v8847_v6 }
0x3f4a   : > { %v8857_v63 = vadd.f32 1e-06, %v8854_v22 }
0x3f4b   : > { %v8850_v59 = vpop.xlane.xlu1 %8849 }
0x3f4c   : > { %13051 = vrsqrt.f32 %v8857_v63  ;;  %v8855_v49 = vmul.f32 0.03125, %v8850_v59 }
0x3f4e   : > { %v8858_v23 = vadd.f32 1e-06, %v8855_v49 }
0x3f4f   : > { %v8853_v16 = vpop.xlane.xlu0 %8852 }
0x3f50   : > { %13053 = vrsqrt.f32 %v8858_v23  ;;  %v8856_v27 = vmul.f32 0.03125, %v8853_v16 }
0x3f52   : > { %v8859_v24 = vadd.f32 1e-06, %v8856_v27 }
0x3f54   : > { %13055 = vrsqrt.f32 %v8859_v24 }
0x3f56   : > { %v13052_v5 = vpop.eup %13051 }
0x3f57   : > { %v8863_v50 = vmul.f32 %v13052_v5, %v8839_v13  ;;  %v12179_v13 = vpack.c.bf16 %v9024_v47, %v9023_v46  ;;  %v9133_v47 = vld [vmem:[%s16003_s2 + $0x8] sm:$0xff] }
0x3f59   : > { %v8873_v30 = vmul.f32 %v10577_v57, %v8863_v50  ;;  %12180 = vmatpush3.bf16.msra.mxu1 %v12179_v13 }
0x3f5a   : > { %v13054_v25 = vpop.eup %13053  ;;  %12181 = vmatprep.subr.bf16.mxu1 %v13704_v0 }
0x3f5b   : > { %v8883_v1 = vadd.f32 %v10578_v12, %v8873_v30  ;;  %v8864_v48 = vmul.f32 %v13054_v25, %v8840_v29  ;;  %v9027_v29 = vld [vmem:[%s16002_s4 + $0x70] sm:$0xff] }
0x3f5c   : > { %v12185_v38 = vpack.c.bf16 %v9028_v53, %v9027_v29  ;;  %v9149_v29 = vld [vmem:[%s16003_s2 + $0x88] sm:$0xff] }
0x3f5d   : > { %11814 = vmatmul.mubr.msk.f32.vlgmr.msra.gmra.mrb[96].mxu0 %vm2143_vm1, %v8883_v1  ;;  %v8874_v54 = vmul.f32 %v10577_v57, %v8864_v48  ;;  %12183 = vmatpush3.bf16.msra.mxu1 %v12182_v9  ;;  %v12189_v9 = vpack.c.bf16 %v9140_v7, %v9132_v51  ;;  %v9157_v53 = vld [vmem:[%s16003_s2 + $0xc8] sm:$0xff]  ;;  %v9150_v7 = vld [vmem:[%s16003_s2 + $0x90] sm:$0xff] }
0x3f5e   : > { %v13056_v4 = vpop.eup %13055  ;;  %11816 = vmatprep.mubr.msk.f32.mxu0 %vm13705_vm5, %v13706_v10  ;;  %12184 = vmatprep.subr.bf16.mxu1 %v13704_v0 }
0x3f5f   : > { %v8884_v18 = vadd.f32 %v10578_v12, %v8874_v54  ;;  %v8865_v31 = vmul.f32 %v13056_v4, %v8841_v62 }
0x3f61   : > { %11817 = vmatmul.mubr.msk.f32.gmra.mrb[98].mxu0 %vm2143_vm1, %v8884_v18  ;;  %v8875_v11 = vmul.f32 %v10577_v57, %v8865_v31  ;;  %12186 = vmatpush3.bf16.msra.mxu1 %v12185_v38  ;;  %v12191_v38 = vpack.c.bf16 %v9157_v53, %v9149_v29  ;;  %v9137_v29 = vld [vmem:[%s16003_s2 + $0x28] sm:$0xff] }
0x3f62   : > { %11819 = vmatprep.mubr.msk.f32.mxu0 %vm13705_vm5, %v13706_v10  ;;  %v9145_v53 = vld [vmem:[%s16003_s2 + $0x68] sm:$0xff] }
0x3f63   : > { %v8885_v58 = vadd.f32 %v10578_v12, %v8875_v11 }
0x3f65   : > { %11820 = vmatmul.mubr.msk.f32.gmra.mrb[100].mxu0 %vm2143_vm1, %v8885_v58 }
0x3f66   : > { %9273 = vmatprep.mubr.f32.mxu0 %v13706_v10 }
0x4030   : > { %v8972_v56 = vpop.f32.mrb[96].mxu0 }
0x4031   : > { %v8973_v62 = vadd.f32 %v10579_v55, %v8972_v56  ;;  %v11815_v60 = vpop.f32.mrb[97].mxu0  ;;  %v9156_v56 = vld [vmem:[%s16003_s2 + $0xc0] sm:$0xff] }
0x4032   : > { %v9135_v60 = vld [vmem:[%s16003_s2 + $0x18] sm:$0xff] }
0x4033   : > { %v8989_v3 = vmul.f32 0.044715, %v8973_v62  ;;  %v8986_v57 = vmul.f32 0.5, %v8973_v62 }
0x4034   : > { %v8977_v61 = vpop.f32.mrb[98].mxu0 }
0x4035   : > { %v8992_v26 = vmul.f32 %v8989_v3, %v8973_v62  ;;  %v8978_v32 = vadd.f32 %v10579_v55, %v8977_v61  ;;  %v11818_v43 = vpop.f32.mrb[99].mxu0  ;;  %v9143_v3 = vld [vmem:[%s16003_s2 + $0x58] sm:$0xff] }
0x4036   : > { %v12195_v61 = vpack.c.bf16 %v9143_v3, %v9135_v60  ;;  %v9644_v43 = vld [vmem:[%s16005_s6 + $0x88] sm:$0xff] }
0x4037   : > { %v8995_v8 = vmul.f32 %v8992_v26, %v8973_v62  ;;  %v8990_v20 = vmul.f32 0.044715, %v8978_v32  ;;  %v8987_v25 = vmul.f32 0.5, %v8978_v32  ;;  %v9501_v26 = vld [vmem:[#allocation2] sm:$0x1]  ;;  %v9161_v60 = vld [vmem:[%s16003_s2 + $0xe8] sm:$0xff] }
0x4038   : > { %v8982_v21 = vpop.f32.mrb[100].mxu0 }
0x4039   : > { %v8998_v19 = vadd.f32 %v8995_v8, %v8973_v62  ;;  %v8993_v41 = vmul.f32 %v8990_v20, %v8978_v32  ;;  %v8983_v35 = vadd.f32 %v10579_v55, %v8982_v21  ;;  %v11821_v6 = vpop.f32.mrb[101].mxu0  ;;  %v9148_v55 = vld [vmem:[%s16003_s2 + $0x80] sm:$0xff]  ;;  %v9628_v21 = vld [vmem:[%s16005_s6 + $0x8] sm:$0xff] }
0x403a   : > { %v12193_v62 = vpack.c.bf16 %v9156_v56, %v9148_v55  ;;  %v9627_v20 = vld [vmem:[%s16005_s6] sm:$0xff]  ;;  %v9629_v6 = vld [vmem:[%s16005_s6 + $0x10] sm:$0xff] }
0x403b   : > { %v9001_v22 = vmul.f32 0.7978846, %v8998_v19  ;;  %v8991_v63 = vmul.f32 0.044715, %v8983_v35  ;;  %v8996_v0 = vmul.f32 %v8993_v41, %v8978_v32  ;;  %v8988_v4 = vmul.f32 0.5, %v8983_v35  ;;  %v9645_v19 = vld [vmem:[%s16005_s6 + $0x90] sm:$0xff] }
0x403c   : > { %v12221_v41 = vpack.c.bf16 %v9628_v21, %v9627_v20  ;;  %v9136_v55 = vld [vmem:[%s16003_s2 + $0x20] sm:$0xff] }
0x403d   : > { %13057 = vtanh.f32 %v9001_v22  ;;  %v8994_v59 = vmul.f32 %v8991_v63, %v8983_v35  ;;  %v8999_v49 = vadd.f32 %v8996_v0, %v8978_v32  ;;  %v9643_v32 = vld [vmem:[%s16004_s26 + $0x80] sm:$0xff]  ;;  %v9630_v22 = vld [vmem:[%s16005_s6 + $0x18] sm:$0xff]  ;;  %s16007_s26 = sld [smem:[#allocation84_spill]] }
0x403e   : > { %v12219_v8 = vpack.c.bf16 %v9644_v43, %v9643_v32  ;;  %v9647_v0 = vld [vmem:[%s16005_s6 + $0xa0] sm:$0xff]  ;;  %v9139_v43 = vld [vmem:[%s16003_s2 + $0x38] sm:$0xff] }
0x403f   : > { %v9002_v23 = vmul.f32 0.7978846, %v8999_v49  ;;  %v8997_v16 = vmul.f32 %v8994_v59, %v8983_v35  ;;  %v12225_v59 = vpack.c.bf16 %v9630_v22, %v9629_v6  ;;  %v9648_v49 = vld [vmem:[%s16005_s6 + $0xa8] sm:$0xff]  ;;  %v9144_v56 = vld [vmem:[%s16003_s2 + $0x60] sm:$0xff]  ;;  %v9163_v6 = vld [vmem:[%s16003_s2 + $0xf8] sm:$0xff] }
0x4040   : > { %12220 = vmatprep.subr.bf16.mxu1 %v12219_v8  ;;  %v12205_v3 = vpack.c.bf16 %v9144_v56, %v9136_v55  ;;  %v9160_v32 = vld [vmem:[%s16003_s2 + $0xe0] sm:$0xff]  ;;  %v9147_v8 = vld [vmem:[%s16003_s2 + $0x78] sm:$0xff]  ;;  %v9657_v56 = vld [vmem:[%s16005_s6 + $0xf0] sm:$0xff] }
0x4041   : > { %13059 = vtanh.f32 %v9002_v23  ;;  %v9000_v27 = vadd.f32 %v8997_v16, %v8983_v35  ;;  %v9646_v35 = vld [vmem:[%s16005_s6 + $0x98] sm:$0xff]  ;;  %v12227_v23 = vpack.c.bf16 %v9648_v49, %v9647_v0  ;;  %v9631_v16 = vld [vmem:[%s16005_s6 + $0x20] sm:$0xff]  ;;  %v12211_v21 = vpack.c.bf16 %v9147_v8, %v9139_v43  ;;  %v9154_v0 = vld [vmem:[%s16003_s2 + $0xb0] sm:$0xff] }
0x4042   : > { %v12223_v63 = vpack.c.bf16 %v9646_v35, %v9645_v19  ;;  %v9138_v19 = vld [vmem:[%s16003_s2 + $0x30] sm:$0xff]  ;;  %v9155_v35 = vld [vmem:[%s16003_s2 + $0xb8] sm:$0xff]  ;;  %v9675_v49 = vld [vmem:[%s16005_s6 + $0x180] sm:$0xff] }
0x4043   : > { %v9003_v24 = vmul.f32 0.7978846, %v9000_v27  ;;  %v9632_v27 = vld [vmem:[%s16005_s6 + $0x28] sm:$0xff] }
0x4045   : > { %13061 = vtanh.f32 %v9003_v24  ;;  %v9649_v24 = vld [vmem:[%s16005_s6 + $0xb0] sm:$0xff] }
0x4047   : > { %v13058_v5 = vpop.eup %13057 }
0x4048   : > { %v9007_v50 = vadd.f32 1.0, %v13058_v5  ;;  %v9650_v5 = vld [vmem:[%s16005_s6 + $0xb8] sm:$0xff] }
0x404a   : > { %v9010_v12 = vmul.f32 %v9007_v50, %v8986_v57  ;;  %v12229_v57 = vpack.c.bf16 %v9632_v27, %v9631_v16  ;;  %v12231_v50 = vpack.c.bf16 %v9650_v5, %v9649_v24  ;;  %v9659_v24 = vld [vmem:[%s16005_s6 + $0x100] sm:$0xff]  ;;  %v9660_v5 = vld [vmem:[%s16005_s6 + $0x108] sm:$0xff] }
0x404b   : > { %v13060_v30 = vpop.eup %13059 }
0x404c   : > { %11855 = vmatmul.mubr.f32.vlgmr.msra.gmra.mrb[126].mxu1 %v9010_v12  ;;  %v9008_v1 = vadd.f32 1.0, %v13060_v30  ;;  %v9633_v12 = vld [vmem:[%s16005_s6 + $0x30] sm:$0xff]  ;;  %v9634_v30 = vld [vmem:[%s16005_s6 + $0x38] sm:$0xff] }
0x404d   : > { %11857 = vmatprep.mubr.msk.f32.mxu1 %vm13705_vm5, %v13706_v10  ;;  %12222 = vmatpush3.bf16.msra.mxu1 %v12221_v41  ;;  %v9146_v41 = vld [vmem:[%s16003_s2 + $0x70] sm:$0xff] }
0x404e   : > { %v9011_v48 = vmul.f32 %v9008_v1, %v8987_v25  ;;  %12224 = vmatprep.subr.bf16.mxu1 %v12223_v63  ;;  %v9651_v25 = vld [vmem:[%s16005_s6 + $0xc0] sm:$0xff]  ;;  %v9652_v1 = vld [vmem:[%s16005_s6 + $0xc8] sm:$0xff]  ;;  %v12213_v22 = vpack.c.bf16 %v9146_v41, %v9138_v19  ;;  %v12215_v63 = vpack.c.bf16 %v9163_v6, %v9155_v35 }
0x404f   : > { %v13062_v54 = vpop.eup %13061  ;;  %v9671_v41 = vld [vmem:[%s16005_s6 + $0x160] sm:$0xff]  ;;  %v9672_v35 = vld [vmem:[%s16005_s6 + $0x168] sm:$0xff] }
0x4050   : > { %11858 = vmatmul.mubr.f32.gmra.mrb[128].mxu1 %v9011_v48  ;;  %v9009_v18 = vadd.f32 1.0, %v13062_v54  ;;  %v12233_v48 = vpack.c.bf16 %v9634_v30, %v9633_v12  ;;  %v12235_v54 = vpack.c.bf16 %v9652_v1, %v9651_v25  ;;  %v12253_v12 = vpack.c.bf16 %v9660_v5, %v9659_v24  ;;  %v9661_v25 = vld [vmem:[%s16005_s6 + $0x110] sm:$0xff]  ;;  %v9662_v1 = vld [vmem:[%s16005_s6 + $0x118] sm:$0xff]  ;;  %v9707_v6 = vld [vmem:[%s16005_s6 + $0x280] sm:$0xff] }
0x4051   : > { %11860 = vmatprep.mubr.msk.f32.mxu1 %vm13705_vm5, %v13706_v10  ;;  %12226 = vmatpush3.bf16.msra.mxu1 %v12225_v59  ;;  %v9162_v59 = vld [vmem:[%s16003_s2 + $0xf0] sm:$0xff]  ;;  %v9739_v5 = vld [vmem:[%s16005_s6 + $0x380] sm:$0xff] }
0x4052   : > { %v9012_v31 = vmul.f32 %v9009_v18, %v8988_v4  ;;  %12228 = vmatprep.subr.bf16.mxu1 %v12227_v23  ;;  %v9635_v4 = vld [vmem:[%s16005_s6 + $0x40] sm:$0xff]  ;;  %v9636_v18 = vld [vmem:[%s16005_s6 + $0x48] sm:$0xff]  ;;  %v12217_v16 = vpack.c.bf16 %v9162_v59, %v9154_v0  ;;  %v9689_v59 = vld [vmem:[%s16005_s6 + $0x1f0] sm:$0xff] }
0x4053   : > { %v9676_v23 = vld [vmem:[%s16005_s6 + $0x188] sm:$0xff] }
0x4054   : > { %11861 = vmatmul.mubr.f32.gmra.mrb[130].mxu1 %v9012_v31  ;;  %v9653_v31 = vld [vmem:[%s16005_s6 + $0xd0] sm:$0xff]  ;;  %v12251_v27 = vpack.c.bf16 %v9676_v23, %v9675_v49  ;;  %v9690_v49 = vld [vmem:[%s16005_s6 + $0x1f8] sm:$0xff] }
0x4055   : > { %12230 = vmatpush3.bf16.msra.mxu1 %v12229_v57  ;;  %v9677_v57 = vld [vmem:[%s16005_s6 + $0x190] sm:$0xff]  ;;  %v12279_v23 = vpack.c.bf16 %v9690_v49, %v9689_v59 }
0x4056   : > { %12232 = vmatprep.subr.bf16.mxu1 %v12231_v50  ;;  %v9678_v50 = vld [vmem:[%s16005_s6 + $0x198] sm:$0xff] }
0x4057   : > { %v12255_v30 = vpack.c.bf16 %v9678_v50, %v9677_v57  ;;  %v9740_v57 = vld [vmem:[%s16005_s6 + $0x388] sm:$0xff] }
0x4058   : > { %v12315_v50 = vpack.c.bf16 %v9740_v57, %v9739_v5  ;;  %v9742_v57 = vld [vmem:[%s16005_s6 + $0x398] sm:$0xff] }
0x4059   : > { %12234 = vmatpush3.bf16.msra.mxu1 %v12233_v48  ;;  %v9679_v48 = vld [vmem:[%s16005_s6 + $0x1a0] sm:$0xff] }
0x405a   : > { %12236 = vmatprep.subr.bf16.mxu1 %v12235_v54  ;;  %v12257_v54 = vpack.c.bf16 %v9662_v1, %v9661_v25 }
0x411f   : > { %v9102_v11 = vpop.f32.mrb[126].mxu1 }
0x4120   : > { %v11856_v58 = vpop.f32.mrb[127].mxu1  ;;  %v9654_v11 = vld [vmem:[%s16005_s6 + $0xd8] sm:$0xff] }
0x4121   : > { %v12237_v58 = vpack.c.bf16 %v9636_v18, %v9635_v4  ;;  %v9663_v18 = vld [vmem:[%s16005_s6 + $0x120] sm:$0xff] }
0x4123   : > { %v9106_v33 = vpop.f32.mrb[128].mxu1  ;;  %12238 = vmatpush3.bf16.msra.mxu1 %v12237_v58  ;;  %v9682_v58 = vld [vmem:[%s16005_s6 + $0x1b8] sm:$0xff] }
0x4124   : > { %v11859_v34 = vpop.f32.mrb[129].mxu1  ;;  %v12239_v33 = vpack.c.bf16 %v9654_v11, %v9653_v31  ;;  %v9664_v31 = vld [vmem:[%s16005_s6 + $0x128] sm:$0xff]  ;;  %v9681_v11 = vld [vmem:[%s16005_s6 + $0x1b0] sm:$0xff] }
0x4126   : > { %12240 = vmatprep.subr.bf16.mxu1 %v12239_v33  ;;  %v12261_v33 = vpack.c.bf16 %v9664_v31, %v9663_v18 }
0x4127   : > { %v9110_v52 = vpop.f32.mrb[130].mxu1 }
0x4128   : > { %v9111_v36 = vadd.f32 %v10583_v15, %v9110_v52  ;;  %v11862_v28 = vpop.f32.mrb[131].mxu1 }
0x4129   : > { %v9128_v28 = vld [vmem:[#allocation27] sm:$0x1] }
0x412a   : > { %v9114_v37 = vadd.f32 %v9111_v36, %v15425_v45  ;;  %v9141_v45 = vld [vmem:[%s16003_s2 + $0x48] sm:$0xff] }
0x412b   : > { %v12187_v13 = vpack.c.bf16 %v9141_v45, %v9133_v47 }
0x412c   : > { %v9115_v39 = vsel %vm5587_vm4, %v9114_v37, 0.0 }
0x412d   : > { %9116 = vadd.xlane.f32.xlu1 %v9115_v39  ;;  %12188 = vmatprep.subr.bf16.mxu0 %v12187_v13  ;;  %v9134_v39 = vld [vmem:[%s16003_s2 + $0x10] sm:$0xff] }
0x412e   : > { %12190 = vmatpush1.bf16.msra.mxu0 %v12189_v9  ;;  %v9158_v9 = vld [vmem:[%s16003_s2 + $0xd0] sm:$0xff] }
0x412f   : > { %12192 = vmatprep.subr.bf16.mxu0 %v12191_v38  ;;  %v12203_v38 = vpack.c.bf16 %v9145_v53, %v9137_v29 }
0x4132   : > { %12194 = vmatpush1.bf16.msra.mxu0 %v12193_v62  ;;  %v9153_v62 = vld [vmem:[%s16003_s2 + $0xa8] sm:$0xff] }
0x4133   : > { %12196 = vmatprep.subr.bf16.mxu0 %v12195_v61  ;;  %v12207_v61 = vpack.c.bf16 %v9161_v60, %v9153_v62  ;;  %v9658_v62 = vld [vmem:[%s16005_s6 + $0xf8] sm:$0xff]  ;;  %v9669_v60 = vld [vmem:[%s16005_s6 + $0x150] sm:$0xff] }
0x413e   : > { %9504 = vperm.xlu1 %12809, %v9501_v26   ;;  %v9152_v26 = vld [vmem:[%s16003_s2 + $0xa0] sm:$0xff] }
0x413f   : > { %v12209_v20 = vpack.c.bf16 %v9160_v32, %v9152_v26  ;;  %v9641_v26 = vld [vmem:[%s16005_s6 + $0x70] sm:$0xff]  ;;  %v9642_v32 = vld [vmem:[%s16005_s6 + $0x78] sm:$0xff] }
0x4140   : > { %v12249_v8 = vpack.c.bf16 %v9642_v32, %v9641_v26  ;;  %v9694_v26 = vld [vmem:[%s16005_s6 + $0x218] sm:$0xff] }
0x41ba   : > { %v9117_v40 = vpop.xlane.xlu1 %9116 }
0x41bb   : > { %v9118_v42 = vmul.f32 0.03125, %v9117_v40  ;;  %v9142_v40 = vld [vmem:[%s16003_s2 + $0x50] sm:$0xff] }
0x41bc   : > { %v12197_v45 = vpack.c.bf16 %v9142_v40, %v9134_v39  ;;  %v9683_v40 = vld [vmem:[%s16005_s6 + $0x1c0] sm:$0xff] }
0x41bd   : > { %v15475_v44 = vsub.f32 %v9114_v37, %v9118_v42  ;;  %v9130_v42 = vld [vmem:[#allocation26] sm:$0x1] }
0x41be   : > { %v9505_v25 = vpop.permute.xlu1 %9504 }
0x41bf   : > { %v9120_v2 = vmul.f32 %v15475_v44, %v15475_v44 }
0x41c1   : > { %v9121_v46 = vsel %vm5587_vm4, %v9120_v2, 0.0  ;;  %v9151_v2 = vld [vmem:[%s16003_s2 + $0x98] sm:$0xff] }
0x41c2   : > { %9122 = vadd.xlane.f32.xlu0 %v9121_v46  ;;  %v9159_v46 = vld [vmem:[%s16003_s2 + $0xd8] sm:$0xff] }
0x41c3   : > { %v12199_v51 = vpack.c.bf16 %v9159_v46, %v9151_v2  ;;  %v9655_v46 = vld [vmem:[%s16005_s6 + $0xe0] sm:$0xff] }
0x424f   : > { %v9123_v34 = vpop.xlane.xlu0 %9122 }
0x4250   : > { %v9124_v15 = vmul.f32 0.03125, %v9123_v34  ;;  %v12263_v34 = vpack.c.bf16 %v9682_v58, %v9681_v11  ;;  %v15602_v11 = vsub.s32 2, %v14393_v14 }
0x4252   : > { %v9125_v52 = vadd.f32 1e-06, %v9124_v15  ;;  %v9665_v15 = vld [vmem:[%s16005_s6 + $0x130] sm:$0xff] }
0x4254   : > { %13063 = vrsqrt.f32 %v9125_v52  ;;  %v9666_v52 = vld [vmem:[%s16005_s6 + $0x138] sm:$0xff] }
0x425e   : > { %v13064_v36 = vpop.eup %13063 }
0x425f   : > { %v9127_v37 = vmul.f32 %v13064_v36, %v15475_v44  ;;  %v12201_v44 = vpack.c.bf16 %v9158_v9, %v9150_v7  ;;  %v12265_v36 = vpack.c.bf16 %v9666_v52, %v9665_v15  ;;  %v9639_v7 = vld [vmem:[%s16005_s6 + $0x60] sm:$0xff]  ;;  %v9640_v9 = vld [vmem:[%s16005_s6 + $0x68] sm:$0xff] }
0x4260   : > { %v12245_v53 = vpack.c.bf16 %v9640_v9, %v9639_v7  ;;  %v9709_v7 = vld [vmem:[%s16005_s6 + $0x290] sm:$0xff]  ;;  %v9710_v9 = vld [vmem:[%s16005_s6 + $0x298] sm:$0xff] }
0x4261   : > { %v9129_v47 = vmul.f32 %v9128_v28, %v9127_v37  ;;  %v9637_v28 = vld [vmem:[%s16005_s6 + $0x50] sm:$0xff]  ;;  %v9638_v37 = vld [vmem:[%s16005_s6 + $0x58] sm:$0xff] }
0x4262   : > { %v12241_v39 = vpack.c.bf16 %v9638_v37, %v9637_v28 }
0x4263   : > { %v9131_v13 = vadd.f32 %v9130_v42, %v9129_v47  ;;  %v9684_v42 = vld [vmem:[%s16005_s6 + $0x1c8] sm:$0xff] }
0x4264   : > { %12242 = vmatpush3.bf16.msra.mxu1 %v12241_v39  ;;  %v12267_v2 = vpack.c.bf16 %v9684_v42, %v9683_v40  ;;  %v9656_v47 = vld [vmem:[%s16005_s6 + $0xe8] sm:$0xff] }
0x4265   : > { %10584 = vmatmul.mubr.msk.f32.vlgmr.msra.gmra.mrb[102].mxu0 %vm2143_vm1, %v9131_v13 }
0x4266   : > { %12198 = vmatpush1.bf16.msra.mxu0 %v12197_v45  ;;  %9344 = vmatprep.mubr.f32.mxu0 %v13706_v10  ;;  %v9667_v45 = vld [vmem:[%s16005_s6 + $0x140] sm:$0xff] }
0x4267   : > { %12200 = vmatprep.subr.bf16.mxu0 %v12199_v51  ;;  %v9668_v51 = vld [vmem:[%s16005_s6 + $0x148] sm:$0xff] }
0x4268   : > { %v12269_v29 = vpack.c.bf16 %v9668_v51, %v9667_v45  ;;  %v9691_v45 = vld [vmem:[%s16005_s6 + $0x200] sm:$0xff] }
0x426a   : > { %12202 = vmatpush1.bf16.msra.mxu0 %v12201_v44  ;;  %v9685_v44 = vld [vmem:[%s16005_s6 + $0x1d0] sm:$0xff] }
0x426b   : > { %12204 = vmatprep.subr.bf16.mxu0 %v12203_v38  ;;  %v9686_v38 = vld [vmem:[%s16005_s6 + $0x1d8] sm:$0xff] }
0x426c   : > { %v12271_v55 = vpack.c.bf16 %v9686_v38, %v9685_v44 }
0x426d   : > { %10585 = vmatmul.mubr.msk.f32.vlgmr.msra.gmra.mrb[104].mxu0 %vm2143_vm1, %v9131_v13 }
0x426e   : > { %12206 = vmatpush1.bf16.msra.mxu0 %v12205_v3  ;;  %9415 = vmatprep.mubr.f32.mxu0 %v13706_v10  ;;  %v12247_v3 = vpack.c.bf16 %v9658_v62, %v9657_v56 }
0x426f   : > { %12208 = vmatprep.subr.bf16.mxu0 %v12207_v61  ;;  %v9670_v61 = vld [vmem:[%s16005_s6 + $0x158] sm:$0xff] }
0x4270   : > { %v12273_v43 = vpack.c.bf16 %v9670_v61, %v9669_v60  ;;  %v9693_v61 = vld [vmem:[%s16005_s6 + $0x210] sm:$0xff] }
0x4272   : > { %12210 = vmatpush1.bf16.msra.mxu0 %v12209_v20  ;;  %v9687_v20 = vld [vmem:[%s16005_s6 + $0x1e0] sm:$0xff] }
0x4273   : > { %12212 = vmatprep.subr.bf16.mxu0 %v12211_v21  ;;  %v9688_v21 = vld [vmem:[%s16005_s6 + $0x1e8] sm:$0xff] }
0x4274   : > { %v12275_v19 = vpack.c.bf16 %v9688_v21, %v9687_v20  ;;  %v9712_v20 = vld [vmem:[%s16005_s6 + $0x2a8] sm:$0xff] }
0x4275   : > { %10586 = vmatmul.mubr.msk.f32.vlgmr.msra.gmra.mrb[106].mxu0 %vm2143_vm1, %v9131_v13 }
0x4276   : > { %12214 = vmatpush1.bf16.msra.mxu0 %v12213_v22  ;;  %9486 = vmatprep.mubr.f32.mxu0 %v13706_v10  ;;  %v9680_v10 = vld [vmem:[%s16005_s6 + $0x1a8] sm:$0xff]  ;;  %v12277_v22 = vpack.c.bf16 %v9672_v35, %v9671_v41  ;;  %v12289_v41 = vpack.c.bf16 %v9694_v26, %v9693_v61  ;;  %v9746_v26 = vld [vmem:[%s16005_s6 + $0x3b8] sm:$0xff] }
0x4277   : > { %12216 = vmatprep.subr.bf16.mxu0 %v12215_v63  ;;  %v12259_v4 = vpack.c.bf16 %v9680_v10, %v9679_v48  ;;  %v9708_v63 = vld [vmem:[%s16005_s6 + $0x288] sm:$0xff]  ;;  %v15596_v10 = vrot.slane %v9505_v25, %v14400_v17 }
0x4278   : > { %v12283_v0 = vpack.c.bf16 %v9708_v63, %v9707_v6  ;;  %v9724_v63 = vld [vmem:[%s16005_s6 + $0x308] sm:$0xff] }
0x427a   : > { %12218 = vmatpush1.bf16.msra.mxu0 %v12217_v16  ;;  %v9673_v16 = vld [vmem:[%s16005_s6 + $0x170] sm:$0xff] }
0x427b   : > { %12252 = vmatprep.subr.bf16.mxu0 %v12251_v27  ;;  %v9674_v27 = vld [vmem:[%s16005_s6 + $0x178] sm:$0xff] }
0x427c   : > { %v12281_v24 = vpack.c.bf16 %v9674_v27, %v9673_v16  ;;  %v9695_v16 = vld [vmem:[%s16005_s6 + $0x220] sm:$0xff]  ;;  %v9696_v27 = vld [vmem:[%s16005_s6 + $0x228] sm:$0xff] }
0x427d   : > { %10587 = vmatmul.mubr.msk.f32.vlgmr.msra.gmra.mrb[108].mxu0 %vm2143_vm1, %v9131_v13  ;;  %v12243_v13 = vpack.c.bf16 %v9656_v47, %v9655_v46  ;;  %vm10036_vm1 = vcmask 16384  }
0x427e   : > { %12254 = vmatpush3.bf16.msra.mxu0 %v12253_v12  ;;  %v15589_v12 = vld [vmem:[%s16006_s9] sm:$0xff]  ;;  %s10588_s9 = sshll.u32 %s14056_s29, 4  ;;  %s13711_s29 = smov [#allocation29]  }
0x427f   : > { %12256 = vmatprep.subr.bf16.mxu0 %v12255_v30  ;;  %12244 = vmatprep.subr.bf16.mxu1 %v12243_v13  ;;  %v9172_v30 = vsub.s32 1, %v14393_v14  ;;  %v9169_v1 = vrot.slane %v15589_v12, %v14400_v17  ;;  %v9177_v37 = vrot.slane %v15589_v12, %v15602_v11  ;;  %v9692_v13 = vld [vmem:[%s16005_s6 + $0x208] sm:$0xff]  ;;  %s15741_s3 = scalar_lea.hbm %s14033_s5, %s10588_s9  ;;  %s13518_s7 = sshll.u32 %s13711_s29, 4  ;;  %s13519_s7 = int_to_ptr.vmem [resolvable:$false] %s13518_s7 }
0x4280   : > { %12246 = vmatpush3.bf16.msra.mxu1 %v12245_v53  ;;  %v12285_v56 = vpack.c.bf16 %v9692_v13, %v9691_v45  ;;  %s13520_s8 = scalar_lea.vmem %s13519_s7, 32 }
0x4281   : > { %12248 = vmatprep.subr.bf16.mxu1 %v12247_v3  ;;  %v9173_v48 = vrot.slane %v15589_v12, %v9172_v30  ;;  %v15629_v3 = vsub.s32 5, %v14393_v14 }
0x4282   : > { %12258 = vmatpush3.bf16.msra.mxu0 %v12257_v54  ;;  %v15599_v54 = vld [vmem:[%s16007_s26] sm:$0xff] }
0x4283   : > { %12260 = vmatprep.subr.bf16.mxu0 %v12259_v4  ;;  %v9532_v15 = vrot.slane %v15599_v54, %v14400_v17  ;;  %v9536_v52 = vrot.slane %v15599_v54, %v9172_v30  ;;  %v9540_v44 = vrot.slane %v15599_v54, %v15602_v11  ;;  %v9189_v49 = vrot.slane %v15589_v12, %v15629_v3 }
0x4284   : > { %12250 = vmatpush3.bf16.msra.mxu1 %v12249_v8  ;;  %v9711_v8 = vld [vmem:[%s16005_s6 + $0x2a0] sm:$0xff] }
0x4285   : > { %12284 = vmatprep.subr.bf16.mxu1 %v12283_v0 }
0x4286   : > { %12262 = vmatpush3.bf16.msra.mxu0 %v12261_v33  ;;  %v15605_v33 = vsub.s32 3, %v14393_v14 }
0x4287   : > { %12264 = vmatprep.subr.bf16.mxu0 %v12263_v34  ;;  %v15608_v34 = vld [vmem:[%s16008_s1] sm:$0xff]  ;;  %s2048_s1 = sand.u32 1, %s13604_s23  }
0x4288   : > { %v9586_v39 = vrot.slane %v15608_v34, %v9172_v30  ;;  %v9582_v47 = vrot.slane %v15608_v34, %v14400_v17  ;;  %v12287_v17 = vpack.c.bf16 %v9710_v9, %v9709_v7  ;;  %v9594_v35 = vrot.slane %v15608_v34, %v15605_v33  ;;  %v9714_v30 = vld [vmem:[%s16005_s6 + $0x2b8] sm:$0xff]  ;;  %s2049_s26 = scalar_lea.vmem [#allocation29], %s2048_s1  ;;  %s10039_s4 = scalar_lea.sflag [#allocation5], %s2048_s1 }
0x4289   : > { %v9590_v6 = vrot.slane %v15608_v34, %v15602_v11  ;;  %v9726_v11 = vld [vmem:[%s16005_s6 + $0x318] sm:$0xff]  ;;  %v9602_v9 = vrot.slane %v15608_v34, %v15629_v3  ;;  %s10051_s2 = sshll.u32 %s2049_s26, 4  ;;  %s15743_s2 = int_to_ptr.vmem [resolvable:$true] %s10051_s2 }
0x428a   : > { %12266 = vmatpush3.bf16.msra.mxu0 %v12265_v36  ;;  %p13521_p10 = scmp.lt.s32.totalorder %s15743_s2, %s13519_s7 }
0x428b   : > { %12268 = vmatprep.subr.bf16.mxu0 %v12267_v2  ;;  %v9181_v2 = vrot.slane %v15589_v12, %v15605_v33 }
0x428e   : > { %12270 = vmatpush3.bf16.msra.mxu0 %v12269_v29 }
0x428f   : > { %12272 = vmatprep.subr.bf16.mxu0 %v12271_v55 }
0x4292   : > { %12274 = vmatpush3.bf16.msra.mxu0 %v12273_v43  ;;  %v9544_v43 = vrot.slane %v15599_v54, %v15605_v33 }
0x4293   : > { %12276 = vmatprep.subr.bf16.mxu0 %v12275_v19 }
0x4296   : > { %12278 = vmatpush3.bf16.msra.mxu0 %v12277_v22  ;;  %v9723_v22 = vld [vmem:[%s16005_s6 + $0x300] sm:$0xff] }
0x4297   : > { %12280 = vmatprep.subr.bf16.mxu0 %v12279_v23  ;;  %v12291_v23 = vpack.c.bf16 %v9712_v20, %v9711_v8 }
0x429a   : > { %12282 = vmatpush3.bf16.msra.mxu0 %v12281_v24  ;;  %v9741_v24 = vld [vmem:[%s16005_s6 + $0x390] sm:$0xff] }
0x429b   : > { %12316 = vmatprep.subr.bf16.mxu0 %v12315_v50  ;;  %v9713_v50 = vld [vmem:[%s16005_s6 + $0x2b0] sm:$0xff] }
0x4338   : > { %v9275_v4 = vpop.f32.mrb[102].mxu0 }
0x4339   : > { %v9276_v18 = vadd.f32 %v9275_v4, %v9169_v1  ;;  %v9277_v31 = vpop.f32.mrb[103].mxu0  ;;  %v12317_v4 = vpack.c.bf16 %v9724_v63, %v9723_v22 }
0x433a   : > { %v9278_v58 = vadd.f32 %v9277_v31, %v9173_v48  ;;  %v9725_v31 = vld [vmem:[%s16005_s6 + $0x310] sm:$0xff] }
0x433b   : > { %vm9493_vm9 = vcmp.ge.f32.partialorder %v9276_v18, 0.0  ;;  %v9511_v36 = vmul.f32 %v15596_v10, %v9276_v18  ;;  %v12321_v13 = vpack.c.bf16 %v9726_v11, %v9725_v31  ;;  %v9703_v11 = vld [vmem:[%s16005_s6 + $0x260] sm:$0xff] }
0x433c   : > { %vm9494_vm10 = vcmp.ge.f32.partialorder %v9278_v58, 0.0  ;;  %v9512_v28 = vmul.f32 %v15596_v10, %v9278_v58 }
0x433d   : > { %v9519_v40 = vsel %vm9493_vm9, %v9276_v18, %v9511_v36  ;;  %v12293_v18 = vpack.c.bf16 %v9696_v27, %v9695_v16  ;;  %v12295_v36 = vpack.c.bf16 %v9714_v30, %v9713_v50  ;;  %v15695_v16 = vsub.s32 6, %v14393_v14  ;;  %v9748_v27 = vld [vmem:[%s16005_s6 + $0x3c8] sm:$0xff] }
0x433e   : > { %v9520_v42 = vsel %vm9494_vm10, %v9278_v58, %v9512_v28  ;;  %v9569_v46 = vmul.f32 %v9532_v15, %v9519_v40  ;;  %v15658_v58 = vsub.s32 7, %v14393_v14  ;;  %v9697_v28 = vld [vmem:[%s16005_s6 + $0x230] sm:$0xff]  ;;  %v15664_v40 = vsub.s32 4, %v14393_v14 }
0x433f   : > { %v9570_v51 = vmul.f32 %v9536_v52, %v9520_v42  ;;  %v12319_v52 = vpack.c.bf16 %v9742_v57, %v9741_v24  ;;  %v9552_v42 = vrot.slane %v15599_v54, %v15629_v3  ;;  %v9718_v3 = vld [vmem:[%s16005_s6 + $0x2d8] sm:$0xff]  ;;  %v9720_v57 = vld [vmem:[%s16005_s6 + $0x2e8] sm:$0xff] }
0x4340   : > { %v9346_v29 = vpop.f32.mrb[104].mxu0  ;;  %v9619_v60 = vadd.f32 %v9582_v47, %v9569_v46  ;;  %v9715_v46 = vld [vmem:[%s16005_s6 + $0x2c0] sm:$0xff]  ;;  %v9716_v47 = vld [vmem:[%s16005_s6 + $0x2c8] sm:$0xff]  ;;  %v9560_v24 = vrot.slane %v15599_v54, %v15658_v58  ;;  %v9610_v14 = vrot.slane %v15608_v34, %v15658_v58 }
0x4341   : > { %v9347_v53 = vadd.f32 %v9346_v29, %v9177_v37  ;;  %v9348_v38 = vpop.f32.mrb[105].mxu0  ;;  %v9620_v55 = vadd.f32 %v9586_v39, %v9570_v51  ;;  %v9698_v37 = vld [vmem:[%s16005_s6 + $0x238] sm:$0xff]  ;;  %v9743_v39 = vld [vmem:[%s16005_s6 + $0x3a0] sm:$0xff]  ;;  %v9197_v51 = vrot.slane %v15589_v12, %v15658_v58 }
0x4342   : > { %v9349_v62 = vadd.f32 %v9348_v38, %v9181_v2  ;;  %v9744_v2 = vld [vmem:[%s16005_s6 + $0x3a8] sm:$0xff]  ;;  %v12297_v7 = vpack.c.bf16 %v9698_v37, %v9697_v28  ;;  %v9727_v29 = vld [vmem:[%s16005_s6 + $0x320] sm:$0xff]  ;;  %v9750_v58 = vld [vmem:[%s16005_s6 + $0x3d8] sm:$0xff] }
0x4343   : > { %vm9495_vm11 = vcmp.ge.f32.partialorder %v9347_v53, 0.0  ;;  %v9513_v32 = vmul.f32 %v15596_v10, %v9347_v53  ;;  %9820 = vmatprep.mubr.f32.mxu1 %v9620_v55  ;;  %v12323_v38 = vpack.c.bf16 %v9744_v2, %v9743_v39  ;;  %v12299_v55 = vpack.c.bf16 %v9716_v47, %v9715_v46  ;;  %v9721_v37 = vld [vmem:[%s16005_s6 + $0x2f0] sm:$0xff]  ;;  %v9722_v39 = vld [vmem:[%s16005_s6 + $0x2f8] sm:$0xff] }
0x4344   : > { %vm9496_vm12 = vcmp.ge.f32.partialorder %v9349_v62, 0.0  ;;  %v9514_v21 = vmul.f32 %v15596_v10, %v9349_v62  ;;  %9821 = vmatmul.mubr.f32.vlgmr.msra.gmra.mrb[132].mxu1 %v9619_v60  ;;  %v9745_v60 = vld [vmem:[%s16005_s6 + $0x3b0] sm:$0xff] }
0x4345   : > { %v9521_v19 = vsel %vm9495_vm11, %v9347_v53, %v9513_v32  ;;  %12286 = vmatpush3.bf16.msra.mxu1 %v12285_v56  ;;  %v9728_v53 = vld [vmem:[%s16005_s6 + $0x328] sm:$0xff]  ;;  %v9699_v56 = vld [vmem:[%s16005_s6 + $0x240] sm:$0xff]  ;;  %v9717_v32 = vld [vmem:[%s16005_s6 + $0x2d0] sm:$0xff]  ;;  %v12327_v22 = vpack.c.bf16 %v9746_v26, %v9745_v60 }
0x4346   : > { %v9571_v0 = vmul.f32 %v9540_v44, %v9521_v19  ;;  %v9522_v59 = vsel %vm9496_vm12, %v9349_v62, %v9514_v21  ;;  %12288 = vmatprep.subr.bf16.mxu1 %v12287_v17  ;;  %v9700_v62 = vld [vmem:[%s16005_s6 + $0x248] sm:$0xff]  ;;  %v9185_v17 = vrot.slane %v15589_v12, %v15664_v40  ;;  %v12325_v21 = vpack.c.bf16 %v9728_v53, %v9727_v29  ;;  %v9733_v47 = vld [vmem:[%s16005_s6 + $0x350] sm:$0xff] }
0x4347   : > { %v9572_v5 = vmul.f32 %v9544_v43, %v9522_v59  ;;  %v12301_v19 = vpack.c.bf16 %v9700_v62, %v9699_v56  ;;  %v12303_v63 = vpack.c.bf16 %v9718_v3, %v9717_v32  ;;  %v9702_v59 = vld [vmem:[%s16005_s6 + $0x258] sm:$0xff]  ;;  %v9736_v26 = vld [vmem:[%s16005_s6 + $0x368] sm:$0xff]  ;;  %v9753_v3 = vld [vmem:[%s16005_s6 + $0x3f0] sm:$0xff] }
0x4348   : > { %v15653_v25 = vpop.f32.mrb[106].mxu0  ;;  %v9621_v15 = vadd.f32 %v9590_v6, %v9571_v0  ;;  %v9701_v0 = vld [vmem:[%s16005_s6 + $0x250] sm:$0xff] }
0x4349   : > { %v9419_v1 = vpop.f32.mrb[107].mxu0  ;;  %12290 = vmatpush3.bf16.msra.mxu1 %v12289_v41  ;;  %v9622_v48 = vadd.f32 %v9594_v35, %v9572_v5  ;;  %v9729_v41 = vld [vmem:[%s16005_s6 + $0x330] sm:$0xff]  ;;  %v9730_v35 = vld [vmem:[%s16005_s6 + $0x338] sm:$0xff]  ;;  %v9719_v5 = vld [vmem:[%s16005_s6 + $0x2e0] sm:$0xff] }
0x434a   : > { %v9420_v33 = vadd.f32 %v9419_v1, %v9189_v49  ;;  %12292 = vmatprep.subr.bf16.mxu1 %v12291_v23  ;;  %v9747_v49 = vld [vmem:[%s16005_s6 + $0x3c0] sm:$0xff]  ;;  %v9418_v23 = vadd.f32 %v15653_v25, %v9185_v17  ;;  %v12329_v30 = vpack.c.bf16 %v9730_v35, %v9729_v41  ;;  %v12305_v25 = vpack.c.bf16 %v9702_v59, %v9701_v0  ;;  %v9737_v41 = vld [vmem:[%s16005_s6 + $0x370] sm:$0xff]  ;;  %v9738_v35 = vld [vmem:[%s16005_s6 + $0x378] sm:$0xff] }
0x434b   : > { %9890 = vmatprep.mubr.f32.mxu0 %v9622_v48  ;;  %v9731_v1 = vld [vmem:[%s16005_s6 + $0x340] sm:$0xff]  ;;  %v9732_v48 = vld [vmem:[%s16005_s6 + $0x348] sm:$0xff]  ;;  %v12307_v31 = vpack.c.bf16 %v9720_v57, %v9719_v5  ;;  %v9598_v17 = vrot.slane %v15608_v34, %v15664_v40 }
0x434c   : > { %vm9498_vm13 = vcmp.ge.f32.partialorder %v9420_v33, 0.0  ;;  %v9516_v45 = vmul.f32 %v15596_v10, %v9420_v33  ;;  %9891 = vmatmul.mubr.f32.vlgmr.msra.gmra.mrb[110].mxu0 %v9621_v15  ;;  %v9749_v15 = vld [vmem:[%s16005_s6 + $0x3d0] sm:$0xff]  ;;  %vm9497_vm15 = vcmp.ge.f32.partialorder %v9418_v23, 0.0  ;;  %v12333_v2 = vpack.c.bf16 %v9732_v48, %v9731_v1 }
0x434d   : > { %12318 = vmatpush3.bf16.msra.mxu0 %v12317_v4  ;;  %12294 = vmatpush3.bf16.msra.mxu1 %v12293_v18  ;;  %v12331_v18 = vpack.c.bf16 %v9748_v27, %v9747_v49  ;;  %v9755_v49 = vld [vmem:[#allocation24] sm:$0x1] }
0x434e   : > { %v9524_v44 = vsel %vm9498_vm13, %v9420_v33, %v9516_v45  ;;  %12320 = vmatprep.subr.bf16.mxu0 %v12319_v52  ;;  %12296 = vmatprep.subr.bf16.mxu1 %v12295_v36  ;;  %v9704_v33 = vld [vmem:[%s16005_s6 + $0x268] sm:$0xff]  ;;  %v9515_v52 = vmul.f32 %v15596_v10, %v9418_v23  ;;  %v9193_v36 = vrot.slane %v15589_v12, %v15695_v16 }
0x434f   : > { %v9574_v61 = vmul.f32 %v9552_v42, %v9524_v44  ;;  %v12309_v46 = vpack.c.bf16 %v9704_v33, %v9703_v11  ;;  %v9548_v45 = vrot.slane %v15599_v54, %v15664_v40  ;;  %v12335_v12 = vpack.c.bf16 %v9750_v58, %v9749_v15  ;;  %v9751_v44 = vld [vmem:[%s16005_s6 + $0x3e0] sm:$0xff] }
0x4350   : > { %v15686_v43 = vpop.f32.mrb[108].mxu0  ;;  %v9523_v29 = vsel %vm9497_vm15, %v9418_v23, %v9515_v52  ;;  %v12345_v40 = vpack.c.bf16 %v9738_v35, %v9737_v41 }
0x4351   : > { %12322 = vmatpush3.bf16.msra.mxu0 %v12321_v13  ;;  %v9490_v8 = vpop.f32.mrb[109].mxu0  ;;  %12298 = vmatpush3.bf16.msra.mxu1 %v12297_v7  ;;  %v9624_v20 = vadd.f32 %v9602_v9, %v9574_v61  ;;  %v12311_v13 = vpack.c.bf16 %v9722_v39, %v9721_v37  ;;  %v9705_v7 = vld [vmem:[%s16005_s6 + $0x270] sm:$0xff]  ;;  %v9706_v9 = vld [vmem:[%s16005_s6 + $0x278] sm:$0xff]  ;;  %v9489_v53 = vadd.f32 %v15686_v43, %v9193_v36  ;;  %v9735_v61 = vld [vmem:[%s16005_s6 + $0x360] sm:$0xff] }
0x4352   : > { %v9491_v6 = vadd.f32 %v9490_v8, %v9197_v51  ;;  %12324 = vmatprep.subr.bf16.mxu0 %v12323_v38  ;;  %12300 = vmatprep.subr.bf16.mxu1 %v12299_v55  ;;  %v9734_v51 = vld [vmem:[%s16005_s6 + $0x358] sm:$0xff]  ;;  %v9752_v38 = vld [vmem:[%s16005_s6 + $0x3e8] sm:$0xff]  ;;  %v12313_v56 = vpack.c.bf16 %v9706_v9, %v9705_v7  ;;  %v9573_v62 = vmul.f32 %v9548_v45, %v9523_v29 }
0x4353   : > { %9960 = vmatprep.mubr.f32.mxu1 %v9624_v20  ;;  %v12337_v55 = vpack.c.bf16 %v9734_v51, %v9733_v47  ;;  %v12339_v60 = vpack.c.bf16 %v9752_v38, %v9751_v44  ;;  %v9517_v32 = vmul.f32 %v15596_v10, %v9489_v53  ;;  %v9754_v43 = vld [vmem:[%s16005_s6 + $0x3f8] sm:$0xff]  ;;  %vm9499_vm0 = vcmp.ge.f32.partialorder %v9489_v53, 0.0  ;;  %s13514_s6 = scalar_lea.vmem %s15743_s2, 16 }
0x4354   : > { %vm9500_vm14 = vcmp.ge.f32.partialorder %v9491_v6, 0.0  ;;  %v9518_v50 = vmul.f32 %v15596_v10, %v9491_v6  ;;  %v12341_v8 = vpack.c.bf16 %v9736_v26, %v9735_v61  ;;  %v9556_v20 = vrot.slane %v15599_v54, %v15695_v16  ;;  %p13515_p12 = scmp.ne.s32.totalorder %s15743_s2, %s13514_s6  ;;  %p13522_p7 = scmp.lt.s32.totalorder %s13520_s8, %s13514_s6 }
0x4355   : > { %12326 = vmatpush3.bf16.msra.mxu0 %v12325_v21  ;;  %12302 = vmatpush3.bf16.msra.mxu1 %v12301_v19  ;;  %v9623_v21 = vadd.f32 %v9598_v17, %v9573_v62  ;;  %v12343_v19 = vpack.c.bf16 %v9754_v43, %v9753_v3  ;;  %v9606_v10 = vrot.slane %v15608_v34, %v15695_v16 }
0x4356   : > { %v9526_v4 = vsel %vm9500_vm14, %v9491_v6, %v9518_v50  ;;  %12328 = vmatprep.subr.bf16.mxu0 %v12327_v22  ;;  %12304 = vmatprep.subr.bf16.mxu1 %v12303_v63  ;;  %v9525_v6 = vsel %vm9499_vm0, %v9489_v53, %v9517_v32  ;;  %p13516_p6 = pnand %p13515_p12, %p16009_p5  ;;  %p13523_p8 = por %p13522_p7, %p13521_p10 }
0x4357   : > { %v9576_v28 = vmul.f32 %v9560_v24, %v9526_v4  ;;  %v9575_v22 = vmul.f32 %v9556_v20, %v9525_v6 }
0x4358   : > { %p13517_p9 = pneg %p13516_p6 }
0x4359   : > { %12330 = vmatpush3.bf16.msra.mxu0 %v12329_v30  ;;  %12306 = vmatpush3.bf16.msra.mxu1 %v12305_v25  ;;  %v9626_v42 = vadd.f32 %v9610_v14, %v9576_v28  ;;  %v9625_v63 = vadd.f32 %v9606_v10, %v9575_v22 }
0x435a   : > { %12332 = vmatprep.subr.bf16.mxu0 %v12331_v18  ;;  %12308 = vmatprep.subr.bf16.mxu1 %v12307_v31  ;;  %p13524_p11 = pnand %p13523_p8, %p13517_p9 }
0x435b   : > { %10030 = vmatprep.mubr.f32.mxu0 %v9626_v42 }
0x435d   : > { %12334 = vmatpush3.bf16.msra.mxu0 %v12333_v2  ;;  %12310 = vmatpush3.bf16.msra.mxu1 %v12309_v46 }
0x435e   : > { %12336 = vmatprep.subr.bf16.mxu0 %v12335_v12  ;;  %12312 = vmatprep.subr.bf16.mxu1 %v12311_v13 }
0x4361   : > { %12338 = vmatpush3.bf16.msra.mxu0 %v12337_v55  ;;  %12314 = vmatpush3.bf16.msra.mxu1 %v12313_v56 }
0x4362   : > { %12340 = vmatprep.subr.bf16.mxu0 %v12339_v60 }
0x4364   : > { %9961 = vmatmul.mubr.f32.vlgmr.msra.gmra.mrb[134].mxu1 %v9623_v21 }
0x4365   : > { %12342 = vmatpush3.bf16.msra.mxu0 %v12341_v8 }
0x4366   : > { %12344 = vmatprep.subr.bf16.mxu0 %v12343_v19 }
0x4369   : > { %12346 = vmatpush3.bf16.msra.mxu0 %v12345_v40 }
0x436c   : > { %10031 = vmatmul.mubr.f32.vlgmr.msra.gmra.mrb[112].mxu0 %v9625_v63 }
0x4417   : > { %v10982_v0 = vpop.f32.mrb[132].mxu1 }
0x4418   : > { %v10983_v54 = vpop.f32.mrb[133].mxu1 }
0x4419   : > { %v10984_v59 = vadd.f32 %v10983_v54, %v10982_v0 }
0x441b   : > { %v9823_v24 = vadd.f32 %v10984_v59, %v9755_v49 }
0x441f   : > { %v11017_v23 = vpop.f32.mrb[110].mxu0 }
0x4420   : > { %v11018_v27 = vpop.f32.mrb[111].mxu0 }
0x4421   : > { %v11019_v5 = vadd.f32 %v11018_v27, %v11017_v23 }
0x4423   : > { %v9893_v57 = vadd.f32 %v11019_v5, %v9823_v24 }
0x4437   : > { %v11052_v50 = vpop.f32.mrb[134].mxu1 }
0x4438   : > { %v11053_v30 = vpop.f32.mrb[135].mxu1 }
0x4439   : > { %v11054_v25 = vadd.f32 %v11053_v30, %v11052_v50 }
0x443b   : > { %v9963_v34 = vadd.f32 %v11054_v25, %v9893_v57 }
0x443f   : > { %v11087_v16 = vpop.f32.mrb[112].mxu0 }
0x4440   : > { %v11088_v14 = vpop.f32.mrb[113].mxu0 }
0x4441   : > { %v11089_v1 = vadd.f32 %v11088_v14, %v11087_v16 }
0x4443   : > { %v10033_v48 = vadd.f32 %v11089_v1, %v9963_v34 }
0x4445   : > { %10037 = vst.msk [vmem:[%s2049_s26] sm:$0x1] %vm10036_vm1, %v10033_v48 }
0x4446   : > { %13527 = shalt.err (!%p13524_p11)
}
0x4447   : > { %s13528_s1 = scalar_lea.hbm %s15741_s3, 16  ;;  %s13532_s9 = scalar_lea.hbm %s14033_s5, 32 }
0x4448   : > { %p13529_p13 = scmp.ne.s32.totalorder %s15741_s3, %s13528_s1  ;;  %p13533_p0 = scmp.lt.u32.totalorder %s15741_s3, %s14033_s5 }
0x4449   : > { %p13534_p3 = scmp.lt.u32.totalorder %s13532_s9, %s13528_s1  ;;  %p13536_p12 = scmp.lt.u32.totalorder %s13528_s1, %s15741_s3 }
0x444a   : > { %p13530_p1 = pnand %p13529_p13, %p16009_p5 }
0x444b   : > { %p13535_p4 = por %p13534_p3, %p13533_p0 }
0x444c   : > { %p13531_p2 = pneg %p13530_p1 }
0x444d   : > { %p13537_p6 = por %p13536_p12, %p13535_p4 }
0x444f   : > { %p13538_p9 = pnand %p13537_p6, %p13531_p2 }
0x4451   : > { %13541 = shalt.err (!%p13538_p9)
}
0x4452   : > { %12427 = dma.vmem_to_hbm [thread:$0]  (%p16009_p5), %s15743_s2, 16, %s15741_s3, %s10039_s4  }
0x4453 PF: > { %s16010_s7 = sld [smem:[#allocation97_spill]]  ;;  %p12514_p10 = scmp.ge.s32.totalorder %s13612_s0, 2 }
0x4454   : > { %s10063_s8 = sand.u32 1, %s13600_s22  }
0x4455   : > { %s10064_s6 = scalar_lea.sflag [#allocation5], %s10063_s8 }
0x4459   : > { %p16011_p7 = scmp.ne.s32.totalorder %s16010_s7, 0 }
0x445b   : > { %p12479_p8 = pnand %p12514_p10, %p16011_p7 }
0x445d   : > { %13595 = dma.done.wait (!%p12479_p8), %s10064_s6, 16  }
0x445e   : > { %13597 = vsyncadd (!%p12479_p8), %s10064_s6, 4294967280  ;;  %s16012_s0 = sld [smem:[#allocation95_spill]]  ;;  %s16013_s26 = sld [smem:[#allocation94_spill]] }
0x445f   : > { %s16014_s29 = sld [smem:[#allocation96_spill]]  ;;  %s16015_s22 = smov %s13604_s23 }
0x4464   : > { %p148_p11 = scmp.ge.s32.totalorder %s16012_s0, 4   ;;  %s16016_s23 = smov %s16013_s26 }
0x4465   : > { %s16017_s26 = smov %s16014_s29 }
0x4466   :  { %150 = sbr.rel (!%p148_p11) target bundleno = 146 (0x92), region = 435 }
0x446d   :  { %10068 = vsyncpa [#allocation4], 1 }
0x446e   :  { %10070 = vsyncpa [#allocation4 + $0x1], 1 }
0x446f   :  { %10071 = vsyncpa [#allocation7], 1 }
0x4470   :  { %10072 = vsyncpa [#allocation10], 1 }
0x4471   :  { %10073 = vsyncpa [#allocation13], 1 }
0x4472   :  { %10074 = vsyncpa [#allocation16], 1 }
0x4473   :  { %10075 = vsyncpa [#allocation19], 1 }
0x4474   :  { %10076 = vsyncpa [#allocation22], 1 }
0x4475   :  { %10077 = vsyncpa [#allocation25], 1 }
0x4476   :  { %10078 = vsyncpa [#allocation28], 1 }
0x4477   :  { %10079 = vsyncpa [#allocation5], 1 }
0x4478   :  { %10081 = vsyncpa [#allocation5 + $0x1], 1 }

</bundles_post_ra>
